<compile_context>
chip_gen: v7x
topology: tpu7x:2x2x1
jax: 0.10.0
libtpu: 0.0.40
codegen_flags: <defaults>
</compile_context>

<pallas_src>
import functools

import numpy as np
import jax
import jax.numpy as jnp
from jax import lax
from jax.experimental import pallas as pl
from jax.experimental.pallas import tpu as pltpu

_MM_DTYPE = jnp.bfloat16   # MXU-native operand dtype (accumulation stays f32)


# ----------------------------------------------------------------------------
# One-time weight preprocessing: conv / conv-transpose -> block-Toeplitz matmul
# matrices in the torch (C, H, W) flatten order.
# ----------------------------------------------------------------------------
def _conv_toeplitz(w_oihw, h_in, w_in):
    """T such that flat_out = flat_in @ T reproduces a VALID Conv2d (stride 1),
    with flat vectors in (C, H, W) order."""
    c_out, c_in, kh_n, kw_n = w_oihw.shape
    h_out, w_out = h_in - kh_n + 1, w_in - kw_n + 1
    t = np.zeros((c_in, h_in, w_in, c_out, h_out, w_out), np.float32)
    for ho in range(h_out):
        for wo in range(w_out):
            for kh in range(kh_n):
                for kw in range(kw_n):
                    t[:, ho + kh, wo + kw, :, ho, wo] = w_oihw[:, :, kh, kw].T
    return t.reshape(c_in * h_in * w_in, c_out * h_out * w_out)


def _convT_toeplitz(w_iohw, h_in, w_in):
    """T such that flat_out = flat_in @ T reproduces ConvTranspose2d (stride 1,
    no padding), with flat vectors in (C, H, W) order.  The implicit spatial
    zero-padding is folded into the matrix."""
    c_in, c_out, kh_n, kw_n = w_iohw.shape
    h_out, w_out = h_in + kh_n - 1, w_in + kw_n - 1
    t = np.zeros((c_in, h_in, w_in, c_out, h_out, w_out), np.float32)
    for hi in range(h_in):
        for wi in range(w_in):
            for kh in range(kh_n):
                for kw in range(kw_n):
                    t[:, hi, wi, :, hi + kh, wi + kw] = w_iohw[:, :, kh, kw]
    return t.reshape(c_in * h_in * w_in, c_out * h_out * w_out)


# ----------------------------------------------------------------------------
# Parameter initialization (torch-layout, torch-default-style uniform bounds).
# ----------------------------------------------------------------------------
def _uniform(key, shape, fan_in):
    bound = 1.0 / np.sqrt(float(fan_in))
    return jax.random.uniform(key, shape, jnp.float32, -bound, bound)


def init_params(key, in_ch, hidden_size, bottleneck_size, enc_size):
    ks = jax.random.split(key, 16)
    p = {}
    p["w_conv0"] = _uniform(ks[0], (6, in_ch, 5, 5), in_ch * 25)
    p["b_conv0"] = _uniform(ks[1], (6,), in_ch * 25)
    p["w_conv1"] = _uniform(ks[2], (16, 6, 5, 5), 6 * 25)
    p["b_conv1"] = _uniform(ks[3], (16,), 6 * 25)
    p["w_enc_h"] = _uniform(ks[4], (hidden_size, enc_size), enc_size)
    p["b_enc_h"] = _uniform(ks[5], (hidden_size,), enc_size)
    p["w_enc_o"] = _uniform(ks[6], (bottleneck_size, hidden_size), hidden_size)
    p["b_enc_o"] = _uniform(ks[7], (bottleneck_size,), hidden_size)
    p["w_dec_h"] = _uniform(ks[8], (hidden_size, bottleneck_size), bottleneck_size)
    p["b_dec_h"] = _uniform(ks[9], (hidden_size,), bottleneck_size)
    p["w_dec_o"] = _uniform(ks[10], (enc_size, hidden_size), hidden_size)
    p["b_dec_o"] = _uniform(ks[11], (enc_size,), hidden_size)
    # ConvTranspose2d: torch default fan_in = weight.size(1) * KH * KW
    p["w_dct0"] = _uniform(ks[12], (16, 6, 5, 5), 6 * 25)
    p["b_dct0"] = _uniform(ks[13], (6,), 6 * 25)
    p["w_dct1"] = _uniform(ks[14], (6, in_ch, 5, 5), in_ch * 25)
    p["b_dct1"] = _uniform(ks[15], (in_ch,), in_ch * 25)
    return p


_KP_ORDER = ("t0", "b0", "t1", "b1", "weh", "beh", "weo", "beo",
             "wdh", "bdh", "wdo", "bdo", "t2", "b2", "t3", "b3")
_MM_KEYS = {"t0", "t1", "t2", "t3", "weh", "weo", "wdh", "wdo"}


def prepare_kernel_params(params, in_ch, H, W):
    """One-time transformation of torch-layout params into kernel-ready matrices.

    Because the conv Toeplitz matrices are built in the (C, H, W) flatten order,
    the Linear weights need NO permutation (torch's x.view(-1, enc_size) uses
    the same order), and the wrapper needs NO transposes."""
    del in_ch  # implied by the conv weight shapes
    H1, W1 = H - 4, W - 4
    H2, W2 = H - 8, W - 8
    npf = lambda a: np.asarray(jax.device_get(a), np.float32)

    kp = {
        "t0": _conv_toeplitz(npf(params["w_conv0"]), H, W),
        "b0": np.repeat(npf(params["b_conv0"]), H1 * W1)[None, :],
        "t1": _conv_toeplitz(npf(params["w_conv1"]), H1, W1),
        "b1": np.repeat(npf(params["b_conv1"]), H2 * W2)[None, :],
        "weh": npf(params["w_enc_h"]).T,
        "beh": npf(params["b_enc_h"])[None, :],
        "weo": npf(params["w_enc_o"]).T,
        "beo": npf(params["b_enc_o"])[None, :],
        "wdh": npf(params["w_dec_h"]).T,
        "bdh": npf(params["b_dec_h"])[None, :],
        "wdo": npf(params["w_dec_o"]).T,
        "bdo": npf(params["b_dec_o"])[None, :],
        "t2": _convT_toeplitz(npf(params["w_dct0"]), H2, W2),
        "b2": np.repeat(npf(params["b_dct0"]), H1 * W1)[None, :],
        "t3": _convT_toeplitz(npf(params["w_dct1"]), H1, W1),
        "b3": np.repeat(npf(params["b_dct1"]), H * W)[None, :],
    }
    return {k: jnp.asarray(v, _MM_DTYPE if k in _MM_KEYS else jnp.float32)
            for k, v in kp.items()}


# ----------------------------------------------------------------------------
# The fused kernel: eight lane-dense matmuls per batch tile, all in VMEM/vregs.
# ----------------------------------------------------------------------------
def _ae_kernel(x_ref,
               t0_ref, b0_ref, t1_ref, b1_ref,
               weh_ref, beh_ref, weo_ref, beo_ref,
               wdh_ref, bdh_ref, wdo_ref, bdo_ref,
               t2_ref, b2_ref, t3_ref, b3_ref,
               o_ref):
    f32 = jnp.float32

    def mm(act, w_ref):
        # bf16 operands, f32 accumulation on the MXU.
        return jnp.dot(act.astype(_MM_DTYPE), w_ref[...],
                       preferred_element_type=f32)

    x = x_ref[...].astype(f32)
    a = jnp.maximum(mm(x, t0_ref) + b0_ref[...], 0.0)        # encoder_0 conv + ReLU
    a = jnp.maximum(mm(a, t1_ref) + b1_ref[...], 0.0)        # encoder_1 conv + ReLU
    a = jnp.tanh(mm(a, weh_ref) + beh_ref[...])              # enc hidden  (dropout -> id)
    a = jnp.tanh(mm(a, weo_ref) + beo_ref[...])              # embedding   (BlockDropout -> id)
    a = jnp.tanh(mm(a, wdh_ref) + bdh_ref[...])              # dec hidden
    a = jnp.tanh(mm(a, wdo_ref) + bdo_ref[...])              # dec output  (dropout -> id)
    a = jnp.maximum(mm(a, t2_ref) + b2_ref[...], 0.0)        # ConvT(16->6) + ReLU
    o_ref[...] = jnp.maximum(mm(a, t3_ref) + b3_ref[...], 0.0)  # ConvT(6->C) + ReLU


def _pick_batch_block(n):
    """Batch tile TB: either the whole (small) batch or a multiple of 8, so the
    second-to-last block dim is sublane-aligned; prefer an even number of grid
    steps so v7x's two TensorCores stay balanced."""
    if n <= 8:
        return n
    best = 8
    for tb in (8, 16, 24, 32):
        g = -(-n // tb)
        if g >= 2 and g % 2 == 0:
            best = tb
    return best


def ae_forward(kp, x_nchw, *, batch_block=None):
    n, c, h, w = x_nchw.shape
    d_in = c * h * w                      # lane-dense input width  (= 1024 here)
    d_out = d_in                          # lane-dense output width (= 1024 here)

    tb = batch_block if batch_block is not None else _pick_batch_block(n)
    g = -(-n // tb)
    n_pad = g * tb

    # torch (C,H,W) flatten order == plain reshape of NCHW: no transposes needed.
    x_flat = x_nchw.reshape(n, d_in)
    if n_pad != n:
        x_flat = jnp.pad(x_flat, ((0, n_pad - n), (0, 0)))

    weights = [kp[name] for name in _KP_ORDER]
    in_specs = [pl.BlockSpec((tb, d_in), lambda i: (i, 0))]
    in_specs += [pl.BlockSpec(wt.shape, lambda i: (0, 0)) for wt in weights]

    out_flat = pl.pallas_call(
        _ae_kernel,
        out_shape=jax.ShapeDtypeStruct((n_pad, d_out), jnp.float32),
        grid=(g,),
        in_specs=in_specs,
        out_specs=pl.BlockSpec((tb, d_out), lambda i: (i, 0)),
        compiler_params=pltpu.CompilerParams(
            dimension_semantics=("parallel",),
            vmem_limit_bytes=32 * 1024 * 1024),
    )(x_flat, *weights)

    return out_flat[:n].reshape(n, c, h, w)


# ----------------------------------------------------------------------------
# Pure-JAX (XLA, f32) reference of the same eval-mode forward, for a numerics check.
# ----------------------------------------------------------------------------
def ref_forward(params, x_nchw, *, enc_shape):
    N = x_nchw.shape[0]
    dn = ("NCHW", "OIHW", "NCHW")
    hi = lax.Precision.HIGHEST

    y = lax.conv_general_dilated(x_nchw, params["w_conv0"], (1, 1), "VALID",
                                 dimension_numbers=dn, precision=hi)
    y = y + params["b_conv0"][None, :, None, None]
    y = jnp.maximum(y, 0.0)
    y = lax.conv_general_dilated(y, params["w_conv1"], (1, 1), "VALID",
                                 dimension_numbers=dn, precision=hi)
    y = y + params["b_conv1"][None, :, None, None]
    y = jnp.maximum(y, 0.0)

    flat = y.reshape(N, -1)
    h = jnp.tanh(jnp.dot(flat, params["w_enc_h"].T, precision=hi) + params["b_enc_h"])
    emb = jnp.tanh(jnp.dot(h, params["w_enc_o"].T, precision=hi) + params["b_enc_o"])
    d = jnp.tanh(jnp.dot(emb, params["w_dec_h"].T, precision=hi) + params["b_dec_h"])
    d = jnp.tanh(jnp.dot(d, params["w_dec_o"].T, precision=hi) + params["b_dec_o"])
    d = d.reshape(N, *enc_shape)

    w_eq0 = jnp.transpose(jnp.flip(params["w_dct0"], (2, 3)), (1, 0, 2, 3))
    d = lax.conv_general_dilated(d, w_eq0, (1, 1), ((4, 4), (4, 4)),
                                 dimension_numbers=dn, precision=hi)
    d = jnp.maximum(d + params["b_dct0"][None, :, None, None], 0.0)
    w_eq1 = jnp.transpose(jnp.flip(params["w_dct1"], (2, 3)), (1, 0, 2, 3))
    d = lax.conv_general_dilated(d, w_eq1, (1, 1), ((4, 4), (4, 4)),
                                 dimension_numbers=dn, precision=hi)
    d = jnp.maximum(d + params["b_dct1"][None, :, None, None], 0.0)
    return d


if __name__ == "__main__":
    batch, in_ch, H, W = 2, 4, 16, 16
    hidden, bottleneck = 32, 8
    enc_shape = (16, H - 8, W - 8)
    enc_size = int(np.prod(enc_shape))

    key = jax.random.PRNGKey(0)
    k_params, k_x = jax.random.split(key)
    params = init_params(k_params, in_ch, hidden, bottleneck, enc_size)
    kparams = prepare_kernel_params(params, in_ch, H, W)
    x = jax.random.normal(k_x, (batch, in_ch, H, W), jnp.float32)

    fwd = jax.jit(ae_forward)
    out = fwd(kparams, x)
    jax.block_until_ready(out)
    assert out.shape == (batch, in_ch, H, W), out.shape
    assert out.dtype == jnp.float32

    ref = jax.jit(functools.partial(ref_forward, enc_shape=enc_shape))(params, x)
    # bf16 MXU operands (f32 accumulation) vs an f32 XLA reference -> relaxed tol.
    np.testing.assert_allclose(np.asarray(out), np.asarray(ref),
                               rtol=2e-2, atol=2e-2)

    print("KERNEL_OK")
</pallas_src>

<mosaic_0001>
module attributes {stable_mosaic.version = 11 : i64} {
  func.func @_ae_kernel(%arg0: i32, %arg1: memref<2x1024xf32, #tpu.memory_space<vmem>>, %arg2: memref<1024x864xbf16, #tpu.memory_space<vmem>>, %arg3: memref<1x864xf32, #tpu.memory_space<vmem>>, %arg4: memref<864x1024xbf16, #tpu.memory_space<vmem>>, %arg5: memref<1x1024xf32, #tpu.memory_space<vmem>>, %arg6: memref<1024x32xbf16, #tpu.memory_space<vmem>>, %arg7: memref<1x32xf32, #tpu.memory_space<vmem>>, %arg8: memref<32x8xbf16, #tpu.memory_space<vmem>>, %arg9: memref<1x8xf32, #tpu.memory_space<vmem>>, %arg10: memref<8x32xbf16, #tpu.memory_space<vmem>>, %arg11: memref<1x32xf32, #tpu.memory_space<vmem>>, %arg12: memref<32x1024xbf16, #tpu.memory_space<vmem>>, %arg13: memref<1x1024xf32, #tpu.memory_space<vmem>>, %arg14: memref<1024x864xbf16, #tpu.memory_space<vmem>>, %arg15: memref<1x864xf32, #tpu.memory_space<vmem>>, %arg16: memref<864x1024xbf16, #tpu.memory_space<vmem>>, %arg17: memref<1x1024xf32, #tpu.memory_space<vmem>>, %arg18: memref<2x1024xf32, #tpu.memory_space<vmem>>) attributes {dimension_semantics = [#tpu.dimension_semantics<parallel>], iteration_bounds = array<i64: 1>, scalar_prefetch = 0 : i64, scratch_operands = 0 : i64, tpu.core_type = #tpu.core_type<tc>, window_params = [{transform_indices = @transform_0, window_bounds = array<i64: 2, 1024>}, {pipeline_mode = #tpu.pipeline_mode<synchronous>, transform_indices = @transform_1, window_bounds = array<i64: 1024, 864>}, {pipeline_mode = #tpu.pipeline_mode<synchronous>, transform_indices = @transform_2, window_bounds = array<i64: 1, 864>}, {pipeline_mode = #tpu.pipeline_mode<synchronous>, transform_indices = @transform_3, window_bounds = array<i64: 864, 1024>}, {pipeline_mode = #tpu.pipeline_mode<synchronous>, transform_indices = @transform_4, window_bounds = array<i64: 1, 1024>}, {pipeline_mode = #tpu.pipeline_mode<synchronous>, transform_indices = @transform_5, window_bounds = array<i64: 1024, 32>}, {pipeline_mode = #tpu.pipeline_mode<synchronous>, transform_indices = @transform_6, window_bounds = array<i64: 1, 32>}, {pipeline_mode = #tpu.pipeline_mode<synchronous>, transform_indices = @transform_7, window_bounds = array<i64: 32, 8>}, {pipeline_mode = #tpu.pipeline_mode<synchronous>, transform_indices = @transform_8, window_bounds = array<i64: 1, 8>}, {pipeline_mode = #tpu.pipeline_mode<synchronous>, transform_indices = @transform_9, window_bounds = array<i64: 8, 32>}, {pipeline_mode = #tpu.pipeline_mode<synchronous>, transform_indices = @transform_10, window_bounds = array<i64: 1, 32>}, {pipeline_mode = #tpu.pipeline_mode<synchronous>, transform_indices = @transform_11, window_bounds = array<i64: 32, 1024>}, {pipeline_mode = #tpu.pipeline_mode<synchronous>, transform_indices = @transform_12, window_bounds = array<i64: 1, 1024>}, {pipeline_mode = #tpu.pipeline_mode<synchronous>, transform_indices = @transform_13, window_bounds = array<i64: 1024, 864>}, {pipeline_mode = #tpu.pipeline_mode<synchronous>, transform_indices = @transform_14, window_bounds = array<i64: 1, 864>}, {pipeline_mode = #tpu.pipeline_mode<synchronous>, transform_indices = @transform_15, window_bounds = array<i64: 864, 1024>}, {pipeline_mode = #tpu.pipeline_mode<synchronous>, transform_indices = @transform_16, window_bounds = array<i64: 1, 1024>}, {transform_indices = @transform_17, window_bounds = array<i64: 2, 1024>}]} {
    %c0 = arith.constant 0 : index
    %c0_0 = arith.constant 0 : index
    %0 = vector.load %arg1[%c0, %c0_0] : memref<2x1024xf32, #tpu.memory_space<vmem>>, vector<2x1024xf32>
    %1 = arith.truncf %0 : vector<2x1024xf32> to vector<2x1024xbf16>
    %c0_1 = arith.constant 0 : index
    %c0_2 = arith.constant 0 : index
    %2 = vector.load %arg2[%c0_1, %c0_2] : memref<1024x864xbf16, #tpu.memory_space<vmem>>, vector<1024x864xbf16>
    %cst = arith.constant dense<0.000000e+00> : vector<2x864xf32>
    %3 = tpu.matmul %1, %2, %cst {dimension_numbers = #tpu.dot_dimension_numbers<[1], [0], [0], [1], [0, 0, 1, 1], [], []>} : vector<2x1024xbf16>, vector<1024x864xbf16>, vector<2x864xf32> -> vector<2x864xf32>
    %c0_3 = arith.constant 0 : index
    %c0_4 = arith.constant 0 : index
    %4 = vector.load %arg3[%c0_3, %c0_4] : memref<1x864xf32, #tpu.memory_space<vmem>>, vector<1x864xf32>
    %5 = vector.broadcast %4 : vector<1x864xf32> to vector<2x864xf32>
    %6 = arith.addf %3, %5 : vector<2x864xf32>
    %cst_5 = arith.constant 0.000000e+00 : f32
    %7 = vector.broadcast %cst_5 : f32 to vector<2x864xf32>
    %8 = arith.maximumf %6, %7 : vector<2x864xf32>
    %9 = arith.truncf %8 : vector<2x864xf32> to vector<2x864xbf16>
    %c0_6 = arith.constant 0 : index
    %c0_7 = arith.constant 0 : index
    %10 = vector.load %arg4[%c0_6, %c0_7] : memref<864x1024xbf16, #tpu.memory_space<vmem>>, vector<864x1024xbf16>
    %cst_8 = arith.constant dense<0.000000e+00> : vector<2x1024xf32>
    %11 = tpu.matmul %9, %10, %cst_8 {dimension_numbers = #tpu.dot_dimension_numbers<[1], [0], [0], [1], [0, 0, 1, 1], [], []>} : vector<2x864xbf16>, vector<864x1024xbf16>, vector<2x1024xf32> -> vector<2x1024xf32>
    %c0_9 = arith.constant 0 : index
    %c0_10 = arith.constant 0 : index
    %12 = vector.load %arg5[%c0_9, %c0_10] : memref<1x1024xf32, #tpu.memory_space<vmem>>, vector<1x1024xf32>
    %13 = vector.broadcast %12 : vector<1x1024xf32> to vector<2x1024xf32>
    %14 = arith.addf %11, %13 : vector<2x1024xf32>
    %cst_11 = arith.constant 0.000000e+00 : f32
    %15 = vector.broadcast %cst_11 : f32 to vector<2x1024xf32>
    %16 = arith.maximumf %14, %15 : vector<2x1024xf32>
    %17 = arith.truncf %16 : vector<2x1024xf32> to vector<2x1024xbf16>
    %c0_12 = arith.constant 0 : index
    %c0_13 = arith.constant 0 : index
    %18 = vector.load %arg6[%c0_12, %c0_13] : memref<1024x32xbf16, #tpu.memory_space<vmem>>, vector<1024x32xbf16>
    %cst_14 = arith.constant dense<0.000000e+00> : vector<2x32xf32>
    %19 = tpu.matmul %17, %18, %cst_14 {dimension_numbers = #tpu.dot_dimension_numbers<[1], [0], [0], [1], [0, 0, 1, 1], [], []>} : vector<2x1024xbf16>, vector<1024x32xbf16>, vector<2x32xf32> -> vector<2x32xf32>
    %c0_15 = arith.constant 0 : index
    %c0_16 = arith.constant 0 : index
    %20 = vector.load %arg7[%c0_15, %c0_16] : memref<1x32xf32, #tpu.memory_space<vmem>>, vector<1x32xf32>
    %21 = vector.broadcast %20 : vector<1x32xf32> to vector<2x32xf32>
    %22 = arith.addf %19, %21 : vector<2x32xf32>
    %23 = math.tanh %22 : vector<2x32xf32>
    %24 = arith.truncf %23 : vector<2x32xf32> to vector<2x32xbf16>
    %c0_17 = arith.constant 0 : index
    %c0_18 = arith.constant 0 : index
    %25 = vector.load %arg8[%c0_17, %c0_18] : memref<32x8xbf16, #tpu.memory_space<vmem>>, vector<32x8xbf16>
    %cst_19 = arith.constant dense<0.000000e+00> : vector<2x8xf32>
    %26 = tpu.matmul %24, %25, %cst_19 {dimension_numbers = #tpu.dot_dimension_numbers<[1], [0], [0], [1], [0, 0, 1, 1], [], []>} : vector<2x32xbf16>, vector<32x8xbf16>, vector<2x8xf32> -> vector<2x8xf32>
    %c0_20 = arith.constant 0 : index
    %c0_21 = arith.constant 0 : index
    %27 = vector.load %arg9[%c0_20, %c0_21] : memref<1x8xf32, #tpu.memory_space<vmem>>, vector<1x8xf32>
    %28 = vector.broadcast %27 : vector<1x8xf32> to vector<2x8xf32>
    %29 = arith.addf %26, %28 : vector<2x8xf32>
    %30 = math.tanh %29 : vector<2x8xf32>
    %31 = arith.truncf %30 : vector<2x8xf32> to vector<2x8xbf16>
    %c0_22 = arith.constant 0 : index
    %c0_23 = arith.constant 0 : index
    %32 = vector.load %arg10[%c0_22, %c0_23] : memref<8x32xbf16, #tpu.memory_space<vmem>>, vector<8x32xbf16>
    %cst_24 = arith.constant dense<0.000000e+00> : vector<2x32xf32>
    %33 = tpu.matmul %31, %32, %cst_24 {dimension_numbers = #tpu.dot_dimension_numbers<[1], [0], [0], [1], [0, 0, 1, 1], [], []>} : vector<2x8xbf16>, vector<8x32xbf16>, vector<2x32xf32> -> vector<2x32xf32>
    %c0_25 = arith.constant 0 : index
    %c0_26 = arith.constant 0 : index
    %34 = vector.load %arg11[%c0_25, %c0_26] : memref<1x32xf32, #tpu.memory_space<vmem>>, vector<1x32xf32>
    %35 = vector.broadcast %34 : vector<1x32xf32> to vector<2x32xf32>
    %36 = arith.addf %33, %35 : vector<2x32xf32>
    %37 = math.tanh %36 : vector<2x32xf32>
    %38 = arith.truncf %37 : vector<2x32xf32> to vector<2x32xbf16>
    %c0_27 = arith.constant 0 : index
    %c0_28 = arith.constant 0 : index
    %39 = vector.load %arg12[%c0_27, %c0_28] : memref<32x1024xbf16, #tpu.memory_space<vmem>>, vector<32x1024xbf16>
    %cst_29 = arith.constant dense<0.000000e+00> : vector<2x1024xf32>
    %40 = tpu.matmul %38, %39, %cst_29 {dimension_numbers = #tpu.dot_dimension_numbers<[1], [0], [0], [1], [0, 0, 1, 1], [], []>} : vector<2x32xbf16>, vector<32x1024xbf16>, vector<2x1024xf32> -> vector<2x1024xf32>
    %c0_30 = arith.constant 0 : index
    %c0_31 = arith.constant 0 : index
    %41 = vector.load %arg13[%c0_30, %c0_31] : memref<1x1024xf32, #tpu.memory_space<vmem>>, vector<1x1024xf32>
    %42 = vector.broadcast %41 : vector<1x1024xf32> to vector<2x1024xf32>
    %43 = arith.addf %40, %42 : vector<2x1024xf32>
    %44 = math.tanh %43 : vector<2x1024xf32>
    %45 = arith.truncf %44 : vector<2x1024xf32> to vector<2x1024xbf16>
    %c0_32 = arith.constant 0 : index
    %c0_33 = arith.constant 0 : index
    %46 = vector.load %arg14[%c0_32, %c0_33] : memref<1024x864xbf16, #tpu.memory_space<vmem>>, vector<1024x864xbf16>
    %cst_34 = arith.constant dense<0.000000e+00> : vector<2x864xf32>
    %47 = tpu.matmul %45, %46, %cst_34 {dimension_numbers = #tpu.dot_dimension_numbers<[1], [0], [0], [1], [0, 0, 1, 1], [], []>} : vector<2x1024xbf16>, vector<1024x864xbf16>, vector<2x864xf32> -> vector<2x864xf32>
    %c0_35 = arith.constant 0 : index
    %c0_36 = arith.constant 0 : index
    %48 = vector.load %arg15[%c0_35, %c0_36] : memref<1x864xf32, #tpu.memory_space<vmem>>, vector<1x864xf32>
    %49 = vector.broadcast %48 : vector<1x864xf32> to vector<2x864xf32>
    %50 = arith.addf %47, %49 : vector<2x864xf32>
    %cst_37 = arith.constant 0.000000e+00 : f32
    %51 = vector.broadcast %cst_37 : f32 to vector<2x864xf32>
    %52 = arith.maximumf %50, %51 : vector<2x864xf32>
    %53 = arith.truncf %52 : vector<2x864xf32> to vector<2x864xbf16>
    %c0_38 = arith.constant 0 : index
    %c0_39 = arith.constant 0 : index
    %54 = vector.load %arg16[%c0_38, %c0_39] : memref<864x1024xbf16, #tpu.memory_space<vmem>>, vector<864x1024xbf16>
    %cst_40 = arith.constant dense<0.000000e+00> : vector<2x1024xf32>
    %55 = tpu.matmul %53, %54, %cst_40 {dimension_numbers = #tpu.dot_dimension_numbers<[1], [0], [0], [1], [0, 0, 1, 1], [], []>} : vector<2x864xbf16>, vector<864x1024xbf16>, vector<2x1024xf32> -> vector<2x1024xf32>
    %c0_41 = arith.constant 0 : index
    %c0_42 = arith.constant 0 : index
    %56 = vector.load %arg17[%c0_41, %c0_42] : memref<1x1024xf32, #tpu.memory_space<vmem>>, vector<1x1024xf32>
    %57 = vector.broadcast %56 : vector<1x1024xf32> to vector<2x1024xf32>
    %58 = arith.addf %55, %57 : vector<2x1024xf32>
    %cst_43 = arith.constant 0.000000e+00 : f32
    %59 = vector.broadcast %cst_43 : f32 to vector<2x1024xf32>
    %60 = arith.maximumf %58, %59 : vector<2x1024xf32>
    %c0_44 = arith.constant 0 : index
    %c0_45 = arith.constant 0 : index
    %61 = vector.load %arg18[%c0_44, %c0_45] : memref<2x1024xf32, #tpu.memory_space<vmem>>, vector<2x1024xf32>
    tpu.vector_store %arg18[%c0_44, %c0_45], %60 {strides = array<i32>} : memref<2x1024xf32, #tpu.memory_space<vmem>>, vector<2x1024xf32>,
    return
  }
  func.func @transform_0(%arg0: i32) -> (i32, i32) {
    %c0_i32 = arith.constant 0 : i32
    %c0_i32_0 = arith.constant 0 : i32
    return %arg0, %c0_i32 : i32, i32
  }
  func.func @transform_1(%arg0: i32) -> (i32, i32) {
    %c0_i32 = arith.constant 0 : i32
    %c0_i32_0 = arith.constant 0 : i32
    %c0_i32_1 = arith.constant 0 : i32
    return %c0_i32, %c0_i32_0 : i32, i32
  }
  func.func @transform_2(%arg0: i32) -> (i32, i32) {
    %c0_i32 = arith.constant 0 : i32
    %c0_i32_0 = arith.constant 0 : i32
    %c0_i32_1 = arith.constant 0 : i32
    return %c0_i32, %c0_i32_0 : i32, i32
  }
  func.func @transform_3(%arg0: i32) -> (i32, i32) {
    %c0_i32 = arith.constant 0 : i32
    %c0_i32_0 = arith.constant 0 : i32
    %c0_i32_1 = arith.constant 0 : i32
    return %c0_i32, %c0_i32_0 : i32, i32
  }
  func.func @transform_4(%arg0: i32) -> (i32, i32) {
    %c0_i32 = arith.constant 0 : i32
    %c0_i32_0 = arith.constant 0 : i32
    %c0_i32_1 = arith.constant 0 : i32
    return %c0_i32, %c0_i32_0 : i32, i32
  }
  func.func @transform_5(%arg0: i32) -> (i32, i32) {
    %c0_i32 = arith.constant 0 : i32
    %c0_i32_0 = arith.constant 0 : i32
    %c0_i32_1 = arith.constant 0 : i32
    return %c0_i32, %c0_i32_0 : i32, i32
  }
  func.func @transform_6(%arg0: i32) -> (i32, i32) {
    %c0_i32 = arith.constant 0 : i32
    %c0_i32_0 = arith.constant 0 : i32
    %c0_i32_1 = arith.constant 0 : i32
    return %c0_i32, %c0_i32_0 : i32, i32
  }
  func.func @transform_7(%arg0: i32) -> (i32, i32) {
    %c0_i32 = arith.constant 0 : i32
    %c0_i32_0 = arith.constant 0 : i32
    %c0_i32_1 = arith.constant 0 : i32
    return %c0_i32, %c0_i32_0 : i32, i32
  }
  func.func @transform_8(%arg0: i32) -> (i32, i32) {
    %c0_i32 = arith.constant 0 : i32
    %c0_i32_0 = arith.constant 0 : i32
    %c0_i32_1 = arith.constant 0 : i32
    return %c0_i32, %c0_i32_0 : i32, i32
  }
  func.func @transform_9(%arg0: i32) -> (i32, i32) {
    %c0_i32 = arith.constant 0 : i32
    %c0_i32_0 = arith.constant 0 : i32
    %c0_i32_1 = arith.constant 0 : i32
    return %c0_i32, %c0_i32_0 : i32, i32
  }
  func.func @transform_10(%arg0: i32) -> (i32, i32) {
    %c0_i32 = arith.constant 0 : i32
    %c0_i32_0 = arith.constant 0 : i32
    %c0_i32_1 = arith.constant 0 : i32
    return %c0_i32, %c0_i32_0 : i32, i32
  }
  func.func @transform_11(%arg0: i32) -> (i32, i32) {
    %c0_i32 = arith.constant 0 : i32
    %c0_i32_0 = arith.constant 0 : i32
    %c0_i32_1 = arith.constant 0 : i32
    return %c0_i32, %c0_i32_0 : i32, i32
  }
  func.func @transform_12(%arg0: i32) -> (i32, i32) {
    %c0_i32 = arith.constant 0 : i32
    %c0_i32_0 = arith.constant 0 : i32
    %c0_i32_1 = arith.constant 0 : i32
    return %c0_i32, %c0_i32_0 : i32, i32
  }
  func.func @transform_13(%arg0: i32) -> (i32, i32) {
    %c0_i32 = arith.constant 0 : i32
    %c0_i32_0 = arith.constant 0 : i32
    %c0_i32_1 = arith.constant 0 : i32
    return %c0_i32, %c0_i32_0 : i32, i32
  }
  func.func @transform_14(%arg0: i32) -> (i32, i32) {
    %c0_i32 = arith.constant 0 : i32
    %c0_i32_0 = arith.constant 0 : i32
    %c0_i32_1 = arith.constant 0 : i32
    return %c0_i32, %c0_i32_0 : i32, i32
  }
  func.func @transform_15(%arg0: i32) -> (i32, i32) {
    %c0_i32 = arith.constant 0 : i32
    %c0_i32_0 = arith.constant 0 : i32
    %c0_i32_1 = arith.constant 0 : i32
    return %c0_i32, %c0_i32_0 : i32, i32
  }
  func.func @transform_16(%arg0: i32) -> (i32, i32) {
    %c0_i32 = arith.constant 0 : i32
    %c0_i32_0 = arith.constant 0 : i32
    %c0_i32_1 = arith.constant 0 : i32
    return %c0_i32, %c0_i32_0 : i32, i32
  }
  func.func @transform_17(%arg0: i32) -> (i32, i32) {
    %c0_i32 = arith.constant 0 : i32
    %c0_i32_0 = arith.constant 0 : i32
    return %arg0, %c0_i32 : i32, i32
  }
}

</mosaic_0001>

<bundles_post_ra>
// kernel: ae_forward.1
= control target key start
LH: loop header
LB: loop body
LE: loop exit
PB: predicated region body
PF: predicated region fallthrough
CT: control target
= control target key end

     0   :  { %v18651_v36 = vmov 1983009808   ;;  %v65_v38 = vlaneseq  ;;  %vm6264_vm0 = vcmask 785408   ;;  %vm18654_vm1 = vmmov 0   ;;  %s24727_s1 = inlined_call_operand.vmem [shape: bf16[1024,864], index: 1, kind: input, shape index: {}]   ;;  %s24728_s0 = inlined_call_operand.vmem [shape: f32[2,1024], index: 0, kind: input, shape index: {}]   ;;  %s24729_s2 = inlined_call_operand.vmem [shape: f32[1,864], index: 2, kind: input, shape index: {}]   ;;  %s24730_s3 = inlined_call_operand.vmem [shape: bf16[864,1024], index: 3, kind: input, shape index: {}]   ;;  %s24731_s5 = inlined_call_operand.vmem [shape: bf16[1024,32], index: 5, kind: input, shape index: {}]   ;;  %s24732_s4 = inlined_call_operand.vmem [shape: f32[1,1024], index: 4, kind: input, shape index: {}]   ;;  %s24733_s6 = inlined_call_operand.vmem [shape: f32[1,32], index: 6, kind: input, shape index: {}]   ;;  %s24734_s7 = inlined_call_operand.vmem [shape: bf16[32,8], index: 7, kind: input, shape index: {}]   ;;  %s24735_s9 = inlined_call_operand.vmem [shape: bf16[8,32], index: 9, kind: input, shape index: {}]   ;;  %s24736_s8 = inlined_call_operand.vmem [shape: f32[1,8], index: 8, kind: input, shape index: {}]   ;;  %s24737_s11 = inlined_call_operand.vmem [shape: bf16[32,1024], index: 11, kind: input, shape index: {}]   ;;  %s24738_s13 = inlined_call_operand.vmem [shape: bf16[1024,864], index: 13, kind: input, shape index: {}]   ;;  %s24739_s10 = inlined_call_operand.vmem [shape: f32[1,32], index: 10, kind: input, shape index: {}]   ;;  %s24740_s12 = inlined_call_operand.vmem [shape: f32[1,1024], index: 12, kind: input, shape index: {}]   ;;  %s24741_s15 = inlined_call_operand.vmem [shape: bf16[864,1024], index: 15, kind: input, shape index: {}]   ;;  %s24742_s14 = inlined_call_operand.vmem [shape: f32[1,864], index: 14, kind: input, shape index: {}]   ;;  %s24743_s16 = inlined_call_operand.vmem [shape: f32[1,1024], index: 16, kind: input, shape index: {}]   ;;  %s24744_s17 = inlined_call_operand.vmem [shape: f32[2,1024], index: 17, kind: output, shape index: {}]  }
   0x1   :  { %24747 = sst [smem:[#allocation2_spill]] %s24727_s1  ;;  %v63_v37 = vunpack.c.l.s4 %v18651_v36  ;;  %vm7644_vm2 = vcmask 261120   ;;  %vm7702_vm3 = vcmask 1043456   ;;  %vm7698_vm4 = vcmask 64512  }
   0x2   :  { %24748 = sst [smem:[#allocation3_spill]] %s24728_s0  ;;  %s24749_s26 = sld [smem:[#allocation2_spill]]  ;;  %v18862_v43 = vshrl.u32 %v65_v38, 7 }
   0x3   :  { %v64_v42 = vunpack.c.0.s8 %v63_v37  ;;  %s24750_s20 = sld [smem:[#allocation3_spill]] }
   0x5   :  { %v18880_v49 = vsub.s32 %v64_v42, %v18862_v43 }
   0x8   :  { %v17279_v0 = vld [vmem:[%s24749_s26 + $0x4] ss:$28 sps:$4 sm:$0xff]   ;;  %v17285_v4 = vld [vmem:[%s24749_s26 + $0x3c] ss:$28 sps:$4 sm:$0xff]   ;;  %v17291_v8 = vld [vmem:[%s24749_s26 + $0x74] ss:$28 sps:$4 sm:$0xff]  }
   0x9   :  { %v17281_v1 = vld [vmem:[%s24749_s26 + $0x384] ss:$28 sps:$4 sm:$0xff]   ;;  %2964 = vmatprep.subr.bf16.mxu1 %v17279_v0  ;;  %v17287_v5 = vld [vmem:[%s24749_s26 + $0x3bc] ss:$28 sps:$4 sm:$0xff]   ;;  %v17293_v9 = vld [vmem:[%s24749_s26 + $0x3f4] ss:$28 sps:$4 sm:$0xff]  }
   0xa   :  { %v17283_v2 = vld [vmem:[%s24749_s26] ss:$28 sps:$4 sm:$0xff]   ;;  %3005 = vmatprep.subr.bf16.mxu0 %v17281_v1  ;;  %v17289_v6 = vld [vmem:[%s24749_s26 + $0x38] ss:$28 sps:$4 sm:$0xff]   ;;  %v17295_v10 = vld [vmem:[%s24749_s26 + $0x70] ss:$28 sps:$4 sm:$0xff]  }
   0xb   :  { %v17284_v3 = vld [vmem:[%s24749_s26 + $0x380] ss:$28 sps:$4 sm:$0xff]   ;;  %2965 = vmatpush1.bf16.msra.mxu1 %v17283_v2  ;;  %v17290_v7 = vld [vmem:[%s24749_s26 + $0x3b8] ss:$28 sps:$4 sm:$0xff]   ;;  %v17296_v11 = vld [vmem:[%s24749_s26 + $0x3f0] ss:$28 sps:$4 sm:$0xff]  }
   0xc   :  { %3006 = vmatpush1.bf16.msra.mxu0 %v17284_v3  ;;  %2966 = vmatprep.subr.bf16.mxu1 %v17285_v4  ;;  %v17297_v12 = vld [vmem:[%s24749_s26 + $0xac] ss:$28 sps:$4 sm:$0xff]   ;;  %v17303_v16 = vld [vmem:[%s24749_s26 + $0xe4] ss:$28 sps:$4 sm:$0xff]   ;;  %v17309_v20 = vld [vmem:[%s24749_s26 + $0x11c] ss:$28 sps:$4 sm:$0xff]  }
   0xd   :  { %3007 = vmatprep.subr.bf16.mxu0 %v17287_v5  ;;  %v17299_v13 = vld [vmem:[%s24749_s26 + $0x42c] ss:$28 sps:$4 sm:$0xff]   ;;  %v17305_v17 = vld [vmem:[%s24749_s26 + $0x464] ss:$28 sps:$4 sm:$0xff]   ;;  %v17311_v21 = vld [vmem:[%s24749_s26 + $0x49c] ss:$28 sps:$4 sm:$0xff]  }
   0xe   :  { %v17301_v14 = vld [vmem:[%s24749_s26 + $0xa8] ss:$28 sps:$4 sm:$0xff]   ;;  %v17307_v18 = vld [vmem:[%s24749_s26 + $0xe0] ss:$28 sps:$4 sm:$0xff]   ;;  %v17313_v22 = vld [vmem:[%s24749_s26 + $0x118] ss:$28 sps:$4 sm:$0xff]  }
   0xf   :  { %2967 = vmatpush1.bf16.msra.mxu1 %v17289_v6  ;;  %v17302_v15 = vld [vmem:[%s24749_s26 + $0x428] ss:$28 sps:$4 sm:$0xff]   ;;  %v17308_v19 = vld [vmem:[%s24749_s26 + $0x460] ss:$28 sps:$4 sm:$0xff]   ;;  %v17314_v23 = vld [vmem:[%s24749_s26 + $0x498] ss:$28 sps:$4 sm:$0xff]  }
  0x10   :  { %3008 = vmatpush1.bf16.msra.mxu0 %v17290_v7  ;;  %2968 = vmatprep.subr.bf16.mxu1 %v17291_v8  ;;  %v17315_v24 = vld [vmem:[%s24749_s26 + $0x154] ss:$28 sps:$4 sm:$0xff]   ;;  %v17321_v28 = vld [vmem:[%s24749_s26 + $0x18c] ss:$28 sps:$4 sm:$0xff]   ;;  %v17327_v32 = vld [vmem:[%s24749_s26 + $0x1c4] ss:$28 sps:$4 sm:$0xff]  }
  0x11   :  { %3009 = vmatprep.subr.bf16.mxu0 %v17293_v9  ;;  %v17317_v25 = vld [vmem:[%s24749_s26 + $0x4d4] ss:$28 sps:$4 sm:$0xff]   ;;  %v17323_v29 = vld [vmem:[%s24749_s26 + $0x50c] ss:$28 sps:$4 sm:$0xff]   ;;  %v17329_v33 = vld [vmem:[%s24749_s26 + $0x544] ss:$28 sps:$4 sm:$0xff]  }
  0x12   :  { %v17319_v26 = vld [vmem:[%s24749_s26 + $0x150] ss:$28 sps:$4 sm:$0xff]   ;;  %v17325_v30 = vld [vmem:[%s24749_s26 + $0x188] ss:$28 sps:$4 sm:$0xff]   ;;  %v17331_v34 = vld [vmem:[%s24749_s26 + $0x1c0] ss:$28 sps:$4 sm:$0xff]  }
  0x13   :  { %2969 = vmatpush1.bf16.msra.mxu1 %v17295_v10  ;;  %v17320_v27 = vld [vmem:[%s24749_s26 + $0x4d0] ss:$28 sps:$4 sm:$0xff]   ;;  %v17326_v31 = vld [vmem:[%s24749_s26 + $0x508] ss:$28 sps:$4 sm:$0xff]   ;;  %v17332_v35 = vld [vmem:[%s24749_s26 + $0x540] ss:$28 sps:$4 sm:$0xff]  }
  0x14   :  { %3010 = vmatpush1.bf16.msra.mxu0 %v17296_v11  ;;  %2970 = vmatprep.subr.bf16.mxu1 %v17297_v12  ;;  %v17333_v39 = vld [vmem:[%s24749_s26 + $0x1fc] ss:$28 sps:$4 sm:$0xff]   ;;  %v17339_v45 = vld [vmem:[%s24749_s26 + $0x234] ss:$28 sps:$4 sm:$0xff]   ;;  %v17345_v50 = vld [vmem:[%s24749_s26 + $0x26c] ss:$28 sps:$4 sm:$0xff]  }
  0x15   :  { %3011 = vmatprep.subr.bf16.mxu0 %v17299_v13  ;;  %v17335_v40 = vld [vmem:[%s24749_s26 + $0x57c] ss:$28 sps:$4 sm:$0xff]   ;;  %v17341_v46 = vld [vmem:[%s24749_s26 + $0x5b4] ss:$28 sps:$4 sm:$0xff]   ;;  %v17347_v51 = vld [vmem:[%s24749_s26 + $0x5ec] ss:$28 sps:$4 sm:$0xff]  }
  0x16   :  { %v17337_v41 = vld [vmem:[%s24749_s26 + $0x1f8] ss:$28 sps:$4 sm:$0xff]   ;;  %v17343_v47 = vld [vmem:[%s24749_s26 + $0x230] ss:$28 sps:$4 sm:$0xff]   ;;  %v57_v52 = vld [vmem:[%s24750_s20] sm:$0xff] }
  0x17   :  { %2971 = vmatpush1.bf16.msra.mxu1 %v17301_v14  ;;  %v17338_v44 = vld [vmem:[%s24749_s26 + $0x578] ss:$28 sps:$4 sm:$0xff]   ;;  %v17344_v48 = vld [vmem:[%s24749_s26 + $0x5b0] ss:$28 sps:$4 sm:$0xff]   ;;  %v17349_v53 = vld [vmem:[%s24749_s26 + $0x268] ss:$28 sps:$4 sm:$0xff]   ;;  %v68_v54 = vrot.slane %v57_v52, %v18880_v49  ;;  %v61_v55 = vcombine.high %v57_v52, %v57_v52 }
  0x18   :  { %3012 = vmatpush1.bf16.msra.mxu0 %v17302_v15  ;;  %2972 = vmatprep.subr.bf16.mxu1 %v17303_v16  ;;  %v17350_v56 = vld [vmem:[%s24749_s26 + $0x5e8] ss:$28 sps:$4 sm:$0xff]   ;;  %v17355_v61 = vld [vmem:[%s24749_s26 + $0x2a0] ss:$28 sps:$4 sm:$0xff]   ;;  %v17361_v4 = vld [vmem:[%s24749_s26 + $0x2d8] ss:$28 sps:$4 sm:$0xff]  }
  0x19   :  { %3013 = vmatprep.subr.bf16.mxu0 %v17305_v17  ;;  %v17351_v57 = vld [vmem:[%s24749_s26 + $0x2a4] ss:$28 sps:$4 sm:$0xff]   ;;  %v76_v59 = vcombine.high %v68_v54, %v68_v54  ;;  %v75_v60 = vrot.slane %v61_v55, %v18880_v49  ;;  %v17357_v1 = vld [vmem:[%s24749_s26 + $0x2dc] ss:$28 sps:$4 sm:$0xff]   ;;  %v17363_v6 = vld [vmem:[%s24749_s26 + $0x314] ss:$28 sps:$4 sm:$0xff]   ;;  %v18962_v17 = vpack.c.bf16 %v68_v54, %v68_v54 }
  0x1a   :  { %v17353_v58 = vld [vmem:[%s24749_s26 + $0x624] ss:$28 sps:$4 sm:$0xff]   ;;  %v17359_v2 = vld [vmem:[%s24749_s26 + $0x65c] ss:$28 sps:$4 sm:$0xff]   ;;  %v17365_v7 = vld [vmem:[%s24749_s26 + $0x694] ss:$28 sps:$4 sm:$0xff]  }
  0x1b   :  { %2973 = vmatpush1.bf16.msra.mxu1 %v17307_v18  ;;  %v18908_v62 = vpack.c.bf16 %v76_v59, %v76_v59  ;;  %v77_v63 = vcombine.high %v75_v60, %v75_v60  ;;  %v17356_v0 = vld [vmem:[%s24749_s26 + $0x620] ss:$28 sps:$4 sm:$0xff]   ;;  %v17362_v5 = vld [vmem:[%s24749_s26 + $0x658] ss:$28 sps:$4 sm:$0xff]   ;;  %v17367_v8 = vld [vmem:[%s24749_s26 + $0x310] ss:$28 sps:$4 sm:$0xff]   ;;  %v18964_v18 = vpack.c.bf16 %v75_v60, %v75_v60 }
  0x1c   :  { %3014 = vmatpush1.bf16.msra.mxu0 %v17308_v19  ;;  %2974 = vmatprep.subr.bf16.mxu1 %v17309_v20  ;;  %v17368_v9 = vld [vmem:[%s24749_s26 + $0x690] ss:$28 sps:$4 sm:$0xff]   ;;  %v17373_v12 = vld [vmem:[%s24749_s26 + $0x348] ss:$28 sps:$4 sm:$0xff]   ;;  %v17376_v16 = vld [vmem:[%s24749_s26 + $0x700] ss:$28 sps:$4 sm:$0xff]  }
  0x1d   :  { %3015 = vmatprep.subr.bf16.mxu0 %v17311_v21  ;;  %v18919_v3 = vpack.c.bf16 %v77_v63, %v77_v63  ;;  %2996 = vmatprep.mubr.bf16.mxu1 %v18908_v62  ;;  %v17369_v10 = vld [vmem:[%s24749_s26 + $0x34c] ss:$28 sps:$4 sm:$0xff]   ;;  %v17378_v14 = vld [vmem:[%s24749_s26 + $0x704] ss:$28 sps:$4 sm:$0xff]   ;;  %v17384_v20 = vld [vmem:[%s24749_s26 + $0x73c] ss:$28 sps:$4 sm:$0xff]  }
  0x1e   :  { %v17371_v11 = vld [vmem:[%s24749_s26 + $0x6cc] ss:$28 sps:$4 sm:$0xff]   ;;  %v17387_v21 = vld [vmem:[%s24749_s26 + $0x44] ss:$28 sps:$4 sm:$0xff]   ;;  %v17408_v36 = vld [vmem:[%s24749_s26 + $0x81c] ss:$28 sps:$4 sm:$0xff]  }
  0x1f   :  { %2975 = vmatpush1.bf16.msra.mxu1 %v17313_v22  ;;  %3037 = vmatprep.mubr.bf16.mxu0 %v18919_v3  ;;  %v17374_v13 = vld [vmem:[%s24749_s26 + $0x6c8] ss:$28 sps:$4 sm:$0xff]   ;;  %v17382_v22 = vld [vmem:[%s24749_s26 + $0x738] ss:$28 sps:$4 sm:$0xff]  }
  0x20   :  { %3016 = vmatpush1.bf16.msra.mxu0 %v17314_v23  ;;  %2976 = vmatprep.subr.bf16.mxu1 %v17315_v24  ;;  %v17381_v15 = vld [vmem:[%s24749_s26 + $0xc] ss:$28 sps:$4 sm:$0xff]   ;;  %v17385_v23 = vld [vmem:[%s24749_s26 + $0x40] ss:$28 sps:$4 sm:$0xff]   ;;  %v17390_v24 = vld [vmem:[%s24749_s26 + $0x774] ss:$28 sps:$4 sm:$0xff]  }
  0x21   :  { %3017 = vmatprep.subr.bf16.mxu0 %v17317_v25  ;;  %v17379_v19 = vld [vmem:[%s24749_s26 + $0x8] ss:$28 sps:$4 sm:$0xff]   ;;  %v17393_v25 = vld [vmem:[%s24749_s26 + $0x7c] ss:$28 sps:$4 sm:$0xff]   ;;  %v17438_v63 = vld [vmem:[%s24749_s26 + $0x934] ss:$28 sps:$4 sm:$0xff]  }
  0x22   :  { %v17411_v37 = vld [vmem:[%s24749_s26 + $0x124] ss:$28 sps:$4 sm:$0xff]   ;;  %v17406_v38 = vld [vmem:[%s24749_s26 + $0x818] ss:$28 sps:$4 sm:$0xff]   ;;  %v19041_v42 = vld [vmem:[%s24750_s20 + $0x8] sm:$0xff] }
  0x23   :  { %2977 = vmatpush1.bf16.msra.mxu1 %v17319_v26  ;;  %v17388_v26 = vld [vmem:[%s24749_s26 + $0x770] ss:$28 sps:$4 sm:$0xff]   ;;  %v17418_v52 = vld [vmem:[%s24749_s26 + $0x888] ss:$28 sps:$4 sm:$0xff]   ;;  %v17430_v60 = vld [vmem:[%s24749_s26 + $0x8f8] ss:$28 sps:$4 sm:$0xff]  }
  0x24   :  { %3018 = vmatpush1.bf16.msra.mxu0 %v17320_v27  ;;  %2978 = vmatprep.subr.bf16.mxu1 %v17321_v28  ;;  %v17391_v27 = vld [vmem:[%s24749_s26 + $0x78] ss:$28 sps:$4 sm:$0xff]   ;;  %v17396_v28 = vld [vmem:[%s24749_s26 + $0x7ac] ss:$28 sps:$4 sm:$0xff]   ;;  %v17426_v54 = vld [vmem:[%s24749_s26 + $0x8c4] ss:$28 sps:$4 sm:$0xff]  }
  0x25   :  { %3019 = vmatprep.subr.bf16.mxu0 %v17323_v29  ;;  %v17399_v29 = vld [vmem:[%s24749_s26 + $0xb4] ss:$28 sps:$4 sm:$0xff]   ;;  %v17429_v55 = vld [vmem:[%s24749_s26 + $0x1cc] ss:$28 sps:$4 sm:$0xff]   ;;  %v17435_v59 = vld [vmem:[%s24749_s26 + $0x204] ss:$28 sps:$4 sm:$0xff]  }
  0x27   :  { %2979 = vmatpush1.bf16.msra.mxu1 %v17325_v30  ;;  %v17394_v30 = vld [vmem:[%s24749_s26 + $0x7a8] ss:$28 sps:$4 sm:$0xff]  }
  0x28   :  { %3020 = vmatpush1.bf16.msra.mxu0 %v17326_v31  ;;  %2980 = vmatprep.subr.bf16.mxu1 %v17327_v32  ;;  %v17397_v31 = vld [vmem:[%s24749_s26 + $0xb0] ss:$28 sps:$4 sm:$0xff]   ;;  %v17402_v32 = vld [vmem:[%s24749_s26 + $0x7e4] ss:$28 sps:$4 sm:$0xff]  }
  0x29   :  { %3021 = vmatprep.subr.bf16.mxu0 %v17329_v33  ;;  %v17405_v33 = vld [vmem:[%s24749_s26 + $0xec] ss:$28 sps:$4 sm:$0xff]  }
  0x2b   :  { %2981 = vmatpush1.bf16.msra.mxu1 %v17331_v34  ;;  %v17400_v34 = vld [vmem:[%s24749_s26 + $0x7e0] ss:$28 sps:$4 sm:$0xff]  }
  0x2c   :  { %3022 = vmatpush1.bf16.msra.mxu0 %v17332_v35  ;;  %2982 = vmatprep.subr.bf16.mxu1 %v17333_v39  ;;  %v17403_v35 = vld [vmem:[%s24749_s26 + $0xe8] ss:$28 sps:$4 sm:$0xff]   ;;  %v17409_v39 = vld [vmem:[%s24749_s26 + $0x120] ss:$28 sps:$4 sm:$0xff]  }
  0x2d   :  { %3023 = vmatprep.subr.bf16.mxu0 %v17335_v40  ;;  %v17414_v40 = vld [vmem:[%s24749_s26 + $0x854] ss:$28 sps:$4 sm:$0xff]  }
  0x2f   :  { %2983 = vmatpush1.bf16.msra.mxu1 %v17337_v41  ;;  %v17417_v41 = vld [vmem:[%s24749_s26 + $0x15c] ss:$28 sps:$4 sm:$0xff]  }
  0x30   :  { %3024 = vmatpush1.bf16.msra.mxu0 %v17338_v44  ;;  %2984 = vmatprep.subr.bf16.mxu1 %v17339_v45  ;;  %v19045_v44 = vrot.slane %v19041_v42, %v18880_v49  ;;  %v17412_v45 = vld [vmem:[%s24749_s26 + $0x850] ss:$28 sps:$4 sm:$0xff]  }
  0x31   :  { %3025 = vmatprep.subr.bf16.mxu0 %v17341_v46  ;;  %v17415_v46 = vld [vmem:[%s24749_s26 + $0x158] ss:$28 sps:$4 sm:$0xff]  }
  0x33   :  { %2985 = vmatpush1.bf16.msra.mxu1 %v17343_v47  ;;  %v93_v47 = vcombine.high %v19045_v44, %v19045_v44 }
  0x34   :  { %3026 = vmatpush1.bf16.msra.mxu0 %v17344_v48  ;;  %2986 = vmatprep.subr.bf16.mxu1 %v17345_v50  ;;  %v17420_v48 = vld [vmem:[%s24749_s26 + $0x88c] ss:$28 sps:$4 sm:$0xff]   ;;  %v17423_v50 = vld [vmem:[%s24749_s26 + $0x194] ss:$28 sps:$4 sm:$0xff]  }
  0x35   :  { %3027 = vmatprep.subr.bf16.mxu0 %v17347_v51  ;;  %v19061_v51 = vpack.c.bf16 %v93_v47, %v93_v47  ;;  %v17493_v47 = vld [vmem:[%s24749_s26 + $0x430] ss:$28 sps:$4 sm:$0xff]  }
  0x37   :  { %2987 = vmatpush1.bf16.msra.mxu1 %v17349_v53  ;;  %v17421_v53 = vld [vmem:[%s24749_s26 + $0x190] ss:$28 sps:$4 sm:$0xff]  }
  0x38   :  { %3028 = vmatpush1.bf16.msra.mxu0 %v17350_v56  ;;  %2988 = vmatprep.subr.bf16.mxu1 %v17351_v57  ;;  %v17424_v56 = vld [vmem:[%s24749_s26 + $0x8c0] ss:$28 sps:$4 sm:$0xff]   ;;  %v17427_v57 = vld [vmem:[%s24749_s26 + $0x1c8] ss:$28 sps:$4 sm:$0xff]  }
  0x39   :  { %3029 = vmatprep.subr.bf16.mxu0 %v17353_v58  ;;  %v17432_v58 = vld [vmem:[%s24749_s26 + $0x8fc] ss:$28 sps:$4 sm:$0xff]  }
  0x3b   :  { %2989 = vmatpush1.bf16.msra.mxu1 %v17355_v61  ;;  %v17433_v61 = vld [vmem:[%s24749_s26 + $0x200] ss:$28 sps:$4 sm:$0xff]  }
  0x3c   :  { %3030 = vmatpush1.bf16.msra.mxu0 %v17356_v0  ;;  %2990 = vmatprep.subr.bf16.mxu1 %v17357_v1  ;;  %v17441_v0 = vld [vmem:[%s24749_s26 + $0x23c] ss:$28 sps:$4 sm:$0xff]   ;;  %v17436_v1 = vld [vmem:[%s24749_s26 + $0x930] ss:$28 sps:$4 sm:$0xff]  }
  0x3d   :  { %3031 = vmatprep.subr.bf16.mxu0 %v17359_v2  ;;  %v17439_v2 = vld [vmem:[%s24749_s26 + $0x238] ss:$28 sps:$4 sm:$0xff]  }
  0x3f   :  { %2991 = vmatpush1.bf16.msra.mxu1 %v17361_v4  ;;  %v17444_v4 = vld [vmem:[%s24749_s26 + $0x96c] ss:$28 sps:$4 sm:$0xff]  }
  0x40   :  { %3032 = vmatpush1.bf16.msra.mxu0 %v17362_v5  ;;  %2992 = vmatprep.subr.bf16.mxu1 %v17363_v6  ;;  %v17447_v5 = vld [vmem:[%s24749_s26 + $0x274] ss:$28 sps:$4 sm:$0xff]   ;;  %v17442_v6 = vld [vmem:[%s24749_s26 + $0x968] ss:$28 sps:$4 sm:$0xff]  }
  0x41   :  { %3033 = vmatprep.subr.bf16.mxu0 %v17365_v7  ;;  %v17445_v7 = vld [vmem:[%s24749_s26 + $0x270] ss:$28 sps:$4 sm:$0xff]  }
  0x43   :  { %2993 = vmatpush1.bf16.msra.mxu1 %v17367_v8  ;;  %v17450_v8 = vld [vmem:[%s24749_s26 + $0x9a4] ss:$28 sps:$4 sm:$0xff]  }
  0x44   :  { %3034 = vmatpush1.bf16.msra.mxu0 %v17368_v9  ;;  %2994 = vmatprep.subr.bf16.mxu1 %v17369_v10  ;;  %v17453_v9 = vld [vmem:[%s24749_s26 + $0x2ac] ss:$28 sps:$4 sm:$0xff]   ;;  %v17448_v10 = vld [vmem:[%s24749_s26 + $0x9a0] ss:$28 sps:$4 sm:$0xff]  }
  0x45   :  { %3035 = vmatprep.subr.bf16.mxu0 %v17371_v11  ;;  %v17451_v11 = vld [vmem:[%s24749_s26 + $0x2a8] ss:$28 sps:$4 sm:$0xff]  }
  0x47   :  { %2995 = vmatpush1.bf16.msra.mxu1 %v17373_v12  ;;  %v17456_v12 = vld [vmem:[%s24749_s26 + $0x9dc] ss:$28 sps:$4 sm:$0xff]  }
  0x48   :  { %3036 = vmatpush1.bf16.msra.mxu0 %v17374_v13  ;;  %3128 = vmatprep.subr.bf16.mxu1 %v17381_v15  ;;  %v17459_v13 = vld [vmem:[%s24749_s26 + $0x2e4] ss:$28 sps:$4 sm:$0xff]  }
  0x49   :  { %3046 = vmatprep.subr.bf16.mxu0 %v17378_v14  ;;  %v17454_v14 = vld [vmem:[%s24749_s26 + $0x9d8] ss:$28 sps:$4 sm:$0xff]   ;;  %v17457_v15 = vld [vmem:[%s24749_s26 + $0x2e0] ss:$28 sps:$4 sm:$0xff]  }
  0x4a   :  { %2997 = vmatmul.mubr.bf16.vlgmr.msra.gmra.mrb[0].mxu1 %v18962_v17 }
  0x4b   :  { %3038 = vmatmul.mubr.bf16.vlgmr.msra.gmra.mrb[0].mxu0 %v18964_v18  ;;  %3129 = vmatpush1.bf16.msra.mxu1 %v17379_v19  ;;  %v17465_v19 = vld [vmem:[%s24749_s26 + $0x31c] ss:$28 sps:$4 sm:$0xff]  }
  0x4c   :  { %3047 = vmatpush1.bf16.msra.mxu0 %v17376_v16  ;;  %3130 = vmatprep.subr.bf16.mxu1 %v17387_v21  ;;  %v17462_v16 = vld [vmem:[%s24749_s26 + $0xa14] ss:$28 sps:$4 sm:$0xff]  }
  0x4d   :  { %3048 = vmatprep.subr.bf16.mxu0 %v17384_v20  ;;  %3160 = vmatprep.mubr.bf16.mxu1 %v18908_v62  ;;  %v78_v20 = vcombine.high %v19041_v42, %v19041_v42  ;;  %v17460_v21 = vld [vmem:[%s24749_s26 + $0xa10] ss:$28 sps:$4 sm:$0xff]   ;;  %v17487_v42 = vld [vmem:[%s24749_s26 + $0x3f8] ss:$28 sps:$4 sm:$0xff]  }
  0x4e   :  { %3078 = vmatprep.mubr.bf16.mxu0 %v19061_v51 }
  0x4f   :  { %3131 = vmatpush1.bf16.msra.mxu1 %v17385_v23  ;;  %v17468_v23 = vld [vmem:[%s24749_s26 + $0xa4c] ss:$28 sps:$4 sm:$0xff]  }
  0x50   :  { %3049 = vmatpush1.bf16.msra.mxu0 %v17382_v22  ;;  %3132 = vmatprep.subr.bf16.mxu1 %v17393_v25  ;;  %v17463_v22 = vld [vmem:[%s24749_s26 + $0x318] ss:$28 sps:$4 sm:$0xff]   ;;  %v19163_v25 = vrot.slane %v78_v20, %v18880_v49  ;;  %v17538_v20 = vld [vmem:[%s24749_s26 + $0xce8] ss:$28 sps:$4 sm:$0xff]  }
  0x51   :  { %3050 = vmatprep.subr.bf16.mxu0 %v17390_v24  ;;  %v17471_v24 = vld [vmem:[%s24749_s26 + $0x354] ss:$28 sps:$4 sm:$0xff]  }
  0x53   :  { %3133 = vmatpush1.bf16.msra.mxu1 %v17391_v27  ;;  %v17469_v27 = vld [vmem:[%s24749_s26 + $0x350] ss:$28 sps:$4 sm:$0xff]  }
  0x54   :  { %3051 = vmatpush1.bf16.msra.mxu0 %v17388_v26  ;;  %3134 = vmatprep.subr.bf16.mxu1 %v17399_v29  ;;  %v17466_v26 = vld [vmem:[%s24749_s26 + $0xa48] ss:$28 sps:$4 sm:$0xff]  }
  0x55   :  { %3052 = vmatprep.subr.bf16.mxu0 %v17396_v28  ;;  %v17474_v28 = vld [vmem:[%s24749_s26 + $0xa84] ss:$28 sps:$4 sm:$0xff]   ;;  %v17477_v29 = vld [vmem:[%s24749_s26 + $0x38c] ss:$28 sps:$4 sm:$0xff]  }
  0x57   :  { %3135 = vmatpush1.bf16.msra.mxu1 %v17397_v31  ;;  %v19181_v31 = vpack.c.bf16 %v19045_v44, %v19045_v44  ;;  %v17492_v44 = vld [vmem:[%s24749_s26 + $0xb2c] ss:$28 sps:$4 sm:$0xff]  }
  0x58   :  { %3053 = vmatpush1.bf16.msra.mxu0 %v17394_v30  ;;  %3136 = vmatprep.subr.bf16.mxu1 %v17405_v33  ;;  %v94_v30 = vcombine.high %v19163_v25, %v19163_v25  ;;  %v17475_v33 = vld [vmem:[%s24749_s26 + $0x388] ss:$28 sps:$4 sm:$0xff]  }
  0x59   :  { %3054 = vmatprep.subr.bf16.mxu0 %v17402_v32  ;;  %v17472_v32 = vld [vmem:[%s24749_s26 + $0xa80] ss:$28 sps:$4 sm:$0xff]  }
  0x5b   :  { %3137 = vmatpush1.bf16.msra.mxu1 %v17403_v35  ;;  %v17483_v35 = vld [vmem:[%s24749_s26 + $0x3c4] ss:$28 sps:$4 sm:$0xff]  }
  0x5c   :  { %3055 = vmatpush1.bf16.msra.mxu0 %v17400_v34  ;;  %3138 = vmatprep.subr.bf16.mxu1 %v17411_v37  ;;  %v17480_v34 = vld [vmem:[%s24749_s26 + $0xabc] ss:$28 sps:$4 sm:$0xff]  }
  0x5d   :  { %3056 = vmatprep.subr.bf16.mxu0 %v17408_v36  ;;  %v19195_v36 = vpack.c.bf16 %v94_v30, %v94_v30  ;;  %v17478_v37 = vld [vmem:[%s24749_s26 + $0xab8] ss:$28 sps:$4 sm:$0xff]   ;;  %v17553_v30 = vld [vmem:[%s24749_s26 + $0x660] ss:$28 sps:$4 sm:$0xff]  }
  0x5f   :  { %3139 = vmatpush1.bf16.msra.mxu1 %v17409_v39  ;;  %v17486_v39 = vld [vmem:[%s24749_s26 + $0xaf4] ss:$28 sps:$4 sm:$0xff]  }
  0x60   :  { %3057 = vmatpush1.bf16.msra.mxu0 %v17406_v38  ;;  %3140 = vmatprep.subr.bf16.mxu1 %v17417_v41  ;;  %v17481_v38 = vld [vmem:[%s24749_s26 + $0x3c0] ss:$28 sps:$4 sm:$0xff]   ;;  %v17484_v41 = vld [vmem:[%s24749_s26 + $0xaf0] ss:$28 sps:$4 sm:$0xff]  }
  0x61   :  { %3058 = vmatprep.subr.bf16.mxu0 %v17414_v40  ;;  %v17489_v40 = vld [vmem:[%s24749_s26 + $0x3fc] ss:$28 sps:$4 sm:$0xff]  }
  0x63   :  { %3141 = vmatpush1.bf16.msra.mxu1 %v17415_v46  ;;  %v17490_v46 = vld [vmem:[%s24749_s26 + $0xb28] ss:$28 sps:$4 sm:$0xff]  }
  0x64   :  { %3059 = vmatpush1.bf16.msra.mxu0 %v17412_v45  ;;  %3142 = vmatprep.subr.bf16.mxu1 %v17423_v50  ;;  %v17495_v45 = vld [vmem:[%s24749_s26 + $0x434] ss:$28 sps:$4 sm:$0xff]   ;;  %v17501_v50 = vld [vmem:[%s24749_s26 + $0x46c] ss:$28 sps:$4 sm:$0xff]  }
  0x65   :  { %3060 = vmatprep.subr.bf16.mxu0 %v17420_v48  ;;  %v17498_v48 = vld [vmem:[%s24749_s26 + $0xb64] ss:$28 sps:$4 sm:$0xff]  }
  0x67   :  { %3143 = vmatpush1.bf16.msra.mxu1 %v17421_v53  ;;  %v17499_v53 = vld [vmem:[%s24749_s26 + $0x468] ss:$28 sps:$4 sm:$0xff]  }
  0x68   :  { %3061 = vmatpush1.bf16.msra.mxu0 %v17418_v52  ;;  %3144 = vmatprep.subr.bf16.mxu1 %v17429_v55  ;;  %v17496_v52 = vld [vmem:[%s24749_s26 + $0xb60] ss:$28 sps:$4 sm:$0xff]  }
  0x69   :  { %3062 = vmatprep.subr.bf16.mxu0 %v17426_v54  ;;  %v17504_v54 = vld [vmem:[%s24749_s26 + $0xb9c] ss:$28 sps:$4 sm:$0xff]   ;;  %v17507_v55 = vld [vmem:[%s24749_s26 + $0x4a4] ss:$28 sps:$4 sm:$0xff]  }
  0x6b   :  { %3145 = vmatpush1.bf16.msra.mxu1 %v17427_v57  ;;  %v17505_v57 = vld [vmem:[%s24749_s26 + $0x4a0] ss:$28 sps:$4 sm:$0xff]  }
  0x6c   :  { %3063 = vmatpush1.bf16.msra.mxu0 %v17424_v56  ;;  %3146 = vmatprep.subr.bf16.mxu1 %v17435_v59  ;;  %v17502_v56 = vld [vmem:[%s24749_s26 + $0xb98] ss:$28 sps:$4 sm:$0xff]  }
  0x6d   :  { %3064 = vmatprep.subr.bf16.mxu0 %v17432_v58  ;;  %v17510_v58 = vld [vmem:[%s24749_s26 + $0xbd4] ss:$28 sps:$4 sm:$0xff]   ;;  %v17513_v59 = vld [vmem:[%s24749_s26 + $0x4dc] ss:$28 sps:$4 sm:$0xff]  }
  0x6f   :  { %3147 = vmatpush1.bf16.msra.mxu1 %v17433_v61  ;;  %v17511_v61 = vld [vmem:[%s24749_s26 + $0x4d8] ss:$28 sps:$4 sm:$0xff]  }
  0x70   :  { %3065 = vmatpush1.bf16.msra.mxu0 %v17430_v60  ;;  %3148 = vmatprep.subr.bf16.mxu1 %v17441_v0  ;;  %v17508_v60 = vld [vmem:[%s24749_s26 + $0xbd0] ss:$28 sps:$4 sm:$0xff]  }
  0x71   :  { %3066 = vmatprep.subr.bf16.mxu0 %v17438_v63  ;;  %v17516_v63 = vld [vmem:[%s24749_s26 + $0xc0c] ss:$28 sps:$4 sm:$0xff]   ;;  %v17519_v0 = vld [vmem:[%s24749_s26 + $0x514] ss:$28 sps:$4 sm:$0xff]  }
  0x73   :  { %3149 = vmatpush1.bf16.msra.mxu1 %v17439_v2  ;;  %v17517_v2 = vld [vmem:[%s24749_s26 + $0x510] ss:$28 sps:$4 sm:$0xff]  }
  0x74   :  { %3067 = vmatpush1.bf16.msra.mxu0 %v17436_v1  ;;  %3150 = vmatprep.subr.bf16.mxu1 %v17447_v5  ;;  %v17514_v1 = vld [vmem:[%s24749_s26 + $0xc08] ss:$28 sps:$4 sm:$0xff]  }
  0x75   :  { %3068 = vmatprep.subr.bf16.mxu0 %v17444_v4  ;;  %v17522_v4 = vld [vmem:[%s24749_s26 + $0xc44] ss:$28 sps:$4 sm:$0xff]   ;;  %v17525_v5 = vld [vmem:[%s24749_s26 + $0x54c] ss:$28 sps:$4 sm:$0xff]  }
  0x77   :  { %3151 = vmatpush1.bf16.msra.mxu1 %v17445_v7  ;;  %v17523_v7 = vld [vmem:[%s24749_s26 + $0x548] ss:$28 sps:$4 sm:$0xff]  }
  0x78   :  { %3069 = vmatpush1.bf16.msra.mxu0 %v17442_v6  ;;  %3152 = vmatprep.subr.bf16.mxu1 %v17453_v9  ;;  %v17520_v6 = vld [vmem:[%s24749_s26 + $0xc40] ss:$28 sps:$4 sm:$0xff]  }
  0x79   :  { %3070 = vmatprep.subr.bf16.mxu0 %v17450_v8  ;;  %v17528_v8 = vld [vmem:[%s24749_s26 + $0xc7c] ss:$28 sps:$4 sm:$0xff]   ;;  %v17531_v9 = vld [vmem:[%s24749_s26 + $0x584] ss:$28 sps:$4 sm:$0xff]  }
  0x7b   :  { %3153 = vmatpush1.bf16.msra.mxu1 %v17451_v11  ;;  %v17529_v11 = vld [vmem:[%s24749_s26 + $0x580] ss:$28 sps:$4 sm:$0xff]  }
  0x7c   :  { %3071 = vmatpush1.bf16.msra.mxu0 %v17448_v10  ;;  %3154 = vmatprep.subr.bf16.mxu1 %v17459_v13  ;;  %v17526_v10 = vld [vmem:[%s24749_s26 + $0xc78] ss:$28 sps:$4 sm:$0xff]  }
  0x7d   :  { %3072 = vmatprep.subr.bf16.mxu0 %v17456_v12  ;;  %v17534_v12 = vld [vmem:[%s24749_s26 + $0xcb4] ss:$28 sps:$4 sm:$0xff]   ;;  %v17537_v13 = vld [vmem:[%s24749_s26 + $0x5bc] ss:$28 sps:$4 sm:$0xff]  }
  0x7f   :  { %3155 = vmatpush1.bf16.msra.mxu1 %v17457_v15  ;;  %v17535_v15 = vld [vmem:[%s24749_s26 + $0x5b8] ss:$28 sps:$4 sm:$0xff]  }
  0x80   :  { %3073 = vmatpush1.bf16.msra.mxu0 %v17454_v14  ;;  %3156 = vmatprep.subr.bf16.mxu1 %v17465_v19  ;;  %v17532_v14 = vld [vmem:[%s24749_s26 + $0xcb0] ss:$28 sps:$4 sm:$0xff]  }
  0x81   :  { %3074 = vmatprep.subr.bf16.mxu0 %v17462_v16  ;;  %v17540_v16 = vld [vmem:[%s24749_s26 + $0xcec] ss:$28 sps:$4 sm:$0xff]   ;;  %v17543_v19 = vld [vmem:[%s24749_s26 + $0x5f4] ss:$28 sps:$4 sm:$0xff]  }
  0x83   :  { %3157 = vmatpush1.bf16.msra.mxu1 %v17463_v22  ;;  %v17546_v22 = vld [vmem:[%s24749_s26 + $0xd24] ss:$28 sps:$4 sm:$0xff]  }
  0x84   :  { %3075 = vmatpush1.bf16.msra.mxu0 %v17460_v21  ;;  %3158 = vmatprep.subr.bf16.mxu1 %v17471_v24  ;;  %v17541_v21 = vld [vmem:[%s24749_s26 + $0x5f0] ss:$28 sps:$4 sm:$0xff]   ;;  %v17544_v24 = vld [vmem:[%s24749_s26 + $0xd20] ss:$28 sps:$4 sm:$0xff]  }
  0x85   :  { %3076 = vmatprep.subr.bf16.mxu0 %v17468_v23  ;;  %v17549_v23 = vld [vmem:[%s24749_s26 + $0x62c] ss:$28 sps:$4 sm:$0xff]  }
  0x87   :  { %3159 = vmatpush1.bf16.msra.mxu1 %v17469_v27  ;;  %v17552_v27 = vld [vmem:[%s24749_s26 + $0xd5c] ss:$28 sps:$4 sm:$0xff]  }
  0x88   :  { %3077 = vmatpush1.bf16.msra.mxu0 %v17466_v26  ;;  %3169 = vmatprep.subr.bf16.mxu1 %v17477_v29  ;;  %v17547_v26 = vld [vmem:[%s24749_s26 + $0x628] ss:$28 sps:$4 sm:$0xff]   ;;  %v17550_v29 = vld [vmem:[%s24749_s26 + $0xd58] ss:$28 sps:$4 sm:$0xff]  }
  0x89   :  { %3087 = vmatprep.subr.bf16.mxu0 %v17474_v28  ;;  %v17555_v28 = vld [vmem:[%s24749_s26 + $0x664] ss:$28 sps:$4 sm:$0xff]  }
  0x8a   :  { %3161 = vmatmul.mubr.bf16.vlgmr.msra.gmra.mrb[4].mxu1 %v18962_v17 }
  0x8b   :  { %3079 = vmatmul.mubr.bf16.vlgmr.msra.gmra.mrb[0].mxu0 %v19181_v31  ;;  %3170 = vmatpush1.bf16.msra.mxu1 %v17475_v33  ;;  %v17561_v33 = vld [vmem:[%s24749_s26 + $0x69c] ss:$28 sps:$4 sm:$0xff]  }
  0x8c   :  { %3088 = vmatpush1.bf16.msra.mxu0 %v17472_v32  ;;  %3171 = vmatprep.subr.bf16.mxu1 %v17483_v35  ;;  %v17558_v32 = vld [vmem:[%s24749_s26 + $0xd94] ss:$28 sps:$4 sm:$0xff]  }
  0x8d   :  { %3089 = vmatprep.subr.bf16.mxu0 %v17480_v34  ;;  %3119 = vmatprep.mubr.bf16.mxu0 %v19195_v36  ;;  %v17556_v34 = vld [vmem:[%s24749_s26 + $0xd90] ss:$28 sps:$4 sm:$0xff]   ;;  %v17559_v35 = vld [vmem:[%s24749_s26 + $0x698] ss:$28 sps:$4 sm:$0xff]  }
  0x8e   :  { %3201 = vmatprep.mubr.bf16.mxu1 %v18919_v3 }
  0x8f   :  { %3172 = vmatpush1.bf16.msra.mxu1 %v17481_v38  ;;  %v17567_v38 = vld [vmem:[%s24749_s26 + $0x6d4] ss:$28 sps:$4 sm:$0xff]  }
  0x90   :  { %3090 = vmatpush1.bf16.msra.mxu0 %v17478_v37  ;;  %3173 = vmatprep.subr.bf16.mxu1 %v17489_v40  ;;  %v17564_v37 = vld [vmem:[%s24749_s26 + $0xdcc] ss:$28 sps:$4 sm:$0xff]  }
  0x91   :  { %3091 = vmatprep.subr.bf16.mxu0 %v17486_v39  ;;  %v17562_v39 = vld [vmem:[%s24749_s26 + $0xdc8] ss:$28 sps:$4 sm:$0xff]   ;;  %v17565_v40 = vld [vmem:[%s24749_s26 + $0x6d0] ss:$28 sps:$4 sm:$0xff]  }
  0x93   :  { %3174 = vmatpush1.bf16.msra.mxu1 %v17487_v42  ;;  %v17574_v42 = vld [vmem:[%s24749_s26 + $0x14] ss:$28 sps:$4 sm:$0xff]  }
  0x94   :  { %3092 = vmatpush1.bf16.msra.mxu0 %v17484_v41  ;;  %3175 = vmatprep.subr.bf16.mxu1 %v17495_v45  ;;  %v17571_v41 = vld [vmem:[%s24749_s26 + $0x70c] ss:$28 sps:$4 sm:$0xff]  }
  0x95   :  { %3093 = vmatprep.subr.bf16.mxu0 %v17492_v44  ;;  %v19383_v44 = vpack.c.bf16 %v19163_v25, %v19163_v25  ;;  %v17569_v45 = vld [vmem:[%s24749_s26 + $0x708] ss:$28 sps:$4 sm:$0xff]  }
  0x96   :  { %v17580_v25 = vld [vmem:[%s24749_s26 + $0x4c] ss:$28 sps:$4 sm:$0xff]  }
  0x97   :  { %3176 = vmatpush1.bf16.msra.mxu1 %v17493_v47  ;;  %v17577_v47 = vld [vmem:[%s24749_s26 + $0x744] ss:$28 sps:$4 sm:$0xff]  }
  0x98   :  { %3094 = vmatpush1.bf16.msra.mxu0 %v17490_v46  ;;  %3177 = vmatprep.subr.bf16.mxu1 %v17501_v50  ;;  %v17572_v46 = vld [vmem:[%s24749_s26 + $0x10] ss:$28 sps:$4 sm:$0xff]   ;;  %v17578_v50 = vld [vmem:[%s24749_s26 + $0x48] ss:$28 sps:$4 sm:$0xff]  }
  0x99   :  { %3095 = vmatprep.subr.bf16.mxu0 %v17498_v48  ;;  %v17575_v48 = vld [vmem:[%s24749_s26 + $0x740] ss:$28 sps:$4 sm:$0xff]  }
  0x9b   :  { %3178 = vmatpush1.bf16.msra.mxu1 %v17499_v53  ;;  %v17586_v53 = vld [vmem:[%s24749_s26 + $0x84] ss:$28 sps:$4 sm:$0xff]  }
  0x9c   :  { %3096 = vmatpush1.bf16.msra.mxu0 %v17496_v52  ;;  %3179 = vmatprep.subr.bf16.mxu1 %v17507_v55  ;;  %v17583_v52 = vld [vmem:[%s24749_s26 + $0x77c] ss:$28 sps:$4 sm:$0xff]  }
  0x9d   :  { %3097 = vmatprep.subr.bf16.mxu0 %v17504_v54  ;;  %v17581_v54 = vld [vmem:[%s24749_s26 + $0x778] ss:$28 sps:$4 sm:$0xff]   ;;  %v17584_v55 = vld [vmem:[%s24749_s26 + $0x80] ss:$28 sps:$4 sm:$0xff]  }
  0x9f   :  { %3180 = vmatpush1.bf16.msra.mxu1 %v17505_v57  ;;  %v17592_v57 = vld [vmem:[%s24749_s26 + $0xbc] ss:$28 sps:$4 sm:$0xff]  }
  0xa0   :  { %3098 = vmatpush1.bf16.msra.mxu0 %v17502_v56  ;;  %3181 = vmatprep.subr.bf16.mxu1 %v17513_v59  ;;  %v17589_v56 = vld [vmem:[%s24749_s26 + $0x7b4] ss:$28 sps:$4 sm:$0xff]  }
  0xa1   :  { %3099 = vmatprep.subr.bf16.mxu0 %v17510_v58  ;;  %v17587_v58 = vld [vmem:[%s24749_s26 + $0x7b0] ss:$28 sps:$4 sm:$0xff]   ;;  %v17590_v59 = vld [vmem:[%s24749_s26 + $0xb8] ss:$28 sps:$4 sm:$0xff]  }
  0xa3   :  { %3182 = vmatpush1.bf16.msra.mxu1 %v17511_v61  ;;  %v17598_v61 = vld [vmem:[%s24749_s26 + $0xf4] ss:$28 sps:$4 sm:$0xff]  }
  0xa4   :  { %3100 = vmatpush1.bf16.msra.mxu0 %v17508_v60  ;;  %3183 = vmatprep.subr.bf16.mxu1 %v17519_v0  ;;  %v17595_v60 = vld [vmem:[%s24749_s26 + $0x7ec] ss:$28 sps:$4 sm:$0xff]  }
  0xa5   :  { %3101 = vmatprep.subr.bf16.mxu0 %v17516_v63  ;;  %v17593_v63 = vld [vmem:[%s24749_s26 + $0x7e8] ss:$28 sps:$4 sm:$0xff]   ;;  %v17596_v0 = vld [vmem:[%s24749_s26 + $0xf0] ss:$28 sps:$4 sm:$0xff]  }
  0xa7   :  { %3184 = vmatpush1.bf16.msra.mxu1 %v17517_v2  ;;  %v17604_v2 = vld [vmem:[%s24749_s26 + $0x12c] ss:$28 sps:$4 sm:$0xff]  }
  0xa8   :  { %3102 = vmatpush1.bf16.msra.mxu0 %v17514_v1  ;;  %3185 = vmatprep.subr.bf16.mxu1 %v17525_v5  ;;  %v17601_v1 = vld [vmem:[%s24749_s26 + $0x824] ss:$28 sps:$4 sm:$0xff]  }
  0xa9   :  { %3103 = vmatprep.subr.bf16.mxu0 %v17522_v4  ;;  %v17599_v4 = vld [vmem:[%s24749_s26 + $0x820] ss:$28 sps:$4 sm:$0xff]   ;;  %v17602_v5 = vld [vmem:[%s24749_s26 + $0x128] ss:$28 sps:$4 sm:$0xff]  }
  0xab   :  { %3186 = vmatpush1.bf16.msra.mxu1 %v17523_v7  ;;  %v17610_v7 = vld [vmem:[%s24749_s26 + $0x164] ss:$28 sps:$4 sm:$0xff]  }
  0xac   :  { %3104 = vmatpush1.bf16.msra.mxu0 %v17520_v6  ;;  %3187 = vmatprep.subr.bf16.mxu1 %v17531_v9  ;;  %v17607_v6 = vld [vmem:[%s24749_s26 + $0x85c] ss:$28 sps:$4 sm:$0xff]  }
  0xad   :  { %3105 = vmatprep.subr.bf16.mxu0 %v17528_v8  ;;  %v17605_v8 = vld [vmem:[%s24749_s26 + $0x858] ss:$28 sps:$4 sm:$0xff]   ;;  %v17608_v9 = vld [vmem:[%s24749_s26 + $0x160] ss:$28 sps:$4 sm:$0xff]  }
  0xaf   :  { %3188 = vmatpush1.bf16.msra.mxu1 %v17529_v11  ;;  %v17616_v11 = vld [vmem:[%s24749_s26 + $0x19c] ss:$28 sps:$4 sm:$0xff]  }
  0xb0   :  { %3106 = vmatpush1.bf16.msra.mxu0 %v17526_v10  ;;  %3189 = vmatprep.subr.bf16.mxu1 %v17537_v13  ;;  %v17613_v10 = vld [vmem:[%s24749_s26 + $0x894] ss:$28 sps:$4 sm:$0xff]  }
  0xb1   :  { %3107 = vmatprep.subr.bf16.mxu0 %v17534_v12  ;;  %v17611_v12 = vld [vmem:[%s24749_s26 + $0x890] ss:$28 sps:$4 sm:$0xff]   ;;  %v17614_v13 = vld [vmem:[%s24749_s26 + $0x198] ss:$28 sps:$4 sm:$0xff]  }
  0xb3   :  { %3190 = vmatpush1.bf16.msra.mxu1 %v17535_v15  ;;  %v17622_v15 = vld [vmem:[%s24749_s26 + $0x1d4] ss:$28 sps:$4 sm:$0xff]  }
  0xb4   :  { %3108 = vmatpush1.bf16.msra.mxu0 %v17532_v14  ;;  %3191 = vmatprep.subr.bf16.mxu1 %v17543_v19  ;;  %v17619_v14 = vld [vmem:[%s24749_s26 + $0x8cc] ss:$28 sps:$4 sm:$0xff]  }
  0xb5   :  { %3109 = vmatprep.subr.bf16.mxu0 %v17540_v16  ;;  %v17617_v16 = vld [vmem:[%s24749_s26 + $0x8c8] ss:$28 sps:$4 sm:$0xff]   ;;  %v17620_v19 = vld [vmem:[%s24749_s26 + $0x1d0] ss:$28 sps:$4 sm:$0xff]  }
  0xb7   :  { %3192 = vmatpush1.bf16.msra.mxu1 %v17541_v21  ;;  %v17628_v21 = vld [vmem:[%s24749_s26 + $0x20c] ss:$28 sps:$4 sm:$0xff]  }
  0xb8   :  { %3110 = vmatpush1.bf16.msra.mxu0 %v17538_v20  ;;  %3193 = vmatprep.subr.bf16.mxu1 %v17549_v23  ;;  %v17625_v20 = vld [vmem:[%s24749_s26 + $0x904] ss:$28 sps:$4 sm:$0xff]  }
  0xb9   :  { %3111 = vmatprep.subr.bf16.mxu0 %v17546_v22  ;;  %v17623_v22 = vld [vmem:[%s24749_s26 + $0x900] ss:$28 sps:$4 sm:$0xff]   ;;  %v17626_v23 = vld [vmem:[%s24749_s26 + $0x208] ss:$28 sps:$4 sm:$0xff]  }
  0xbb   :  { %3194 = vmatpush1.bf16.msra.mxu1 %v17547_v26  ;;  %v17634_v26 = vld [vmem:[%s24749_s26 + $0x244] ss:$28 sps:$4 sm:$0xff]  }
  0xbc   :  { %3112 = vmatpush1.bf16.msra.mxu0 %v17544_v24  ;;  %3195 = vmatprep.subr.bf16.mxu1 %v17555_v28  ;;  %v17631_v24 = vld [vmem:[%s24749_s26 + $0x93c] ss:$28 sps:$4 sm:$0xff]  }
  0xbd   :  { %3113 = vmatprep.subr.bf16.mxu0 %v17552_v27  ;;  %v17629_v27 = vld [vmem:[%s24749_s26 + $0x938] ss:$28 sps:$4 sm:$0xff]   ;;  %v17632_v28 = vld [vmem:[%s24749_s26 + $0x240] ss:$28 sps:$4 sm:$0xff]  }
  0xbf   :  { %3196 = vmatpush1.bf16.msra.mxu1 %v17553_v30  ;;  %v17640_v30 = vld [vmem:[%s24749_s26 + $0x27c] ss:$28 sps:$4 sm:$0xff]  }
  0xc0   :  { %3114 = vmatpush1.bf16.msra.mxu0 %v17550_v29  ;;  %3197 = vmatprep.subr.bf16.mxu1 %v17561_v33  ;;  %v17637_v29 = vld [vmem:[%s24749_s26 + $0x974] ss:$28 sps:$4 sm:$0xff]  }
  0xc1   :  { %3115 = vmatprep.subr.bf16.mxu0 %v17558_v32  ;;  %v17635_v32 = vld [vmem:[%s24749_s26 + $0x970] ss:$28 sps:$4 sm:$0xff]   ;;  %v17638_v33 = vld [vmem:[%s24749_s26 + $0x278] ss:$28 sps:$4 sm:$0xff]  }
  0xc3   :  { %3198 = vmatpush1.bf16.msra.mxu1 %v17559_v35  ;;  %v17646_v35 = vld [vmem:[%s24749_s26 + $0x2b4] ss:$28 sps:$4 sm:$0xff]  }
  0xc4   :  { %3116 = vmatpush1.bf16.msra.mxu0 %v17556_v34  ;;  %3199 = vmatprep.subr.bf16.mxu1 %v17567_v38  ;;  %v17643_v34 = vld [vmem:[%s24749_s26 + $0x9ac] ss:$28 sps:$4 sm:$0xff]  }
  0xc5   :  { %3117 = vmatprep.subr.bf16.mxu0 %v17564_v37  ;;  %v17641_v37 = vld [vmem:[%s24749_s26 + $0x9a8] ss:$28 sps:$4 sm:$0xff]   ;;  %v17644_v38 = vld [vmem:[%s24749_s26 + $0x2b0] ss:$28 sps:$4 sm:$0xff]  }
  0xc7   :  { %3200 = vmatpush1.bf16.msra.mxu1 %v17565_v40  ;;  %v17652_v40 = vld [vmem:[%s24749_s26 + $0x2ec] ss:$28 sps:$4 sm:$0xff]  }
  0xc8   :  { %3118 = vmatpush1.bf16.msra.mxu0 %v17562_v39  ;;  %3210 = vmatprep.subr.bf16.mxu1 %v17571_v41  ;;  %v17649_v39 = vld [vmem:[%s24749_s26 + $0x9e4] ss:$28 sps:$4 sm:$0xff]  }
  0xc9   :  { %3292 = vmatprep.subr.bf16.mxu0 %v17574_v42  ;;  %v17647_v41 = vld [vmem:[%s24749_s26 + $0x9e0] ss:$28 sps:$4 sm:$0xff]   ;;  %v17650_v42 = vld [vmem:[%s24749_s26 + $0x2e8] ss:$28 sps:$4 sm:$0xff]  }
  0xca   :  { %3202 = vmatmul.mubr.bf16.vlgmr.msra.gmra.mrb[4].mxu1 %v18964_v18 }
  0xcb   :  { %3120 = vmatmul.mubr.bf16.vlgmr.msra.gmra.mrb[0].mxu0 %v19383_v44  ;;  %3211 = vmatpush1.bf16.msra.mxu1 %v17569_v45  ;;  %v17655_v45 = vld [vmem:[%s24749_s26 + $0xa1c] ss:$28 sps:$4 sm:$0xff]  }
  0xcc   :  { %3293 = vmatpush1.bf16.msra.mxu0 %v17572_v46  ;;  %3212 = vmatprep.subr.bf16.mxu1 %v17577_v47  ;;  %v17658_v46 = vld [vmem:[%s24749_s26 + $0x324] ss:$28 sps:$4 sm:$0xff]   ;;  %v17653_v47 = vld [vmem:[%s24749_s26 + $0xa18] ss:$28 sps:$4 sm:$0xff]  }
  0xcd   :  { %3294 = vmatprep.subr.bf16.mxu0 %v17580_v25  ;;  %3242 = vmatprep.mubr.bf16.mxu1 %v19061_v51  ;;  %v17656_v25 = vld [vmem:[%s24749_s26 + $0x320] ss:$28 sps:$4 sm:$0xff]  }
  0xce   :  { %3324 = vmatprep.mubr.bf16.mxu0 %v18908_v62 }
  0xcf   :  { %3213 = vmatpush1.bf16.msra.mxu1 %v17575_v48  ;;  %v17661_v48 = vld [vmem:[%s24749_s26 + $0xa54] ss:$28 sps:$4 sm:$0xff]  }
  0xd0   :  { %3295 = vmatpush1.bf16.msra.mxu0 %v17578_v50  ;;  %3214 = vmatprep.subr.bf16.mxu1 %v17583_v52  ;;  %v17664_v50 = vld [vmem:[%s24749_s26 + $0x35c] ss:$28 sps:$4 sm:$0xff]   ;;  %v17659_v52 = vld [vmem:[%s24749_s26 + $0xa50] ss:$28 sps:$4 sm:$0xff]  }
  0xd1   :  { %3296 = vmatprep.subr.bf16.mxu0 %v17586_v53  ;;  %v17662_v53 = vld [vmem:[%s24749_s26 + $0x358] ss:$28 sps:$4 sm:$0xff]  }
  0xd3   :  { %3215 = vmatpush1.bf16.msra.mxu1 %v17581_v54  ;;  %v17667_v54 = vld [vmem:[%s24749_s26 + $0xa8c] ss:$28 sps:$4 sm:$0xff]  }
  0xd4   :  { %3297 = vmatpush1.bf16.msra.mxu0 %v17584_v55  ;;  %3216 = vmatprep.subr.bf16.mxu1 %v17589_v56  ;;  %v17670_v55 = vld [vmem:[%s24749_s26 + $0x394] ss:$28 sps:$4 sm:$0xff]   ;;  %v17665_v56 = vld [vmem:[%s24749_s26 + $0xa88] ss:$28 sps:$4 sm:$0xff]  }
  0xd5   :  { %3298 = vmatprep.subr.bf16.mxu0 %v17592_v57  ;;  %v17668_v57 = vld [vmem:[%s24749_s26 + $0x390] ss:$28 sps:$4 sm:$0xff]  }
  0xd7   :  { %3217 = vmatpush1.bf16.msra.mxu1 %v17587_v58  ;;  %v17673_v58 = vld [vmem:[%s24749_s26 + $0xac4] ss:$28 sps:$4 sm:$0xff]  }
  0xd8   :  { %3299 = vmatpush1.bf16.msra.mxu0 %v17590_v59  ;;  %3218 = vmatprep.subr.bf16.mxu1 %v17595_v60  ;;  %v17676_v59 = vld [vmem:[%s24749_s26 + $0x3cc] ss:$28 sps:$4 sm:$0xff]   ;;  %v17671_v60 = vld [vmem:[%s24749_s26 + $0xac0] ss:$28 sps:$4 sm:$0xff]  }
  0xd9   :  { %3300 = vmatprep.subr.bf16.mxu0 %v17598_v61  ;;  %v17674_v61 = vld [vmem:[%s24749_s26 + $0x3c8] ss:$28 sps:$4 sm:$0xff]  }
  0xdb   :  { %3219 = vmatpush1.bf16.msra.mxu1 %v17593_v63  ;;  %v17679_v63 = vld [vmem:[%s24749_s26 + $0xafc] ss:$28 sps:$4 sm:$0xff]  }
  0xdc   :  { %3301 = vmatpush1.bf16.msra.mxu0 %v17596_v0  ;;  %3220 = vmatprep.subr.bf16.mxu1 %v17601_v1  ;;  %v17682_v0 = vld [vmem:[%s24749_s26 + $0x404] ss:$28 sps:$4 sm:$0xff]   ;;  %v17677_v1 = vld [vmem:[%s24749_s26 + $0xaf8] ss:$28 sps:$4 sm:$0xff]  }
  0xdd   :  { %3302 = vmatprep.subr.bf16.mxu0 %v17604_v2  ;;  %v17680_v2 = vld [vmem:[%s24749_s26 + $0x400] ss:$28 sps:$4 sm:$0xff]  }
  0xdf   :  { %3221 = vmatpush1.bf16.msra.mxu1 %v17599_v4  ;;  %v17685_v4 = vld [vmem:[%s24749_s26 + $0xb34] ss:$28 sps:$4 sm:$0xff]  }
  0xe0   :  { %3303 = vmatpush1.bf16.msra.mxu0 %v17602_v5  ;;  %3222 = vmatprep.subr.bf16.mxu1 %v17607_v6  ;;  %v17688_v5 = vld [vmem:[%s24749_s26 + $0x43c] ss:$28 sps:$4 sm:$0xff]   ;;  %v17683_v6 = vld [vmem:[%s24749_s26 + $0xb30] ss:$28 sps:$4 sm:$0xff]  }
  0xe1   :  { %3304 = vmatprep.subr.bf16.mxu0 %v17610_v7  ;;  %v17686_v7 = vld [vmem:[%s24749_s26 + $0x438] ss:$28 sps:$4 sm:$0xff]  }
  0xe3   :  { %3223 = vmatpush1.bf16.msra.mxu1 %v17605_v8  ;;  %v17691_v8 = vld [vmem:[%s24749_s26 + $0xb6c] ss:$28 sps:$4 sm:$0xff]  }
  0xe4   :  { %3305 = vmatpush1.bf16.msra.mxu0 %v17608_v9  ;;  %3224 = vmatprep.subr.bf16.mxu1 %v17613_v10  ;;  %v17694_v9 = vld [vmem:[%s24749_s26 + $0x474] ss:$28 sps:$4 sm:$0xff]   ;;  %v17689_v10 = vld [vmem:[%s24749_s26 + $0xb68] ss:$28 sps:$4 sm:$0xff]  }
  0xe5   :  { %3306 = vmatprep.subr.bf16.mxu0 %v17616_v11  ;;  %v17692_v11 = vld [vmem:[%s24749_s26 + $0x470] ss:$28 sps:$4 sm:$0xff]  }
  0xe7   :  { %3225 = vmatpush1.bf16.msra.mxu1 %v17611_v12  ;;  %v17697_v12 = vld [vmem:[%s24749_s26 + $0xba4] ss:$28 sps:$4 sm:$0xff]  }
  0xe8   :  { %3307 = vmatpush1.bf16.msra.mxu0 %v17614_v13  ;;  %3226 = vmatprep.subr.bf16.mxu1 %v17619_v14  ;;  %v17700_v13 = vld [vmem:[%s24749_s26 + $0x4ac] ss:$28 sps:$4 sm:$0xff]   ;;  %v17695_v14 = vld [vmem:[%s24749_s26 + $0xba0] ss:$28 sps:$4 sm:$0xff]  }
  0xe9   :  { %3308 = vmatprep.subr.bf16.mxu0 %v17622_v15  ;;  %v17698_v15 = vld [vmem:[%s24749_s26 + $0x4a8] ss:$28 sps:$4 sm:$0xff]  }
  0xeb   :  { %3227 = vmatpush1.bf16.msra.mxu1 %v17617_v16  ;;  %v17703_v16 = vld [vmem:[%s24749_s26 + $0xbdc] ss:$28 sps:$4 sm:$0xff]  }
  0xec   :  { %3309 = vmatpush1.bf16.msra.mxu0 %v17620_v19  ;;  %3228 = vmatprep.subr.bf16.mxu1 %v17625_v20  ;;  %v17706_v19 = vld [vmem:[%s24749_s26 + $0x4e4] ss:$28 sps:$4 sm:$0xff]   ;;  %v17701_v20 = vld [vmem:[%s24749_s26 + $0xbd8] ss:$28 sps:$4 sm:$0xff]  }
  0xed   :  { %3310 = vmatprep.subr.bf16.mxu0 %v17628_v21  ;;  %v17704_v21 = vld [vmem:[%s24749_s26 + $0x4e0] ss:$28 sps:$4 sm:$0xff]  }
  0xef   :  { %3229 = vmatpush1.bf16.msra.mxu1 %v17623_v22 }
  0xf0   :  { %3311 = vmatpush1.bf16.msra.mxu0 %v17626_v23  ;;  %3230 = vmatprep.subr.bf16.mxu1 %v17631_v24  ;;  %v17709_v24 = vld [vmem:[%s24749_s26 + $0xc14] ss:$28 sps:$4 sm:$0xff]  }
  0xf1   :  { %3312 = vmatprep.subr.bf16.mxu0 %v17634_v26 }
  0xf3   :  { %3231 = vmatpush1.bf16.msra.mxu1 %v17629_v27  ;;  %v17712_v27 = vld [vmem:[%s24749_s26 + $0x51c] ss:$28 sps:$4 sm:$0xff]  }
  0xf4   :  { %3313 = vmatpush1.bf16.msra.mxu0 %v17632_v28  ;;  %3232 = vmatprep.subr.bf16.mxu1 %v17637_v29  ;;  %v17707_v29 = vld [vmem:[%s24749_s26 + $0xc10] ss:$28 sps:$4 sm:$0xff]  }
  0xf5   :  { %3314 = vmatprep.subr.bf16.mxu0 %v17640_v30  ;;  %v17710_v30 = vld [vmem:[%s24749_s26 + $0x518] ss:$28 sps:$4 sm:$0xff]  }
  0xf7   :  { %3233 = vmatpush1.bf16.msra.mxu1 %v17635_v32  ;;  %v17715_v32 = vld [vmem:[%s24749_s26 + $0xc4c] ss:$28 sps:$4 sm:$0xff]  }
  0xf8   :  { %3315 = vmatpush1.bf16.msra.mxu0 %v17638_v33  ;;  %3234 = vmatprep.subr.bf16.mxu1 %v17643_v34  ;;  %v17718_v33 = vld [vmem:[%s24749_s26 + $0x554] ss:$28 sps:$4 sm:$0xff]   ;;  %v17713_v34 = vld [vmem:[%s24749_s26 + $0xc48] ss:$28 sps:$4 sm:$0xff]  }
  0xf9   :  { %3316 = vmatprep.subr.bf16.mxu0 %v17646_v35  ;;  %v17716_v35 = vld [vmem:[%s24749_s26 + $0x550] ss:$28 sps:$4 sm:$0xff]  }
  0xfb   :  { %3235 = vmatpush1.bf16.msra.mxu1 %v17641_v37  ;;  %v17721_v37 = vld [vmem:[%s24749_s26 + $0xc84] ss:$28 sps:$4 sm:$0xff]  }
  0xfc   :  { %3317 = vmatpush1.bf16.msra.mxu0 %v17644_v38  ;;  %3236 = vmatprep.subr.bf16.mxu1 %v17649_v39  ;;  %v17724_v38 = vld [vmem:[%s24749_s26 + $0x58c] ss:$28 sps:$4 sm:$0xff]   ;;  %v17719_v39 = vld [vmem:[%s24749_s26 + $0xc80] ss:$28 sps:$4 sm:$0xff]  }
  0xfd   :  { %3318 = vmatprep.subr.bf16.mxu0 %v17652_v40  ;;  %v17722_v40 = vld [vmem:[%s24749_s26 + $0x588] ss:$28 sps:$4 sm:$0xff]  }
  0xff   :  { %3237 = vmatpush1.bf16.msra.mxu1 %v17647_v41  ;;  %v17727_v41 = vld [vmem:[%s24749_s26 + $0xcbc] ss:$28 sps:$4 sm:$0xff]  }
 0x100   :  { %3319 = vmatpush1.bf16.msra.mxu0 %v17650_v42  ;;  %3238 = vmatprep.subr.bf16.mxu1 %v17655_v45  ;;  %v17730_v42 = vld [vmem:[%s24749_s26 + $0x5c4] ss:$28 sps:$4 sm:$0xff]   ;;  %v17725_v45 = vld [vmem:[%s24749_s26 + $0xcb8] ss:$28 sps:$4 sm:$0xff]  }
 0x101   :  { %3320 = vmatprep.subr.bf16.mxu0 %v17658_v46  ;;  %v17728_v46 = vld [vmem:[%s24749_s26 + $0x5c0] ss:$28 sps:$4 sm:$0xff]  }
 0x103   :  { %3239 = vmatpush1.bf16.msra.mxu1 %v17653_v47  ;;  %v17733_v47 = vld [vmem:[%s24749_s26 + $0xcf4] ss:$28 sps:$4 sm:$0xff]  }
 0x104   :  { %3321 = vmatpush1.bf16.msra.mxu0 %v17656_v25  ;;  %3240 = vmatprep.subr.bf16.mxu1 %v17661_v48  ;;  %v17736_v25 = vld [vmem:[%s24749_s26 + $0x5fc] ss:$28 sps:$4 sm:$0xff]   ;;  %v17731_v48 = vld [vmem:[%s24749_s26 + $0xcf0] ss:$28 sps:$4 sm:$0xff]  }
 0x105   :  { %3322 = vmatprep.subr.bf16.mxu0 %v17664_v50  ;;  %v17734_v50 = vld [vmem:[%s24749_s26 + $0x5f8] ss:$28 sps:$4 sm:$0xff]  }
 0x107   :  { %3241 = vmatpush1.bf16.msra.mxu1 %v17659_v52  ;;  %v17739_v52 = vld [vmem:[%s24749_s26 + $0xd2c] ss:$28 sps:$4 sm:$0xff]  }
 0x108   :  { %3323 = vmatpush1.bf16.msra.mxu0 %v17662_v53  ;;  %3251 = vmatprep.subr.bf16.mxu1 %v17667_v54  ;;  %v17742_v53 = vld [vmem:[%s24749_s26 + $0x634] ss:$28 sps:$4 sm:$0xff]   ;;  %v17737_v54 = vld [vmem:[%s24749_s26 + $0xd28] ss:$28 sps:$4 sm:$0xff]  }
 0x109   :  { %3333 = vmatprep.subr.bf16.mxu0 %v17670_v55  ;;  %v17740_v55 = vld [vmem:[%s24749_s26 + $0x630] ss:$28 sps:$4 sm:$0xff]  }
 0x10a   :  { %3243 = vmatmul.mubr.bf16.vlgmr.msra.gmra.mrb[4].mxu1 %v19181_v31 }
 0x10b   :  { %3325 = vmatmul.mubr.bf16.vlgmr.msra.gmra.mrb[4].mxu0 %v18962_v17  ;;  %3252 = vmatpush1.bf16.msra.mxu1 %v17665_v56  ;;  %v17745_v56 = vld [vmem:[%s24749_s26 + $0xd64] ss:$28 sps:$4 sm:$0xff]  }
 0x10c   :  { %3334 = vmatpush1.bf16.msra.mxu0 %v17668_v57  ;;  %3253 = vmatprep.subr.bf16.mxu1 %v17673_v58  ;;  %v17748_v57 = vld [vmem:[%s24749_s26 + $0x66c] ss:$28 sps:$4 sm:$0xff]   ;;  %v17743_v58 = vld [vmem:[%s24749_s26 + $0xd60] ss:$28 sps:$4 sm:$0xff]  }
 0x10d   :  { %3335 = vmatprep.subr.bf16.mxu0 %v17676_v59  ;;  %3283 = vmatprep.mubr.bf16.mxu1 %v19195_v36  ;;  %v17746_v59 = vld [vmem:[%s24749_s26 + $0x668] ss:$28 sps:$4 sm:$0xff]  }
 0x10e   :  { %3365 = vmatprep.mubr.bf16.mxu0 %v18919_v3 }
 0x10f   :  { %3254 = vmatpush1.bf16.msra.mxu1 %v17671_v60  ;;  %v17751_v60 = vld [vmem:[%s24749_s26 + $0xd9c] ss:$28 sps:$4 sm:$0xff]  }
 0x110   :  { %3336 = vmatpush1.bf16.msra.mxu0 %v17674_v61  ;;  %3255 = vmatprep.subr.bf16.mxu1 %v17679_v63  ;;  %v17754_v61 = vld [vmem:[%s24749_s26 + $0x6a4] ss:$28 sps:$4 sm:$0xff]   ;;  %v17749_v63 = vld [vmem:[%s24749_s26 + $0xd98] ss:$28 sps:$4 sm:$0xff]  }
 0x111   :  { %3337 = vmatprep.subr.bf16.mxu0 %v17682_v0  ;;  %v17752_v0 = vld [vmem:[%s24749_s26 + $0x6a0] ss:$28 sps:$4 sm:$0xff]  }
 0x113   :  { %3256 = vmatpush1.bf16.msra.mxu1 %v17677_v1  ;;  %v17757_v1 = vld [vmem:[%s24749_s26 + $0xdd4] ss:$28 sps:$4 sm:$0xff]  }
 0x114   :  { %3338 = vmatpush1.bf16.msra.mxu0 %v17680_v2  ;;  %3257 = vmatprep.subr.bf16.mxu1 %v17685_v4  ;;  %v17760_v2 = vld [vmem:[%s24749_s26 + $0x6dc] ss:$28 sps:$4 sm:$0xff]   ;;  %v17755_v4 = vld [vmem:[%s24749_s26 + $0xdd0] ss:$28 sps:$4 sm:$0xff]  }
 0x115   :  { %3339 = vmatprep.subr.bf16.mxu0 %v17688_v5  ;;  %v17758_v5 = vld [vmem:[%s24749_s26 + $0x6d8] ss:$28 sps:$4 sm:$0xff]  }
 0x117   :  { %3258 = vmatpush1.bf16.msra.mxu1 %v17683_v6  ;;  %v17763_v6 = vld [vmem:[%s24749_s26 + $0x714] ss:$28 sps:$4 sm:$0xff]  }
 0x118   :  { %3340 = vmatpush1.bf16.msra.mxu0 %v17686_v7  ;;  %3259 = vmatprep.subr.bf16.mxu1 %v17691_v8  ;;  %v17764_v7 = vld [vmem:[%s24749_s26 + $0x1d8] ss:$28 sps:$4 sm:$0xff]   ;;  %v17761_v8 = vld [vmem:[%s24749_s26 + $0x710] ss:$28 sps:$4 sm:$0xff]  }
 0x119   :  { %3341 = vmatprep.subr.bf16.mxu0 %v17694_v9  ;;  %v17765_v9 = vld [vmem:[%s24749_s26 + $0x18] ss:$28 sps:$4 sm:$0xff]  }
 0x11b   :  { %3260 = vmatpush1.bf16.msra.mxu1 %v17689_v10  ;;  %v17768_v10 = vld [vmem:[%s24749_s26 + $0x74c] ss:$28 sps:$4 sm:$0xff]  }
 0x11c   :  { %3342 = vmatpush1.bf16.msra.mxu0 %v17692_v11  ;;  %3261 = vmatprep.subr.bf16.mxu1 %v17697_v12  ;;  %v17769_v11 = vld [vmem:[%s24749_s26 + $0x210] ss:$28 sps:$4 sm:$0xff]   ;;  %v17766_v12 = vld [vmem:[%s24749_s26 + $0x748] ss:$28 sps:$4 sm:$0xff]  }
 0x11d   :  { %3343 = vmatprep.subr.bf16.mxu0 %v17700_v13  ;;  %v19663_v22 = vpop.f32.mrb[0].mxu1  ;;  %v17770_v13 = vld [vmem:[%s24749_s26 + $0x50] ss:$28 sps:$4 sm:$0xff]  }
 0x11e   :  { %v19665_v23 = vpop.f32.mrb[1].mxu1 }
 0x11f   :  { %3262 = vmatpush1.bf16.msra.mxu1 %v17695_v14  ;;  %v3002_v26 = vpop.f32.mrb[2].mxu1  ;;  %v17773_v14 = vld [vmem:[%s24749_s26 + $0x784] ss:$28 sps:$4 sm:$0xff]  }
 0x120   :  { %3344 = vmatpush1.bf16.msra.mxu0 %v17698_v15  ;;  %3263 = vmatprep.subr.bf16.mxu1 %v17703_v16  ;;  %v3003_v28 = vpop.f32.mrb[3].mxu1  ;;  %v17774_v15 = vld [vmem:[%s24749_s26 + $0x248] ss:$28 sps:$4 sm:$0xff]   ;;  %v17771_v16 = vld [vmem:[%s24749_s26 + $0x780] ss:$28 sps:$4 sm:$0xff]  }
 0x121   :  { %3345 = vmatprep.subr.bf16.mxu0 %v17706_v19  ;;  %v17775_v19 = vld [vmem:[%s24749_s26 + $0x88] ss:$28 sps:$4 sm:$0xff]   ;;  %v17783_v26 = vld [vmem:[%s24749_s26 + $0x7f4] ss:$28 sps:$4 sm:$0xff]  }
 0x122   :  { %v17781_v28 = vld [vmem:[%s24749_s26 + $0x7f0] ss:$28 sps:$4 sm:$0xff]  }
 0x123   :  { %3264 = vmatpush1.bf16.msra.mxu1 %v17701_v20  ;;  %v17778_v20 = vld [vmem:[%s24749_s26 + $0x7bc] ss:$28 sps:$4 sm:$0xff]  }
 0x124   :  { %3346 = vmatpush1.bf16.msra.mxu0 %v17704_v21  ;;  %3265 = vmatprep.subr.bf16.mxu1 %v17709_v24  ;;  %v17776_v21 = vld [vmem:[%s24749_s26 + $0x7b8] ss:$28 sps:$4 sm:$0xff]   ;;  %v17780_v24 = vld [vmem:[%s24749_s26 + $0xc0] ss:$28 sps:$4 sm:$0xff]  }
 0x125   :  { %3347 = vmatprep.subr.bf16.mxu0 %v17712_v27  ;;  %v17784_v27 = vld [vmem:[%s24749_s26 + $0x2b8] ss:$28 sps:$4 sm:$0xff]  }
 0x127   :  { %3266 = vmatpush1.bf16.msra.mxu1 %v17707_v29  ;;  %v17785_v29 = vld [vmem:[%s24749_s26 + $0xf8] ss:$28 sps:$4 sm:$0xff]  }
 0x128   :  { %3348 = vmatpush1.bf16.msra.mxu0 %v17710_v30  ;;  %3267 = vmatprep.subr.bf16.mxu1 %v17715_v32  ;;  %v17788_v30 = vld [vmem:[%s24749_s26 + $0x82c] ss:$28 sps:$4 sm:$0xff]  }
 0x129   :  { %3349 = vmatprep.subr.bf16.mxu0 %v17718_v33  ;;  %v17789_v32 = vld [vmem:[%s24749_s26 + $0x2f0] ss:$28 sps:$4 sm:$0xff]   ;;  %v17786_v33 = vld [vmem:[%s24749_s26 + $0x828] ss:$28 sps:$4 sm:$0xff]  }
 0x12b   :  { %3268 = vmatpush1.bf16.msra.mxu1 %v17713_v34  ;;  %v17790_v34 = vld [vmem:[%s24749_s26 + $0x130] ss:$28 sps:$4 sm:$0xff]  }
 0x12c   :  { %3350 = vmatpush1.bf16.msra.mxu0 %v17716_v35  ;;  %3269 = vmatprep.subr.bf16.mxu1 %v17721_v37  ;;  %v17793_v35 = vld [vmem:[%s24749_s26 + $0x864] ss:$28 sps:$4 sm:$0xff]  }
 0x12d   :  { %3351 = vmatprep.subr.bf16.mxu0 %v17724_v38  ;;  %v17794_v37 = vld [vmem:[%s24749_s26 + $0x328] ss:$28 sps:$4 sm:$0xff]   ;;  %v17791_v38 = vld [vmem:[%s24749_s26 + $0x860] ss:$28 sps:$4 sm:$0xff]  }
 0x12f   :  { %3270 = vmatpush1.bf16.msra.mxu1 %v17719_v39  ;;  %v17795_v39 = vld [vmem:[%s24749_s26 + $0x168] ss:$28 sps:$4 sm:$0xff]  }
 0x130   :  { %3352 = vmatpush1.bf16.msra.mxu0 %v17722_v40  ;;  %3271 = vmatprep.subr.bf16.mxu1 %v17727_v41  ;;  %v17798_v40 = vld [vmem:[%s24749_s26 + $0x89c] ss:$28 sps:$4 sm:$0xff]  }
 0x131   :  { %3353 = vmatprep.subr.bf16.mxu0 %v17730_v42  ;;  %v17799_v41 = vld [vmem:[%s24749_s26 + $0x360] ss:$28 sps:$4 sm:$0xff]   ;;  %v17796_v42 = vld [vmem:[%s24749_s26 + $0x898] ss:$28 sps:$4 sm:$0xff]  }
 0x133   :  { %3272 = vmatpush1.bf16.msra.mxu1 %v17725_v45  ;;  %v17800_v45 = vld [vmem:[%s24749_s26 + $0x1a0] ss:$28 sps:$4 sm:$0xff]  }
 0x134   :  { %3354 = vmatpush1.bf16.msra.mxu0 %v17728_v46  ;;  %3273 = vmatprep.subr.bf16.mxu1 %v17733_v47  ;;  %v17803_v46 = vld [vmem:[%s24749_s26 + $0x8d4] ss:$28 sps:$4 sm:$0xff]  }
 0x135   :  { %3355 = vmatprep.subr.bf16.mxu0 %v17736_v25  ;;  %v17804_v47 = vld [vmem:[%s24749_s26 + $0x558] ss:$28 sps:$4 sm:$0xff]   ;;  %v17801_v25 = vld [vmem:[%s24749_s26 + $0x8d0] ss:$28 sps:$4 sm:$0xff]  }
 0x137   :  { %3274 = vmatpush1.bf16.msra.mxu1 %v17731_v48  ;;  %v17805_v48 = vld [vmem:[%s24749_s26 + $0x398] ss:$28 sps:$4 sm:$0xff]  }
 0x138   :  { %3356 = vmatpush1.bf16.msra.mxu0 %v17734_v50  ;;  %3275 = vmatprep.subr.bf16.mxu1 %v17739_v52  ;;  %v17808_v50 = vld [vmem:[%s24749_s26 + $0x90c] ss:$28 sps:$4 sm:$0xff]  }
 0x139   :  { %3357 = vmatprep.subr.bf16.mxu0 %v17742_v53  ;;  %v17809_v52 = vld [vmem:[%s24749_s26 + $0x590] ss:$28 sps:$4 sm:$0xff]   ;;  %v17806_v53 = vld [vmem:[%s24749_s26 + $0x908] ss:$28 sps:$4 sm:$0xff]  }
 0x13b   :  { %3276 = vmatpush1.bf16.msra.mxu1 %v17737_v54  ;;  %v17810_v54 = vld [vmem:[%s24749_s26 + $0x3d0] ss:$28 sps:$4 sm:$0xff]  }
 0x13c   :  { %3358 = vmatpush1.bf16.msra.mxu0 %v17740_v55  ;;  %3277 = vmatprep.subr.bf16.mxu1 %v17745_v56  ;;  %v17813_v55 = vld [vmem:[%s24749_s26 + $0x944] ss:$28 sps:$4 sm:$0xff]  }
 0x13d   :  { %3359 = vmatprep.subr.bf16.mxu0 %v17748_v57  ;;  %v17811_v56 = vld [vmem:[%s24749_s26 + $0x940] ss:$28 sps:$4 sm:$0xff]   ;;  %v17815_v57 = vld [vmem:[%s24749_s26 + $0x408] ss:$28 sps:$4 sm:$0xff]  }
 0x13f   :  { %3278 = vmatpush1.bf16.msra.mxu1 %v17743_v58  ;;  %v17818_v58 = vld [vmem:[%s24749_s26 + $0x97c] ss:$28 sps:$4 sm:$0xff]  }
 0x140   :  { %3360 = vmatpush1.bf16.msra.mxu0 %v17746_v59  ;;  %3279 = vmatprep.subr.bf16.mxu1 %v17751_v60  ;;  %v17816_v59 = vld [vmem:[%s24749_s26 + $0x978] ss:$28 sps:$4 sm:$0xff]   ;;  %v17820_v60 = vld [vmem:[%s24749_s26 + $0x440] ss:$28 sps:$4 sm:$0xff]  }
 0x141   :  { %3361 = vmatprep.subr.bf16.mxu0 %v17754_v61  ;;  %v17823_v61 = vld [vmem:[%s24749_s26 + $0x9b4] ss:$28 sps:$4 sm:$0xff]  }
 0x143   :  { %3280 = vmatpush1.bf16.msra.mxu1 %v17749_v63  ;;  %v17824_v63 = vld [vmem:[%s24749_s26 + $0x638] ss:$28 sps:$4 sm:$0xff]  }
 0x144   :  { %3362 = vmatpush1.bf16.msra.mxu0 %v17752_v0  ;;  %3281 = vmatprep.subr.bf16.mxu1 %v17757_v1  ;;  %v17821_v0 = vld [vmem:[%s24749_s26 + $0x9b0] ss:$28 sps:$4 sm:$0xff]   ;;  %v17825_v1 = vld [vmem:[%s24749_s26 + $0x478] ss:$28 sps:$4 sm:$0xff]  }
 0x145   :  { %3363 = vmatprep.subr.bf16.mxu0 %v17760_v2  ;;  %v17828_v2 = vld [vmem:[%s24749_s26 + $0x9ec] ss:$28 sps:$4 sm:$0xff]  }
 0x147   :  { %3282 = vmatpush1.bf16.msra.mxu1 %v17755_v4  ;;  %v17829_v4 = vld [vmem:[%s24749_s26 + $0x670] ss:$28 sps:$4 sm:$0xff]  }
 0x148   :  { %3364 = vmatpush1.bf16.msra.mxu0 %v17758_v5  ;;  %16798 = vmatprep.subr.bf16.mxu1 %v17764_v7  ;;  %v17826_v5 = vld [vmem:[%s24749_s26 + $0x9e8] ss:$28 sps:$4 sm:$0xff]  }
 0x149   :  { %3374 = vmatprep.subr.bf16.mxu0 %v17763_v6  ;;  %v17830_v6 = vld [vmem:[%s24749_s26 + $0x4b0] ss:$28 sps:$4 sm:$0xff]   ;;  %v17833_v7 = vld [vmem:[%s24749_s26 + $0xa24] ss:$28 sps:$4 sm:$0xff]  }
 0x14a   :  { %3284 = vmatmul.mubr.bf16.vlgmr.msra.gmra.mrb[4].mxu1 %v19383_v44 }
 0x14b   :  { %3366 = vmatmul.mubr.bf16.vlgmr.msra.gmra.mrb[4].mxu0 %v18964_v18  ;;  %16799 = vmatpush3.bf16.msra.mxu1 %v17765_v9  ;;  %v17831_v9 = vld [vmem:[%s24749_s26 + $0xa20] ss:$28 sps:$4 sm:$0xff]  }
 0x14c   :  { %3375 = vmatpush1.bf16.msra.mxu0 %v17761_v8  ;;  %16800 = vmatprep.subr.bf16.mxu1 %v17769_v11  ;;  %v17834_v8 = vld [vmem:[%s24749_s26 + $0x6a8] ss:$28 sps:$4 sm:$0xff]   ;;  %v17838_v11 = vld [vmem:[%s24749_s26 + $0xa5c] ss:$28 sps:$4 sm:$0xff]  }
 0x14d   :  { %3376 = vmatprep.subr.bf16.mxu0 %v17768_v10  ;;  %3488 = vmatprep.mubr.bf16.mxu1 %v18908_v62  ;;  %v17779_v62 = vld [vmem:[%s24749_s26 + $0x280] ss:$28 sps:$4 sm:$0xff]   ;;  %v17835_v10 = vld [vmem:[%s24749_s26 + $0x4e8] ss:$28 sps:$4 sm:$0xff]  }
 0x14e   :  { %3406 = vmatprep.mubr.bf16.mxu0 %v19061_v51 }
 0x14f   :  { %16801 = vmatpush3.bf16.msra.mxu1 %v17770_v13  ;;  %v17836_v13 = vld [vmem:[%s24749_s26 + $0xa58] ss:$28 sps:$4 sm:$0xff]  }
 0x150   :  { %3377 = vmatpush1.bf16.msra.mxu0 %v17766_v12  ;;  %16802 = vmatprep.subr.bf16.mxu1 %v17774_v15  ;;  %v17839_v12 = vld [vmem:[%s24749_s26 + $0x6e0] ss:$28 sps:$4 sm:$0xff]   ;;  %v17843_v15 = vld [vmem:[%s24749_s26 + $0xa94] ss:$28 sps:$4 sm:$0xff]  }
 0x151   :  { %3378 = vmatprep.subr.bf16.mxu0 %v17773_v14  ;;  %v17840_v14 = vld [vmem:[%s24749_s26 + $0x520] ss:$28 sps:$4 sm:$0xff]  }
 0x153   :  { %16803 = vmatpush3.bf16.msra.mxu1 %v17775_v19  ;;  %v17841_v19 = vld [vmem:[%s24749_s26 + $0xa90] ss:$28 sps:$4 sm:$0xff]  }
 0x154   :  { %3379 = vmatpush1.bf16.msra.mxu0 %v17771_v16  ;;  %16804 = vmatprep.subr.bf16.mxu1 %v17779_v62  ;;  %v17844_v16 = vld [vmem:[%s24749_s26 + $0x8d8] ss:$28 sps:$4 sm:$0xff]   ;;  %v17848_v62 = vld [vmem:[%s24749_s26 + $0xacc] ss:$28 sps:$4 sm:$0xff]  }
 0x155   :  { %3380 = vmatprep.subr.bf16.mxu0 %v17778_v20  ;;  %v17845_v20 = vld [vmem:[%s24749_s26 + $0x718] ss:$28 sps:$4 sm:$0xff]  }
 0x157   :  { %16805 = vmatpush3.bf16.msra.mxu1 %v17780_v24  ;;  %v17846_v24 = vld [vmem:[%s24749_s26 + $0xac8] ss:$28 sps:$4 sm:$0xff]  }
 0x158   :  { %3381 = vmatpush1.bf16.msra.mxu0 %v17776_v21  ;;  %16806 = vmatprep.subr.bf16.mxu1 %v17784_v27  ;;  %v17849_v21 = vld [vmem:[%s24749_s26 + $0x910] ss:$28 sps:$4 sm:$0xff]   ;;  %v17853_v27 = vld [vmem:[%s24749_s26 + $0xb04] ss:$28 sps:$4 sm:$0xff]  }
 0x159   :  { %3382 = vmatprep.subr.bf16.mxu0 %v17783_v26  ;;  %v17850_v26 = vld [vmem:[%s24749_s26 + $0x750] ss:$28 sps:$4 sm:$0xff]  }
 0x15b   :  { %16807 = vmatpush3.bf16.msra.mxu1 %v17785_v29  ;;  %v17855_v29 = vld [vmem:[%s24749_s26 + $0x788] ss:$28 sps:$4 sm:$0xff]  }
 0x15c   :  { %3383 = vmatpush1.bf16.msra.mxu0 %v17781_v28  ;;  %16808 = vmatprep.subr.bf16.mxu1 %v17789_v32  ;;  %v17851_v28 = vld [vmem:[%s24749_s26 + $0xb00] ss:$28 sps:$4 sm:$0xff]   ;;  %v17856_v32 = vld [vmem:[%s24749_s26 + $0xb38] ss:$28 sps:$4 sm:$0xff]  }
 0x15d   :  { %3384 = vmatprep.subr.bf16.mxu0 %v17788_v30  ;;  %v17858_v30 = vld [vmem:[%s24749_s26 + $0xb3c] ss:$28 sps:$4 sm:$0xff]  }
 0x15f   :  { %16809 = vmatpush3.bf16.msra.mxu1 %v17790_v34  ;;  %v20026_v34 = vsub.s32 0, %v18862_v43 }
 0x160   :  { %3385 = vmatpush1.bf16.msra.mxu0 %v17786_v33  ;;  %16810 = vmatprep.subr.bf16.mxu1 %v17794_v37  ;;  %v17860_v33 = vld [vmem:[%s24749_s26 + $0x7c0] ss:$28 sps:$4 sm:$0xff]   ;;  %v17864_v37 = vld [vmem:[%s24749_s26 + $0x9b8] ss:$28 sps:$4 sm:$0xff]  }
 0x161   :  { %3386 = vmatprep.subr.bf16.mxu0 %v17793_v35  ;;  %v17863_v35 = vld [vmem:[%s24749_s26 + $0xb74] ss:$28 sps:$4 sm:$0xff]  }
 0x163   :  { %16811 = vmatpush3.bf16.msra.mxu1 %v17795_v39  ;;  %v20040_v39 = vsub.s32 1, %v18862_v43 }
 0x164   :  { %3387 = vmatpush1.bf16.msra.mxu0 %v17791_v38  ;;  %16812 = vmatprep.subr.bf16.mxu1 %v17799_v41  ;;  %v20037_v38 = vld [vmem:[%s24729_s2] sm:$0x7f]  ;;  %v17865_v41 = vld [vmem:[%s24749_s26 + $0x7f8] ss:$28 sps:$4 sm:$0xff]  }
 0x165   :  { %3388 = vmatprep.subr.bf16.mxu0 %v17798_v40  ;;  %v17861_v40 = vld [vmem:[%s24749_s26 + $0xb70] ss:$28 sps:$4 sm:$0xff]  }
 0x167   :  { %16813 = vmatpush3.bf16.msra.mxu1 %v17800_v45  ;;  %v17868_v45 = vld [vmem:[%s24749_s26 + $0xbac] ss:$28 sps:$4 sm:$0xff]  }
 0x168   :  { %3389 = vmatpush1.bf16.msra.mxu0 %v17796_v42  ;;  %16820 = vmatprep.subr.bf16.mxu1 %v17804_v47  ;;  %v628_v42 = vrot.slane %v20037_v38, %v20026_v34  ;;  %v632_v47 = vrot.slane %v20037_v38, %v20040_v39 }
 0x169   :  { %3390 = vmatprep.subr.bf16.mxu0 %v17803_v46  ;;  %v17869_v46 = vld [vmem:[%s24749_s26 + $0x9f0] ss:$28 sps:$4 sm:$0xff]  }
 0x16a   :  { %3489 = vmatmul.mubr.bf16.vlgmr.msra.gmra.mrb[8].mxu1 %v18962_v17  ;;  %v17814_v17 = vld [vmem:[%s24749_s26 + $0x5c8] ss:$28 sps:$4 sm:$0xff]  }
 0x16b   :  { %16821 = vmatpush3.bf16.msra.mxu1 %v17805_v48  ;;  %3528 = vmatprep.mubr.bf16.mxu1 %v18919_v3  ;;  %v17819_v3 = vld [vmem:[%s24749_s26 + $0x600] ss:$28 sps:$4 sm:$0xff]   ;;  %v17870_v48 = vld [vmem:[%s24749_s26 + $0x830] ss:$28 sps:$4 sm:$0xff]  }
 0x16c   :  { %3391 = vmatpush1.bf16.msra.mxu0 %v17801_v25  ;;  %16822 = vmatprep.subr.bf16.mxu1 %v17809_v52  ;;  %v17866_v25 = vld [vmem:[%s24749_s26 + $0xba8] ss:$28 sps:$4 sm:$0xff]  }
 0x16d   :  { %3392 = vmatprep.subr.bf16.mxu0 %v17808_v50  ;;  %v2999_v50 = vadd.f32 %v19663_v22, %v628_v42  ;;  %v17873_v52 = vld [vmem:[%s24749_s26 + $0xbe4] ss:$28 sps:$4 sm:$0xff]  }
 0x16e   :  { %v17871_v22 = vld [vmem:[%s24749_s26 + $0xbe0] ss:$28 sps:$4 sm:$0xff]  }
 0x16f   :  { %16823 = vmatpush3.bf16.msra.mxu1 %v17810_v54  ;;  %v3001_v54 = vadd.f32 %v19665_v23, %v632_v47  ;;  %v17878_v23 = vld [vmem:[%s24749_s26 + $0xc1c] ss:$28 sps:$4 sm:$0xff]   ;;  %v3638_v47 = vld [vmem:[%s24730_s3 + $0x40] sm:$0xff] }
 0x170   :  { %3393 = vmatpush1.bf16.msra.mxu0 %v17806_v53  ;;  %16824 = vmatprep.subr.bf16.mxu1 %v17814_v17  ;;  %v17874_v53 = vld [vmem:[%s24749_s26 + $0xa28] ss:$28 sps:$4 sm:$0xff]  }
 0x171   :  { %3394 = vmatprep.subr.bf16.mxu0 %v17813_v55 }
 0x173   :  { %16825 = vmatpush3.bf16.msra.mxu1 %v17815_v57 }
 0x174   :  { %3395 = vmatpush1.bf16.msra.mxu0 %v17811_v56  ;;  %16826 = vmatprep.subr.bf16.mxu1 %v17819_v3  ;;  %v17875_v3 = vld [vmem:[%s24749_s26 + $0x868] ss:$28 sps:$4 sm:$0xff]  }
 0x175   :  { %3396 = vmatprep.subr.bf16.mxu0 %v17818_v58 }
 0x177   :  { %16827 = vmatpush3.bf16.msra.mxu1 %v17820_v60  ;;  %v17879_v60 = vld [vmem:[%s24749_s26 + $0xa60] ss:$28 sps:$4 sm:$0xff]  }
 0x178   :  { %3397 = vmatpush1.bf16.msra.mxu0 %v17816_v59  ;;  %16828 = vmatprep.subr.bf16.mxu1 %v17824_v63  ;;  %v17880_v63 = vld [vmem:[%s24749_s26 + $0x8a0] ss:$28 sps:$4 sm:$0xff]  }
 0x179   :  { %3398 = vmatprep.subr.bf16.mxu0 %v17823_v61  ;;  %v17876_v61 = vld [vmem:[%s24749_s26 + $0xc18] ss:$28 sps:$4 sm:$0xff]  }
 0x17b   :  { %16829 = vmatpush3.bf16.msra.mxu1 %v17825_v1  ;;  %v17884_v1 = vld [vmem:[%s24749_s26 + $0xc58] ss:$28 sps:$4 sm:$0xff]  }
 0x17c   :  { %3399 = vmatpush1.bf16.msra.mxu0 %v17821_v0  ;;  %16830 = vmatprep.subr.bf16.mxu1 %v17829_v4  ;;  %v17883_v0 = vld [vmem:[%s24749_s26 + $0xc54] ss:$28 sps:$4 sm:$0xff]  }
 0x17d   :  { %3400 = vmatprep.subr.bf16.mxu0 %v17828_v2  ;;  %v17881_v2 = vld [vmem:[%s24749_s26 + $0xc50] ss:$28 sps:$4 sm:$0xff]   ;;  %v17885_v4 = vld [vmem:[%s24749_s26 + $0xa98] ss:$28 sps:$4 sm:$0xff]  }
 0x17f   :  { %16831 = vmatpush3.bf16.msra.mxu1 %v17830_v6  ;;  %v17889_v6 = vld [vmem:[%s24749_s26 + $0xc90] ss:$28 sps:$4 sm:$0xff]  }
 0x180   :  { %3401 = vmatpush1.bf16.msra.mxu0 %v17826_v5  ;;  %16832 = vmatprep.subr.bf16.mxu1 %v17834_v8  ;;  %v17888_v5 = vld [vmem:[%s24749_s26 + $0xc8c] ss:$28 sps:$4 sm:$0xff]  }
 0x181   :  { %3402 = vmatprep.subr.bf16.mxu0 %v17833_v7  ;;  %v17886_v7 = vld [vmem:[%s24749_s26 + $0xc88] ss:$28 sps:$4 sm:$0xff]   ;;  %v17890_v8 = vld [vmem:[%s24749_s26 + $0xad0] ss:$28 sps:$4 sm:$0xff]  }
 0x183   :  { %16833 = vmatpush3.bf16.msra.mxu1 %v17835_v10  ;;  %v17891_v10 = vld [vmem:[%s24749_s26 + $0xcc0] ss:$28 sps:$4 sm:$0xff]  }
 0x184   :  { %3403 = vmatpush1.bf16.msra.mxu0 %v17831_v9  ;;  %16834 = vmatprep.subr.bf16.mxu1 %v17839_v12  ;;  %v17893_v9 = vld [vmem:[%s24749_s26 + $0xcc4] ss:$28 sps:$4 sm:$0xff]   ;;  %v17898_v12 = vld [vmem:[%s24749_s26 + $0xcfc] ss:$28 sps:$4 sm:$0xff]  }
 0x185   :  { %3404 = vmatprep.subr.bf16.mxu0 %v17838_v11  ;;  %v17895_v11 = vld [vmem:[%s24749_s26 + $0xb08] ss:$28 sps:$4 sm:$0xff]  }
 0x187   :  { %16835 = vmatpush3.bf16.msra.mxu1 %v17840_v14  ;;  %v17900_v14 = vld [vmem:[%s24749_s26 + $0xb40] ss:$28 sps:$4 sm:$0xff]  }
 0x188   :  { %3405 = vmatpush1.bf16.msra.mxu0 %v17836_v13  ;;  %16842 = vmatprep.subr.bf16.mxu1 %v17844_v16  ;;  %v17896_v13 = vld [vmem:[%s24749_s26 + $0xcf8] ss:$28 sps:$4 sm:$0xff]  }
 0x189   :  { %3415 = vmatprep.subr.bf16.mxu0 %v17843_v15  ;;  %v17903_v15 = vld [vmem:[%s24749_s26 + $0xd34] ss:$28 sps:$4 sm:$0xff]  }
 0x18a   :  { %3529 = vmatmul.mubr.bf16.vlgmr.msra.gmra.mrb[12].mxu1 %v18964_v18  ;;  %v17854_v18 = vld [vmem:[%s24749_s26 + $0x948] ss:$28 sps:$4 sm:$0xff]   ;;  %v17904_v16 = vld [vmem:[%s24749_s26 + $0xd38] ss:$28 sps:$4 sm:$0xff]  }
 0x18b   :  { %3407 = vmatmul.mubr.bf16.vlgmr.msra.gmra.mrb[4].mxu0 %v19181_v31  ;;  %16843 = vmatpush3.bf16.msra.mxu1 %v17845_v20  ;;  %v17905_v20 = vld [vmem:[%s24749_s26 + $0xb78] ss:$28 sps:$4 sm:$0xff]  }
 0x18c   :  { %3416 = vmatpush1.bf16.msra.mxu0 %v17841_v19  ;;  %16844 = vmatprep.subr.bf16.mxu1 %v17849_v21  ;;  %v17901_v19 = vld [vmem:[%s24749_s26 + $0xd30] ss:$28 sps:$4 sm:$0xff]  }
 0x18d   :  { %3417 = vmatprep.subr.bf16.mxu0 %v17848_v62  ;;  %3568 = vmatprep.mubr.bf16.mxu1 %v19061_v51  ;;  %v17859_v51 = vld [vmem:[%s24749_s26 + $0x980] ss:$28 sps:$4 sm:$0xff]   ;;  %v17908_v62 = vld [vmem:[%s24749_s26 + $0xd6c] ss:$28 sps:$4 sm:$0xff]  }
 0x18e   :  { %3447 = vmatprep.mubr.bf16.mxu0 %v19195_v36  ;;  %v17909_v21 = vld [vmem:[%s24749_s26 + $0xd70] ss:$28 sps:$4 sm:$0xff]  }
 0x18f   :  { %16845 = vmatpush3.bf16.msra.mxu1 %v17850_v26  ;;  %v17910_v26 = vld [vmem:[%s24749_s26 + $0xbb0] ss:$28 sps:$4 sm:$0xff]  }
 0x190   :  { %3418 = vmatpush1.bf16.msra.mxu0 %v17846_v24  ;;  %16846 = vmatprep.subr.bf16.mxu1 %v17854_v18  ;;  %v17906_v24 = vld [vmem:[%s24749_s26 + $0xd68] ss:$28 sps:$4 sm:$0xff]  }
 0x191   :  { %3419 = vmatprep.subr.bf16.mxu0 %v17853_v27  ;;  %v17913_v27 = vld [vmem:[%s24749_s26 + $0xda4] ss:$28 sps:$4 sm:$0xff]  }
 0x192   :  { %v17914_v18 = vld [vmem:[%s24749_s26 + $0xda8] ss:$28 sps:$4 sm:$0xff]  }
 0x193   :  { %16847 = vmatpush3.bf16.msra.mxu1 %v17855_v29  ;;  %v17915_v29 = vld [vmem:[%s24749_s26 + $0xbe8] ss:$28 sps:$4 sm:$0xff]  }
 0x194   :  { %3420 = vmatpush1.bf16.msra.mxu0 %v17851_v28  ;;  %16848 = vmatprep.subr.bf16.mxu1 %v17859_v51  ;;  %v17911_v28 = vld [vmem:[%s24749_s26 + $0xda0] ss:$28 sps:$4 sm:$0xff]  }
 0x195   :  { %3421 = vmatprep.subr.bf16.mxu0 %v17858_v30  ;;  %v17918_v30 = vld [vmem:[%s24749_s26 + $0xddc] ss:$28 sps:$4 sm:$0xff]  }
 0x196   :  { %v17919_v51 = vld [vmem:[%s24749_s26 + $0xde0] ss:$28 sps:$4 sm:$0xff]  }
 0x197   :  { %16849 = vmatpush3.bf16.msra.mxu1 %v17860_v33  ;;  %v3634_v33 = vld [vmem:[%s24730_s3 + $0x20] sm:$0xff] }
 0x198   :  { %3422 = vmatpush1.bf16.msra.mxu0 %v17856_v32  ;;  %16850 = vmatprep.subr.bf16.mxu1 %v17864_v37  ;;  %v3630_v32 = vld [vmem:[%s24730_s3] sm:$0xff]  ;;  %v3635_v37 = vld [vmem:[%s24730_s3 + $0x28] sm:$0xff] }
 0x199   :  { %3423 = vmatprep.subr.bf16.mxu0 %v17863_v35  ;;  %v3631_v35 = vld [vmem:[%s24730_s3 + $0x8] sm:$0xff]  ;;  %v15388_v42 = vcombine.high %v3630_v32, %v3634_v33 }
 0x19b   :  { %16851 = vmatpush3.bf16.msra.mxu1 %v17865_v41  ;;  %v17920_v41 = vld [vmem:[%s24749_s26 + $0xc20] ss:$28 sps:$4 sm:$0xff]  }
 0x19c   :  { %3424 = vmatpush1.bf16.msra.mxu0 %v17861_v40  ;;  %16852 = vmatprep.subr.bf16.mxu1 %v17869_v46  ;;  %v17916_v40 = vld [vmem:[%s24749_s26 + $0xdd8] ss:$28 sps:$4 sm:$0xff]  }
 0x19d   :  { %3425 = vmatprep.subr.bf16.mxu0 %v17868_v45  ;;  %v15390_v45 = vcombine.high %v3631_v35, %v3635_v37 }
 0x19e   :  { %v3121_v55 = vpop.f32.mrb[0].mxu0 }
 0x19f   :  { %v20072_v17 = vadd.f32 %v3121_v55, %v2999_v50  ;;  %v3123_v56 = vpop.f32.mrb[1].mxu0  ;;  %16853 = vmatpush3.bf16.msra.mxu1 %v17870_v48  ;;  %v3639_v48 = vld [vmem:[%s24730_s3 + $0x48] sm:$0xff] }
 0x1a0   :  { %v20074_v57 = vadd.f32 %v3123_v56, %v3001_v54  ;;  %v3125_v58 = vpop.f32.mrb[2].mxu0  ;;  %3426 = vmatpush1.bf16.msra.mxu0 %v17866_v25  ;;  %16854 = vmatprep.subr.bf16.mxu1 %v17874_v53  ;;  %v3642_v25 = vld [vmem:[%s24730_s3 + $0x60] sm:$0xff]  ;;  %v3643_v50 = vld [vmem:[%s24730_s3 + $0x68] sm:$0xff]  ;;  %v15389_v53 = vcombine.low %v3631_v35, %v3635_v37 }
 0x1a1   :  { %v3126_v59 = vpop.f32.mrb[3].mxu0  ;;  %3427 = vmatprep.subr.bf16.mxu0 %v17873_v52  ;;  %v15387_v52 = vcombine.low %v3630_v32, %v3634_v33  ;;  %v15396_v55 = vcombine.high %v3638_v47, %v3642_v25  ;;  %v15398_v56 = vcombine.high %v3639_v48, %v3643_v50  ;;  %v3650_v58 = vld [vmem:[%s24730_s3 + $0xa0] sm:$0xff]  ;;  %v3687_v35 = vld [vmem:[%s24730_s3 + $0x1c8] sm:$0xff] }
 0x1a2   :  { %v3617_v46 = vmax.f32 %v20074_v57, 0.0  ;;  %v3646_v57 = vld [vmem:[%s24730_s3 + $0x80] sm:$0xff]  ;;  %v15395_v59 = vcombine.low %v3638_v47, %v3642_v25  ;;  %v3691_v37 = vld [vmem:[%s24730_s3 + $0x1e8] sm:$0xff] }
 0x1a3   :  { %16855 = vmatpush3.bf16.msra.mxu1 %v17875_v3  ;;  %v3651_v3 = vld [vmem:[%s24730_s3 + $0xa8] sm:$0xff]  ;;  %v3686_v32 = vld [vmem:[%s24730_s3 + $0x1c0] sm:$0xff] }
 0x1a4   :  { %3428 = vmatpush1.bf16.msra.mxu0 %v17871_v22  ;;  %16856 = vmatprep.subr.bf16.mxu1 %v17879_v60  ;;  %v20217_v54 = vpack.c.bf16 %v3617_v46, %v3617_v46  ;;  %v3647_v22 = vld [vmem:[%s24730_s3 + $0x88] sm:$0xff]  ;;  %v15404_v60 = vcombine.high %v3646_v57, %v3650_v58  ;;  %v3690_v33 = vld [vmem:[%s24730_s3 + $0x1e0] sm:$0xff] }
 0x1a5   :  { %3429 = vmatprep.subr.bf16.mxu0 %v17878_v23  ;;  %v15397_v23 = vcombine.low %v3639_v48, %v3643_v50  ;;  %v3694_v46 = vld [vmem:[%s24730_s3 + $0x200] sm:$0xff]  ;;  %v3695_v25 = vld [vmem:[%s24730_s3 + $0x208] sm:$0xff]  ;;  %v15443_v50 = vcombine.low %v3686_v32, %v3690_v33 }
 0x1a6   :  { %v3698_v47 = vld [vmem:[%s24730_s3 + $0x220] sm:$0xff]  ;;  %v3699_v48 = vld [vmem:[%s24730_s3 + $0x228] sm:$0xff] }
 0x1a7   :  { %16857 = vmatpush3.bf16.msra.mxu1 %v17880_v63  ;;  %v3658_v63 = vld [vmem:[%s24730_s3 + $0xe0] sm:$0xff] }
 0x1a8   :  { %3430 = vmatpush1.bf16.msra.mxu0 %v17876_v61  ;;  %16864 = vmatprep.subr.bf16.mxu1 %v17884_v1  ;;  %v3654_v61 = vld [vmem:[%s24730_s3 + $0xc0] sm:$0xff]  ;;  %v3659_v1 = vld [vmem:[%s24730_s3 + $0xe8] sm:$0xff] }
 0x1a9   :  { %3431 = vmatprep.subr.bf16.mxu0 %v17883_v0  ;;  %v3655_v0 = vld [vmem:[%s24730_s3 + $0xc8] sm:$0xff] }
 0x1aa   :  { %3569 = vmatmul.mubr.bf16.vlgmr.msra.gmra.mrb[16].mxu1 %v19181_v31  ;;  %v17894_v31 = vld [vmem:[%s24749_s26 + $0xcc8] ss:$28 sps:$4 sm:$0xff]  }
 0x1ab   :  { %16865 = vmatpush3.bf16.msra.mxu1 %v17885_v4  ;;  %3608 = vmatprep.mubr.bf16.mxu1 %v19195_v36  ;;  %v17899_v36 = vld [vmem:[%s24749_s26 + $0xd00] ss:$28 sps:$4 sm:$0xff]   ;;  %v15405_v4 = vcombine.low %v3647_v22, %v3651_v3 }
 0x1ac   :  { %3432 = vmatpush1.bf16.msra.mxu0 %v17881_v2  ;;  %16866 = vmatprep.subr.bf16.mxu1 %v17889_v6  ;;  %v15403_v2 = vcombine.low %v3646_v57, %v3650_v58  ;;  %v15414_v6 = vcombine.high %v3655_v0, %v3659_v1  ;;  %v3706_v57 = vld [vmem:[%s24730_s3 + $0x260] sm:$0xff]  ;;  %v3703_v58 = vld [vmem:[%s24730_s3 + $0x248] sm:$0xff] }
 0x1ad   :  { %3433 = vmatprep.subr.bf16.mxu0 %v17888_v5  ;;  %v15412_v5 = vcombine.high %v3654_v61, %v3658_v63 }
 0x1af   :  { %16867 = vmatpush3.bf16.msra.mxu1 %v17890_v8  ;;  %v3666_v8 = vld [vmem:[%s24730_s3 + $0x120] sm:$0xff] }
 0x1b0   :  { %3434 = vmatpush1.bf16.msra.mxu0 %v17886_v7  ;;  %16868 = vmatprep.subr.bf16.mxu1 %v17894_v31  ;;  %v3662_v7 = vld [vmem:[%s24730_s3 + $0x100] sm:$0xff]  ;;  %v3667_v31 = vld [vmem:[%s24730_s3 + $0x128] sm:$0xff] }
 0x1b1   :  { %3435 = vmatprep.subr.bf16.mxu0 %v17893_v9  ;;  %v3663_v9 = vld [vmem:[%s24730_s3 + $0x108] sm:$0xff] }
 0x1b3   :  { %16869 = vmatpush3.bf16.msra.mxu1 %v17895_v11  ;;  %v15413_v11 = vcombine.low %v3655_v0, %v3659_v1  ;;  %v3715_v0 = vld [vmem:[%s24730_s3 + $0x2a8] sm:$0xff] }
 0x1b4   :  { %3436 = vmatpush1.bf16.msra.mxu0 %v17891_v10  ;;  %16870 = vmatprep.subr.bf16.mxu1 %v17899_v36  ;;  %v15411_v10 = vcombine.low %v3654_v61, %v3658_v63  ;;  %v15422_v36 = vcombine.high %v3663_v9, %v3667_v31  ;;  %v3714_v61 = vld [vmem:[%s24730_s3 + $0x2a0] sm:$0xff]  ;;  %v3711_v63 = vld [vmem:[%s24730_s3 + $0x288] sm:$0xff] }
 0x1b5   :  { %3437 = vmatprep.subr.bf16.mxu0 %v17898_v12  ;;  %v15420_v12 = vcombine.high %v3662_v7, %v3666_v8 }
 0x1b7   :  { %16871 = vmatpush3.bf16.msra.mxu1 %v17900_v14  ;;  %v3674_v14 = vld [vmem:[%s24730_s3 + $0x160] sm:$0xff] }
 0x1b8   :  { %3438 = vmatpush1.bf16.msra.mxu0 %v17896_v13  ;;  %16872 = vmatprep.subr.bf16.mxu1 %v17904_v16  ;;  %v3670_v13 = vld [vmem:[%s24730_s3 + $0x140] sm:$0xff]  ;;  %v3675_v16 = vld [vmem:[%s24730_s3 + $0x168] sm:$0xff] }
 0x1b9   :  { %3439 = vmatprep.subr.bf16.mxu0 %v17903_v15  ;;  %v3671_v15 = vld [vmem:[%s24730_s3 + $0x148] sm:$0xff] }
 0x1bb   :  { %16873 = vmatpush3.bf16.msra.mxu1 %v17905_v20  ;;  %v15421_v20 = vcombine.low %v3663_v9, %v3667_v31  ;;  %v3723_v9 = vld [vmem:[%s24730_s3 + $0x2e8] sm:$0xff] }
 0x1bc   :  { %3440 = vmatpush1.bf16.msra.mxu0 %v17901_v19  ;;  %16874 = vmatprep.subr.bf16.mxu1 %v17909_v21  ;;  %v15419_v19 = vcombine.low %v3662_v7, %v3666_v8  ;;  %v15430_v21 = vcombine.high %v3671_v15, %v3675_v16  ;;  %v3722_v7 = vld [vmem:[%s24730_s3 + $0x2e0] sm:$0xff]  ;;  %v3719_v8 = vld [vmem:[%s24730_s3 + $0x2c8] sm:$0xff] }
 0x1bd   :  { %3441 = vmatprep.subr.bf16.mxu0 %v17908_v62  ;;  %v15428_v62 = vcombine.high %v3670_v13, %v3674_v14 }
 0x1bf   :  { %16875 = vmatpush3.bf16.msra.mxu1 %v17910_v26  ;;  %v3682_v26 = vld [vmem:[%s24730_s3 + $0x1a0] sm:$0xff] }
 0x1c0   :  { %3442 = vmatpush1.bf16.msra.mxu0 %v17906_v24  ;;  %16876 = vmatprep.subr.bf16.mxu1 %v17914_v18  ;;  %v3678_v24 = vld [vmem:[%s24730_s3 + $0x180] sm:$0xff]  ;;  %v3683_v18 = vld [vmem:[%s24730_s3 + $0x1a8] sm:$0xff] }
 0x1c1   :  { %3443 = vmatprep.subr.bf16.mxu0 %v17913_v27  ;;  %v3679_v27 = vld [vmem:[%s24730_s3 + $0x188] sm:$0xff] }
 0x1c3   :  { %16877 = vmatpush3.bf16.msra.mxu1 %v17915_v29  ;;  %v15429_v29 = vcombine.low %v3671_v15, %v3675_v16  ;;  %v3731_v15 = vld [vmem:[%s24730_s3 + $0x328] sm:$0xff] }
 0x1c4   :  { %3444 = vmatpush1.bf16.msra.mxu0 %v17911_v28  ;;  %16878 = vmatprep.subr.bf16.mxu1 %v17919_v51  ;;  %v15427_v28 = vcombine.low %v3670_v13, %v3674_v14  ;;  %v15438_v51 = vcombine.high %v3679_v27, %v3683_v18  ;;  %v3730_v13 = vld [vmem:[%s24730_s3 + $0x320] sm:$0xff]  ;;  %v3727_v14 = vld [vmem:[%s24730_s3 + $0x308] sm:$0xff] }
 0x1c5   :  { %3445 = vmatprep.subr.bf16.mxu0 %v17918_v30  ;;  %v15436_v30 = vcombine.high %v3678_v24, %v3682_v26 }
 0x1c7   :  { %16879 = vmatpush3.bf16.msra.mxu1 %v17920_v41  ;;  %v15437_v41 = vcombine.low %v3679_v27, %v3683_v18  ;;  %v3739_v27 = vld [vmem:[%s24730_s3 + $0x368] sm:$0xff] }
 0x1c8   :  { %3446 = vmatpush1.bf16.msra.mxu0 %v17916_v40  ;;  %6268 = vmatprep.subr.bf16.mxu1 %v15388_v42  ;;  %v15435_v40 = vcombine.low %v3678_v24, %v3682_v26  ;;  %v15444_v42 = vcombine.high %v3686_v32, %v3690_v33  ;;  %v3738_v24 = vld [vmem:[%s24730_s3 + $0x360] sm:$0xff]  ;;  %v3735_v26 = vld [vmem:[%s24730_s3 + $0x348] sm:$0xff] }
 0x1c9   :  { %6432 = vmatprep.subr.bf16.mxu0 %v15390_v45  ;;  %v15446_v45 = vcombine.high %v3687_v35, %v3691_v37  ;;  %v3746_v32 = vld [vmem:[%s24730_s3 + $0x3a0] sm:$0xff]  ;;  %v3743_v33 = vld [vmem:[%s24730_s3 + $0x388] sm:$0xff] }
 0x1ca   :  { %3609 = vmatmul.mubr.bf16.vlgmr.msra.gmra.mrb[20].mxu1 %v19383_v44 }
 0x1cb   :  { %3448 = vmatmul.mubr.bf16.vlgmr.msra.gmra.mrb[4].mxu0 %v19383_v44  ;;  %6269 = vmatpush1.bf16.msra.mxu1 %v15387_v52  ;;  %v15406_v44 = vcombine.high %v3647_v22, %v3651_v3  ;;  %v15445_v52 = vcombine.low %v3687_v35, %v3691_v37  ;;  %v3707_v22 = vld [vmem:[%s24730_s3 + $0x268] sm:$0xff]  ;;  %v15451_v3 = vcombine.low %v3694_v46, %v3698_v47 }
 0x1cc   :  { %6300 = vmatprep.mubr.bf16.mxu1 %v20217_v54  ;;  %6433 = vmatpush1.bf16.msra.mxu0 %v15389_v53  ;;  %v15452_v53 = vcombine.high %v3694_v46, %v3698_v47  ;;  %v3747_v35 = vld [vmem:[%s24730_s3 + $0x3a8] sm:$0xff]  ;;  %v3754_v46 = vld [vmem:[%s24730_s3 + $0x3e0] sm:$0xff] }
 0x1cd   :  { %6464 = vmatprep.mubr.bf16.mxu0 %v20217_v54  ;;  %6270 = vmatprep.subr.bf16.mxu1 %v15396_v55  ;;  %v15454_v55 = vcombine.high %v3695_v25, %v3699_v48  ;;  %v3751_v47 = vld [vmem:[%s24730_s3 + $0x3c8] sm:$0xff] }
 0x1ce   :  { %6434 = vmatprep.subr.bf16.mxu0 %v15398_v56  ;;  %v3702_v56 = vld [vmem:[%s24730_s3 + $0x240] sm:$0xff] }
 0x1cf   :  { %6271 = vmatpush1.bf16.msra.mxu1 %v15395_v59  ;;  %v15453_v59 = vcombine.low %v3695_v25, %v3699_v48  ;;  %v15459_v1 = vcombine.low %v3702_v56, %v3706_v57  ;;  %v3755_v25 = vld [vmem:[%s24730_s3 + $0x3e8] sm:$0xff] }
 0x1d0   :  { %6435 = vmatpush1.bf16.msra.mxu0 %v15397_v23  ;;  %6272 = vmatprep.subr.bf16.mxu1 %v15404_v60  ;;  %v15460_v23 = vcombine.high %v3702_v56, %v3706_v57  ;;  %v15462_v60 = vcombine.high %v3703_v58, %v3707_v22  ;;  %v3762_v56 = vld [vmem:[%s24730_s3 + $0x420] sm:$0xff]  ;;  %v3759_v57 = vld [vmem:[%s24730_s3 + $0x408] sm:$0xff] }
 0x1d1   :  { %6436 = vmatprep.subr.bf16.mxu0 %v15406_v44  ;;  %v3710_v44 = vld [vmem:[%s24730_s3 + $0x280] sm:$0xff] }
 0x1d2   :  { %v15467_v31 = vcombine.low %v3710_v44, %v3714_v61 }
 0x1d3   :  { %6273 = vmatpush1.bf16.msra.mxu1 %v15403_v2  ;;  %v15461_v2 = vcombine.low %v3703_v58, %v3707_v22  ;;  %v3763_v58 = vld [vmem:[%s24730_s3 + $0x428] sm:$0xff] }
 0x1d4   :  { %6437 = vmatpush1.bf16.msra.mxu0 %v15405_v4  ;;  %6274 = vmatprep.subr.bf16.mxu1 %v15412_v5  ;;  %v15468_v4 = vcombine.high %v3710_v44, %v3714_v61  ;;  %v15470_v5 = vcombine.high %v3711_v63, %v3715_v0  ;;  %v3766_v44 = vld [vmem:[%s24730_s3 + $0x440] sm:$0xff] }
 0x1d5   :  { %6438 = vmatprep.subr.bf16.mxu0 %v15414_v6  ;;  %v3718_v6 = vld [vmem:[%s24730_s3 + $0x2c0] sm:$0xff] }
 0x1d6   :  { %v15475_v16 = vcombine.low %v3718_v6, %v3722_v7  ;;  %v3770_v61 = vld [vmem:[%s24730_s3 + $0x460] sm:$0xff] }
 0x1d7   :  { %6275 = vmatpush1.bf16.msra.mxu1 %v15411_v10  ;;  %v15469_v10 = vcombine.low %v3711_v63, %v3715_v0  ;;  %v3767_v63 = vld [vmem:[%s24730_s3 + $0x448] sm:$0xff] }
 0x1d8   :  { %6439 = vmatpush1.bf16.msra.mxu0 %v15413_v11  ;;  %6276 = vmatprep.subr.bf16.mxu1 %v15420_v12  ;;  %v15476_v11 = vcombine.high %v3718_v6, %v3722_v7  ;;  %v15478_v12 = vcombine.high %v3719_v8, %v3723_v9  ;;  %v3774_v6 = vld [vmem:[%s24730_s3 + $0x480] sm:$0xff] }
 0x1d9   :  { %6440 = vmatprep.subr.bf16.mxu0 %v15422_v36  ;;  %v3726_v36 = vld [vmem:[%s24730_s3 + $0x300] sm:$0xff] }
 0x1da   :  { %v15483_v18 = vcombine.low %v3726_v36, %v3730_v13  ;;  %v3778_v7 = vld [vmem:[%s24730_s3 + $0x4a0] sm:$0xff] }
 0x1db   :  { %6277 = vmatpush1.bf16.msra.mxu1 %v15419_v19  ;;  %v15477_v19 = vcombine.low %v3719_v8, %v3723_v9  ;;  %v3775_v8 = vld [vmem:[%s24730_s3 + $0x488] sm:$0xff] }
 0x1dc   :  { %6441 = vmatpush1.bf16.msra.mxu0 %v15421_v20  ;;  %6278 = vmatprep.subr.bf16.mxu1 %v15428_v62  ;;  %v15484_v20 = vcombine.high %v3726_v36, %v3730_v13  ;;  %v15486_v62 = vcombine.high %v3727_v14, %v3731_v15  ;;  %v3779_v9 = vld [vmem:[%s24730_s3 + $0x4a8] sm:$0xff]  ;;  %v3782_v36 = vld [vmem:[%s24730_s3 + $0x4c0] sm:$0xff] }
 0x1dd   :  { %6442 = vmatprep.subr.bf16.mxu0 %v15430_v21  ;;  %v3734_v21 = vld [vmem:[%s24730_s3 + $0x340] sm:$0xff] }
 0x1de   :  { %v15491_v37 = vcombine.low %v3734_v21, %v3738_v24  ;;  %v3786_v13 = vld [vmem:[%s24730_s3 + $0x4e0] sm:$0xff] }
 0x1df   :  { %6279 = vmatpush1.bf16.msra.mxu1 %v15427_v28  ;;  %v15485_v28 = vcombine.low %v3727_v14, %v3731_v15  ;;  %v3783_v14 = vld [vmem:[%s24730_s3 + $0x4c8] sm:$0xff] }
 0x1e0   :  { %6443 = vmatpush1.bf16.msra.mxu0 %v15429_v29  ;;  %6280 = vmatprep.subr.bf16.mxu1 %v15436_v30  ;;  %v15492_v29 = vcombine.high %v3734_v21, %v3738_v24  ;;  %v15494_v30 = vcombine.high %v3735_v26, %v3739_v27  ;;  %v3787_v15 = vld [vmem:[%s24730_s3 + $0x4e8] sm:$0xff]  ;;  %v3790_v21 = vld [vmem:[%s24730_s3 + $0x500] sm:$0xff] }
 0x1e1   :  { %6444 = vmatprep.subr.bf16.mxu0 %v15438_v51  ;;  %v3742_v51 = vld [vmem:[%s24730_s3 + $0x380] sm:$0xff] }
 0x1e2   :  { %v15499_v48 = vcombine.low %v3742_v51, %v3746_v32  ;;  %v3794_v24 = vld [vmem:[%s24730_s3 + $0x520] sm:$0xff] }
 0x1e3   :  { %6281 = vmatpush1.bf16.msra.mxu1 %v15435_v40  ;;  %v15493_v40 = vcombine.low %v3735_v26, %v3739_v27  ;;  %v3791_v26 = vld [vmem:[%s24730_s3 + $0x508] sm:$0xff] }
 0x1e4   :  { %6445 = vmatpush1.bf16.msra.mxu0 %v15437_v41  ;;  %6282 = vmatprep.subr.bf16.mxu1 %v15444_v42  ;;  %v15500_v41 = vcombine.high %v3742_v51, %v3746_v32  ;;  %v15502_v42 = vcombine.high %v3743_v33, %v3747_v35  ;;  %v3795_v27 = vld [vmem:[%s24730_s3 + $0x528] sm:$0xff]  ;;  %v3798_v51 = vld [vmem:[%s24730_s3 + $0x540] sm:$0xff] }
 0x1e5   :  { %6446 = vmatprep.subr.bf16.mxu0 %v15446_v45  ;;  %v3750_v45 = vld [vmem:[%s24730_s3 + $0x3c0] sm:$0xff] }
 0x1e6   :  { %v15507_v22 = vcombine.low %v3750_v45, %v3754_v46  ;;  %v3802_v32 = vld [vmem:[%s24730_s3 + $0x560] sm:$0xff] }
 0x1e7   :  { %6283 = vmatpush1.bf16.msra.mxu1 %v15443_v50  ;;  %v15501_v50 = vcombine.low %v3743_v33, %v3747_v35  ;;  %v3799_v33 = vld [vmem:[%s24730_s3 + $0x548] sm:$0xff] }
 0x1e8   :  { %6447 = vmatpush1.bf16.msra.mxu0 %v15445_v52  ;;  %6284 = vmatprep.subr.bf16.mxu1 %v15452_v53  ;;  %v15508_v52 = vcombine.high %v3750_v45, %v3754_v46  ;;  %v15510_v53 = vcombine.high %v3751_v47, %v3755_v25  ;;  %v3803_v35 = vld [vmem:[%s24730_s3 + $0x568] sm:$0xff]  ;;  %v3806_v46 = vld [vmem:[%s24730_s3 + $0x580] sm:$0xff] }
 0x1e9   :  { %6448 = vmatprep.subr.bf16.mxu0 %v15454_v55  ;;  %v3758_v55 = vld [vmem:[%s24730_s3 + $0x400] sm:$0xff]  ;;  %v15558_v45 = vcombine.high %v3799_v33, %v3803_v35 }
 0x1ea   :  { %v15515_v0 = vcombine.low %v3758_v55, %v3762_v56 }
 0x1eb   :  { %6285 = vmatpush1.bf16.msra.mxu1 %v15451_v3  ;;  %v3616_v3 = vmax.f32 %v20072_v17, 0.0  ;;  %v3771_v17 = vld [vmem:[%s24730_s3 + $0x468] sm:$0xff] }
 0x1ec   :  { %6449 = vmatpush1.bf16.msra.mxu0 %v15453_v59  ;;  %6286 = vmatprep.subr.bf16.mxu1 %v15460_v23  ;;  %v15509_v59 = vcombine.low %v3751_v47, %v3755_v25  ;;  %v15516_v23 = vcombine.high %v3758_v55, %v3762_v56  ;;  %v3810_v47 = vld [vmem:[%s24730_s3 + $0x5a0] sm:$0xff]  ;;  %v3807_v25 = vld [vmem:[%s24730_s3 + $0x588] sm:$0xff] }
 0x1ed   :  { %6450 = vmatprep.subr.bf16.mxu0 %v15462_v60  ;;  %v15518_v60 = vcombine.high %v3759_v57, %v3763_v58  ;;  %v15564_v55 = vcombine.high %v3806_v46, %v3810_v47 }
 0x1ef   :  { %6287 = vmatpush1.bf16.msra.mxu1 %v15459_v1  ;;  %v20416_v1 = vpack.c.bf16 %v3616_v3, %v3616_v3 }
 0x1f0   :  { %6451 = vmatpush1.bf16.msra.mxu0 %v15461_v2  ;;  %6288 = vmatprep.subr.bf16.mxu1 %v15468_v4  ;;  %v15517_v2 = vcombine.low %v3759_v57, %v3763_v58  ;;  %v15524_v4 = vcombine.high %v3766_v44, %v3770_v61  ;;  %v3814_v58 = vld [vmem:[%s24730_s3 + $0x5c0] sm:$0xff] }
 0x1f1   :  { %6452 = vmatprep.subr.bf16.mxu0 %v15470_v5  ;;  %v15526_v5 = vcombine.high %v3767_v63, %v3771_v17 }
 0x1f3   :  { %6289 = vmatpush1.bf16.msra.mxu1 %v15467_v31  ;;  %v15523_v31 = vcombine.low %v3766_v44, %v3770_v61  ;;  %v3815_v44 = vld [vmem:[%s24730_s3 + $0x5c8] sm:$0xff] }
 0x1f4   :  { %6453 = vmatpush1.bf16.msra.mxu0 %v15469_v10  ;;  %6290 = vmatprep.subr.bf16.mxu1 %v15476_v11  ;;  %v15525_v10 = vcombine.low %v3767_v63, %v3771_v17  ;;  %v15532_v11 = vcombine.high %v3774_v6, %v3778_v7  ;;  %v3819_v61 = vld [vmem:[%s24730_s3 + $0x5e8] sm:$0xff] }
 0x1f5   :  { %6454 = vmatprep.subr.bf16.mxu0 %v15478_v12  ;;  %v15534_v12 = vcombine.high %v3775_v8, %v3779_v9 }
 0x1f7   :  { %6291 = vmatpush1.bf16.msra.mxu1 %v15475_v16  ;;  %v15531_v16 = vcombine.low %v3774_v6, %v3778_v7  ;;  %v15574_v6 = vcombine.high %v3815_v44, %v3819_v61  ;;  %v3823_v7 = vld [vmem:[%s24730_s3 + $0x608] sm:$0xff] }
 0x1f8   :  { %6455 = vmatpush1.bf16.msra.mxu0 %v15477_v19  ;;  %6292 = vmatprep.subr.bf16.mxu1 %v15484_v20  ;;  %v15533_v19 = vcombine.low %v3775_v8, %v3779_v9  ;;  %v15540_v20 = vcombine.high %v3782_v36, %v3786_v13  ;;  %v3827_v8 = vld [vmem:[%s24730_s3 + $0x628] sm:$0xff] }
 0x1f9   :  { %6456 = vmatprep.subr.bf16.mxu0 %v15486_v62  ;;  %v15542_v62 = vcombine.high %v3783_v14, %v3787_v15 }
 0x1fb   :  { %6293 = vmatpush1.bf16.msra.mxu1 %v15483_v18  ;;  %v15539_v18 = vcombine.low %v3782_v36, %v3786_v13  ;;  %v3830_v36 = vld [vmem:[%s24730_s3 + $0x640] sm:$0xff] }
 0x1fc   :  { %6457 = vmatpush1.bf16.msra.mxu0 %v15485_v28  ;;  %6294 = vmatprep.subr.bf16.mxu1 %v15492_v29  ;;  %v15541_v28 = vcombine.low %v3783_v14, %v3787_v15  ;;  %v15548_v29 = vcombine.high %v3790_v21, %v3794_v24  ;;  %v3834_v13 = vld [vmem:[%s24730_s3 + $0x660] sm:$0xff]  ;;  %v3831_v14 = vld [vmem:[%s24730_s3 + $0x648] sm:$0xff] }
 0x1fd   :  { %6458 = vmatprep.subr.bf16.mxu0 %v15494_v30  ;;  %v15550_v30 = vcombine.high %v3791_v26, %v3795_v27  ;;  %v3835_v15 = vld [vmem:[%s24730_s3 + $0x668] sm:$0xff] }
 0x1ff   :  { %6295 = vmatpush1.bf16.msra.mxu1 %v15491_v37  ;;  %v15547_v37 = vcombine.low %v3790_v21, %v3794_v24  ;;  %v3838_v21 = vld [vmem:[%s24730_s3 + $0x680] sm:$0xff] }
 0x200   :  { %6459 = vmatpush1.bf16.msra.mxu0 %v15493_v40  ;;  %6296 = vmatprep.subr.bf16.mxu1 %v15500_v41  ;;  %v20469_v40 = vsub.s32 3, %v18862_v43  ;;  %v15549_v41 = vcombine.low %v3791_v26, %v3795_v27  ;;  %v3842_v24 = vld [vmem:[%s24730_s3 + $0x6a0] sm:$0xff]  ;;  %v3839_v26 = vld [vmem:[%s24730_s3 + $0x688] sm:$0xff] }
 0x201   :  { %6460 = vmatprep.subr.bf16.mxu0 %v15502_v42  ;;  %v15556_v42 = vcombine.high %v3798_v51, %v3802_v32  ;;  %v3843_v27 = vld [vmem:[%s24730_s3 + $0x6a8] sm:$0xff] }
 0x203   :  { %6297 = vmatpush1.bf16.msra.mxu1 %v15499_v48  ;;  %v3811_v48 = vld [vmem:[%s24730_s3 + $0x5a8] sm:$0xff] }
 0x204   :  { %6461 = vmatpush1.bf16.msra.mxu0 %v15501_v50  ;;  %6298 = vmatprep.subr.bf16.mxu1 %v15508_v52  ;;  %v640_v50 = vrot.slane %v20037_v38, %v20469_v40  ;;  %v15555_v52 = vcombine.low %v3798_v51, %v3802_v32  ;;  %v15566_v57 = vcombine.high %v3807_v25, %v3811_v48  ;;  %v3846_v51 = vld [vmem:[%s24730_s3 + $0x6c0] sm:$0xff] }
 0x205   :  { %6462 = vmatprep.subr.bf16.mxu0 %v15510_v53  ;;  %v15557_v53 = vcombine.low %v3799_v33, %v3803_v35  ;;  %v15565_v17 = vcombine.low %v3807_v25, %v3811_v48  ;;  %v3850_v32 = vld [vmem:[%s24730_s3 + $0x6e0] sm:$0xff]  ;;  %v3847_v33 = vld [vmem:[%s24730_s3 + $0x6c8] sm:$0xff] }
 0x206   :  { %v3851_v35 = vld [vmem:[%s24730_s3 + $0x6e8] sm:$0xff] }
 0x207   :  { %6299 = vmatpush1.bf16.msra.mxu1 %v15507_v22  ;;  %v3818_v22 = vld [vmem:[%s24730_s3 + $0x5e0] sm:$0xff]  ;;  %v3855_v25 = vld [vmem:[%s24730_s3 + $0x708] sm:$0xff] }
 0x208   :  { %6463 = vmatpush1.bf16.msra.mxu0 %v15509_v59  ;;  %6309 = vmatprep.subr.bf16.mxu1 %v15516_v23  ;;  %v3859_v48 = vld [vmem:[%s24730_s3 + $0x728] sm:$0xff] }
 0x209   :  { %6473 = vmatprep.subr.bf16.mxu0 %v15518_v60  ;;  %v15563_v60 = vcombine.low %v3806_v46, %v3810_v47  ;;  %v3854_v46 = vld [vmem:[%s24730_s3 + $0x700] sm:$0xff] }
 0x20a   :  { %6301 = vmatmul.mubr.bf16.vlgmr.msra.gmra.mrb[24].mxu1 %v20416_v1  ;;  %v3858_v47 = vld [vmem:[%s24730_s3 + $0x720] sm:$0xff] }
 0x20b   :  { %6465 = vmatmul.mubr.bf16.vlgmr.msra.gmra.mrb[8].mxu0 %v20416_v1  ;;  %6310 = vmatpush1.bf16.msra.mxu1 %v15515_v0  ;;  %v15572_v0 = vcombine.high %v3814_v58, %v3818_v22 }
 0x20c   :  { %6474 = vmatpush1.bf16.msra.mxu0 %v15517_v2  ;;  %6311 = vmatprep.subr.bf16.mxu1 %v15524_v4  ;;  %v3822_v4 = vld [vmem:[%s24730_s3 + $0x600] sm:$0xff] }
 0x20d   :  { %6475 = vmatprep.subr.bf16.mxu0 %v15526_v5  ;;  %v3826_v5 = vld [vmem:[%s24730_s3 + $0x620] sm:$0xff] }
 0x20f   :  { %6312 = vmatpush1.bf16.msra.mxu1 %v15523_v31  ;;  %v15571_v31 = vcombine.low %v3814_v58, %v3818_v22  ;;  %v3866_v58 = vld [vmem:[%s24730_s3 + $0x760] sm:$0xff]  ;;  %v3863_v22 = vld [vmem:[%s24730_s3 + $0x748] sm:$0xff] }
 0x210   :  { %6476 = vmatpush1.bf16.msra.mxu0 %v15525_v10  ;;  %6313 = vmatprep.subr.bf16.mxu1 %v15532_v11  ;;  %v15573_v10 = vcombine.low %v3815_v44, %v3819_v61  ;;  %v15580_v11 = vcombine.high %v3822_v4, %v3826_v5 }
 0x211   :  { %6477 = vmatprep.subr.bf16.mxu0 %v15534_v12  ;;  %v15582_v12 = vcombine.high %v3823_v7, %v3827_v8 }
 0x213   :  { %6314 = vmatpush1.bf16.msra.mxu1 %v15531_v16  ;;  %v15579_v16 = vcombine.low %v3822_v4, %v3826_v5 }
 0x214   :  { %6478 = vmatpush1.bf16.msra.mxu0 %v15533_v19  ;;  %6315 = vmatprep.subr.bf16.mxu1 %v15540_v20  ;;  %v15581_v19 = vcombine.low %v3823_v7, %v3827_v8  ;;  %v15588_v20 = vcombine.high %v3830_v36, %v3834_v13 }
 0x215   :  { %6479 = vmatprep.subr.bf16.mxu0 %v15542_v62  ;;  %v15590_v62 = vcombine.high %v3831_v14, %v3835_v15 }
 0x217   :  { %6316 = vmatpush1.bf16.msra.mxu1 %v15539_v18  ;;  %v15587_v18 = vcombine.low %v3830_v36, %v3834_v13 }
 0x218   :  { %6480 = vmatpush1.bf16.msra.mxu0 %v15541_v28  ;;  %6317 = vmatprep.subr.bf16.mxu1 %v15548_v29  ;;  %v15589_v28 = vcombine.low %v3831_v14, %v3835_v15  ;;  %v15596_v29 = vcombine.high %v3838_v21, %v3842_v24 }
 0x219   :  { %6481 = vmatprep.subr.bf16.mxu0 %v15550_v30  ;;  %v15598_v30 = vcombine.high %v3839_v26, %v3843_v27 }
 0x21b   :  { %6318 = vmatpush1.bf16.msra.mxu1 %v15547_v37  ;;  %v15595_v37 = vcombine.low %v3838_v21, %v3842_v24  ;;  %v3886_v24 = vld [vmem:[%s24730_s3 + $0x800] sm:$0xff] }
 0x21c   :  { %6482 = vmatpush1.bf16.msra.mxu0 %v15549_v41  ;;  %6319 = vmatprep.subr.bf16.mxu1 %v15556_v42  ;;  %v15597_v41 = vcombine.low %v3839_v26, %v3843_v27  ;;  %v15604_v42 = vcombine.high %v3846_v51, %v3850_v32  ;;  %v3890_v26 = vld [vmem:[%s24730_s3 + $0x820] sm:$0xff]  ;;  %v3887_v27 = vld [vmem:[%s24730_s3 + $0x808] sm:$0xff] }
 0x21d   :  { %v20485_v56 = vpop.f32.mrb[4].mxu1  ;;  %6483 = vmatprep.subr.bf16.mxu0 %v15558_v45  ;;  %v15606_v45 = vcombine.high %v3847_v33, %v3851_v35 }
 0x21e   :  { %v3287_v3 = vpop.f32.mrb[5].mxu1 }
 0x21f   :  { %v17086_v59 = vadd.f32 %v3287_v3, %v640_v50  ;;  %v3289_v23 = vpop.f32.mrb[6].mxu1  ;;  %6320 = vmatpush1.bf16.msra.mxu1 %v15555_v52  ;;  %v15603_v50 = vcombine.low %v3846_v51, %v3850_v32  ;;  %v15605_v52 = vcombine.low %v3847_v33, %v3851_v35  ;;  %v3867_v3 = vld [vmem:[%s24730_s3 + $0x768] sm:$0xff]  ;;  %v3894_v32 = vld [vmem:[%s24730_s3 + $0x840] sm:$0xff] }
 0x220   :  { %6484 = vmatpush1.bf16.msra.mxu0 %v15557_v53  ;;  %v3290_v63 = vpop.f32.mrb[7].mxu1  ;;  %6321 = vmatprep.subr.bf16.mxu1 %v15564_v55  ;;  %v15612_v53 = vcombine.high %v3854_v46, %v3858_v47  ;;  %v15614_v55 = vcombine.high %v3855_v25, %v3859_v48  ;;  %v20576_v23 = vsub.s32 2, %v18862_v43  ;;  %v15622_v61 = vcombine.high %v3863_v22, %v3867_v3  ;;  %v3898_v33 = vld [vmem:[%s24730_s3 + $0x860] sm:$0xff]  ;;  %v3895_v35 = vld [vmem:[%s24730_s3 + $0x848] sm:$0xff] }
 0x221   :  { %v3619_v2 = vmax.f32 %v17086_v59, 0.0  ;;  %6485 = vmatprep.subr.bf16.mxu0 %v15566_v57  ;;  %v3862_v57 = vld [vmem:[%s24730_s3 + $0x740] sm:$0xff]  ;;  %v15611_v59 = vcombine.low %v3854_v46, %v3858_v47  ;;  %v15652_v46 = vcombine.high %v3894_v32, %v3898_v33 }
 0x222   :  { %v15620_v44 = vcombine.high %v3862_v57, %v3866_v58  ;;  %v3870_v63 = vld [vmem:[%s24730_s3 + $0x780] sm:$0xff]  ;;  %v15619_v4 = vcombine.low %v3862_v57, %v3866_v58  ;;  %v636_v5 = vrot.slane %v20037_v38, %v20576_v23  ;;  %v3883_v38 = vld [vmem:[%s24730_s3 + $0x7e8] sm:$0xff] }
 0x223   :  { %v20511_v9 = vpack.c.bf16 %v3619_v2, %v3619_v2  ;;  %6322 = vmatpush1.bf16.msra.mxu1 %v15563_v60  ;;  %v15613_v60 = vcombine.low %v3855_v25, %v3859_v48  ;;  %v3875_v2 = vld [vmem:[%s24730_s3 + $0x7a8] sm:$0xff]  ;;  %v3902_v25 = vld [vmem:[%s24730_s3 + $0x880] sm:$0xff] }
 0x224   :  { %6486 = vmatpush1.bf16.msra.mxu0 %v15565_v17  ;;  %6323 = vmatprep.subr.bf16.mxu1 %v15572_v0  ;;  %v3874_v17 = vld [vmem:[%s24730_s3 + $0x7a0] sm:$0xff]  ;;  %v3871_v0 = vld [vmem:[%s24730_s3 + $0x788] sm:$0xff] }
 0x225   :  { %6341 = vmatprep.mubr.bf16.mxu1 %v20511_v9  ;;  %6505 = vmatprep.mubr.bf16.mxu0 %v20511_v9  ;;  %v15628_v7 = vcombine.high %v3870_v63, %v3874_v17  ;;  %v15630_v8 = vcombine.high %v3871_v0, %v3875_v2  ;;  %v15627_v13 = vcombine.low %v3870_v63, %v3874_v17  ;;  %v3906_v48 = vld [vmem:[%s24730_s3 + $0x8a0] sm:$0xff] }
 0x226   :  { %6487 = vmatprep.subr.bf16.mxu0 %v15574_v6  ;;  %v15621_v6 = vcombine.low %v3863_v22, %v3867_v3  ;;  %v15660_v57 = vcombine.high %v3902_v25, %v3906_v48  ;;  %v3910_v22 = vld [vmem:[%s24730_s3 + $0x8c0] sm:$0xff] }
 0x227   :  { %6324 = vmatpush1.bf16.msra.mxu1 %v15571_v31  ;;  %v3878_v31 = vld [vmem:[%s24730_s3 + $0x7c0] sm:$0xff] }
 0x228   :  { %6488 = vmatpush1.bf16.msra.mxu0 %v15573_v10  ;;  %6325 = vmatprep.subr.bf16.mxu1 %v15580_v11  ;;  %v3882_v10 = vld [vmem:[%s24730_s3 + $0x7e0] sm:$0xff] }
 0x229   :  { %6489 = vmatprep.subr.bf16.mxu0 %v15582_v12  ;;  %v3879_v12 = vld [vmem:[%s24730_s3 + $0x7c8] sm:$0xff]  ;;  %v3914_v3 = vld [vmem:[%s24730_s3 + $0x8e0] sm:$0xff] }
 0x22a   :  { %v15638_v21 = vcombine.high %v3879_v12, %v3883_v38  ;;  %v15668_v63 = vcombine.high %v3910_v22, %v3914_v3 }
 0x22b   :  { %6326 = vmatpush1.bf16.msra.mxu1 %v15579_v16  ;;  %v17085_v16 = vadd.f32 %v20485_v56, %v636_v5  ;;  %v3891_v56 = vld [vmem:[%s24730_s3 + $0x828] sm:$0xff] }
 0x22c   :  { %6490 = vmatpush1.bf16.msra.mxu0 %v15581_v19  ;;  %6327 = vmatprep.subr.bf16.mxu1 %v15588_v20  ;;  %v15629_v19 = vcombine.low %v3871_v0, %v3875_v2  ;;  %v15636_v20 = vcombine.high %v3878_v31, %v3882_v10  ;;  %v15646_v51 = vcombine.high %v3887_v27, %v3891_v56  ;;  %v3918_v0 = vld [vmem:[%s24730_s3 + $0x900] sm:$0xff]  ;;  %v3923_v5 = vld [vmem:[%s24730_s3 + $0x928] sm:$0xff] }
 0x22d   :  { %6491 = vmatprep.subr.bf16.mxu0 %v15590_v62  ;;  %v3922_v2 = vld [vmem:[%s24730_s3 + $0x920] sm:$0xff] }
 0x22f   :  { %6328 = vmatpush1.bf16.msra.mxu1 %v15587_v18  ;;  %v15635_v18 = vcombine.low %v3878_v31, %v3882_v10  ;;  %v3926_v10 = vld [vmem:[%s24730_s3 + $0x940] sm:$0xff] }
 0x230   :  { %6492 = vmatpush1.bf16.msra.mxu0 %v15589_v28  ;;  %6329 = vmatprep.subr.bf16.mxu1 %v15596_v29  ;;  %v3618_v28 = vmax.f32 %v17085_v16, 0.0  ;;  %v15637_v29 = vcombine.low %v3879_v12, %v3883_v38  ;;  %v3927_v12 = vld [vmem:[%s24730_s3 + $0x948] sm:$0xff] }
 0x231   :  { %6493 = vmatprep.subr.bf16.mxu0 %v15598_v30  ;;  %v15644_v30 = vcombine.high %v3886_v24, %v3890_v26  ;;  %v3931_v38 = vld [vmem:[%s24730_s3 + $0x968] sm:$0xff] }
 0x233   :  { %6330 = vmatpush1.bf16.msra.mxu1 %v15595_v37  ;;  %v3899_v37 = vld [vmem:[%s24730_s3 + $0x868] sm:$0xff] }
 0x234   :  { %6494 = vmatpush1.bf16.msra.mxu0 %v15597_v41  ;;  %6331 = vmatprep.subr.bf16.mxu1 %v15604_v42  ;;  %v15643_v41 = vcombine.low %v3886_v24, %v3890_v26  ;;  %v20631_v42 = vpack.c.bf16 %v3618_v28, %v3618_v28  ;;  %v15654_v47 = vcombine.high %v3895_v35, %v3899_v37  ;;  %v3939_v24 = vld [vmem:[%s24730_s3 + $0x9a8] sm:$0xff]  ;;  %v20701_v26 = vld [vmem:[%s24729_s2] sm:$0x7f] }
 0x235   :  { %6495 = vmatprep.subr.bf16.mxu0 %v15606_v45  ;;  %v15645_v45 = vcombine.low %v3887_v27, %v3891_v56 }
 0x237   :  { %6332 = vmatpush1.bf16.msra.mxu1 %v15603_v50  ;;  %v3903_v50 = vld [vmem:[%s24730_s3 + $0x888] sm:$0xff] }
 0x238   :  { %6496 = vmatpush1.bf16.msra.mxu0 %v15605_v52  ;;  %6333 = vmatprep.subr.bf16.mxu1 %v15612_v53  ;;  %v3907_v52 = vld [vmem:[%s24730_s3 + $0x8a8] sm:$0xff]  ;;  %v15651_v53 = vcombine.low %v3894_v32, %v3898_v33  ;;  %v3946_v32 = vld [vmem:[%s24730_s3 + $0x9e0] sm:$0xff] }
 0x239   :  { %6497 = vmatprep.subr.bf16.mxu0 %v15614_v55  ;;  %v15653_v55 = vcombine.low %v3895_v35, %v3899_v37  ;;  %v15662_v58 = vcombine.high %v3903_v50, %v3907_v52  ;;  %v3943_v35 = vld [vmem:[%s24730_s3 + $0x9c8] sm:$0xff] }
 0x23a   :  { %v3947_v37 = vld [vmem:[%s24730_s3 + $0x9e8] sm:$0xff] }
 0x23b   :  { %6334 = vmatpush1.bf16.msra.mxu1 %v15611_v59  ;;  %v3911_v59 = vld [vmem:[%s24730_s3 + $0x8c8] sm:$0xff] }
 0x23c   :  { %6498 = vmatpush1.bf16.msra.mxu0 %v15613_v60  ;;  %6335 = vmatprep.subr.bf16.mxu1 %v15620_v44  ;;  %v3915_v60 = vld [vmem:[%s24730_s3 + $0x8e8] sm:$0xff]  ;;  %v15659_v44 = vcombine.low %v3902_v25, %v3906_v48 }
 0x23d   :  { %6499 = vmatprep.subr.bf16.mxu0 %v15622_v61  ;;  %v16814_v11 = vpop.f32.mrb[8].mxu1  ;;  %v15661_v61 = vcombine.low %v3903_v50, %v3907_v52  ;;  %v15670_v17 = vcombine.high %v3911_v59, %v3915_v60 }
 0x23e   :  { %v16815_v36 = vpop.f32.mrb[9].mxu1 }
 0x23f   :  { %6336 = vmatpush1.bf16.msra.mxu1 %v15619_v4  ;;  %v20604_v14 = vadd.f32 %v16815_v36, %v16814_v11  ;;  %v16817_v15 = vpop.f32.mrb[10].mxu1  ;;  %v3919_v4 = vld [vmem:[%s24730_s3 + $0x908] sm:$0xff]  ;;  %v3930_v11 = vld [vmem:[%s24730_s3 + $0x960] sm:$0xff]  ;;  %v20684_v36 = vsub.s32 6, %v18862_v43 }
 0x240   :  { %6500 = vmatpush1.bf16.msra.mxu0 %v15621_v6  ;;  %6337 = vmatprep.subr.bf16.mxu1 %v15628_v7  ;;  %v16818_v62 = vpop.f32.mrb[11].mxu1  ;;  %v15667_v6 = vcombine.low %v3910_v22, %v3914_v3  ;;  %v15669_v7 = vcombine.low %v3911_v59, %v3915_v60  ;;  %v15678_v31 = vcombine.high %v3919_v4, %v3923_v5 }
 0x241   :  { %6501 = vmatprep.subr.bf16.mxu0 %v15630_v8  ;;  %v15676_v8 = vcombine.high %v3918_v0, %v3922_v2  ;;  %v15677_v15 = vcombine.low %v3919_v4, %v3923_v5  ;;  %v15684_v16 = vcombine.high %v3926_v10, %v3930_v11  ;;  %v3938_v62 = vld [vmem:[%s24730_s3 + $0x9a0] sm:$0xff]  ;;  %v652_v27 = vrot.slane %v20701_v26, %v20684_v36 }
 0x242   :  { %v15683_v56 = vcombine.low %v3926_v10, %v3930_v11  ;;  %v15701_v3 = vcombine.low %v3943_v35, %v3947_v37 }
 0x243   :  { %6338 = vmatpush1.bf16.msra.mxu1 %v15627_v13  ;;  %v15675_v13 = vcombine.low %v3918_v0, %v3922_v2 }
 0x244   :  { %6502 = vmatpush1.bf16.msra.mxu0 %v15629_v19  ;;  %6339 = vmatprep.subr.bf16.mxu1 %v15636_v20  ;;  %v15686_v19 = vcombine.high %v3927_v12, %v3931_v38  ;;  %v3934_v20 = vld [vmem:[%s24730_s3 + $0x980] sm:$0xff] }
 0x245   :  { %6503 = vmatprep.subr.bf16.mxu0 %v15638_v21  ;;  %v3935_v21 = vld [vmem:[%s24730_s3 + $0x988] sm:$0xff]  ;;  %v15692_v28 = vcombine.high %v3934_v20, %v3938_v62 }
 0x246   :  { %v15693_v48 = vcombine.low %v3935_v21, %v3939_v24 }
 0x247   :  { %6340 = vmatpush1.bf16.msra.mxu1 %v15635_v18  ;;  %v15685_v18 = vcombine.low %v3927_v12, %v3931_v38 }
 0x248   :  { %6504 = vmatpush1.bf16.msra.mxu0 %v15637_v29  ;;  %6350 = vmatprep.subr.bf16.mxu1 %v15644_v30  ;;  %v15694_v30 = vcombine.high %v3935_v21, %v3939_v24 }
 0x249   :  { %6514 = vmatprep.subr.bf16.mxu0 %v15646_v51  ;;  %v3942_v51 = vld [vmem:[%s24730_s3 + $0x9c0] sm:$0xff] }
 0x24a   :  { %6342 = vmatmul.mubr.bf16.vlgmr.msra.gmra.mrb[24].mxu1 %v20631_v42  ;;  %v15700_v50 = vcombine.high %v3942_v51, %v3946_v32  ;;  %v15699_v22 = vcombine.low %v3942_v51, %v3946_v32 }
 0x24b   :  { %6506 = vmatmul.mubr.bf16.vlgmr.msra.gmra.mrb[8].mxu0 %v20631_v42  ;;  %6351 = vmatpush1.bf16.msra.mxu1 %v15643_v41  ;;  %v3491_v41 = vadd.f32 %v20604_v14, %v652_v27  ;;  %v3954_v14 = vld [vmem:[%s24730_s3 + $0xa20] sm:$0xff] }
 0x24c   :  { %6515 = vmatpush1.bf16.msra.mxu0 %v15645_v45  ;;  %6352 = vmatprep.subr.bf16.mxu1 %v15652_v46  ;;  %v3982_v27 = vld [vmem:[%s24730_s3 + $0xb00] sm:$0xff] }
 0x24d   :  { %6516 = vmatprep.subr.bf16.mxu0 %v15654_v47  ;;  %v15691_v47 = vcombine.low %v3934_v20, %v3938_v62 }
 0x24f   :  { %6353 = vmatpush1.bf16.msra.mxu1 %v15651_v53  ;;  %v15702_v53 = vcombine.high %v3943_v35, %v3947_v37  ;;  %v3994_v35 = vld [vmem:[%s24730_s3 + $0xb60] sm:$0xff]  ;;  %v3991_v37 = vld [vmem:[%s24730_s3 + $0xb48] sm:$0xff] }
 0x250   :  { %6517 = vmatpush1.bf16.msra.mxu0 %v15653_v55  ;;  %6354 = vmatprep.subr.bf16.mxu1 %v15660_v57  ;;  %v3950_v55 = vld [vmem:[%s24730_s3 + $0xa00] sm:$0xff]  ;;  %v3951_v57 = vld [vmem:[%s24730_s3 + $0xa08] sm:$0xff] }
 0x251   :  { %6518 = vmatprep.subr.bf16.mxu0 %v15662_v58  ;;  %v3955_v58 = vld [vmem:[%s24730_s3 + $0xa28] sm:$0xff]  ;;  %v15708_v59 = vcombine.high %v3950_v55, %v3954_v14  ;;  %v15707_v0 = vcombine.low %v3950_v55, %v3954_v14 }
 0x252   :  { %v15710_v60 = vcombine.high %v3951_v57, %v3955_v58  ;;  %v15709_v2 = vcombine.low %v3951_v57, %v3955_v58  ;;  %v4003_v55 = vld [vmem:[%s24730_s3 + $0xba8] sm:$0xff] }
 0x253   :  { %6355 = vmatpush1.bf16.msra.mxu1 %v15659_v44  ;;  %v3958_v44 = vld [vmem:[%s24730_s3 + $0xa40] sm:$0xff] }
 0x254   :  { %6519 = vmatpush1.bf16.msra.mxu0 %v15661_v61  ;;  %6356 = vmatprep.subr.bf16.mxu1 %v15668_v63  ;;  %v3962_v61 = vld [vmem:[%s24730_s3 + $0xa60] sm:$0xff]  ;;  %v3959_v63 = vld [vmem:[%s24730_s3 + $0xa48] sm:$0xff] }
 0x255   :  { %6520 = vmatprep.subr.bf16.mxu0 %v15670_v17  ;;  %v3963_v17 = vld [vmem:[%s24730_s3 + $0xa68] sm:$0xff]  ;;  %v15716_v4 = vcombine.high %v3958_v44, %v3962_v61  ;;  %v15715_v10 = vcombine.low %v3958_v44, %v3962_v61 }
 0x256   :  { %v15718_v5 = vcombine.high %v3959_v63, %v3963_v17  ;;  %v15717_v11 = vcombine.low %v3959_v63, %v3963_v17  ;;  %v4007_v61 = vld [vmem:[%s24730_s3 + $0xbc8] sm:$0xff] }
 0x257   :  { %6357 = vmatpush1.bf16.msra.mxu1 %v15667_v6  ;;  %v3966_v6 = vld [vmem:[%s24730_s3 + $0xa80] sm:$0xff]  ;;  %v4011_v63 = vld [vmem:[%s24730_s3 + $0xbe8] sm:$0xff] }
 0x258   :  { %6521 = vmatpush1.bf16.msra.mxu0 %v15669_v7  ;;  %6358 = vmatprep.subr.bf16.mxu1 %v15676_v8  ;;  %v3970_v7 = vld [vmem:[%s24730_s3 + $0xaa0] sm:$0xff]  ;;  %v3967_v8 = vld [vmem:[%s24730_s3 + $0xa88] sm:$0xff] }
 0x259   :  { %6522 = vmatprep.subr.bf16.mxu0 %v15678_v31  ;;  %v3971_v31 = vld [vmem:[%s24730_s3 + $0xaa8] sm:$0xff]  ;;  %v15724_v12 = vcombine.high %v3966_v6, %v3970_v7  ;;  %v15723_v20 = vcombine.low %v3966_v6, %v3970_v7 }
 0x25a   :  { %v15726_v38 = vcombine.high %v3967_v8, %v3971_v31  ;;  %v15725_v62 = vcombine.low %v3967_v8, %v3971_v31  ;;  %v15766_v8 = vcombine.high %v4007_v61, %v4011_v63  ;;  %v4014_v31 = vld [vmem:[%s24730_s3 + $0xc00] sm:$0xff] }
 0x25b   :  { %6359 = vmatpush1.bf16.msra.mxu1 %v15675_v13  ;;  %v3974_v13 = vld [vmem:[%s24730_s3 + $0xac0] sm:$0xff] }
 0x25c   :  { %6523 = vmatpush1.bf16.msra.mxu0 %v15677_v15  ;;  %6360 = vmatprep.subr.bf16.mxu1 %v15684_v16  ;;  %v3978_v15 = vld [vmem:[%s24730_s3 + $0xae0] sm:$0xff]  ;;  %v3975_v16 = vld [vmem:[%s24730_s3 + $0xac8] sm:$0xff] }
 0x25d   :  { %v16836_v29 = vpop.f32.mrb[12].mxu1  ;;  %6524 = vmatprep.subr.bf16.mxu0 %v15686_v19  ;;  %v3979_v19 = vld [vmem:[%s24730_s3 + $0xae8] sm:$0xff]  ;;  %v15732_v21 = vcombine.high %v3974_v13, %v3978_v15 }
 0x25e   :  { %v16837_v33 = vpop.f32.mrb[13].mxu1  ;;  %v15734_v24 = vcombine.high %v3975_v16, %v3979_v19 }
 0x25f   :  { %v16838_v45 = vadd.f32 %v16837_v33, %v16836_v29  ;;  %v16839_v46 = vpop.f32.mrb[14].mxu1  ;;  %6361 = vmatpush1.bf16.msra.mxu1 %v15683_v56  ;;  %v3986_v56 = vld [vmem:[%s24730_s3 + $0xb20] sm:$0xff]  ;;  %v15731_v29 = vcombine.low %v3974_v13, %v3978_v15 }
 0x260   :  { %v16840_v25 = vpop.f32.mrb[15].mxu1  ;;  %6525 = vmatpush1.bf16.msra.mxu0 %v15685_v18  ;;  %6362 = vmatprep.subr.bf16.mxu1 %v15692_v28  ;;  %v3983_v18 = vld [vmem:[%s24730_s3 + $0xb08] sm:$0xff]  ;;  %v15740_v51 = vcombine.high %v3982_v27, %v3986_v56  ;;  %v3990_v33 = vld [vmem:[%s24730_s3 + $0xb40] sm:$0xff] }
 0x261   :  { %v20718_v52 = vadd.f32 %v16838_v45, %v3491_v41  ;;  %6526 = vmatprep.subr.bf16.mxu0 %v15694_v30  ;;  %v3987_v28 = vld [vmem:[%s24730_s3 + $0xb28] sm:$0xff]  ;;  %v15733_v30 = vcombine.low %v3975_v16, %v3979_v19  ;;  %v15739_v45 = vcombine.low %v3982_v27, %v3986_v56  ;;  %v15747_v14 = vcombine.low %v3990_v33, %v3994_v35 }
 0x262   :  { %v15742_v32 = vcombine.high %v3983_v18, %v3987_v28  ;;  %v3995_v41 = vld [vmem:[%s24730_s3 + $0xb68] sm:$0xff]  ;;  %v15741_v46 = vcombine.low %v3983_v18, %v3987_v28  ;;  %v20830_v16 = vsub.s32 4, %v18862_v43  ;;  %v20833_v19 = vsub.s32 5, %v18862_v43 }
 0x263   :  { %6363 = vmatpush1.bf16.msra.mxu1 %v15691_v47  ;;  %v15748_v47 = vcombine.high %v3990_v33, %v3994_v35  ;;  %v15750_v25 = vcombine.high %v3991_v37, %v3995_v41  ;;  %v15749_v57 = vcombine.low %v3991_v37, %v3995_v41  ;;  %v4022_v35 = vld [vmem:[%s24730_s3 + $0xc40] sm:$0xff] }
 0x264   :  { %6527 = vmatpush1.bf16.msra.mxu0 %v15693_v48  ;;  %6364 = vmatprep.subr.bf16.mxu1 %v15700_v50  ;;  %v3998_v48 = vld [vmem:[%s24730_s3 + $0xb80] sm:$0xff] }
 0x265   :  { %6528 = vmatprep.subr.bf16.mxu0 %v15702_v53  ;;  %v4002_v50 = vld [vmem:[%s24730_s3 + $0xba0] sm:$0xff]  ;;  %v3999_v53 = vld [vmem:[%s24730_s3 + $0xb88] sm:$0xff] }
 0x266   :  { %v15756_v58 = vcombine.high %v3998_v48, %v4002_v50 }
 0x267   :  { %6365 = vmatpush1.bf16.msra.mxu1 %v15699_v22 }
 0x268   :  { %6529 = vmatpush1.bf16.msra.mxu0 %v15701_v3  ;;  %6366 = vmatprep.subr.bf16.mxu1 %v15708_v59  ;;  %v15758_v3 = vcombine.high %v3999_v53, %v4003_v55  ;;  %v4006_v59 = vld [vmem:[%s24730_s3 + $0xbc0] sm:$0xff] }
 0x269   :  { %6530 = vmatprep.subr.bf16.mxu0 %v15710_v60  ;;  %v4010_v60 = vld [vmem:[%s24730_s3 + $0xbe0] sm:$0xff] }
 0x26a   :  { %v15764_v6 = vcombine.high %v4006_v59, %v4010_v60 }
 0x26b   :  { %6367 = vmatpush1.bf16.msra.mxu1 %v15707_v0 }
 0x26c   :  { %6531 = vmatpush1.bf16.msra.mxu0 %v15709_v2  ;;  %6368 = vmatprep.subr.bf16.mxu1 %v15716_v4  ;;  %v15755_v2 = vcombine.low %v3998_v48, %v4002_v50 }
 0x26d   :  { %6532 = vmatprep.subr.bf16.mxu0 %v15718_v5  ;;  %v15757_v5 = vcombine.low %v3999_v53, %v4003_v55 }
 0x26f   :  { %6369 = vmatpush1.bf16.msra.mxu1 %v15715_v10  ;;  %v4018_v10 = vld [vmem:[%s24730_s3 + $0xc20] sm:$0xff] }
 0x270   :  { %6533 = vmatpush1.bf16.msra.mxu0 %v15717_v11  ;;  %6370 = vmatprep.subr.bf16.mxu1 %v15724_v12  ;;  %v4015_v11 = vld [vmem:[%s24730_s3 + $0xc08] sm:$0xff]  ;;  %v15772_v13 = vcombine.high %v4014_v31, %v4018_v10  ;;  %v15771_v48 = vcombine.low %v4014_v31, %v4018_v10  ;;  %v4046_v31 = vld [vmem:[%s24730_s3 + $0xd00] sm:$0xff] }
 0x271   :  { %6534 = vmatprep.subr.bf16.mxu0 %v15726_v38  ;;  %v4019_v12 = vld [vmem:[%s24730_s3 + $0xc28] sm:$0xff]  ;;  %v15765_v38 = vcombine.low %v4007_v61, %v4011_v63  ;;  %v4038_v63 = vld [vmem:[%s24730_s3 + $0xcc0] sm:$0xff] }
 0x272   :  { %v15774_v15 = vcombine.high %v4015_v11, %v4019_v12  ;;  %v15773_v50 = vcombine.low %v4015_v11, %v4019_v12  ;;  %v4050_v10 = vld [vmem:[%s24730_s3 + $0xd20] sm:$0xff]  ;;  %v4047_v11 = vld [vmem:[%s24730_s3 + $0xd08] sm:$0xff] }
 0x273   :  { %6371 = vmatpush1.bf16.msra.mxu1 %v15723_v20  ;;  %v644_v20 = vrot.slane %v20701_v26, %v20830_v16  ;;  %v4051_v12 = vld [vmem:[%s24730_s3 + $0xd28] sm:$0xff] }
 0x274   :  { %6535 = vmatpush1.bf16.msra.mxu0 %v15725_v62  ;;  %6372 = vmatprep.subr.bf16.mxu1 %v15732_v21  ;;  %v648_v62 = vrot.slane %v20701_v26, %v20833_v19  ;;  %v4026_v26 = vld [vmem:[%s24730_s3 + $0xc60] sm:$0xff] }
 0x275   :  { %6536 = vmatprep.subr.bf16.mxu0 %v15734_v24  ;;  %v15780_v55 = vcombine.high %v4022_v35, %v4026_v26 }
 0x277   :  { %6373 = vmatpush1.bf16.msra.mxu1 %v15731_v29 }
 0x278   :  { %6537 = vmatpush1.bf16.msra.mxu0 %v15733_v30  ;;  %6374 = vmatprep.subr.bf16.mxu1 %v15740_v51 }
 0x279   :  { %6538 = vmatprep.subr.bf16.mxu0 %v15742_v32 }
 0x27b   :  { %6375 = vmatpush1.bf16.msra.mxu1 %v15739_v45 }
 0x27c   :  { %6539 = vmatpush1.bf16.msra.mxu0 %v15741_v46  ;;  %6376 = vmatprep.subr.bf16.mxu1 %v15748_v47  ;;  %v4023_v46 = vld [vmem:[%s24730_s3 + $0xc48] sm:$0xff] }
 0x27d   :  { %v16858_v22 = vpop.f32.mrb[16].mxu1  ;;  %6540 = vmatprep.subr.bf16.mxu0 %v15750_v25  ;;  %v4027_v47 = vld [vmem:[%s24730_s3 + $0xc68] sm:$0xff] }
 0x27e   :  { %v16859_v44 = vpop.f32.mrb[17].mxu1 }
 0x27f   :  { %v16860_v17 = vadd.f32 %v16859_v44, %v16858_v22  ;;  %v16861_v0 = vpop.f32.mrb[18].mxu1  ;;  %6377 = vmatpush1.bf16.msra.mxu1 %v15747_v14  ;;  %v15782_v14 = vcombine.high %v4023_v46, %v4027_v47  ;;  %v4031_v22 = vld [vmem:[%s24730_s3 + $0xc88] sm:$0xff] }
 0x280   :  { %v16862_v4 = vpop.f32.mrb[19].mxu1  ;;  %6541 = vmatpush1.bf16.msra.mxu0 %v15749_v57  ;;  %6378 = vmatprep.subr.bf16.mxu1 %v15756_v58  ;;  %v4030_v57 = vld [vmem:[%s24730_s3 + $0xc80] sm:$0xff]  ;;  %v4039_v0 = vld [vmem:[%s24730_s3 + $0xcc8] sm:$0xff] }
 0x281   :  { %v3571_v7 = vadd.f32 %v16860_v17, %v20718_v52  ;;  %6542 = vmatprep.subr.bf16.mxu0 %v15758_v3  ;;  %v15763_v52 = vcombine.low %v4006_v59, %v4010_v60  ;;  %v4034_v58 = vld [vmem:[%s24730_s3 + $0xca0] sm:$0xff]  ;;  %v4035_v3 = vld [vmem:[%s24730_s3 + $0xca8] sm:$0xff]  ;;  %v15779_v59 = vcombine.low %v4022_v35, %v4026_v26  ;;  %v15781_v60 = vcombine.low %v4023_v46, %v4027_v47  ;;  %v3640_v46 = vld [vmem:[%s24730_s3 + $0x50] sm:$0xff] }
 0x282   :  { %v15788_v44 = vcombine.high %v4030_v57, %v4034_v58  ;;  %v15790_v61 = vcombine.high %v4031_v22, %v4035_v3  ;;  %v4042_v17 = vld [vmem:[%s24730_s3 + $0xce0] sm:$0xff]  ;;  %v18652_v4 = vmov 0   ;;  %v3644_v47 = vld [vmem:[%s24730_s3 + $0x70] sm:$0xff] }
 0x283   :  { %6379 = vmatpush1.bf16.msra.mxu1 %v15755_v2  ;;  %v4043_v2 = vld [vmem:[%s24730_s3 + $0xce8] sm:$0xff] }
 0x284   :  { %6543 = vmatpush1.bf16.msra.mxu0 %v15757_v5  ;;  %6380 = vmatprep.subr.bf16.mxu1 %v15764_v6  ;;  %v15787_v5 = vcombine.low %v4030_v57, %v4034_v58  ;;  %v15789_v6 = vcombine.low %v4031_v22, %v4035_v3  ;;  %v15400_v57 = vcombine.high %v3640_v46, %v3644_v47  ;;  %v3648_v22 = vld [vmem:[%s24730_s3 + $0x90] sm:$0xff] }
 0x285   :  { %6544 = vmatprep.subr.bf16.mxu0 %v15766_v8  ;;  %v15798_v8 = vcombine.high %v4039_v0, %v4043_v2  ;;  %v3652_v3 = vld [vmem:[%s24730_s3 + $0xb0] sm:$0xff] }
 0x287   :  { %6381 = vmatpush1.bf16.msra.mxu1 %v15763_v52  ;;  %v15795_v52 = vcombine.low %v4038_v63, %v4042_v17 }
 0x288   :  { %6545 = vmatpush1.bf16.msra.mxu0 %v15765_v38  ;;  %6391 = vmatprep.subr.bf16.mxu1 %v15772_v13  ;;  %v15797_v38 = vcombine.low %v4039_v0, %v4043_v2  ;;  %v15804_v13 = vcombine.high %v4046_v31, %v4050_v10  ;;  %v3656_v0 = vld [vmem:[%s24730_s3 + $0xd0] sm:$0xff] }
 0x289   :  { %6555 = vmatprep.subr.bf16.mxu0 %v15774_v15  ;;  %v15806_v15 = vcombine.high %v4047_v11, %v4051_v12  ;;  %v3660_v2 = vld [vmem:[%s24730_s3 + $0xf0] sm:$0xff] }
 0x29d   :  { %v16880_v24 = vpop.f32.mrb[20].mxu1 }
 0x29e   :  { %v3449_v21 = vpop.f32.mrb[4].mxu0  ;;  %v16881_v18 = vpop.f32.mrb[21].mxu1 }
 0x29f   :  { %v17087_v27 = vadd.f32 %v3449_v21, %v644_v20  ;;  %v3451_v56 = vpop.f32.mrb[5].mxu0  ;;  %v16882_v29 = vadd.f32 %v16881_v18, %v16880_v24  ;;  %v16883_v51 = vpop.f32.mrb[22].mxu1  ;;  %v4054_v20 = vld [vmem:[%s24730_s3 + $0xd40] sm:$0xff]  ;;  %v4055_v21 = vld [vmem:[%s24730_s3 + $0xd48] sm:$0xff] }
 0x2a0   :  { %v17088_v28 = vadd.f32 %v3451_v56, %v648_v62  ;;  %v3453_v30 = vpop.f32.mrb[6].mxu0  ;;  %v16884_v37 = vpop.f32.mrb[23].mxu1  ;;  %v4058_v62 = vld [vmem:[%s24730_s3 + $0xd60] sm:$0xff]  ;;  %v4059_v24 = vld [vmem:[%s24730_s3 + $0xd68] sm:$0xff]  ;;  %v15805_v56 = vcombine.low %v4047_v11, %v4051_v12  ;;  %v3633_v51 = vld [vmem:[%s24730_s3 + $0x18] sm:$0xff] }
 0x2a1   :  { %v3620_v32 = vmax.f32 %v17087_v27, 0.0  ;;  %v3454_v33 = vpop.f32.mrb[7].mxu0  ;;  %v20842_v45 = vadd.f32 %v16882_v29, %v3571_v7  ;;  %v15796_v7 = vcombine.high %v4038_v63, %v4042_v17  ;;  %v15803_v27 = vcombine.low %v4046_v31, %v4050_v10  ;;  %v3632_v29 = vld [vmem:[%s24730_s3 + $0x10] sm:$0xff]  ;;  %v3665_v12 = vld [vmem:[%s24730_s3 + $0x118] sm:$0xff] }
 0x2a2   :  { %v3621_v41 = vmax.f32 %v17088_v28, 0.0  ;;  %v15812_v18 = vcombine.high %v4054_v20, %v4058_v62  ;;  %v15814_v28 = vcombine.high %v4055_v21, %v4059_v24  ;;  %v3636_v30 = vld [vmem:[%s24730_s3 + $0x30] sm:$0xff]  ;;  %v15811_v33 = vcombine.low %v4054_v20, %v4058_v62 }
 0x2a3   :  { %v20855_v53 = vpack.c.bf16 %v3620_v32, %v3620_v32  ;;  %v3637_v32 = vld [vmem:[%s24730_s3 + $0x38] sm:$0xff]  ;;  %v15813_v35 = vcombine.low %v4055_v21, %v4059_v24  ;;  %v3622_v37 = vmax.f32 %v20842_v45, 0.0  ;;  %v15408_v63 = vcombine.high %v3648_v22, %v3652_v3  ;;  %v3664_v10 = vld [vmem:[%s24730_s3 + $0x110] sm:$0xff] }
 0x2a4   :  { %v20853_v25 = vpack.c.bf16 %v3621_v41, %v3621_v41  ;;  %v15392_v41 = vcombine.high %v3632_v29, %v3636_v30  ;;  %v15394_v26 = vcombine.high %v3633_v51, %v3637_v32  ;;  %v3645_v45 = vld [vmem:[%s24730_s3 + $0x78] sm:$0xff]  ;;  %v3668_v11 = vld [vmem:[%s24730_s3 + $0x130] sm:$0xff] }
 0x2a5   :  { %v3672_v62 = vld [vmem:[%s24730_s3 + $0x150] sm:$0xff]  ;;  %v3673_v24 = vld [vmem:[%s24730_s3 + $0x158] sm:$0xff] }
 0x2a6   :  { %6382 = vmatprep.mubr.bf16.mxu1 %v20853_v25  ;;  %6546 = vmatprep.mubr.bf16.mxu0 %v20853_v25  ;;  %v3676_v21 = vld [vmem:[%s24730_s3 + $0x170] sm:$0xff] }
 0x2a7   :  { %6383 = vmatmul.mubr.bf16.vlgmr.msra.gmra.mrb[24].mxu1 %v20855_v53  ;;  %6547 = vmatmul.mubr.bf16.vlgmr.msra.gmra.mrb[8].mxu0 %v20855_v53 }
 0x2a8   :  { %6392 = vmatpush1.bf16.msra.mxu1 %v15771_v48  ;;  %6556 = vmatpush1.bf16.msra.mxu0 %v15773_v50  ;;  %v3641_v48 = vld [vmem:[%s24730_s3 + $0x58] sm:$0xff]  ;;  %v15391_v50 = vcombine.low %v3632_v29, %v3636_v30  ;;  %v3680_v30 = vld [vmem:[%s24730_s3 + $0x190] sm:$0xff] }
 0x2a9   :  { %6393 = vmatprep.subr.bf16.mxu1 %v15780_v55  ;;  %6557 = vmatprep.subr.bf16.mxu0 %v15782_v14  ;;  %v20936_v55 = vpack.c.bf16 %v3622_v37, %v3622_v37  ;;  %v15393_v14 = vcombine.low %v3633_v51, %v3637_v32  ;;  %v15402_v58 = vcombine.high %v3641_v48, %v3645_v45  ;;  %v3684_v51 = vld [vmem:[%s24730_s3 + $0x1b0] sm:$0xff]  ;;  %v3681_v32 = vld [vmem:[%s24730_s3 + $0x198] sm:$0xff] }
 0x2aa   :  { %6423 = vmatprep.mubr.bf16.mxu1 %v18652_v4  ;;  %6587 = vmatprep.mubr.bf16.mxu0 %v18652_v4 }
 0x2ac   :  { %6394 = vmatpush1.bf16.msra.mxu1 %v15779_v59  ;;  %6558 = vmatpush1.bf16.msra.mxu0 %v15781_v60  ;;  %v3649_v59 = vld [vmem:[%s24730_s3 + $0x98] sm:$0xff] }
 0x2ad   :  { %6395 = vmatprep.subr.bf16.mxu1 %v15788_v44  ;;  %6559 = vmatprep.subr.bf16.mxu0 %v15790_v61  ;;  %v3653_v60 = vld [vmem:[%s24730_s3 + $0xb8] sm:$0xff]  ;;  %v15399_v44 = vcombine.low %v3640_v46, %v3644_v47  ;;  %v15401_v61 = vcombine.low %v3641_v48, %v3645_v45  ;;  %v3688_v46 = vld [vmem:[%s24730_s3 + $0x1d0] sm:$0xff] }
 0x2ae   :  { %v15410_v17 = vcombine.high %v3649_v59, %v3653_v60  ;;  %v3692_v47 = vld [vmem:[%s24730_s3 + $0x1f0] sm:$0xff]  ;;  %v3689_v48 = vld [vmem:[%s24730_s3 + $0x1d8] sm:$0xff] }
 0x2af   :  { %v3693_v45 = vld [vmem:[%s24730_s3 + $0x1f8] sm:$0xff] }
 0x2b0   :  { %6396 = vmatpush1.bf16.msra.mxu1 %v15787_v5  ;;  %6560 = vmatpush1.bf16.msra.mxu0 %v15789_v6  ;;  %v3657_v5 = vld [vmem:[%s24730_s3 + $0xd8] sm:$0xff]  ;;  %v15407_v6 = vcombine.low %v3648_v22, %v3652_v3  ;;  %v3696_v22 = vld [vmem:[%s24730_s3 + $0x210] sm:$0xff] }
 0x2b1   :  { %6397 = vmatprep.subr.bf16.mxu1 %v15796_v7  ;;  %6561 = vmatprep.subr.bf16.mxu0 %v15798_v8  ;;  %v15409_v7 = vcombine.low %v3649_v59, %v3653_v60  ;;  %v15416_v8 = vcombine.high %v3656_v0, %v3660_v2  ;;  %v3700_v3 = vld [vmem:[%s24730_s3 + $0x230] sm:$0xff]  ;;  %v3697_v59 = vld [vmem:[%s24730_s3 + $0x218] sm:$0xff] }
 0x2b2   :  { %v3701_v60 = vld [vmem:[%s24730_s3 + $0x238] sm:$0xff] }
 0x2b4   :  { %6398 = vmatpush1.bf16.msra.mxu1 %v15795_v52  ;;  %6562 = vmatpush1.bf16.msra.mxu0 %v15797_v38  ;;  %v3669_v52 = vld [vmem:[%s24730_s3 + $0x138] sm:$0xff]  ;;  %v15415_v38 = vcombine.low %v3656_v0, %v3660_v2  ;;  %v3704_v0 = vld [vmem:[%s24730_s3 + $0x250] sm:$0xff] }
 0x2b5   :  { %6399 = vmatprep.subr.bf16.mxu1 %v15804_v13  ;;  %6563 = vmatprep.subr.bf16.mxu0 %v15806_v15  ;;  %v15424_v15 = vcombine.high %v3664_v10, %v3668_v11  ;;  %v15426_v20 = vcombine.high %v3665_v12, %v3669_v52  ;;  %v3708_v2 = vld [vmem:[%s24730_s3 + $0x270] sm:$0xff] }
 0x2b8   :  { %6400 = vmatpush1.bf16.msra.mxu1 %v15803_v27  ;;  %6564 = vmatpush1.bf16.msra.mxu0 %v15805_v56  ;;  %v3677_v27 = vld [vmem:[%s24730_s3 + $0x178] sm:$0xff]  ;;  %v15423_v56 = vcombine.low %v3664_v10, %v3668_v11  ;;  %v3712_v10 = vld [vmem:[%s24730_s3 + $0x290] sm:$0xff] }
 0x2b9   :  { %6401 = vmatprep.subr.bf16.mxu1 %v15812_v18  ;;  %6565 = vmatprep.subr.bf16.mxu0 %v15814_v28  ;;  %v15425_v18 = vcombine.low %v3665_v12, %v3669_v52  ;;  %v15432_v28 = vcombine.high %v3672_v62, %v3676_v21  ;;  %v15434_v29 = vcombine.high %v3673_v24, %v3677_v27  ;;  %v3716_v11 = vld [vmem:[%s24730_s3 + $0x2b0] sm:$0xff]  ;;  %v3713_v12 = vld [vmem:[%s24730_s3 + $0x298] sm:$0xff] }
 0x2ba   :  { %v15433_v37 = vcombine.low %v3673_v24, %v3677_v27  ;;  %v3717_v52 = vld [vmem:[%s24730_s3 + $0x2b8] sm:$0xff] }
 0x2bb   :  { %v3721_v24 = vld [vmem:[%s24730_s3 + $0x2d8] sm:$0xff] }
 0x2bc   :  { %6402 = vmatpush1.bf16.msra.mxu1 %v15811_v33  ;;  %6566 = vmatpush1.bf16.msra.mxu0 %v15813_v35  ;;  %v3685_v33 = vld [vmem:[%s24730_s3 + $0x1b8] sm:$0xff]  ;;  %v15431_v35 = vcombine.low %v3672_v62, %v3676_v21  ;;  %v3720_v62 = vld [vmem:[%s24730_s3 + $0x2d0] sm:$0xff] }
 0x2bd   :  { %6596 = vmatprep.subr.bf16.mxu1 %v15392_v41  ;;  %6760 = vmatprep.subr.bf16.mxu0 %v15394_v26  ;;  %v15440_v41 = vcombine.high %v3680_v30, %v3684_v51  ;;  %v15442_v26 = vcombine.high %v3681_v32, %v3685_v33  ;;  %v3724_v21 = vld [vmem:[%s24730_s3 + $0x2f0] sm:$0xff]  ;;  %v3725_v27 = vld [vmem:[%s24730_s3 + $0x2f8] sm:$0xff] }
 0x2bf   :  { %15819 = vmatmul.mubr.msk.bf16.vlgmr.msra.gmra.mrb[24].mxu1 %vm6264_vm0, %v20936_v55  ;;  %15820 = vmatmul.mubr.msk.bf16.vlgmr.msra.gmra.mrb[8].mxu0 %vm6264_vm0, %v20936_v55 }
 0x2c0   :  { %6597 = vmatpush1.bf16.msra.mxu1 %v15391_v50  ;;  %6628 = vmatprep.mubr.bf16.mxu1 %v20217_v54  ;;  %v15439_v50 = vcombine.low %v3680_v30, %v3684_v51  ;;  %v3728_v30 = vld [vmem:[%s24730_s3 + $0x310] sm:$0xff] }
 0x2c1   :  { %6761 = vmatpush1.bf16.msra.mxu0 %v15393_v14  ;;  %6792 = vmatprep.mubr.bf16.mxu0 %v20217_v54  ;;  %v3661_v54 = vld [vmem:[%s24730_s3 + $0xf8] sm:$0xff]  ;;  %v15441_v14 = vcombine.low %v3681_v32, %v3685_v33  ;;  %v3732_v51 = vld [vmem:[%s24730_s3 + $0x330] sm:$0xff] }
 0x2c2   :  { %6598 = vmatprep.subr.bf16.mxu1 %v15400_v57  ;;  %6762 = vmatprep.subr.bf16.mxu0 %v15402_v58  ;;  %v15418_v31 = vcombine.high %v3657_v5, %v3661_v54  ;;  %v15417_v13 = vcombine.low %v3657_v5, %v3661_v54  ;;  %v15448_v57 = vcombine.high %v3688_v46, %v3692_v47  ;;  %v3705_v5 = vld [vmem:[%s24730_s3 + $0x258] sm:$0xff] }
 0x2c3   :  { %v15450_v58 = vcombine.high %v3689_v48, %v3693_v45  ;;  %v3709_v54 = vld [vmem:[%s24730_s3 + $0x278] sm:$0xff] }
 0x2c4   :  { %6599 = vmatpush1.bf16.msra.mxu1 %v15399_v44  ;;  %v15447_v44 = vcombine.low %v3688_v46, %v3692_v47  ;;  %v3729_v32 = vld [vmem:[%s24730_s3 + $0x318] sm:$0xff]  ;;  %v3736_v46 = vld [vmem:[%s24730_s3 + $0x350] sm:$0xff] }
 0x2c5   :  { %6763 = vmatpush1.bf16.msra.mxu0 %v15401_v61  ;;  %6600 = vmatprep.subr.bf16.mxu1 %v15408_v63  ;;  %v15449_v61 = vcombine.low %v3689_v48, %v3693_v45  ;;  %v15456_v63 = vcombine.high %v3696_v22, %v3700_v3  ;;  %v3733_v33 = vld [vmem:[%s24730_s3 + $0x338] sm:$0xff]  ;;  %v3740_v47 = vld [vmem:[%s24730_s3 + $0x370] sm:$0xff] }
 0x2c6   :  { %6764 = vmatprep.subr.bf16.mxu0 %v15410_v17  ;;  %v15458_v17 = vcombine.high %v3697_v59, %v3701_v60  ;;  %v3737_v48 = vld [vmem:[%s24730_s3 + $0x358] sm:$0xff] }
 0x2c7   :  { %v3741_v45 = vld [vmem:[%s24730_s3 + $0x378] sm:$0xff] }
 0x2c8   :  { %6601 = vmatpush1.bf16.msra.mxu1 %v15407_v6  ;;  %v15455_v6 = vcombine.low %v3696_v22, %v3700_v3  ;;  %v3744_v22 = vld [vmem:[%s24730_s3 + $0x390] sm:$0xff] }
 0x2c9   :  { %6765 = vmatpush1.bf16.msra.mxu0 %v15409_v7  ;;  %6602 = vmatprep.subr.bf16.mxu1 %v15416_v8  ;;  %v15457_v7 = vcombine.low %v3697_v59, %v3701_v60  ;;  %v15464_v8 = vcombine.high %v3704_v0, %v3708_v2  ;;  %v3748_v3 = vld [vmem:[%s24730_s3 + $0x3b0] sm:$0xff]  ;;  %v3745_v59 = vld [vmem:[%s24730_s3 + $0x398] sm:$0xff] }
 0x2ca   :  { %6766 = vmatprep.subr.bf16.mxu0 %v15418_v31  ;;  %v15466_v31 = vcombine.high %v3705_v5, %v3709_v54  ;;  %v3749_v60 = vld [vmem:[%s24730_s3 + $0x3b8] sm:$0xff] }
 0x2cc   :  { %6603 = vmatpush1.bf16.msra.mxu1 %v15415_v38  ;;  %v15463_v38 = vcombine.low %v3704_v0, %v3708_v2  ;;  %v3752_v0 = vld [vmem:[%s24730_s3 + $0x3d0] sm:$0xff] }
 0x2cd   :  { %6767 = vmatpush1.bf16.msra.mxu0 %v15417_v13  ;;  %6604 = vmatprep.subr.bf16.mxu1 %v15424_v15  ;;  %v15465_v13 = vcombine.low %v3705_v5, %v3709_v54  ;;  %v15472_v15 = vcombine.high %v3712_v10, %v3716_v11  ;;  %v3756_v2 = vld [vmem:[%s24730_s3 + $0x3f0] sm:$0xff]  ;;  %v3753_v5 = vld [vmem:[%s24730_s3 + $0x3d8] sm:$0xff] }
 0x2ce   :  { %6768 = vmatprep.subr.bf16.mxu0 %v15426_v20  ;;  %v15474_v20 = vcombine.high %v3713_v12, %v3717_v52  ;;  %v3757_v54 = vld [vmem:[%s24730_s3 + $0x3f8] sm:$0xff] }
 0x2d0   :  { %6605 = vmatpush1.bf16.msra.mxu1 %v15423_v56  ;;  %v15471_v56 = vcombine.low %v3712_v10, %v3716_v11  ;;  %v3760_v10 = vld [vmem:[%s24730_s3 + $0x410] sm:$0xff] }
 0x2d1   :  { %6769 = vmatpush1.bf16.msra.mxu0 %v15425_v18  ;;  %6606 = vmatprep.subr.bf16.mxu1 %v15432_v28  ;;  %v15473_v18 = vcombine.low %v3713_v12, %v3717_v52  ;;  %v15480_v28 = vcombine.high %v3720_v62, %v3724_v21  ;;  %v3764_v11 = vld [vmem:[%s24730_s3 + $0x430] sm:$0xff]  ;;  %v3761_v12 = vld [vmem:[%s24730_s3 + $0x418] sm:$0xff] }
 0x2d2   :  { %6770 = vmatprep.subr.bf16.mxu0 %v15434_v29  ;;  %v15482_v29 = vcombine.high %v3721_v24, %v3725_v27  ;;  %v3765_v52 = vld [vmem:[%s24730_s3 + $0x438] sm:$0xff] }
 0x2d4   :  { %6607 = vmatpush1.bf16.msra.mxu1 %v15431_v35  ;;  %v15479_v35 = vcombine.low %v3720_v62, %v3724_v21  ;;  %v3768_v62 = vld [vmem:[%s24730_s3 + $0x450] sm:$0xff] }
 0x2d5   :  { %6771 = vmatpush1.bf16.msra.mxu0 %v15433_v37  ;;  %6608 = vmatprep.subr.bf16.mxu1 %v15440_v41  ;;  %v15481_v37 = vcombine.low %v3721_v24, %v3725_v27  ;;  %v15488_v41 = vcombine.high %v3728_v30, %v3732_v51  ;;  %v3772_v21 = vld [vmem:[%s24730_s3 + $0x470] sm:$0xff]  ;;  %v15519_v24 = vcombine.low %v3760_v10, %v3764_v11  ;;  %v3769_v27 = vld [vmem:[%s24730_s3 + $0x458] sm:$0xff] }
 0x2d6   :  { %6772 = vmatprep.subr.bf16.mxu0 %v15442_v26  ;;  %v15490_v26 = vcombine.high %v3729_v32, %v3733_v33 }
 0x2d8   :  { %6609 = vmatpush1.bf16.msra.mxu1 %v15439_v50  ;;  %v15487_v50 = vcombine.low %v3728_v30, %v3732_v51  ;;  %v3780_v30 = vld [vmem:[%s24730_s3 + $0x4b0] sm:$0xff] }
 0x2d9   :  { %6773 = vmatpush1.bf16.msra.mxu0 %v15441_v14  ;;  %6610 = vmatprep.subr.bf16.mxu1 %v15448_v57  ;;  %v15489_v14 = vcombine.low %v3729_v32, %v3733_v33  ;;  %v15496_v57 = vcombine.high %v3736_v46, %v3740_v47  ;;  %v3777_v32 = vld [vmem:[%s24730_s3 + $0x498] sm:$0xff] }
 0x2da   :  { %6774 = vmatprep.subr.bf16.mxu0 %v15450_v58  ;;  %v15498_v58 = vcombine.high %v3737_v48, %v3741_v45  ;;  %v3781_v33 = vld [vmem:[%s24730_s3 + $0x4b8] sm:$0xff] }
 0x2dc   :  { %6611 = vmatpush1.bf16.msra.mxu1 %v15447_v44  ;;  %v15495_v44 = vcombine.low %v3736_v46, %v3740_v47  ;;  %v3784_v46 = vld [vmem:[%s24730_s3 + $0x4d0] sm:$0xff] }
 0x2dd   :  { %6775 = vmatpush1.bf16.msra.mxu0 %v15449_v61  ;;  %6612 = vmatprep.subr.bf16.mxu1 %v15456_v63  ;;  %v15497_v61 = vcombine.low %v3737_v48, %v3741_v45  ;;  %v15504_v63 = vcombine.high %v3744_v22, %v3748_v3  ;;  %v3788_v47 = vld [vmem:[%s24730_s3 + $0x4f0] sm:$0xff]  ;;  %v3789_v48 = vld [vmem:[%s24730_s3 + $0x4f8] sm:$0xff]  ;;  %v15537_v45 = vcombine.low %v3777_v32, %v3781_v33 }
 0x2de   :  { %6776 = vmatprep.subr.bf16.mxu0 %v15458_v17  ;;  %v15506_v17 = vcombine.high %v3745_v59, %v3749_v60 }
 0x2e0   :  { %6613 = vmatpush1.bf16.msra.mxu1 %v15455_v6  ;;  %v15503_v6 = vcombine.low %v3744_v22, %v3748_v3  ;;  %v3793_v22 = vld [vmem:[%s24730_s3 + $0x518] sm:$0xff] }
 0x2e1   :  { %6777 = vmatpush1.bf16.msra.mxu0 %v15457_v7  ;;  %6614 = vmatprep.subr.bf16.mxu1 %v15464_v8  ;;  %v15505_v7 = vcombine.low %v3745_v59, %v3749_v60  ;;  %v15512_v8 = vcombine.high %v3752_v0, %v3756_v2  ;;  %v3797_v3 = vld [vmem:[%s24730_s3 + $0x538] sm:$0xff]  ;;  %v15543_v59 = vcombine.low %v3784_v46, %v3788_v47 }
 0x2e2   :  { %6778 = vmatprep.subr.bf16.mxu0 %v15466_v31  ;;  %v15514_v31 = vcombine.high %v3753_v5, %v3757_v54 }
 0x2e4   :  { %6615 = vmatpush1.bf16.msra.mxu1 %v15463_v38  ;;  %v15511_v38 = vcombine.low %v3752_v0, %v3756_v2  ;;  %v3801_v0 = vld [vmem:[%s24730_s3 + $0x558] sm:$0xff] }
 0x2e5   :  { %6779 = vmatpush1.bf16.msra.mxu0 %v15465_v13  ;;  %6616 = vmatprep.subr.bf16.mxu1 %v15472_v15  ;;  %v15513_v13 = vcombine.low %v3753_v5, %v3757_v54  ;;  %v15520_v15 = vcombine.high %v3760_v10, %v3764_v11  ;;  %v3805_v2 = vld [vmem:[%s24730_s3 + $0x578] sm:$0xff]  ;;  %v15553_v54 = vcombine.low %v3793_v22, %v3797_v3 }
 0x2e6   :  { %6780 = vmatprep.subr.bf16.mxu0 %v15474_v20  ;;  %v15522_v20 = vcombine.high %v3761_v12, %v3765_v52  ;;  %v3809_v10 = vld [vmem:[%s24730_s3 + $0x598] sm:$0xff] }
 0x2e7   :  { %v3813_v11 = vld [vmem:[%s24730_s3 + $0x5b8] sm:$0xff] }
 0x2e8   :  { %6617 = vmatpush1.bf16.msra.mxu1 %v15471_v56  ;;  %v3773_v56 = vld [vmem:[%s24730_s3 + $0x478] sm:$0xff] }
 0x2e9   :  { %6781 = vmatpush1.bf16.msra.mxu0 %v15473_v18  ;;  %6618 = vmatprep.subr.bf16.mxu1 %v15480_v28  ;;  %v15521_v18 = vcombine.low %v3761_v12, %v3765_v52  ;;  %v15528_v28 = vcombine.high %v3768_v62, %v3772_v21  ;;  %v15530_v51 = vcombine.high %v3769_v27, %v3773_v56 }
 0x2ea   :  { %6782 = vmatprep.subr.bf16.mxu0 %v15482_v29  ;;  %v3776_v29 = vld [vmem:[%s24730_s3 + $0x490] sm:$0xff]  ;;  %v15561_v52 = vcombine.low %v3801_v0, %v3805_v2 }
 0x2ec   :  { %6619 = vmatpush1.bf16.msra.mxu1 %v15479_v35  ;;  %v15527_v35 = vcombine.low %v3768_v62, %v3772_v21  ;;  %v3817_v62 = vld [vmem:[%s24730_s3 + $0x5d8] sm:$0xff] }
 0x2ed   :  { %6783 = vmatpush1.bf16.msra.mxu0 %v15481_v37  ;;  %6620 = vmatprep.subr.bf16.mxu1 %v15488_v41  ;;  %v15529_v37 = vcombine.low %v3769_v27, %v3773_v56  ;;  %v15536_v41 = vcombine.high %v3776_v29, %v3780_v30  ;;  %v3821_v21 = vld [vmem:[%s24730_s3 + $0x5f8] sm:$0xff]  ;;  %v15569_v27 = vcombine.low %v3809_v10, %v3813_v11 }
 0x2ee   :  { %6784 = vmatprep.subr.bf16.mxu0 %v15490_v26  ;;  %v15538_v26 = vcombine.high %v3777_v32, %v3781_v33  ;;  %v3832_v33 = vld [vmem:[%s24730_s3 + $0x650] sm:$0xff] }
 0x2f0   :  { %6621 = vmatpush1.bf16.msra.mxu1 %v15487_v50  ;;  %v15544_v50 = vcombine.high %v3784_v46, %v3788_v47  ;;  %v3833_v46 = vld [vmem:[%s24730_s3 + $0x658] sm:$0xff] }
 0x2f1   :  { %6785 = vmatpush1.bf16.msra.mxu0 %v15489_v14  ;;  %6622 = vmatprep.subr.bf16.mxu1 %v15496_v57  ;;  %v3792_v57 = vld [vmem:[%s24730_s3 + $0x510] sm:$0xff]  ;;  %v3837_v47 = vld [vmem:[%s24730_s3 + $0x678] sm:$0xff] }
 0x2f2   :  { %6786 = vmatprep.subr.bf16.mxu0 %v15498_v58  ;;  %v3796_v58 = vld [vmem:[%s24730_s3 + $0x530] sm:$0xff] }
 0x2f3   :  { %v15551_v5 = vcombine.low %v3792_v57, %v3796_v58 }
 0x2f4   :  { %6623 = vmatpush1.bf16.msra.mxu1 %v15495_v44  ;;  %v15552_v44 = vcombine.high %v3792_v57, %v3796_v58  ;;  %v3845_v57 = vld [vmem:[%s24730_s3 + $0x6b8] sm:$0xff]  ;;  %v15594_v58 = vcombine.high %v3833_v46, %v3837_v47 }
 0x2f5   :  { %6787 = vmatpush1.bf16.msra.mxu0 %v15497_v61  ;;  %6624 = vmatprep.subr.bf16.mxu1 %v15504_v63  ;;  %v15554_v61 = vcombine.high %v3793_v22, %v3797_v3  ;;  %v3800_v63 = vld [vmem:[%s24730_s3 + $0x550] sm:$0xff] }
 0x2f6   :  { %6788 = vmatprep.subr.bf16.mxu0 %v15506_v17  ;;  %v3804_v17 = vld [vmem:[%s24730_s3 + $0x570] sm:$0xff] }
 0x2f7   :  { %v15559_v12 = vcombine.low %v3800_v63, %v3804_v17  ;;  %v3848_v3 = vld [vmem:[%s24730_s3 + $0x6d0] sm:$0xff] }
 0x2f8   :  { %6625 = vmatpush1.bf16.msra.mxu1 %v15503_v6  ;;  %v15560_v6 = vcombine.high %v3800_v63, %v3804_v17  ;;  %v3853_v63 = vld [vmem:[%s24730_s3 + $0x6f8] sm:$0xff] }
 0x2f9   :  { %6789 = vmatpush1.bf16.msra.mxu0 %v15505_v7  ;;  %6626 = vmatprep.subr.bf16.mxu1 %v15512_v8  ;;  %v15562_v7 = vcombine.high %v3801_v0, %v3805_v2  ;;  %v3808_v8 = vld [vmem:[%s24730_s3 + $0x590] sm:$0xff] }
 0x2fa   :  { %6790 = vmatprep.subr.bf16.mxu0 %v15514_v31  ;;  %v3812_v31 = vld [vmem:[%s24730_s3 + $0x5b0] sm:$0xff] }
 0x2fb   :  { %v3856_v2 = vld [vmem:[%s24730_s3 + $0x710] sm:$0xff] }
 0x2fc   :  { %6627 = vmatpush1.bf16.msra.mxu1 %v15511_v38  ;;  %v15568_v38 = vcombine.high %v3808_v8, %v3812_v31 }
 0x2fd   :  { %6791 = vmatpush1.bf16.msra.mxu0 %v15513_v13  ;;  %6637 = vmatprep.subr.bf16.mxu1 %v15520_v15  ;;  %v15570_v13 = vcombine.high %v3809_v10, %v3813_v11  ;;  %v3816_v15 = vld [vmem:[%s24730_s3 + $0x5d0] sm:$0xff] }
 0x2fe   :  { %6801 = vmatprep.subr.bf16.mxu0 %v15522_v20  ;;  %v3820_v20 = vld [vmem:[%s24730_s3 + $0x5f0] sm:$0xff] }
 0x2ff   :  { %6629 = vmatmul.mubr.bf16.vlgmr.msra.gmra.mrb[28].mxu1 %v20416_v1  ;;  %v15576_v56 = vcombine.high %v3816_v15, %v3820_v20  ;;  %v15575_v32 = vcombine.low %v3816_v15, %v3820_v20  ;;  %v3864_v11 = vld [vmem:[%s24730_s3 + $0x750] sm:$0xff]  ;;  %v3869_v15 = vld [vmem:[%s24730_s3 + $0x778] sm:$0xff] }
 0x300   :  { %6793 = vmatmul.mubr.bf16.vlgmr.msra.gmra.mrb[12].mxu0 %v20416_v1  ;;  %6638 = vmatpush1.bf16.msra.mxu1 %v15519_v24  ;;  %v3785_v1 = vld [vmem:[%s24730_s3 + $0x4d8] sm:$0xff]  ;;  %v15567_v24 = vcombine.low %v3808_v8, %v3812_v31 }
 0x301   :  { %6669 = vmatprep.mubr.bf16.mxu1 %v20511_v9  ;;  %6802 = vmatpush1.bf16.msra.mxu0 %v15521_v18  ;;  %v15546_v14 = vcombine.high %v3785_v1, %v3789_v48  ;;  %v15545_v60 = vcombine.low %v3785_v1, %v3789_v48  ;;  %v15578_v18 = vcombine.high %v3817_v62, %v3821_v21  ;;  %v3840_v48 = vld [vmem:[%s24730_s3 + $0x690] sm:$0xff]  ;;  %v3861_v8 = vld [vmem:[%s24730_s3 + $0x738] sm:$0xff] }
 0x302   :  { %6833 = vmatprep.mubr.bf16.mxu0 %v20511_v9  ;;  %6639 = vmatprep.subr.bf16.mxu1 %v15528_v28  ;;  %v15535_v9 = vcombine.low %v3776_v29, %v3780_v30  ;;  %v3824_v28 = vld [vmem:[%s24730_s3 + $0x610] sm:$0xff]  ;;  %v3825_v30 = vld [vmem:[%s24730_s3 + $0x618] sm:$0xff] }
 0x303   :  { %6803 = vmatprep.subr.bf16.mxu0 %v15530_v51  ;;  %v3828_v29 = vld [vmem:[%s24730_s3 + $0x630] sm:$0xff]  ;;  %v3829_v51 = vld [vmem:[%s24730_s3 + $0x638] sm:$0xff] }
 0x304   :  { %6640 = vmatpush1.bf16.msra.mxu1 %v15527_v35  ;;  %v3836_v35 = vld [vmem:[%s24730_s3 + $0x670] sm:$0xff]  ;;  %v15583_v1 = vcombine.low %v3824_v28, %v3828_v29 }
 0x305   :  { %6804 = vmatpush1.bf16.msra.mxu0 %v15529_v37  ;;  %6641 = vmatprep.subr.bf16.mxu1 %v15536_v41  ;;  %v15577_v37 = vcombine.low %v3817_v62, %v3821_v21  ;;  %v15584_v41 = vcombine.high %v3824_v28, %v3828_v29  ;;  %v15591_v22 = vcombine.low %v3832_v33, %v3836_v35  ;;  %v3872_v21 = vld [vmem:[%s24730_s3 + $0x790] sm:$0xff]  ;;  %v3877_v28 = vld [vmem:[%s24730_s3 + $0x7b8] sm:$0xff] }
 0x306   :  { %6805 = vmatprep.subr.bf16.mxu0 %v15538_v26  ;;  %v15586_v26 = vcombine.high %v3825_v30, %v3829_v51 }
 0x308   :  { %6642 = vmatpush1.bf16.msra.mxu1 %v15535_v9  ;;  %v3844_v9 = vld [vmem:[%s24730_s3 + $0x6b0] sm:$0xff] }
 0x309   :  { %6806 = vmatpush1.bf16.msra.mxu0 %v15537_v45  ;;  %6643 = vmatprep.subr.bf16.mxu1 %v15544_v50  ;;  %v15585_v45 = vcombine.low %v3825_v30, %v3829_v51  ;;  %v15592_v50 = vcombine.high %v3832_v33, %v3836_v35  ;;  %v15599_v0 = vcombine.low %v3840_v48, %v3844_v9  ;;  %v3880_v51 = vld [vmem:[%s24730_s3 + $0x7d0] sm:$0xff] }
 0x30a   :  { %6807 = vmatprep.subr.bf16.mxu0 %v15546_v14  ;;  %v3841_v14 = vld [vmem:[%s24730_s3 + $0x698] sm:$0xff] }
 0x30b   :  { %v15602_v17 = vcombine.high %v3841_v14, %v3845_v57 }
 0x30c   :  { %6644 = vmatpush1.bf16.msra.mxu1 %v15543_v59  ;;  %v3852_v59 = vld [vmem:[%s24730_s3 + $0x6f0] sm:$0xff] }
 0x30d   :  { %6808 = vmatpush1.bf16.msra.mxu0 %v15545_v60  ;;  %6645 = vmatprep.subr.bf16.mxu1 %v15552_v44  ;;  %v15593_v60 = vcombine.low %v3833_v46, %v3837_v47  ;;  %v15600_v44 = vcombine.high %v3840_v48, %v3844_v9  ;;  %v15607_v10 = vcombine.low %v3848_v3, %v3852_v59  ;;  %v3888_v47 = vld [vmem:[%s24730_s3 + $0x810] sm:$0xff] }
 0x30e   :  { %6809 = vmatprep.subr.bf16.mxu0 %v15554_v61  ;;  %v3849_v61 = vld [vmem:[%s24730_s3 + $0x6d8] sm:$0xff] }
 0x30f   :  { %v15610_v31 = vcombine.high %v3849_v61, %v3853_v63 }
 0x310   :  { %6646 = vmatpush1.bf16.msra.mxu1 %v15551_v5  ;;  %v3860_v5 = vld [vmem:[%s24730_s3 + $0x730] sm:$0xff] }
 0x311   :  { %6810 = vmatpush1.bf16.msra.mxu0 %v15553_v54  ;;  %6647 = vmatprep.subr.bf16.mxu1 %v15560_v6  ;;  %v15601_v54 = vcombine.low %v3841_v14, %v3845_v57  ;;  %v15608_v6 = vcombine.high %v3848_v3, %v3852_v59  ;;  %v15615_v62 = vcombine.low %v3856_v2, %v3860_v5  ;;  %v3893_v14 = vld [vmem:[%s24730_s3 + $0x838] sm:$0xff]  ;;  %v3896_v3 = vld [vmem:[%s24730_s3 + $0x850] sm:$0xff] }
 0x312   :  { %6811 = vmatprep.subr.bf16.mxu0 %v15562_v7  ;;  %v3857_v7 = vld [vmem:[%s24730_s3 + $0x718] sm:$0xff]  ;;  %v3900_v59 = vld [vmem:[%s24730_s3 + $0x870] sm:$0xff] }
 0x313   :  { %v15618_v20 = vcombine.high %v3857_v7, %v3861_v8 }
 0x314   :  { %6648 = vmatpush1.bf16.msra.mxu1 %v15559_v12  ;;  %v3868_v12 = vld [vmem:[%s24730_s3 + $0x770] sm:$0xff] }
 0x315   :  { %6812 = vmatpush1.bf16.msra.mxu0 %v15561_v52  ;;  %6649 = vmatprep.subr.bf16.mxu1 %v15568_v38  ;;  %v15609_v52 = vcombine.low %v3849_v61, %v3853_v63  ;;  %v15616_v38 = vcombine.high %v3856_v2, %v3860_v5  ;;  %v15623_v30 = vcombine.low %v3864_v11, %v3868_v12  ;;  %v3901_v61 = vld [vmem:[%s24730_s3 + $0x878] sm:$0xff] }
 0x316   :  { %6813 = vmatprep.subr.bf16.mxu0 %v15570_v13  ;;  %v3865_v13 = vld [vmem:[%s24730_s3 + $0x758] sm:$0xff] }
 0x317   :  { %v15626_v29 = vcombine.high %v3865_v13, %v3869_v15  ;;  %v15625_v33 = vcombine.low %v3865_v13, %v3869_v15  ;;  %v3905_v5 = vld [vmem:[%s24730_s3 + $0x898] sm:$0xff]  ;;  %v3920_v15 = vld [vmem:[%s24730_s3 + $0x910] sm:$0xff] }
 0x318   :  { %6650 = vmatpush1.bf16.msra.mxu1 %v15567_v24  ;;  %v3876_v24 = vld [vmem:[%s24730_s3 + $0x7b0] sm:$0xff] }
 0x319   :  { %6814 = vmatpush1.bf16.msra.mxu0 %v15569_v27  ;;  %6651 = vmatprep.subr.bf16.mxu1 %v15576_v56  ;;  %v15617_v27 = vcombine.low %v3857_v7, %v3861_v8  ;;  %v15624_v56 = vcombine.high %v3864_v11, %v3868_v12  ;;  %v15632_v35 = vcombine.high %v3872_v21, %v3876_v24 }
 0x31a   :  { %6815 = vmatprep.subr.bf16.mxu0 %v15578_v18  ;;  %v3873_v18 = vld [vmem:[%s24730_s3 + $0x798] sm:$0xff]  ;;  %v15631_v46 = vcombine.low %v3872_v21, %v3876_v24  ;;  %v15655_v8 = vcombine.low %v3896_v3, %v3900_v59 }
 0x31b   :  { %v15633_v48 = vcombine.low %v3873_v18, %v3877_v28  ;;  %v3925_v24 = vld [vmem:[%s24730_s3 + $0x938] sm:$0xff] }
 0x31c   :  { %6652 = vmatpush1.bf16.msra.mxu1 %v15575_v32  ;;  %v3884_v32 = vld [vmem:[%s24730_s3 + $0x7f0] sm:$0xff] }
 0x31d   :  { %6816 = vmatpush1.bf16.msra.mxu0 %v15577_v37  ;;  %6653 = vmatprep.subr.bf16.mxu1 %v15584_v41  ;;  %v3881_v37 = vld [vmem:[%s24730_s3 + $0x7d8] sm:$0xff]  ;;  %v15640_v9 = vcombine.high %v3880_v51, %v3884_v32  ;;  %v15639_v57 = vcombine.low %v3880_v51, %v3884_v32 }
 0x31e   :  { %6817 = vmatprep.subr.bf16.mxu0 %v15586_v26  ;;  %v3885_v41 = vld [vmem:[%s24730_s3 + $0x7f8] sm:$0xff]  ;;  %v15634_v26 = vcombine.high %v3873_v18, %v3877_v28  ;;  %v3928_v18 = vld [vmem:[%s24730_s3 + $0x950] sm:$0xff] }
 0x31f   :  { %v3929_v32 = vld [vmem:[%s24730_s3 + $0x958] sm:$0xff] }
 0x320   :  { %6654 = vmatpush1.bf16.msra.mxu1 %v15583_v1  ;;  %v3892_v1 = vld [vmem:[%s24730_s3 + $0x830] sm:$0xff] }
 0x321   :  { %6818 = vmatpush1.bf16.msra.mxu0 %v15585_v45  ;;  %6655 = vmatprep.subr.bf16.mxu1 %v15592_v50  ;;  %v15642_v45 = vcombine.high %v3881_v37, %v3885_v41  ;;  %v3889_v50 = vld [vmem:[%s24730_s3 + $0x818] sm:$0xff]  ;;  %v15647_v63 = vcombine.low %v3888_v47, %v3892_v1 }
 0x322   :  { %6819 = vmatprep.subr.bf16.mxu0 %v15594_v58  ;;  %v15641_v58 = vcombine.low %v3881_v37, %v3885_v41  ;;  %v15649_v2 = vcombine.low %v3889_v50, %v3893_v14 }
 0x324   :  { %6656 = vmatpush1.bf16.msra.mxu1 %v15591_v22  ;;  %v15648_v22 = vcombine.high %v3888_v47, %v3892_v1  ;;  %v3940_v47 = vld [vmem:[%s24730_s3 + $0x9b0] sm:$0xff]  ;;  %v3937_v1 = vld [vmem:[%s24730_s3 + $0x998] sm:$0xff] }
 0x325   :  { %6820 = vmatpush1.bf16.msra.mxu0 %v15593_v60  ;;  %6657 = vmatprep.subr.bf16.mxu1 %v15600_v44  ;;  %v15650_v60 = vcombine.high %v3889_v50, %v3893_v14  ;;  %v3897_v44 = vld [vmem:[%s24730_s3 + $0x858] sm:$0xff] }
 0x326   :  { %6821 = vmatprep.subr.bf16.mxu0 %v15602_v17  ;;  %v3904_v17 = vld [vmem:[%s24730_s3 + $0x890] sm:$0xff]  ;;  %v15658_v7 = vcombine.high %v3897_v44, %v3901_v61  ;;  %v15657_v11 = vcombine.low %v3897_v44, %v3901_v61 }
 0x328   :  { %6658 = vmatpush1.bf16.msra.mxu1 %v15599_v0  ;;  %v3908_v0 = vld [vmem:[%s24730_s3 + $0x8b0] sm:$0xff] }
 0x329   :  { %6822 = vmatpush1.bf16.msra.mxu0 %v15601_v54  ;;  %6659 = vmatprep.subr.bf16.mxu1 %v15608_v6  ;;  %v3909_v54 = vld [vmem:[%s24730_s3 + $0x8b8] sm:$0xff]  ;;  %v15656_v6 = vcombine.high %v3896_v3, %v3900_v59  ;;  %v15664_v12 = vcombine.high %v3904_v17, %v3908_v0  ;;  %v15663_v13 = vcombine.low %v3904_v17, %v3908_v0  ;;  %v3956_v17 = vld [vmem:[%s24730_s3 + $0xa30] sm:$0xff] }
 0x32a   :  { %6823 = vmatprep.subr.bf16.mxu0 %v15610_v31  ;;  %v3912_v31 = vld [vmem:[%s24730_s3 + $0x8d0] sm:$0xff]  ;;  %v3949_v3 = vld [vmem:[%s24730_s3 + $0x9f8] sm:$0xff] }
 0x32b   :  { %v3953_v0 = vld [vmem:[%s24730_s3 + $0xa18] sm:$0xff] }
 0x32c   :  { %6660 = vmatpush1.bf16.msra.mxu1 %v15607_v10  ;;  %v3916_v10 = vld [vmem:[%s24730_s3 + $0x8f0] sm:$0xff] }
 0x32d   :  { %6824 = vmatpush1.bf16.msra.mxu0 %v15609_v52  ;;  %6661 = vmatprep.subr.bf16.mxu1 %v15616_v38  ;;  %v3913_v52 = vld [vmem:[%s24730_s3 + $0x8d8] sm:$0xff]  ;;  %v15666_v38 = vcombine.high %v3905_v5, %v3909_v54  ;;  %v15672_v21 = vcombine.high %v3912_v31, %v3916_v10 }
 0x32e   :  { %6825 = vmatprep.subr.bf16.mxu0 %v15618_v20  ;;  %v3924_v20 = vld [vmem:[%s24730_s3 + $0x930] sm:$0xff] }
 0x330   :  { %6662 = vmatpush1.bf16.msra.mxu1 %v15615_v62  ;;  %v15665_v62 = vcombine.low %v3905_v5, %v3909_v54 }
 0x331   :  { %6826 = vmatpush1.bf16.msra.mxu0 %v15617_v27  ;;  %6663 = vmatprep.subr.bf16.mxu1 %v15624_v56  ;;  %v15671_v56 = vcombine.low %v3912_v31, %v3916_v10  ;;  %v3964_v31 = vld [vmem:[%s24730_s3 + $0xa70] sm:$0xff]  ;;  %v3961_v10 = vld [vmem:[%s24730_s3 + $0xa58] sm:$0xff] }
 0x332   :  { %6827 = vmatprep.subr.bf16.mxu0 %v15626_v29  ;;  %v15680_v29 = vcombine.high %v3920_v15, %v3924_v20 }
 0x334   :  { %6664 = vmatpush1.bf16.msra.mxu1 %v15623_v30  ;;  %v3932_v30 = vld [vmem:[%s24730_s3 + $0x970] sm:$0xff] }
 0x335   :  { %6828 = vmatpush1.bf16.msra.mxu0 %v15625_v33  ;;  %6665 = vmatprep.subr.bf16.mxu1 %v15632_v35  ;;  %v3933_v33 = vld [vmem:[%s24730_s3 + $0x978] sm:$0xff]  ;;  %v15679_v35 = vcombine.low %v3920_v15, %v3924_v20  ;;  %v15688_v41 = vcombine.high %v3928_v18, %v3932_v30  ;;  %v3972_v15 = vld [vmem:[%s24730_s3 + $0xab0] sm:$0xff] }
 0x336   :  { %6829 = vmatprep.subr.bf16.mxu0 %v15634_v26  ;;  %v15690_v26 = vcombine.high %v3929_v32, %v3933_v33  ;;  %v3969_v20 = vld [vmem:[%s24730_s3 + $0xa98] sm:$0xff] }
 0x338   :  { %6666 = vmatpush1.bf16.msra.mxu1 %v15631_v46  ;;  %v3936_v46 = vld [vmem:[%s24730_s3 + $0x990] sm:$0xff] }
 0x339   :  { %6830 = vmatpush1.bf16.msra.mxu0 %v15633_v48  ;;  %6667 = vmatprep.subr.bf16.mxu1 %v15640_v9  ;;  %v3941_v48 = vld [vmem:[%s24730_s3 + $0x9b8] sm:$0xff]  ;;  %v15687_v9 = vcombine.low %v3928_v18, %v3932_v30  ;;  %v15696_v50 = vcombine.high %v3936_v46, %v3940_v47  ;;  %v15695_v59 = vcombine.low %v3936_v46, %v3940_v47  ;;  %v3980_v18 = vld [vmem:[%s24730_s3 + $0xaf0] sm:$0xff] }
 0x33a   :  { %6831 = vmatprep.subr.bf16.mxu0 %v15642_v45  ;;  %v15689_v45 = vcombine.low %v3929_v32, %v3933_v33  ;;  %v15698_v14 = vcombine.high %v3937_v1, %v3941_v48 }
 0x33c   :  { %6668 = vmatpush1.bf16.msra.mxu1 %v15639_v57  ;;  %v3944_v57 = vld [vmem:[%s24730_s3 + $0x9d0] sm:$0xff] }
 0x33d   :  { %6832 = vmatpush1.bf16.msra.mxu0 %v15641_v58  ;;  %6678 = vmatprep.subr.bf16.mxu1 %v15648_v22  ;;  %v3948_v58 = vld [vmem:[%s24730_s3 + $0x9f0] sm:$0xff]  ;;  %v3945_v22 = vld [vmem:[%s24730_s3 + $0x9d8] sm:$0xff] }
 0x33e   :  { %6842 = vmatprep.subr.bf16.mxu0 %v15650_v60  ;;  %v15697_v60 = vcombine.low %v3937_v1, %v3941_v48  ;;  %v15704_v44 = vcombine.high %v3944_v57, %v3948_v58  ;;  %v15706_v61 = vcombine.high %v3945_v22, %v3949_v3  ;;  %v15703_v5 = vcombine.low %v3944_v57, %v3948_v58 }
 0x33f   :  { %6670 = vmatmul.mubr.bf16.vlgmr.msra.gmra.mrb[28].mxu1 %v20631_v42  ;;  %v15705_v54 = vcombine.low %v3945_v22, %v3949_v3 }
 0x340   :  { %6834 = vmatmul.mubr.bf16.vlgmr.msra.gmra.mrb[12].mxu0 %v20631_v42  ;;  %6679 = vmatpush1.bf16.msra.mxu1 %v15647_v63  ;;  %v3917_v42 = vld [vmem:[%s24730_s3 + $0x8f8] sm:$0xff]  ;;  %v3952_v63 = vld [vmem:[%s24730_s3 + $0xa10] sm:$0xff] }
 0x341   :  { %6710 = vmatprep.mubr.bf16.mxu1 %v20853_v25  ;;  %6843 = vmatpush1.bf16.msra.mxu0 %v15649_v2  ;;  %v15674_v27 = vcombine.high %v3913_v52, %v3917_v42  ;;  %v15673_v28 = vcombine.low %v3913_v52, %v3917_v42  ;;  %v3957_v2 = vld [vmem:[%s24730_s3 + $0xa38] sm:$0xff] }
 0x342   :  { %6874 = vmatprep.mubr.bf16.mxu0 %v20853_v25  ;;  %6680 = vmatprep.subr.bf16.mxu1 %v15656_v6  ;;  %v3921_v25 = vld [vmem:[%s24730_s3 + $0x918] sm:$0xff]  ;;  %v15712_v6 = vcombine.high %v3952_v63, %v3956_v17  ;;  %v15713_v52 = vcombine.low %v3953_v0, %v3957_v2 }
 0x343   :  { %6844 = vmatprep.subr.bf16.mxu0 %v15658_v7  ;;  %v15682_v51 = vcombine.high %v3921_v25, %v3925_v24  ;;  %v15681_v37 = vcombine.low %v3921_v25, %v3925_v24  ;;  %v15714_v7 = vcombine.high %v3953_v0, %v3957_v2 }
 0x344   :  { %6681 = vmatpush1.bf16.msra.mxu1 %v15655_v8  ;;  %v3960_v8 = vld [vmem:[%s24730_s3 + $0xa50] sm:$0xff] }
 0x345   :  { %6845 = vmatpush1.bf16.msra.mxu0 %v15657_v11  ;;  %6682 = vmatprep.subr.bf16.mxu1 %v15664_v12  ;;  %v3965_v11 = vld [vmem:[%s24730_s3 + $0xa78] sm:$0xff]  ;;  %v15711_v12 = vcombine.low %v3952_v63, %v3956_v17  ;;  %v15720_v42 = vcombine.high %v3960_v8, %v3964_v31 }
 0x346   :  { %6846 = vmatprep.subr.bf16.mxu0 %v15666_v38  ;;  %v15722_v38 = vcombine.high %v3961_v10, %v3965_v11  ;;  %v15721_v25 = vcombine.low %v3961_v10, %v3965_v11 }
 0x348   :  { %6683 = vmatpush1.bf16.msra.mxu1 %v15663_v13  ;;  %v3968_v13 = vld [vmem:[%s24730_s3 + $0xa90] sm:$0xff] }
 0x349   :  { %6847 = vmatpush1.bf16.msra.mxu0 %v15665_v62  ;;  %6684 = vmatprep.subr.bf16.mxu1 %v15672_v21  ;;  %v3973_v62 = vld [vmem:[%s24730_s3 + $0xab8] sm:$0xff]  ;;  %v15719_v21 = vcombine.low %v3960_v8, %v3964_v31  ;;  %v15728_v24 = vcombine.high %v3968_v13, %v3972_v15  ;;  %v15727_v30 = vcombine.low %v3968_v13, %v3972_v15 }
 0x34a   :  { %6848 = vmatprep.subr.bf16.mxu0 %v15674_v27  ;;  %v15730_v27 = vcombine.high %v3969_v20, %v3973_v62 }
 0x34c   :  { %6685 = vmatpush1.bf16.msra.mxu1 %v15671_v56  ;;  %v3976_v56 = vld [vmem:[%s24730_s3 + $0xad0] sm:$0xff] }
 0x34d   :  { %6849 = vmatpush1.bf16.msra.mxu0 %v15673_v28  ;;  %6686 = vmatprep.subr.bf16.mxu1 %v15680_v29  ;;  %v3977_v28 = vld [vmem:[%s24730_s3 + $0xad8] sm:$0xff]  ;;  %v15736_v32 = vcombine.high %v3976_v56, %v3980_v18  ;;  %v15735_v46 = vcombine.low %v3976_v56, %v3980_v18 }
 0x34e   :  { %6850 = vmatprep.subr.bf16.mxu0 %v15682_v51  ;;  %v3981_v29 = vld [vmem:[%s24730_s3 + $0xaf8] sm:$0xff]  ;;  %v15729_v51 = vcombine.low %v3969_v20, %v3973_v62 }
 0x34f   :  { %v15738_v33 = vcombine.high %v3977_v28, %v3981_v29  ;;  %v15737_v47 = vcombine.low %v3977_v28, %v3981_v29 }
 0x350   :  { %6687 = vmatpush1.bf16.msra.mxu1 %v15679_v35  ;;  %v3984_v35 = vld [vmem:[%s24730_s3 + $0xb10] sm:$0xff] }
 0x351   :  { %6851 = vmatpush1.bf16.msra.mxu0 %v15681_v37  ;;  %6688 = vmatprep.subr.bf16.mxu1 %v15688_v41  ;;  %v3988_v37 = vld [vmem:[%s24730_s3 + $0xb30] sm:$0xff]  ;;  %v3985_v41 = vld [vmem:[%s24730_s3 + $0xb18] sm:$0xff] }
 0x352   :  { %6852 = vmatprep.subr.bf16.mxu0 %v15690_v26  ;;  %v3989_v26 = vld [vmem:[%s24730_s3 + $0xb38] sm:$0xff]  ;;  %v15744_v1 = vcombine.high %v3984_v35, %v3988_v37  ;;  %v15743_v57 = vcombine.low %v3984_v35, %v3988_v37 }
 0x353   :  { %v15746_v48 = vcombine.high %v3985_v41, %v3989_v26  ;;  %v15745_v58 = vcombine.low %v3985_v41, %v3989_v26 }
 0x354   :  { %6689 = vmatpush1.bf16.msra.mxu1 %v15687_v9  ;;  %v3992_v9 = vld [vmem:[%s24730_s3 + $0xb50] sm:$0xff] }
 0x355   :  { %6853 = vmatpush1.bf16.msra.mxu0 %v15689_v45  ;;  %6690 = vmatprep.subr.bf16.mxu1 %v15696_v50  ;;  %v3996_v45 = vld [vmem:[%s24730_s3 + $0xb70] sm:$0xff]  ;;  %v3993_v50 = vld [vmem:[%s24730_s3 + $0xb58] sm:$0xff] }
 0x356   :  { %6854 = vmatprep.subr.bf16.mxu0 %v15698_v14  ;;  %v3997_v14 = vld [vmem:[%s24730_s3 + $0xb78] sm:$0xff]  ;;  %v15752_v22 = vcombine.high %v3992_v9, %v3996_v45  ;;  %v15751_v63 = vcombine.low %v3992_v9, %v3996_v45 }
 0x357   :  { %v15754_v3 = vcombine.high %v3993_v50, %v3997_v14  ;;  %v15753_v17 = vcombine.low %v3993_v50, %v3997_v14  ;;  %v4048_v14 = vld [vmem:[%s24730_s3 + $0xd10] sm:$0xff] }
 0x358   :  { %6691 = vmatpush1.bf16.msra.mxu1 %v15695_v59  ;;  %v4000_v59 = vld [vmem:[%s24730_s3 + $0xb90] sm:$0xff] }
 0x359   :  { %6855 = vmatpush1.bf16.msra.mxu0 %v15697_v60  ;;  %6692 = vmatprep.subr.bf16.mxu1 %v15704_v44  ;;  %v4004_v60 = vld [vmem:[%s24730_s3 + $0xbb0] sm:$0xff]  ;;  %v4001_v44 = vld [vmem:[%s24730_s3 + $0xb98] sm:$0xff] }
 0x35a   :  { %6856 = vmatprep.subr.bf16.mxu0 %v15706_v61  ;;  %v4005_v61 = vld [vmem:[%s24730_s3 + $0xbb8] sm:$0xff]  ;;  %v15760_v0 = vcombine.high %v4000_v59, %v4004_v60  ;;  %v15759_v8 = vcombine.low %v4000_v59, %v4004_v60 }
 0x35b   :  { %v15762_v2 = vcombine.high %v4001_v44, %v4005_v61  ;;  %v15761_v31 = vcombine.low %v4001_v44, %v4005_v61  ;;  %v4056_v61 = vld [vmem:[%s24730_s3 + $0xd50] sm:$0xff] }
 0x35c   :  { %6693 = vmatpush1.bf16.msra.mxu1 %v15703_v5  ;;  %v4008_v5 = vld [vmem:[%s24730_s3 + $0xbd0] sm:$0xff] }
 0x35d   :  { %6857 = vmatpush1.bf16.msra.mxu0 %v15705_v54  ;;  %6694 = vmatprep.subr.bf16.mxu1 %v15712_v6  ;;  %v4012_v54 = vld [vmem:[%s24730_s3 + $0xbf0] sm:$0xff]  ;;  %v4009_v6 = vld [vmem:[%s24730_s3 + $0xbd8] sm:$0xff] }
 0x35e   :  { %6858 = vmatprep.subr.bf16.mxu0 %v15714_v7  ;;  %v4013_v7 = vld [vmem:[%s24730_s3 + $0xbf8] sm:$0xff]  ;;  %v15768_v10 = vcombine.high %v4008_v5, %v4012_v54  ;;  %v15767_v13 = vcombine.low %v4008_v5, %v4012_v54  ;;  %v21583_v54 = vld [vmem:[%s24732_s4] sm:$0xff] }
 0x35f   :  { %v15770_v11 = vcombine.high %v4009_v6, %v4013_v7  ;;  %v15769_v15 = vcombine.low %v4009_v6, %v4013_v7 }
 0x360   :  { %6695 = vmatpush1.bf16.msra.mxu1 %v15711_v12  ;;  %v4016_v12 = vld [vmem:[%s24730_s3 + $0xc10] sm:$0xff] }
 0x361   :  { %6859 = vmatpush1.bf16.msra.mxu0 %v15713_v52  ;;  %6696 = vmatprep.subr.bf16.mxu1 %v15720_v42  ;;  %v4020_v52 = vld [vmem:[%s24730_s3 + $0xc30] sm:$0xff]  ;;  %v4017_v42 = vld [vmem:[%s24730_s3 + $0xc18] sm:$0xff] }
 0x362   :  { %6860 = vmatprep.subr.bf16.mxu0 %v15722_v38  ;;  %v4021_v38 = vld [vmem:[%s24730_s3 + $0xc38] sm:$0xff]  ;;  %v15776_v20 = vcombine.high %v4016_v12, %v4020_v52  ;;  %v15775_v56 = vcombine.low %v4016_v12, %v4020_v52 }
 0x363   :  { %v15778_v62 = vcombine.high %v4017_v42, %v4021_v38  ;;  %v15777_v18 = vcombine.low %v4017_v42, %v4021_v38 }
 0x364   :  { %6697 = vmatpush1.bf16.msra.mxu1 %v15719_v21  ;;  %v4024_v21 = vld [vmem:[%s24730_s3 + $0xc50] sm:$0xff] }
 0x365   :  { %6861 = vmatpush1.bf16.msra.mxu0 %v15721_v25  ;;  %6698 = vmatprep.subr.bf16.mxu1 %v15728_v24  ;;  %v4028_v25 = vld [vmem:[%s24730_s3 + $0xc70] sm:$0xff]  ;;  %v4025_v24 = vld [vmem:[%s24730_s3 + $0xc58] sm:$0xff] }
 0x366   :  { %6862 = vmatprep.subr.bf16.mxu0 %v15730_v27  ;;  %v4029_v27 = vld [vmem:[%s24730_s3 + $0xc78] sm:$0xff]  ;;  %v15784_v28 = vcombine.high %v4024_v21, %v4028_v25  ;;  %v15783_v35 = vcombine.low %v4024_v21, %v4028_v25 }
 0x367   :  { %v15786_v29 = vcombine.high %v4025_v24, %v4029_v27  ;;  %v15785_v37 = vcombine.low %v4025_v24, %v4029_v27  ;;  %v17923_v24 = vld [vmem:[%s24731_s5 + $0x48] sm:$0xff]  }
 0x368   :  { %6699 = vmatpush1.bf16.msra.mxu1 %v15727_v30  ;;  %v4032_v30 = vld [vmem:[%s24730_s3 + $0xc90] sm:$0xff] }
 0x369   :  { %6863 = vmatpush1.bf16.msra.mxu0 %v15729_v51  ;;  %6700 = vmatprep.subr.bf16.mxu1 %v15736_v32  ;;  %v4036_v51 = vld [vmem:[%s24730_s3 + $0xcb0] sm:$0xff]  ;;  %v4033_v32 = vld [vmem:[%s24730_s3 + $0xc98] sm:$0xff] }
 0x36a   :  { %6864 = vmatprep.subr.bf16.mxu0 %v15738_v33  ;;  %v4037_v33 = vld [vmem:[%s24730_s3 + $0xcb8] sm:$0xff]  ;;  %v15792_v41 = vcombine.high %v4032_v30, %v4036_v51 }
 0x36b   :  { %v15794_v26 = vcombine.high %v4033_v32, %v4037_v33  ;;  %v15793_v9 = vcombine.low %v4033_v32, %v4037_v33  ;;  %v17930_v32 = vld [vmem:[%s24731_s5 + $0x20] sm:$0xff]   ;;  %v17931_v33 = vld [vmem:[%s24731_s5 + $0x68] sm:$0xff]  }
 0x36c   :  { %6701 = vmatpush1.bf16.msra.mxu1 %v15735_v46  ;;  %v4040_v46 = vld [vmem:[%s24730_s3 + $0xcd0] sm:$0xff] }
 0x36d   :  { %6865 = vmatpush1.bf16.msra.mxu0 %v15737_v47  ;;  %6702 = vmatprep.subr.bf16.mxu1 %v15744_v1  ;;  %v4044_v47 = vld [vmem:[%s24730_s3 + $0xcf0] sm:$0xff]  ;;  %v4045_v1 = vld [vmem:[%s24730_s3 + $0xcf8] sm:$0xff] }
 0x36e   :  { %6866 = vmatprep.subr.bf16.mxu0 %v15746_v48  ;;  %v15791_v48 = vcombine.low %v4032_v30, %v4036_v51  ;;  %v15800_v45 = vcombine.high %v4040_v46, %v4044_v47  ;;  %v17928_v30 = vld [vmem:[%s24731_s5 + $0x18] sm:$0xff]   ;;  %v17929_v51 = vld [vmem:[%s24731_s5 + $0x60] sm:$0xff]  }
 0x370   :  { %6703 = vmatpush1.bf16.msra.mxu1 %v15743_v57  ;;  %v4052_v57 = vld [vmem:[%s24730_s3 + $0xd30] sm:$0xff] }
 0x371   :  { %6867 = vmatpush1.bf16.msra.mxu0 %v15745_v58  ;;  %6704 = vmatprep.subr.bf16.mxu1 %v15752_v22  ;;  %v4049_v58 = vld [vmem:[%s24730_s3 + $0xd18] sm:$0xff]  ;;  %v15808_v60 = vcombine.high %v4048_v14, %v4052_v57 }
 0x372   :  { %6868 = vmatprep.subr.bf16.mxu0 %v15754_v3  ;;  %v4053_v22 = vld [vmem:[%s24730_s3 + $0xd38] sm:$0xff]  ;;  %v15799_v3 = vcombine.low %v4040_v46, %v4044_v47  ;;  %v17934_v46 = vld [vmem:[%s24731_s5 + $0x30] sm:$0xff]  }
 0x373   :  { %v15810_v44 = vcombine.high %v4049_v58, %v4053_v22  ;;  %v15809_v5 = vcombine.low %v4049_v58, %v4053_v22  ;;  %v17939_v58 = vld [vmem:[%s24731_s5 + $0xc8] sm:$0xff]  }
 0x374   :  { %6705 = vmatpush1.bf16.msra.mxu1 %v15751_v63  ;;  %v4060_v63 = vld [vmem:[%s24730_s3 + $0xd70] sm:$0xff] }
 0x375   :  { %6869 = vmatpush1.bf16.msra.mxu0 %v15753_v17  ;;  %6706 = vmatprep.subr.bf16.mxu1 %v15760_v0  ;;  %v4057_v17 = vld [vmem:[%s24730_s3 + $0xd58] sm:$0xff]  ;;  %v15816_v6 = vcombine.high %v4056_v61, %v4060_v63 }
 0x376   :  { %6870 = vmatprep.subr.bf16.mxu0 %v15762_v2  ;;  %v4061_v0 = vld [vmem:[%s24730_s3 + $0xd78] sm:$0xff]  ;;  %v15807_v2 = vcombine.low %v4048_v14, %v4052_v57  ;;  %v17938_v14 = vld [vmem:[%s24731_s5 + $0x80] sm:$0xff]  }
 0x377   :  { %v15818_v7 = vcombine.high %v4057_v17, %v4061_v0 }
 0x378   :  { %6707 = vmatpush1.bf16.msra.mxu1 %v15759_v8  ;;  %v4071_v8 = vrot.slane %v21583_v54, %v20040_v39 }
 0x379   :  { %6871 = vmatpush1.bf16.msra.mxu0 %v15761_v31  ;;  %6708 = vmatprep.subr.bf16.mxu1 %v15768_v10  ;;  %v15815_v31 = vcombine.low %v4056_v61, %v4060_v63  ;;  %v15817_v10 = vcombine.low %v4057_v17, %v4061_v0  ;;  %v17944_v61 = vld [vmem:[%s24731_s5 + $0x98] sm:$0xff]   ;;  %v17945_v63 = vld [vmem:[%s24731_s5 + $0xe0] sm:$0xff]   ;;  %v17947_v0 = vld [vmem:[%s24731_s5 + $0xe8] sm:$0xff]  }
 0x37a   :  { %6872 = vmatprep.subr.bf16.mxu0 %v15770_v11  ;;  %v17921_v11 = vld [vmem:[%s24731_s5 + $0x40] sm:$0xff]  }
 0x37b   :  { %v17946_v17 = vld [vmem:[%s24731_s5 + $0xa0] sm:$0xff]  }
 0x37c   :  { %6709 = vmatpush1.bf16.msra.mxu1 %v15767_v13 }
 0x37d   :  { %6873 = vmatpush1.bf16.msra.mxu0 %v15769_v15  ;;  %6719 = vmatprep.subr.bf16.mxu1 %v15776_v20 }
 0x37e   :  { %6883 = vmatprep.subr.bf16.mxu0 %v15778_v62  ;;  %v17922_v62 = vld [vmem:[%s24731_s5] sm:$0xff]  }
 0x37f   :  { %6711 = vmatmul.mubr.bf16.vlgmr.msra.gmra.mrb[28].mxu1 %v20855_v53 }
 0x380   :  { %6875 = vmatmul.mubr.bf16.vlgmr.msra.gmra.mrb[12].mxu0 %v20855_v53  ;;  %6720 = vmatpush1.bf16.msra.mxu1 %v15775_v56  ;;  %v4041_v53 = vld [vmem:[%s24730_s3 + $0xcd8] sm:$0xff] }
 0x381   :  { %6884 = vmatpush1.bf16.msra.mxu0 %v15777_v18  ;;  %6721 = vmatprep.subr.bf16.mxu1 %v15784_v28  ;;  %v15802_v50 = vcombine.high %v4041_v53, %v4045_v1  ;;  %v15801_v59 = vcombine.low %v4041_v53, %v4045_v1  ;;  %v17924_v18 = vld [vmem:[%s24731_s5 + $0x8] sm:$0xff]   ;;  %v17925_v28 = vld [vmem:[%s24731_s5 + $0x50] sm:$0xff]   ;;  %v17935_v53 = vld [vmem:[%s24731_s5 + $0x78] sm:$0xff]  }
 0x382   :  { %6885 = vmatprep.subr.bf16.mxu0 %v15786_v29  ;;  %6751 = vmatprep.mubr.bf16.mxu1 %v18652_v4  ;;  %v17926_v29 = vld [vmem:[%s24731_s5 + $0x10] sm:$0xff]  }
 0x383   :  { %6915 = vmatprep.mubr.bf16.mxu0 %v18652_v4 }
 0x384   :  { %6722 = vmatpush1.bf16.msra.mxu1 %v15783_v35  ;;  %v17932_v35 = vld [vmem:[%s24731_s5 + $0x28] sm:$0xff]  }
 0x385   :  { %6886 = vmatpush1.bf16.msra.mxu0 %v15785_v37  ;;  %6723 = vmatprep.subr.bf16.mxu1 %v15792_v41  ;;  %v4067_v37 = vrot.slane %v21583_v54, %v20026_v34  ;;  %v17933_v41 = vld [vmem:[%s24731_s5 + $0x70] sm:$0xff]  }
 0x386   :  { %6887 = vmatprep.subr.bf16.mxu0 %v15794_v26  ;;  %v4079_v26 = vrot.slane %v21583_v54, %v20469_v40 }
 0x388   :  { %6724 = vmatpush1.bf16.msra.mxu1 %v15791_v48  ;;  %v17936_v48 = vld [vmem:[%s24731_s5 + $0x38] sm:$0xff]  }
 0x389   :  { %6888 = vmatpush1.bf16.msra.mxu0 %v15793_v9  ;;  %6725 = vmatprep.subr.bf16.mxu1 %v15800_v45  ;;  %v17937_v45 = vld [vmem:[%s24731_s5 + $0xc0] sm:$0xff]  }
 0x38a   :  { %6889 = vmatprep.subr.bf16.mxu0 %v15802_v50 }
 0x38c   :  { %6726 = vmatpush1.bf16.msra.mxu1 %v15799_v3  ;;  %v17940_v3 = vld [vmem:[%s24731_s5 + $0x88] sm:$0xff]  }
 0x38d   :  { %6890 = vmatpush1.bf16.msra.mxu0 %v15801_v59  ;;  %6727 = vmatprep.subr.bf16.mxu1 %v15808_v60  ;;  %v17941_v59 = vld [vmem:[%s24731_s5 + $0xd0] sm:$0xff]  }
 0x38e   :  { %6891 = vmatprep.subr.bf16.mxu0 %v15810_v44  ;;  %v17942_v60 = vld [vmem:[%s24731_s5 + $0x90] sm:$0xff]   ;;  %v17943_v44 = vld [vmem:[%s24731_s5 + $0xd8] sm:$0xff]  }
 0x390   :  { %6728 = vmatpush1.bf16.msra.mxu1 %v15807_v2  ;;  %v17948_v2 = vld [vmem:[%s24731_s5 + $0xa8] sm:$0xff]  }
 0x391   :  { %6892 = vmatpush1.bf16.msra.mxu0 %v15809_v5  ;;  %6729 = vmatprep.subr.bf16.mxu1 %v15816_v6  ;;  %v4075_v5 = vrot.slane %v21583_v54, %v20576_v23  ;;  %v17949_v6 = vld [vmem:[%s24731_s5 + $0xf0] sm:$0xff]  }
 0x392   :  { %v6425_v12 = vpop.f32.mrb[24].mxu1  ;;  %v21590_v52 = vpop.f32.mrb[8].mxu0  ;;  %6893 = vmatprep.subr.bf16.mxu0 %v15818_v7  ;;  %v17950_v7 = vld [vmem:[%s24731_s5 + $0xb0] sm:$0xff]  }
 0x393   :  { %v6427_v42 = vpop.f32.mrb[25].mxu1  ;;  %v6591_v38 = vpop.f32.mrb[9].mxu0  ;;  %v17089_v47 = vadd.f32 %v6425_v12, %v4067_v37  ;;  %v17953_v12 = vld [vmem:[%s24731_s5 + $0x140] sm:$0xff]  }
 0x394   :  { %v17090_v13 = vadd.f32 %v6427_v42, %v4071_v8  ;;  %v6429_v15 = vpop.f32.mrb[26].mxu1  ;;  %v6593_v20 = vpop.f32.mrb[10].mxu0  ;;  %6730 = vmatpush1.bf16.msra.mxu1 %v15815_v31  ;;  %v17092_v1 = vadd.f32 %v6591_v38, %v4079_v26  ;;  %v17091_v8 = vadd.f32 %v21590_v52, %v4075_v5  ;;  %v17951_v31 = vld [vmem:[%s24731_s5 + $0xf8] sm:$0xff]   ;;  %v17954_v52 = vld [vmem:[%s24731_s5 + $0x100] sm:$0xff]   ;;  %v17955_v38 = vld [vmem:[%s24731_s5 + $0x148] sm:$0xff]  }
 0x395   :  { %6894 = vmatpush1.bf16.msra.mxu0 %v15817_v10  ;;  %v6430_v21 = vpop.f32.mrb[27].mxu1  ;;  %v6594_v25 = vpop.f32.mrb[11].mxu0  ;;  %16886 = vmatprep.subr.bf16.mxu1 %v17921_v11  ;;  %v6924_v9 = vmax.f32 %v17089_v47, 0.0  ;;  %v17952_v10 = vld [vmem:[%s24731_s5 + $0xb8] sm:$0xff]   ;;  %v17957_v15 = vld [vmem:[%s24731_s5 + $0x150] sm:$0xff]   ;;  %v17978_v5 = vld [vmem:[%s24731_s5 + $0x1a0] sm:$0xff]  }
 0x396   :  { %v6925_v27 = vmax.f32 %v17090_v13, 0.0  ;;  %v6927_v50 = vmax.f32 %v17092_v1, 0.0  ;;  %v6926_v11 = vmax.f32 %v17091_v8, 0.0  ;;  %v17956_v13 = vld [vmem:[%s24731_s5 + $0x108] sm:$0xff]   ;;  %v17958_v20 = vld [vmem:[%s24731_s5 + $0x110] sm:$0xff]   ;;  %v17960_v21 = vld [vmem:[%s24731_s5 + $0x118] sm:$0xff]   ;;  %v4091_v8 = vrot.slane %v21583_v54, %v20684_v36 }
 0x397   :  { %15821 = vmatmul.mubr.msk.bf16.vlgmr.msra.gmra.mrb[28].mxu1 %vm6264_vm0, %v20936_v55  ;;  %v6932_v57 = vpack.c.bf16 %v6924_v9, %v6924_v9  ;;  %v17961_v25 = vld [vmem:[%s24731_s5 + $0x160] sm:$0xff]  }
 0x398   :  { %v6933_v56 = vpack.c.bf16 %v6925_v27, %v6925_v27  ;;  %15822 = vmatmul.mubr.msk.bf16.vlgmr.msra.gmra.mrb[12].mxu0 %vm6264_vm0, %v20936_v55  ;;  %16887 = vmatpush3.bf16.msra.mxu1 %v17922_v62  ;;  %v17927_v55 = vld [vmem:[%s24731_s5 + $0x58] sm:$0xff]   ;;  %v6935_v22 = vpack.c.bf16 %v6927_v50, %v6927_v50  ;;  %v6934_v42 = vpack.c.bf16 %v6926_v11, %v6926_v11  ;;  %v17963_v27 = vld [vmem:[%s24731_s5 + $0x168] sm:$0xff]  }
 0x399   :  { %16888 = vmatprep.subr.bf16.mxu1 %v17923_v24  ;;  %v17959_v62 = vld [vmem:[%s24731_s5 + $0x158] sm:$0xff]   ;;  %v17962_v24 = vld [vmem:[%s24731_s5 + $0x120] sm:$0xff]  }
 0x39a   :  { %7491 = vmatprep.mubr.bf16.mxu1 %v6933_v56  ;;  %v17964_v56 = vld [vmem:[%s24731_s5 + $0x128] sm:$0xff]  }
 0x39c   :  { %16889 = vmatpush3.bf16.msra.mxu1 %v17924_v18  ;;  %v17965_v18 = vld [vmem:[%s24731_s5 + $0x170] sm:$0xff]  }
 0x39d   :  { %16890 = vmatprep.subr.bf16.mxu1 %v17925_v28  ;;  %v17966_v28 = vld [vmem:[%s24731_s5 + $0x130] sm:$0xff]  }
 0x3a0   :  { %16891 = vmatpush3.bf16.msra.mxu1 %v17926_v29  ;;  %v17967_v29 = vld [vmem:[%s24731_s5 + $0x178] sm:$0xff]  }
 0x3a1   :  { %16892 = vmatprep.subr.bf16.mxu1 %v17927_v55  ;;  %v17968_v55 = vld [vmem:[%s24731_s5 + $0x138] sm:$0xff]  }
 0x3a4   :  { %16893 = vmatpush3.bf16.msra.mxu1 %v17928_v30  ;;  %v17969_v30 = vld [vmem:[%s24731_s5 + $0x1c0] sm:$0xff]  }
 0x3a5   :  { %16894 = vmatprep.subr.bf16.mxu1 %v17929_v51  ;;  %v21748_v51 = vsub.s32 7, %v18862_v43 }
 0x3a8   :  { %16895 = vmatpush3.bf16.msra.mxu1 %v17930_v32  ;;  %v4083_v32 = vrot.slane %v21583_v54, %v20830_v16 }
 0x3a9   :  { %16896 = vmatprep.subr.bf16.mxu1 %v17931_v33  ;;  %v4087_v33 = vrot.slane %v21583_v54, %v20833_v19 }
 0x3ac   :  { %16897 = vmatpush3.bf16.msra.mxu1 %v17932_v35  ;;  %v4095_v35 = vrot.slane %v21583_v54, %v21748_v51 }
 0x3ad   :  { %16898 = vmatprep.subr.bf16.mxu1 %v17933_v41 }
 0x3b0   :  { %16899 = vmatpush3.bf16.msra.mxu1 %v17934_v46 }
 0x3b1   :  { %16900 = vmatprep.subr.bf16.mxu1 %v17935_v53 }
 0x3b4   :  { %16901 = vmatpush3.bf16.msra.mxu1 %v17936_v48 }
 0x3b5   :  { %16908 = vmatprep.subr.bf16.mxu1 %v17937_v45 }
 0x3b7   :  { %7492 = vmatmul.mubr.bf16.vlgmr.msra.gmra.mrb[32].mxu1 %v6932_v57 }
 0x3b8   :  { %16909 = vmatpush3.bf16.msra.mxu1 %v17938_v14  ;;  %7531 = vmatprep.mubr.bf16.mxu1 %v6935_v22  ;;  %v17970_v22 = vld [vmem:[%s24731_s5 + $0x180] sm:$0xff]  }
 0x3b9   :  { %16910 = vmatprep.subr.bf16.mxu1 %v17939_v58 }
 0x3bc   :  { %16911 = vmatpush3.bf16.msra.mxu1 %v17940_v3 }
 0x3bd   :  { %16912 = vmatprep.subr.bf16.mxu1 %v17941_v59  ;;  %v17971_v59 = vld [vmem:[%s24731_s5 + $0x1c8] sm:$0xff]  }
 0x3c0   :  { %16913 = vmatpush3.bf16.msra.mxu1 %v17942_v60 }
 0x3c1   :  { %16914 = vmatprep.subr.bf16.mxu1 %v17943_v44  ;;  %v17972_v44 = vld [vmem:[%s24731_s5 + $0x188] sm:$0xff]  }
 0x3c4   :  { %16915 = vmatpush3.bf16.msra.mxu1 %v17944_v61  ;;  %v17973_v61 = vld [vmem:[%s24731_s5 + $0x1d0] sm:$0xff]  }
 0x3c5   :  { %16916 = vmatprep.subr.bf16.mxu1 %v17945_v63  ;;  %v17974_v63 = vld [vmem:[%s24731_s5 + $0x190] sm:$0xff]  }
 0x3c8   :  { %16917 = vmatpush3.bf16.msra.mxu1 %v17946_v17  ;;  %v17975_v17 = vld [vmem:[%s24731_s5 + $0x1d8] sm:$0xff]  }
 0x3c9   :  { %16918 = vmatprep.subr.bf16.mxu1 %v17947_v0  ;;  %v17976_v0 = vld [vmem:[%s24731_s5 + $0x198] sm:$0xff]  }
 0x3cc   :  { %16919 = vmatpush3.bf16.msra.mxu1 %v17948_v2  ;;  %v17977_v2 = vld [vmem:[%s24731_s5 + $0x1e0] sm:$0xff]  }
 0x3cd   :  { %16920 = vmatprep.subr.bf16.mxu1 %v17949_v6  ;;  %v17979_v6 = vld [vmem:[%s24731_s5 + $0x1e8] sm:$0xff]  }
 0x3d0   :  { %16921 = vmatpush3.bf16.msra.mxu1 %v17950_v7  ;;  %v17980_v7 = vld [vmem:[%s24731_s5 + $0x1a8] sm:$0xff]  }
 0x3d1   :  { %16922 = vmatprep.subr.bf16.mxu1 %v17951_v31  ;;  %v17981_v31 = vld [vmem:[%s24731_s5 + $0x1f0] sm:$0xff]  }
 0x3d4   :  { %16923 = vmatpush3.bf16.msra.mxu1 %v17952_v10  ;;  %v17982_v10 = vld [vmem:[%s24731_s5 + $0x1b0] sm:$0xff]  }
 0x3d5   :  { %16930 = vmatprep.subr.bf16.mxu1 %v17953_v12  ;;  %v17983_v12 = vld [vmem:[%s24731_s5 + $0x1f8] sm:$0xff]  }
 0x3d7   :  { %7532 = vmatmul.mubr.bf16.vlgmr.msra.gmra.mrb[36].mxu1 %v6934_v42 }
 0x3d8   :  { %16931 = vmatpush3.bf16.msra.mxu1 %v17954_v52 }
 0x3d9   :  { %16932 = vmatprep.subr.bf16.mxu1 %v17955_v38 }
 0x3dc   :  { %16933 = vmatpush3.bf16.msra.mxu1 %v17956_v13  ;;  %v17984_v13 = vld [vmem:[%s24731_s5 + $0x1b8] sm:$0xff]  }
 0x3dd   :  { %16934 = vmatprep.subr.bf16.mxu1 %v17957_v15 }
 0x3e0   :  { %16935 = vmatpush3.bf16.msra.mxu1 %v17958_v20 }
 0x3e1   :  { %16936 = vmatprep.subr.bf16.mxu1 %v17959_v62 }
 0x3e4   :  { %16937 = vmatpush3.bf16.msra.mxu1 %v17960_v21  ;;  %v15823_v21 = vld [vmem:[%s24733_s6] ss:$0 sm:$0xff] }
 0x3e5   :  { %16938 = vmatprep.subr.bf16.mxu1 %v17961_v25 }
 0x3e8   :  { %16939 = vmatpush3.bf16.msra.mxu1 %v17962_v24 }
 0x3e9   :  { %16940 = vmatprep.subr.bf16.mxu1 %v17963_v27 }
 0x3ec   :  { %16941 = vmatpush3.bf16.msra.mxu1 %v17964_v56 }
 0x3ed   :  { %16942 = vmatprep.subr.bf16.mxu1 %v17965_v18 }
 0x3f0   :  { %16943 = vmatpush3.bf16.msra.mxu1 %v17966_v28 }
 0x3f1   :  { %16944 = vmatprep.subr.bf16.mxu1 %v17967_v29 }
 0x3f4   :  { %16945 = vmatpush3.bf16.msra.mxu1 %v17968_v55  ;;  %v17985_v55 = vld [vmem:[%s24734_s7] sm:$0xff]  }
 0x3f5   :  { %16952 = vmatprep.subr.bf16.mxu1 %v17969_v30  ;;  %v18653_v30 = vmov 0.0  }
 0x3f6   :  { %17067 = vmatprep.subr.bf16.mxu0 %v18653_v30  ;;  %17071 = vmatprep.mubr.msk.bf16.mxu0 %vm18654_vm1, %v18653_v30 }
 0x3f7   :  { %17068 = vmatpush3.bf16.msra.mxu0 %v17985_v55 }
 0x3f8   :  { %17069 = vmatprep.subr.bf16.mxu0 %v18653_v30 }
 0x46a   :  { %v6753_v37 = vpop.f32.mrb[28].mxu1 }
 0x46b   :  { %v17093_v41 = vadd.f32 %v6753_v37, %v4083_v32  ;;  %v6917_v26 = vpop.f32.mrb[12].mxu0  ;;  %v6755_v46 = vpop.f32.mrb[29].mxu1  ;;  %v17986_v32 = vld [vmem:[%s24734_s7 + $0x8] sm:$0xff]  }
 0x46c   :  { %v17094_v47 = vadd.f32 %v6755_v46, %v4087_v33  ;;  %v6919_v53 = vpop.f32.mrb[13].mxu0  ;;  %v6757_v1 = vpop.f32.mrb[30].mxu1  ;;  %v17095_v11 = vadd.f32 %v6917_v26, %v4091_v8  ;;  %17070 = vmatpush3.bf16.msra.mxu0 %v17986_v32 }
 0x46d   :  { %v6928_v48 = vmax.f32 %v17093_v41, 0.0  ;;  %v17096_v9 = vadd.f32 %v6919_v53, %v4095_v35  ;;  %v6921_v43 = vpop.f32.mrb[14].mxu0  ;;  %v6758_v45 = vpop.f32.mrb[31].mxu1 }
 0x46e   :  { %v6929_v50 = vmax.f32 %v17094_v47, 0.0  ;;  %v6922_v14 = vpop.f32.mrb[15].mxu0  ;;  %v6930_v15 = vmax.f32 %v17095_v11, 0.0  ;;  %v7760_v11 = vld [vmem:[%s24737_s11 + $0x60] sm:$0xff] }
 0x46f   :  { %v6931_v57 = vmax.f32 %v17096_v9, 0.0  ;;  %v6936_v3 = vpack.c.bf16 %v6928_v48, %v6928_v48  ;;  %v7690_v14 = vld [vmem:[%s24735_s9] sm:$0xf] }
 0x470   :  { %v6937_v58 = vpack.c.bf16 %v6929_v50, %v6929_v50  ;;  %v6938_v62 = vpack.c.bf16 %v6930_v15, %v6930_v15  ;;  %v7750_v15 = vld [vmem:[%s24737_s11 + $0x10] sm:$0xff] }
 0x471   :  { %v6939_v60 = vpack.c.bf16 %v6931_v57, %v6931_v57  ;;  %v7704_v57 = vsel %vm7702_vm3, %v7690_v14, 0  ;;  %v17995_v14 = vld [vmem:[%s24738_s13 + $0x3c] ss:$28 sps:$4 sm:$0xff]  }
 0x472   :  { %7571 = vmatprep.mubr.bf16.mxu1 %v6937_v58  ;;  %v15888_v58 = vld [vmem:[%s24736_s8] ss:$0 sm:$0xff] }
 0x473   :  { %7572 = vmatmul.mubr.bf16.vlgmr.msra.gmra.mrb[40].mxu1 %v6936_v3 }
 0x474   :  { %16953 = vmatpush3.bf16.msra.mxu1 %v17970_v22  ;;  %7611 = vmatprep.mubr.bf16.mxu1 %v6939_v60 }
 0x475   :  { %16954 = vmatprep.subr.bf16.mxu1 %v17971_v59 }
 0x478   :  { %16955 = vmatpush3.bf16.msra.mxu1 %v17972_v44 }
 0x479   :  { %16956 = vmatprep.subr.bf16.mxu1 %v17973_v61 }
 0x47c   :  { %16957 = vmatpush3.bf16.msra.mxu1 %v17974_v63 }
 0x47d   :  { %16958 = vmatprep.subr.bf16.mxu1 %v17975_v17  ;;  %v7748_v17 = vld [vmem:[%s24737_s11] sm:$0xff] }
 0x480   :  { %16959 = vmatpush3.bf16.msra.mxu1 %v17976_v0  ;;  %v7752_v0 = vld [vmem:[%s24737_s11 + $0x20] sm:$0xff] }
 0x481   :  { %16960 = vmatprep.subr.bf16.mxu1 %v17977_v2  ;;  %v7749_v2 = vld [vmem:[%s24737_s11 + $0x8] sm:$0xff] }
 0x484   :  { %16961 = vmatpush3.bf16.msra.mxu1 %v17978_v5  ;;  %v15895_v5 = vcombine.high %v7748_v17, %v7752_v0 }
 0x485   :  { %16962 = vmatprep.subr.bf16.mxu1 %v17979_v6  ;;  %v7753_v6 = vld [vmem:[%s24737_s11 + $0x28] sm:$0xff] }
 0x486   :  { %v15896_v8 = vcombine.low %v7749_v2, %v7753_v6  ;;  %7889 = vmatprep.subr.bf16.mxu0 %v15895_v5  ;;  %v18016_v5 = vld [vmem:[%s24738_s13 + $0xec] ss:$28 sps:$4 sm:$0xff]  }
 0x488   :  { %16963 = vmatpush3.bf16.msra.mxu1 %v17980_v7  ;;  %v15894_v7 = vcombine.low %v7748_v17, %v7752_v0  ;;  %v18005_v17 = vld [vmem:[%s24738_s13 + $0xa8] ss:$28 sps:$4 sm:$0xff]   ;;  %v18008_v0 = vld [vmem:[%s24738_s13 + $0xb0] ss:$28 sps:$4 sm:$0xff]  }
 0x489   :  { %16964 = vmatprep.subr.bf16.mxu1 %v17981_v31  ;;  %v15897_v31 = vcombine.high %v7749_v2, %v7753_v6  ;;  %v18013_v2 = vld [vmem:[%s24738_s13 + $0xe4] ss:$28 sps:$4 sm:$0xff]  }
 0x48a   :  { %v16902_v52 = vpop.f32.mrb[32].mxu1  ;;  %v18011_v6 = vld [vmem:[%s24738_s13 + $0xe0] ss:$28 sps:$4 sm:$0xff]  }
 0x48b   :  { %v16903_v42 = vpop.f32.mrb[33].mxu1 }
 0x48c   :  { %v16904_v38 = vadd.f32 %v16903_v42, %v16902_v52  ;;  %16965 = vmatpush3.bf16.msra.mxu1 %v17982_v10  ;;  %v16905_v54 = vpop.f32.mrb[34].mxu1  ;;  %v7756_v10 = vld [vmem:[%s24737_s11 + $0x40] sm:$0xff]  ;;  %v7761_v42 = vld [vmem:[%s24737_s11 + $0x68] sm:$0xff] }
 0x48d   :  { %v16906_v20 = vpop.f32.mrb[35].mxu1  ;;  %16966 = vmatprep.subr.bf16.mxu1 %v17983_v12  ;;  %v7757_v12 = vld [vmem:[%s24737_s11 + $0x48] sm:$0xff]  ;;  %v15903_v52 = vcombine.high %v7756_v10, %v7760_v11 }
 0x48e   :  { %v7494_v27 = vadd.f32 %v16904_v38, %v15823_v21  ;;  %v15902_v38 = vcombine.low %v7756_v10, %v7760_v11  ;;  %v15904_v54 = vcombine.low %v7757_v12, %v7761_v42  ;;  %v7754_v20 = vld [vmem:[%s24737_s11 + $0x30] sm:$0xff]  ;;  %v18020_v11 = vld [vmem:[%s24738_s13 + $0x120] ss:$28 sps:$4 sm:$0xff]  }
 0x48f   :  { %v15899_v21 = vcombine.high %v7750_v15, %v7754_v20  ;;  %v18017_v10 = vld [vmem:[%s24738_s13 + $0x118] ss:$28 sps:$4 sm:$0xff]  }
 0x490   :  { %16967 = vmatpush3.bf16.msra.mxu1 %v17984_v13  ;;  %v15905_v13 = vcombine.high %v7757_v12, %v7761_v42  ;;  %v18025_v12 = vld [vmem:[%s24738_s13 + $0x154] ss:$28 sps:$4 sm:$0xff]  }
 0x491   :  { %17075 = vmatprep.subr.bf16.mxu1 %v18653_v30  ;;  %v18023_v42 = vld [vmem:[%s24738_s13 + $0x150] ss:$28 sps:$4 sm:$0xff]  }
 0x493   :  { %7612 = vmatmul.mubr.bf16.vlgmr.msra.gmra.mrb[44].mxu1 %v6938_v62  ;;  %v7751_v62 = vld [vmem:[%s24737_s11 + $0x18] sm:$0xff] }
 0x494   :  { %17077 = vmatprep.mubr.msk.bf16.mxu1 %vm18654_vm1, %v18653_v30  ;;  %17076 = vmatpush3.bf16.msra.mxu1 %v7704_v57  ;;  %v17998_v57 = vld [vmem:[%s24738_s13 + $0x44] ss:$28 sps:$4 sm:$0xff]  }
 0x495   :  { %7930 = vmatprep.subr.bf16.mxu1 %v15897_v31  ;;  %v18022_v31 = vld [vmem:[%s24738_s13 + $0x124] ss:$28 sps:$4 sm:$0xff]  }
 0x4aa   :  { %v16924_v25 = vpop.f32.mrb[36].mxu1 }
 0x4ab   :  { %v16925_v24 = vpop.f32.mrb[37].mxu1 }
 0x4ac   :  { %v16926_v56 = vadd.f32 %v16925_v24, %v16924_v25  ;;  %v16927_v18 = vpop.f32.mrb[38].mxu1  ;;  %v7755_v25 = vld [vmem:[%s24737_s11 + $0x38] sm:$0xff]  ;;  %v15898_v24 = vcombine.low %v7750_v15, %v7754_v20  ;;  %v18029_v15 = vld [vmem:[%s24738_s13 + $0x188] ss:$28 sps:$4 sm:$0xff]   ;;  %v18032_v20 = vld [vmem:[%s24738_s13 + $0x190] ss:$28 sps:$4 sm:$0xff]  }
 0x4ad   :  { %v16928_v28 = vpop.f32.mrb[39].mxu1  ;;  %v15892_v18 = vld [vmem:[%s24739_s10] ss:$0 sm:$0xff] }
 0x4ae   :  { %v7534_v29 = vadd.f32 %v16926_v56, %v7494_v27  ;;  %v15900_v27 = vcombine.low %v7751_v62, %v7755_v25  ;;  %v15901_v56 = vcombine.high %v7751_v62, %v7755_v25  ;;  %v18037_v62 = vld [vmem:[%s24738_s13 + $0x1c4] ss:$28 sps:$4 sm:$0xff]  }
 0x4af   :  { %v18035_v25 = vld [vmem:[%s24738_s13 + $0x1c0] ss:$28 sps:$4 sm:$0xff]  }
 0x546   :  { %v16946_v33 = vpop.f32.mrb[40].mxu1 }
 0x547   :  { %v16947_v35 = vpop.f32.mrb[41].mxu1 }
 0x548   :  { %v16948_v37 = vadd.f32 %v16947_v35, %v16946_v33  ;;  %v16949_v41 = vpop.f32.mrb[42].mxu1  ;;  %v7758_v33 = vld [vmem:[%s24737_s11 + $0x50] sm:$0xff] }
 0x549   :  { %v16950_v26 = vpop.f32.mrb[43].mxu1  ;;  %v7762_v35 = vld [vmem:[%s24737_s11 + $0x70] sm:$0xff]  ;;  %v7763_v41 = vld [vmem:[%s24737_s11 + $0x78] sm:$0xff] }
 0x54a   :  { %v7574_v46 = vadd.f32 %v16948_v37, %v7534_v29  ;;  %v7759_v37 = vld [vmem:[%s24737_s11 + $0x58] sm:$0xff] }
 0x566   :  { %v16968_v47 = vpop.f32.mrb[44].mxu1 }
 0x567   :  { %v16969_v53 = vpop.f32.mrb[45].mxu1 }
 0x568   :  { %v16970_v1 = vadd.f32 %v16969_v53, %v16968_v47  ;;  %v16971_v48 = vpop.f32.mrb[46].mxu1  ;;  %v15907_v47 = vcombine.high %v7758_v33, %v7762_v35  ;;  %v15909_v53 = vcombine.high %v7759_v37, %v7763_v41 }
 0x569   :  { %v16972_v9 = vpop.f32.mrb[47].mxu1  ;;  %v17992_v48 = vld [vmem:[%s24738_s13 + $0xc] ss:$28 sps:$4 sm:$0xff]  }
 0x56a   :  { %v7614_v43 = vadd.f32 %v16970_v1, %v7574_v46  ;;  %v17989_v1 = vld [vmem:[%s24738_s13 + $0x4] ss:$28 sps:$4 sm:$0xff]   ;;  %v15906_v9 = vcombine.low %v7758_v33, %v7762_v35  ;;  %v18055_v33 = vld [vmem:[%s24738_s13 + $0x26c] ss:$28 sps:$4 sm:$0xff]   ;;  %v18058_v35 = vld [vmem:[%s24738_s13 + $0x274] ss:$28 sps:$4 sm:$0xff]  }
 0x56c   :  { %18627 = vtanh.f32 %v7614_v43  ;;  %v15908_v43 = vcombine.low %v7759_v37, %v7763_v41  ;;  %v18053_v37 = vld [vmem:[%s24738_s13 + $0x268] ss:$28 sps:$4 sm:$0xff]   ;;  %v18056_v41 = vld [vmem:[%s24738_s13 + $0x270] ss:$28 sps:$4 sm:$0xff]  }
 0x576   :  { %v18628_v45 = vpop.eup %18627 }
 0x577   :  { %v7620_v50 = vpack.c.bf16 %v18628_v45, %v18628_v45  ;;  %v17987_v45 = vld [vmem:[%s24738_s13] ss:$28 sps:$4 sm:$0xff]  }
 0x579   :  { %17072 = vmatmul.mubr.msk.bf16.vlgmr.msra.gmra.mrb[16].mxu0 %vm7644_vm2, %v7620_v50  ;;  %v17990_v50 = vld [vmem:[%s24738_s13 + $0x8] ss:$28 sps:$4 sm:$0xff]  }
 0x57a   :  { %7921 = vmatprep.mubr.bf16.mxu0 %v18652_v4  ;;  %7890 = vmatpush1.bf16.msra.mxu0 %v15894_v7  ;;  %v18014_v7 = vld [vmem:[%s24738_s13 + $0xe8] ss:$28 sps:$4 sm:$0xff]  }
 0x57b   :  { %7891 = vmatprep.subr.bf16.mxu0 %v15903_v52  ;;  %v18028_v52 = vld [vmem:[%s24738_s13 + $0x15c] ss:$28 sps:$4 sm:$0xff]  }
 0x57e   :  { %7892 = vmatpush1.bf16.msra.mxu0 %v15902_v38  ;;  %v18026_v38 = vld [vmem:[%s24738_s13 + $0x158] ss:$28 sps:$4 sm:$0xff]  }
 0x57f   :  { %7971 = vmatprep.subr.bf16.mxu0 %v15899_v21  ;;  %v18040_v21 = vld [vmem:[%s24738_s13 + $0x1cc] ss:$28 sps:$4 sm:$0xff]  }
 0x64c   :  { %v7682_v22 = vpop.f32.mrb[16].mxu0 }
 0x64d   :  { %v7683_v3 = vadd.f32 %v15888_v58, %v7682_v22  ;;  %v17073_v59 = vpop.f32.mrb[17].mxu0  ;;  %v17993_v58 = vld [vmem:[%s24738_s13 + $0x38] ss:$28 sps:$4 sm:$0xff]   ;;  %v17996_v22 = vld [vmem:[%s24738_s13 + $0x40] ss:$28 sps:$4 sm:$0xff]  }
 0x64e   :  { %v7685_v60 = vpop.f32.mrb[18].mxu0  ;;  %v18004_v59 = vld [vmem:[%s24738_s13 + $0x7c] ss:$28 sps:$4 sm:$0xff]  }
 0x64f   :  { %18629 = vtanh.f32 %v7683_v3  ;;  %v17074_v44 = vpop.f32.mrb[19].mxu0  ;;  %v18001_v3 = vld [vmem:[%s24738_s13 + $0x74] ss:$28 sps:$4 sm:$0xff]  }
 0x650   :  { %v17999_v60 = vld [vmem:[%s24738_s13 + $0x70] ss:$28 sps:$4 sm:$0xff]   ;;  %v18002_v44 = vld [vmem:[%s24738_s13 + $0x78] ss:$28 sps:$4 sm:$0xff]  }
 0x659   :  { %v18630_v61 = vpop.eup %18629 }
 0x65a   :  { %v7689_v63 = vpack.c.bf16 %v18630_v61, %v18630_v61  ;;  %v18007_v61 = vld [vmem:[%s24738_s13 + $0xac] ss:$28 sps:$4 sm:$0xff]  }
 0x65c   :  { %17078 = vmatmul.mubr.msk.bf16.vlgmr.msra.gmra.mrb[48].mxu1 %vm7698_vm4, %v7689_v63  ;;  %v18010_v63 = vld [vmem:[%s24738_s13 + $0xb4] ss:$28 sps:$4 sm:$0xff]  }
 0x65d   :  { %7962 = vmatprep.mubr.bf16.mxu1 %v18652_v4  ;;  %7931 = vmatpush1.bf16.msra.mxu1 %v15896_v8  ;;  %v18019_v8 = vld [vmem:[%s24738_s13 + $0x11c] ss:$28 sps:$4 sm:$0xff]  }
 0x65e   :  { %7932 = vmatprep.subr.bf16.mxu1 %v15905_v13  ;;  %v18034_v13 = vld [vmem:[%s24738_s13 + $0x194] ss:$28 sps:$4 sm:$0xff]  }
 0x661   :  { %7933 = vmatpush1.bf16.msra.mxu1 %v15904_v54  ;;  %v18031_v54 = vld [vmem:[%s24738_s13 + $0x18c] ss:$28 sps:$4 sm:$0xff]  }
 0x662   :  { %8012 = vmatprep.subr.bf16.mxu1 %v15901_v56  ;;  %v18046_v56 = vld [vmem:[%s24738_s13 + $0x204] ss:$28 sps:$4 sm:$0xff]  }
 0x72f   :  { %v7740_v28 = vpop.f32.mrb[48].mxu1 }
 0x730   :  { %v7741_v29 = vadd.f32 %v15892_v18, %v7740_v28  ;;  %v17079_v55 = vpop.f32.mrb[49].mxu1  ;;  %v18041_v18 = vld [vmem:[%s24738_s13 + $0x1f8] ss:$28 sps:$4 sm:$0xff]   ;;  %v18044_v28 = vld [vmem:[%s24738_s13 + $0x200] ss:$28 sps:$4 sm:$0xff]  }
 0x731   :  { %v7743_v30 = vpop.f32.mrb[50].mxu1  ;;  %v18052_v55 = vld [vmem:[%s24738_s13 + $0x23c] ss:$28 sps:$4 sm:$0xff]  }
 0x732   :  { %18631 = vtanh.f32 %v7741_v29  ;;  %v17080_v32 = vpop.f32.mrb[51].mxu1  ;;  %v18049_v29 = vld [vmem:[%s24738_s13 + $0x234] ss:$28 sps:$4 sm:$0xff]  }
 0x733   :  { %v18047_v30 = vld [vmem:[%s24738_s13 + $0x230] ss:$28 sps:$4 sm:$0xff]   ;;  %v18050_v32 = vld [vmem:[%s24738_s13 + $0x238] ss:$28 sps:$4 sm:$0xff]  }
 0x73c   :  { %v18632_v26 = vpop.eup %18631 }
 0x73d   :  { %v7747_v46 = vpack.c.bf16 %v18632_v26, %v18632_v26  ;;  %v18061_v26 = vld [vmem:[%s24738_s13 + $0x2a4] ss:$28 sps:$4 sm:$0xff]  }
 0x73f   :  { %15910 = vmatmul.mubr.msk.bf16.vlgmr.msra.gmra.mrb[20].mxu0 %vm7644_vm2, %v7747_v46  ;;  %15911 = vmatmul.mubr.msk.bf16.vlgmr.msra.gmra.mrb[52].mxu1 %vm7644_vm2, %v7747_v46 }
 0x740   :  { %7972 = vmatpush1.bf16.msra.mxu0 %v15898_v24  ;;  %8013 = vmatpush1.bf16.msra.mxu1 %v15900_v27  ;;  %v18038_v24 = vld [vmem:[%s24738_s13 + $0x1c8] ss:$28 sps:$4 sm:$0xff]   ;;  %v18043_v27 = vld [vmem:[%s24738_s13 + $0x1fc] ss:$28 sps:$4 sm:$0xff]  }
 0x741   :  { %7973 = vmatprep.subr.bf16.mxu0 %v15907_v47  ;;  %8014 = vmatprep.subr.bf16.mxu1 %v15909_v53  ;;  %v18059_v47 = vld [vmem:[%s24738_s13 + $0x2a0] ss:$28 sps:$4 sm:$0xff]   ;;  %v18062_v53 = vld [vmem:[%s24738_s13 + $0x2a8] ss:$28 sps:$4 sm:$0xff]  }
 0x742   :  { %8003 = vmatprep.mubr.bf16.mxu0 %v18652_v4  ;;  %8044 = vmatprep.mubr.bf16.mxu1 %v18652_v4 }
 0x744   :  { %7974 = vmatpush1.bf16.msra.mxu0 %v15906_v9  ;;  %8015 = vmatpush1.bf16.msra.mxu1 %v15908_v43  ;;  %v18065_v9 = vld [vmem:[%s24738_s13 + $0x2d8] ss:$28 sps:$4 sm:$0xff]   ;;  %v18068_v43 = vld [vmem:[%s24738_s13 + $0x2e0] ss:$28 sps:$4 sm:$0xff]  }
 0x745   :  { %10922 = vmatprep.subr.bf16.mxu0 %v17989_v1  ;;  %11086 = vmatprep.subr.bf16.mxu1 %v17992_v48  ;;  %v18067_v1 = vld [vmem:[%s24738_s13 + $0x2dc] ss:$28 sps:$4 sm:$0xff]   ;;  %v18070_v48 = vld [vmem:[%s24738_s13 + $0x2e4] ss:$28 sps:$4 sm:$0xff]  }
 0x747   :  { %15912 = vmatmul.mubr.msk.bf16.vlgmr.msra.gmra.mrb[24].mxu0 %vm7644_vm2, %v7747_v46  ;;  %15913 = vmatmul.mubr.msk.bf16.vlgmr.msra.gmra.mrb[56].mxu1 %vm7644_vm2, %v7747_v46  ;;  %v18064_v46 = vld [vmem:[%s24738_s13 + $0x2ac] ss:$28 sps:$4 sm:$0xff]  }
 0x748   :  { %10923 = vmatpush1.bf16.msra.mxu0 %v17987_v45  ;;  %11087 = vmatpush1.bf16.msra.mxu1 %v17990_v50  ;;  %v18073_v45 = vld [vmem:[%s24738_s13 + $0x314] ss:$28 sps:$4 sm:$0xff]   ;;  %v18076_v50 = vld [vmem:[%s24738_s13 + $0x31c] ss:$28 sps:$4 sm:$0xff]  }
 0x749   :  { %10924 = vmatprep.subr.bf16.mxu0 %v17995_v14  ;;  %11088 = vmatprep.subr.bf16.mxu1 %v17998_v57  ;;  %v18071_v14 = vld [vmem:[%s24738_s13 + $0x310] ss:$28 sps:$4 sm:$0xff]   ;;  %v18074_v57 = vld [vmem:[%s24738_s13 + $0x318] ss:$28 sps:$4 sm:$0xff]  }
 0x74c   :  { %10925 = vmatpush1.bf16.msra.mxu0 %v17993_v58  ;;  %11089 = vmatpush1.bf16.msra.mxu1 %v17996_v22  ;;  %v18079_v58 = vld [vmem:[%s24738_s13 + $0x34c] ss:$28 sps:$4 sm:$0xff]   ;;  %v18082_v22 = vld [vmem:[%s24738_s13 + $0x354] ss:$28 sps:$4 sm:$0xff]  }
 0x74d   :  { %10926 = vmatprep.subr.bf16.mxu0 %v18001_v3  ;;  %11090 = vmatprep.subr.bf16.mxu1 %v18004_v59  ;;  %v18077_v3 = vld [vmem:[%s24738_s13 + $0x348] ss:$28 sps:$4 sm:$0xff]   ;;  %v18080_v59 = vld [vmem:[%s24738_s13 + $0x350] ss:$28 sps:$4 sm:$0xff]  }
 0x750   :  { %10927 = vmatpush1.bf16.msra.mxu0 %v17999_v60  ;;  %11091 = vmatpush1.bf16.msra.mxu1 %v18002_v44  ;;  %v18085_v60 = vld [vmem:[%s24738_s13 + $0x384] ss:$28 sps:$4 sm:$0xff]   ;;  %v18088_v44 = vld [vmem:[%s24738_s13 + $0x38c] ss:$28 sps:$4 sm:$0xff]  }
 0x751   :  { %10928 = vmatprep.subr.bf16.mxu0 %v18007_v61  ;;  %11092 = vmatprep.subr.bf16.mxu1 %v18010_v63  ;;  %v22079_v61 = vld [vmem:[%s24740_s12] sm:$0xff] }
 0x752   :  { %v7769_v63 = vrot.slane %v22079_v61, %v20026_v34 }
 0x754   :  { %10929 = vmatpush1.bf16.msra.mxu0 %v18005_v17  ;;  %11093 = vmatpush1.bf16.msra.mxu1 %v18008_v0  ;;  %v7773_v17 = vrot.slane %v22079_v61, %v20040_v39  ;;  %v7781_v0 = vrot.slane %v22079_v61, %v20469_v40 }
 0x755   :  { %10930 = vmatprep.subr.bf16.mxu0 %v18013_v2  ;;  %11094 = vmatprep.subr.bf16.mxu1 %v18016_v5 }
 0x758   :  { %10931 = vmatpush1.bf16.msra.mxu0 %v18011_v6  ;;  %11095 = vmatpush1.bf16.msra.mxu1 %v18014_v7 }
 0x759   :  { %10932 = vmatprep.subr.bf16.mxu0 %v18019_v8  ;;  %11096 = vmatprep.subr.bf16.mxu1 %v18022_v31 }
 0x75c   :  { %10933 = vmatpush1.bf16.msra.mxu0 %v18017_v10  ;;  %11097 = vmatpush1.bf16.msra.mxu1 %v18020_v11 }
 0x75d   :  { %10934 = vmatprep.subr.bf16.mxu0 %v18025_v12  ;;  %11098 = vmatprep.subr.bf16.mxu1 %v18028_v52 }
 0x760   :  { %10935 = vmatpush1.bf16.msra.mxu0 %v18023_v42  ;;  %11099 = vmatpush1.bf16.msra.mxu1 %v18026_v38 }
 0x761   :  { %10936 = vmatprep.subr.bf16.mxu0 %v18031_v54  ;;  %11100 = vmatprep.subr.bf16.mxu1 %v18034_v13 }
 0x764   :  { %10937 = vmatpush1.bf16.msra.mxu0 %v18029_v15  ;;  %11101 = vmatpush1.bf16.msra.mxu1 %v18032_v20 }
 0x765   :  { %10938 = vmatprep.subr.bf16.mxu0 %v18037_v62  ;;  %11102 = vmatprep.subr.bf16.mxu1 %v18040_v21 }
 0x768   :  { %10939 = vmatpush1.bf16.msra.mxu0 %v18035_v25  ;;  %11103 = vmatpush1.bf16.msra.mxu1 %v18038_v24 }
 0x769   :  { %10940 = vmatprep.subr.bf16.mxu0 %v18043_v27  ;;  %11104 = vmatprep.subr.bf16.mxu1 %v18046_v56 }
 0x76c   :  { %10941 = vmatpush1.bf16.msra.mxu0 %v18041_v18  ;;  %11105 = vmatpush1.bf16.msra.mxu1 %v18044_v28  ;;  %v18083_v28 = vld [vmem:[%s24738_s13 + $0x380] ss:$28 sps:$4 sm:$0xff]  }
 0x76d   :  { %10942 = vmatprep.subr.bf16.mxu0 %v18049_v29  ;;  %11106 = vmatprep.subr.bf16.mxu1 %v18052_v55  ;;  %v18086_v29 = vld [vmem:[%s24738_s13 + $0x388] ss:$28 sps:$4 sm:$0xff]  }
 0x770   :  { %10943 = vmatpush1.bf16.msra.mxu0 %v18047_v30  ;;  %11107 = vmatpush1.bf16.msra.mxu1 %v18050_v32  ;;  %v18091_v30 = vld [vmem:[%s24738_s13 + $0x3bc] ss:$28 sps:$4 sm:$0xff]   ;;  %v18094_v32 = vld [vmem:[%s24738_s13 + $0x3c4] ss:$28 sps:$4 sm:$0xff]  }
 0x771   :  { %10944 = vmatprep.subr.bf16.mxu0 %v18055_v33  ;;  %11108 = vmatprep.subr.bf16.mxu1 %v18058_v35  ;;  %v18089_v35 = vld [vmem:[%s24738_s13 + $0x3b8] ss:$28 sps:$4 sm:$0xff]  }
 0x774   :  { %10945 = vmatpush1.bf16.msra.mxu0 %v18053_v37  ;;  %11109 = vmatpush1.bf16.msra.mxu1 %v18056_v41  ;;  %v18092_v37 = vld [vmem:[%s24738_s13 + $0x3c0] ss:$28 sps:$4 sm:$0xff]   ;;  %v18097_v41 = vld [vmem:[%s24738_s13 + $0x3f4] ss:$28 sps:$4 sm:$0xff]  }
 0x775   :  { %10946 = vmatprep.subr.bf16.mxu0 %v18061_v26  ;;  %11110 = vmatprep.subr.bf16.mxu1 %v18064_v46  ;;  %v18100_v26 = vld [vmem:[%s24738_s13 + $0x3fc] ss:$28 sps:$4 sm:$0xff]   ;;  %v18095_v46 = vld [vmem:[%s24738_s13 + $0x3f0] ss:$28 sps:$4 sm:$0xff]  }
 0x778   :  { %10947 = vmatpush1.bf16.msra.mxu0 %v18059_v47  ;;  %11111 = vmatpush1.bf16.msra.mxu1 %v18062_v53  ;;  %v18098_v47 = vld [vmem:[%s24738_s13 + $0x3f8] ss:$28 sps:$4 sm:$0xff]   ;;  %v18103_v53 = vld [vmem:[%s24738_s13 + $0x42c] ss:$28 sps:$4 sm:$0xff]  }
 0x779   :  { %10948 = vmatprep.subr.bf16.mxu0 %v18067_v1  ;;  %11112 = vmatprep.subr.bf16.mxu1 %v18070_v48  ;;  %v18106_v1 = vld [vmem:[%s24738_s13 + $0x434] ss:$28 sps:$4 sm:$0xff]   ;;  %v18101_v48 = vld [vmem:[%s24738_s13 + $0x428] ss:$28 sps:$4 sm:$0xff]  }
 0x77c   :  { %10949 = vmatpush1.bf16.msra.mxu0 %v18065_v9  ;;  %11113 = vmatpush1.bf16.msra.mxu1 %v18068_v43  ;;  %v18104_v9 = vld [vmem:[%s24738_s13 + $0x430] ss:$28 sps:$4 sm:$0xff]   ;;  %v18109_v43 = vld [vmem:[%s24738_s13 + $0x464] ss:$28 sps:$4 sm:$0xff]  }
 0x77d   :  { %10950 = vmatprep.subr.bf16.mxu0 %v18073_v45  ;;  %11114 = vmatprep.subr.bf16.mxu1 %v18076_v50  ;;  %v18112_v45 = vld [vmem:[%s24738_s13 + $0x46c] ss:$28 sps:$4 sm:$0xff]   ;;  %v18107_v50 = vld [vmem:[%s24738_s13 + $0x460] ss:$28 sps:$4 sm:$0xff]  }
 0x780   :  { %10951 = vmatpush1.bf16.msra.mxu0 %v18071_v14  ;;  %11115 = vmatpush1.bf16.msra.mxu1 %v18074_v57  ;;  %v18110_v14 = vld [vmem:[%s24738_s13 + $0x468] ss:$28 sps:$4 sm:$0xff]   ;;  %v18115_v57 = vld [vmem:[%s24738_s13 + $0x49c] ss:$28 sps:$4 sm:$0xff]  }
 0x781   :  { %10952 = vmatprep.subr.bf16.mxu0 %v18079_v58  ;;  %11116 = vmatprep.subr.bf16.mxu1 %v18082_v22  ;;  %v18118_v58 = vld [vmem:[%s24738_s13 + $0x4a4] ss:$28 sps:$4 sm:$0xff]   ;;  %v18113_v22 = vld [vmem:[%s24738_s13 + $0x498] ss:$28 sps:$4 sm:$0xff]  }
 0x784   :  { %10953 = vmatpush1.bf16.msra.mxu0 %v18077_v3  ;;  %11117 = vmatpush1.bf16.msra.mxu1 %v18080_v59  ;;  %v18116_v3 = vld [vmem:[%s24738_s13 + $0x4a0] ss:$28 sps:$4 sm:$0xff]   ;;  %v18121_v59 = vld [vmem:[%s24738_s13 + $0x4d4] ss:$28 sps:$4 sm:$0xff]  }
 0x785   :  { %10963 = vmatprep.subr.bf16.mxu0 %v18085_v60  ;;  %11127 = vmatprep.subr.bf16.mxu1 %v18088_v44  ;;  %v18124_v60 = vld [vmem:[%s24738_s13 + $0x4dc] ss:$28 sps:$4 sm:$0xff]   ;;  %v18119_v44 = vld [vmem:[%s24738_s13 + $0x4d0] ss:$28 sps:$4 sm:$0xff]  }
 0x812   :  { %v7923_v2 = vpop.f32.mrb[20].mxu0  ;;  %v22087_v5 = vpop.f32.mrb[52].mxu1 }
 0x813   :  { %v7924_v6 = vadd.f32 %v7923_v2, %v7769_v63  ;;  %v7925_v7 = vpop.f32.mrb[21].mxu0  ;;  %v7966_v8 = vpop.f32.mrb[53].mxu1  ;;  %v18122_v63 = vld [vmem:[%s24738_s13 + $0x4d8] ss:$28 sps:$4 sm:$0xff]   ;;  %v18125_v2 = vld [vmem:[%s24738_s13 + $0x508] ss:$28 sps:$4 sm:$0xff]  }
 0x814   :  { %v7926_v31 = vadd.f32 %v7925_v7, %v7773_v17  ;;  %v7967_v10 = vadd.f32 %v7966_v8, %v7781_v0  ;;  %v7927_v11 = vpop.f32.mrb[22].mxu0  ;;  %v7968_v12 = vpop.f32.mrb[54].mxu1  ;;  %v18127_v17 = vld [vmem:[%s24738_s13 + $0x50c] ss:$28 sps:$4 sm:$0xff]   ;;  %v18130_v0 = vld [vmem:[%s24738_s13 + $0x514] ss:$28 sps:$4 sm:$0xff]  }
 0x815   :  { %v7928_v52 = vpop.f32.mrb[23].mxu0  ;;  %v7969_v42 = vpop.f32.mrb[55].mxu1  ;;  %18633 = vtanh.f32 %v7924_v6  ;;  %v18128_v6 = vld [vmem:[%s24738_s13 + $0x510] ss:$28 sps:$4 sm:$0xff]   ;;  %v18133_v7 = vld [vmem:[%s24738_s13 + $0x544] ss:$28 sps:$4 sm:$0xff]  }
 0x816   :  { %18635 = vtanh.f32 %v7926_v31  ;;  %v18136_v8 = vld [vmem:[%s24738_s13 + $0x54c] ss:$28 sps:$4 sm:$0xff]   ;;  %v18131_v31 = vld [vmem:[%s24738_s13 + $0x540] ss:$28 sps:$4 sm:$0xff]   ;;  %v18137_v52 = vld [vmem:[%s24738_s13 + $0x578] ss:$28 sps:$4 sm:$0xff]  }
 0x817   :  { %18637 = vtanh.f32 %v7967_v10  ;;  %v18134_v10 = vld [vmem:[%s24738_s13 + $0x548] ss:$28 sps:$4 sm:$0xff]   ;;  %v18139_v11 = vld [vmem:[%s24738_s13 + $0x57c] ss:$28 sps:$4 sm:$0xff]  }
 0x818   :  { %v18142_v12 = vld [vmem:[%s24738_s13 + $0x584] ss:$28 sps:$4 sm:$0xff]  }
 0x819   :  { %v18140_v42 = vld [vmem:[%s24738_s13 + $0x580] ss:$28 sps:$4 sm:$0xff]  }
 0x81a   :  { %v22089_v38 = vpop.f32.mrb[24].mxu0  ;;  %v22091_v54 = vpop.f32.mrb[56].mxu1 }
 0x81b   :  { %v22093_v13 = vpop.f32.mrb[25].mxu0  ;;  %v22095_v15 = vpop.f32.mrb[57].mxu1 }
 0x81c   :  { %v8009_v20 = vpop.f32.mrb[26].mxu0  ;;  %v8050_v62 = vpop.f32.mrb[58].mxu1 }
 0x81d   :  { %v8010_v21 = vpop.f32.mrb[27].mxu0  ;;  %v8051_v25 = vpop.f32.mrb[59].mxu1  ;;  %v18145_v20 = vld [vmem:[%s24738_s13 + $0x5b4] ss:$28 sps:$4 sm:$0xff]   ;;  %v18148_v62 = vld [vmem:[%s24738_s13 + $0x5bc] ss:$28 sps:$4 sm:$0xff]  }
 0x81e   :  { %v18143_v21 = vld [vmem:[%s24738_s13 + $0x5b0] ss:$28 sps:$4 sm:$0xff]   ;;  %v18146_v25 = vld [vmem:[%s24738_s13 + $0x5b8] ss:$28 sps:$4 sm:$0xff]  }
 0x81f   :  { %v18634_v24 = vpop.eup %18633 }
 0x820   :  { %v18636_v27 = vpop.eup %18635  ;;  %v22105_v55 = vpack.c.bf16 %v18634_v24, %v18634_v24  ;;  %v18151_v24 = vld [vmem:[%s24738_s13 + $0x5ec] ss:$28 sps:$4 sm:$0xff]  }
 0x821   :  { %v18638_v56 = vpop.eup %18637  ;;  %v22097_v18 = vpack.c.bf16 %v18636_v27, %v18636_v27  ;;  %v18154_v27 = vld [vmem:[%s24738_s13 + $0x5f4] ss:$28 sps:$4 sm:$0xff]  }
 0x822   :  { %v22115_v33 = vpack.c.bf16 %v18638_v56, %v18638_v56  ;;  %v7777_v56 = vrot.slane %v22079_v61, %v20576_v23 }
 0x823   :  { %10954 = vmatprep.mubr.bf16.mxu0 %v22097_v18  ;;  %11118 = vmatprep.mubr.bf16.mxu1 %v22097_v18 }
 0x824   :  { %10955 = vmatmul.mubr.bf16.vlgmr.msra.gmra.mrb[28].mxu0 %v22105_v55  ;;  %11119 = vmatmul.mubr.bf16.vlgmr.msra.gmra.mrb[60].mxu1 %v22105_v55 }
 0x825   :  { %10964 = vmatpush1.bf16.msra.mxu0 %v18083_v28  ;;  %11128 = vmatpush1.bf16.msra.mxu1 %v18086_v29  ;;  %v18149_v28 = vld [vmem:[%s24738_s13 + $0x5e8] ss:$28 sps:$4 sm:$0xff]   ;;  %v18152_v29 = vld [vmem:[%s24738_s13 + $0x5f0] ss:$28 sps:$4 sm:$0xff]  }
 0x826   :  { %10995 = vmatprep.mubr.bf16.mxu0 %v22115_v33  ;;  %11159 = vmatprep.mubr.bf16.mxu1 %v22115_v33 }
 0x827   :  { %10965 = vmatprep.subr.bf16.mxu0 %v18091_v30  ;;  %11129 = vmatprep.subr.bf16.mxu1 %v18094_v32  ;;  %v7789_v30 = vrot.slane %v22079_v61, %v20833_v19  ;;  %v18157_v32 = vld [vmem:[%s24738_s13 + $0x624] ss:$28 sps:$4 sm:$0xff]  }
 0x829   :  { %10966 = vmatpush1.bf16.msra.mxu0 %v18089_v35  ;;  %11130 = vmatpush1.bf16.msra.mxu1 %v18092_v37  ;;  %v18160_v35 = vld [vmem:[%s24738_s13 + $0x62c] ss:$28 sps:$4 sm:$0xff]   ;;  %v7965_v37 = vadd.f32 %v22087_v5, %v7777_v56  ;;  %v18166_v5 = vld [vmem:[%s24738_s13 + $0x664] ss:$28 sps:$4 sm:$0xff]  }
 0x82a   :  { %10967 = vmatprep.subr.bf16.mxu0 %v18097_v41  ;;  %11131 = vmatprep.subr.bf16.mxu1 %v18100_v26  ;;  %v18155_v41 = vld [vmem:[%s24738_s13 + $0x620] ss:$28 sps:$4 sm:$0xff]   ;;  %v18158_v26 = vld [vmem:[%s24738_s13 + $0x628] ss:$28 sps:$4 sm:$0xff]  }
 0x82b   :  { %18639 = vtanh.f32 %v7965_v37  ;;  %v18214_v56 = vld [vmem:[%s24738_s13 + $0x824] ss:$28 sps:$4 sm:$0xff]   ;;  %v18218_v37 = vld [vmem:[%s24738_s13 + $0x858] ss:$28 sps:$4 sm:$0xff]  }
 0x82d   :  { %10968 = vmatpush1.bf16.msra.mxu0 %v18095_v46  ;;  %11132 = vmatpush1.bf16.msra.mxu1 %v18098_v47  ;;  %v8008_v46 = vadd.f32 %v22093_v13, %v7789_v30  ;;  %v18163_v47 = vld [vmem:[%s24738_s13 + $0x65c] ss:$28 sps:$4 sm:$0xff]   ;;  %v18217_v30 = vld [vmem:[%s24738_s13 + $0x854] ss:$28 sps:$4 sm:$0xff]  }
 0x82e   :  { %10969 = vmatprep.subr.bf16.mxu0 %v18103_v53  ;;  %11133 = vmatprep.subr.bf16.mxu1 %v18106_v1  ;;  %v18161_v53 = vld [vmem:[%s24738_s13 + $0x658] ss:$28 sps:$4 sm:$0xff]   ;;  %v18164_v13 = vld [vmem:[%s24738_s13 + $0x660] ss:$28 sps:$4 sm:$0xff]  }
 0x82f   :  { %18641 = vtanh.f32 %v8008_v46  ;;  %v18169_v1 = vld [vmem:[%s24738_s13 + $0x694] ss:$28 sps:$4 sm:$0xff]   ;;  %v18221_v46 = vld [vmem:[%s24738_s13 + $0x888] ss:$28 sps:$4 sm:$0xff]  }
 0x831   :  { %10970 = vmatpush1.bf16.msra.mxu0 %v18101_v48  ;;  %11134 = vmatpush1.bf16.msra.mxu1 %v18104_v9  ;;  %v18172_v48 = vld [vmem:[%s24738_s13 + $0x69c] ss:$28 sps:$4 sm:$0xff]   ;;  %v18167_v9 = vld [vmem:[%s24738_s13 + $0x690] ss:$28 sps:$4 sm:$0xff]  }
 0x832   :  { %10971 = vmatprep.subr.bf16.mxu0 %v18109_v43  ;;  %11135 = vmatprep.subr.bf16.mxu1 %v18112_v45  ;;  %v18170_v43 = vld [vmem:[%s24738_s13 + $0x698] ss:$28 sps:$4 sm:$0xff]   ;;  %v18175_v45 = vld [vmem:[%s24738_s13 + $0x6cc] ss:$28 sps:$4 sm:$0xff]  }
 0x835   :  { %10972 = vmatpush1.bf16.msra.mxu0 %v18107_v50  ;;  %11136 = vmatpush1.bf16.msra.mxu1 %v18110_v14  ;;  %v18178_v50 = vld [vmem:[%s24738_s13 + $0x6d4] ss:$28 sps:$4 sm:$0xff]   ;;  %v18173_v14 = vld [vmem:[%s24738_s13 + $0x6c8] ss:$28 sps:$4 sm:$0xff]  }
 0x836   :  { %10973 = vmatprep.subr.bf16.mxu0 %v18115_v57  ;;  %11137 = vmatprep.subr.bf16.mxu1 %v18118_v58  ;;  %v18176_v57 = vld [vmem:[%s24738_s13 + $0x6d0] ss:$28 sps:$4 sm:$0xff]   ;;  %v18181_v58 = vld [vmem:[%s24738_s13 + $0x704] ss:$28 sps:$4 sm:$0xff]  }
 0x839   :  { %10974 = vmatpush1.bf16.msra.mxu0 %v18113_v22  ;;  %11138 = vmatpush1.bf16.msra.mxu1 %v18116_v3  ;;  %v18184_v22 = vld [vmem:[%s24738_s13 + $0x70c] ss:$28 sps:$4 sm:$0xff]   ;;  %v18640_v3 = vpop.eup %18639 }
 0x83a   :  { %10975 = vmatprep.subr.bf16.mxu0 %v18121_v59  ;;  %11139 = vmatprep.subr.bf16.mxu1 %v18124_v60  ;;  %v18642_v59 = vpop.eup %18641  ;;  %v18179_v60 = vld [vmem:[%s24738_s13 + $0x700] ss:$28 sps:$4 sm:$0xff]  }
 0x83d   :  { %10976 = vmatpush1.bf16.msra.mxu0 %v18119_v44  ;;  %11140 = vmatpush1.bf16.msra.mxu1 %v18122_v63  ;;  %v22310_v44 = vpack.c.bf16 %v18640_v3, %v18640_v3  ;;  %v18182_v63 = vld [vmem:[%s24738_s13 + $0x708] ss:$28 sps:$4 sm:$0xff]   ;;  %v18250_v3 = vld [vmem:[%s24738_s13 + $0x974] ss:$28 sps:$4 sm:$0xff]  }
 0x83e   :  { %10977 = vmatprep.subr.bf16.mxu0 %v18127_v17  ;;  %11141 = vmatprep.subr.bf16.mxu1 %v18130_v0  ;;  %v22315_v17 = vpack.c.bf16 %v18642_v59, %v18642_v59  ;;  %v18187_v0 = vld [vmem:[%s24738_s13 + $0x73c] ss:$28 sps:$4 sm:$0xff]   ;;  %v7785_v59 = vrot.slane %v22079_v61, %v20830_v16 }
 0x841   :  { %10978 = vmatpush1.bf16.msra.mxu0 %v18125_v2  ;;  %11142 = vmatpush1.bf16.msra.mxu1 %v18128_v6  ;;  %v18190_v2 = vld [vmem:[%s24738_s13 + $0x744] ss:$28 sps:$4 sm:$0xff]   ;;  %v18185_v6 = vld [vmem:[%s24738_s13 + $0x738] ss:$28 sps:$4 sm:$0xff]  }
 0x842   :  { %10979 = vmatprep.subr.bf16.mxu0 %v18133_v7  ;;  %11143 = vmatprep.subr.bf16.mxu1 %v18136_v8  ;;  %v18188_v7 = vld [vmem:[%s24738_s13 + $0x740] ss:$28 sps:$4 sm:$0xff]   ;;  %v18193_v8 = vld [vmem:[%s24738_s13 + $0x774] ss:$28 sps:$4 sm:$0xff]  }
 0x845   :  { %10980 = vmatpush1.bf16.msra.mxu0 %v18131_v31  ;;  %11144 = vmatpush1.bf16.msra.mxu1 %v18134_v10  ;;  %v18196_v31 = vld [vmem:[%s24738_s13 + $0x77c] ss:$28 sps:$4 sm:$0xff]   ;;  %v18191_v10 = vld [vmem:[%s24738_s13 + $0x770] ss:$28 sps:$4 sm:$0xff]  }
 0x846   :  { %10981 = vmatprep.subr.bf16.mxu0 %v18139_v11  ;;  %11145 = vmatprep.subr.bf16.mxu1 %v18142_v12  ;;  %v18194_v11 = vld [vmem:[%s24738_s13 + $0x778] ss:$28 sps:$4 sm:$0xff]   ;;  %v18199_v12 = vld [vmem:[%s24738_s13 + $0x7ac] ss:$28 sps:$4 sm:$0xff]  }
 0x849   :  { %10982 = vmatpush1.bf16.msra.mxu0 %v18137_v52  ;;  %11146 = vmatpush1.bf16.msra.mxu1 %v18140_v42  ;;  %v18202_v52 = vld [vmem:[%s24738_s13 + $0x7b4] ss:$28 sps:$4 sm:$0xff]   ;;  %v18197_v42 = vld [vmem:[%s24738_s13 + $0x7a8] ss:$28 sps:$4 sm:$0xff]  }
 0x84a   :  { %10983 = vmatprep.subr.bf16.mxu0 %v18145_v20  ;;  %11147 = vmatprep.subr.bf16.mxu1 %v18148_v62  ;;  %v18200_v20 = vld [vmem:[%s24738_s13 + $0x7b0] ss:$28 sps:$4 sm:$0xff]   ;;  %v18205_v62 = vld [vmem:[%s24738_s13 + $0x7e4] ss:$28 sps:$4 sm:$0xff]  }
 0x84d   :  { %10984 = vmatpush1.bf16.msra.mxu0 %v18143_v21  ;;  %11148 = vmatpush1.bf16.msra.mxu1 %v18146_v25  ;;  %v18208_v21 = vld [vmem:[%s24738_s13 + $0x7ec] ss:$28 sps:$4 sm:$0xff]   ;;  %v18203_v25 = vld [vmem:[%s24738_s13 + $0x7e0] ss:$28 sps:$4 sm:$0xff]  }
 0x84e   :  { %10985 = vmatprep.subr.bf16.mxu0 %v18151_v24  ;;  %11149 = vmatprep.subr.bf16.mxu1 %v18154_v27  ;;  %v18206_v24 = vld [vmem:[%s24738_s13 + $0x7e8] ss:$28 sps:$4 sm:$0xff]   ;;  %v18211_v27 = vld [vmem:[%s24738_s13 + $0x81c] ss:$28 sps:$4 sm:$0xff]  }
 0x851   :  { %10986 = vmatpush1.bf16.msra.mxu0 %v18149_v28  ;;  %11150 = vmatpush1.bf16.msra.mxu1 %v18152_v29  ;;  %v18209_v28 = vld [vmem:[%s24738_s13 + $0x818] ss:$28 sps:$4 sm:$0xff]   ;;  %v18212_v29 = vld [vmem:[%s24738_s13 + $0x820] ss:$28 sps:$4 sm:$0xff]  }
 0x852   :  { %10987 = vmatprep.subr.bf16.mxu0 %v18157_v32  ;;  %11151 = vmatprep.subr.bf16.mxu1 %v18160_v35  ;;  %v18220_v32 = vld [vmem:[%s24738_s13 + $0x85c] ss:$28 sps:$4 sm:$0xff]   ;;  %v18215_v35 = vld [vmem:[%s24738_s13 + $0x850] ss:$28 sps:$4 sm:$0xff]  }
 0x855   :  { %10988 = vmatpush1.bf16.msra.mxu0 %v18155_v41  ;;  %11152 = vmatpush1.bf16.msra.mxu1 %v18158_v26  ;;  %v18223_v41 = vld [vmem:[%s24738_s13 + $0x88c] ss:$28 sps:$4 sm:$0xff]   ;;  %v18226_v26 = vld [vmem:[%s24738_s13 + $0x894] ss:$28 sps:$4 sm:$0xff]  }
 0x856   :  { %10989 = vmatprep.subr.bf16.mxu0 %v18163_v47  ;;  %11153 = vmatprep.subr.bf16.mxu1 %v18166_v5  ;;  %v18224_v47 = vld [vmem:[%s24738_s13 + $0x890] ss:$28 sps:$4 sm:$0xff]   ;;  %v18229_v5 = vld [vmem:[%s24738_s13 + $0x8c4] ss:$28 sps:$4 sm:$0xff]  }
 0x859   :  { %10990 = vmatpush1.bf16.msra.mxu0 %v18161_v53  ;;  %11154 = vmatpush1.bf16.msra.mxu1 %v18164_v13  ;;  %v18232_v53 = vld [vmem:[%s24738_s13 + $0x8cc] ss:$28 sps:$4 sm:$0xff]   ;;  %v18227_v13 = vld [vmem:[%s24738_s13 + $0x8c0] ss:$28 sps:$4 sm:$0xff]  }
 0x85a   :  { %10991 = vmatprep.subr.bf16.mxu0 %v18169_v1  ;;  %11155 = vmatprep.subr.bf16.mxu1 %v18172_v48  ;;  %v18230_v1 = vld [vmem:[%s24738_s13 + $0x8c8] ss:$28 sps:$4 sm:$0xff]   ;;  %v18235_v48 = vld [vmem:[%s24738_s13 + $0x8fc] ss:$28 sps:$4 sm:$0xff]  }
 0x85d   :  { %10992 = vmatpush1.bf16.msra.mxu0 %v18167_v9  ;;  %11156 = vmatpush1.bf16.msra.mxu1 %v18170_v43  ;;  %v18238_v9 = vld [vmem:[%s24738_s13 + $0x904] ss:$28 sps:$4 sm:$0xff]   ;;  %v18233_v43 = vld [vmem:[%s24738_s13 + $0x8f8] ss:$28 sps:$4 sm:$0xff]  }
 0x85e   :  { %10993 = vmatprep.subr.bf16.mxu0 %v18175_v45  ;;  %11157 = vmatprep.subr.bf16.mxu1 %v18178_v50  ;;  %v18236_v45 = vld [vmem:[%s24738_s13 + $0x900] ss:$28 sps:$4 sm:$0xff]   ;;  %v18241_v50 = vld [vmem:[%s24738_s13 + $0x934] ss:$28 sps:$4 sm:$0xff]  }
 0x861   :  { %10994 = vmatpush1.bf16.msra.mxu0 %v18173_v14  ;;  %11158 = vmatpush1.bf16.msra.mxu1 %v18176_v57  ;;  %v18244_v14 = vld [vmem:[%s24738_s13 + $0x93c] ss:$28 sps:$4 sm:$0xff]   ;;  %v18239_v57 = vld [vmem:[%s24738_s13 + $0x930] ss:$28 sps:$4 sm:$0xff]  }
 0x862   :  { %11004 = vmatprep.subr.bf16.mxu0 %v18181_v58  ;;  %11168 = vmatprep.subr.bf16.mxu1 %v18184_v22  ;;  %v18242_v58 = vld [vmem:[%s24738_s13 + $0x938] ss:$28 sps:$4 sm:$0xff]   ;;  %v18247_v22 = vld [vmem:[%s24738_s13 + $0x96c] ss:$28 sps:$4 sm:$0xff]  }
 0x864   :  { %10996 = vmatmul.mubr.bf16.vlgmr.msra.gmra.mrb[28].mxu0 %v22310_v44  ;;  %11160 = vmatmul.mubr.bf16.vlgmr.msra.gmra.mrb[60].mxu1 %v22310_v44 }
 0x865   :  { %11005 = vmatpush1.bf16.msra.mxu0 %v18179_v60  ;;  %11036 = vmatprep.mubr.bf16.mxu0 %v22315_v17  ;;  %v18245_v60 = vld [vmem:[%s24738_s13 + $0x968] ss:$28 sps:$4 sm:$0xff]  }
 0x866   :  { %11169 = vmatpush1.bf16.msra.mxu1 %v18182_v63  ;;  %11200 = vmatprep.mubr.bf16.mxu1 %v22315_v17  ;;  %v18248_v63 = vld [vmem:[%s24738_s13 + $0x970] ss:$28 sps:$4 sm:$0xff]  }
 0x867   :  { %11006 = vmatprep.subr.bf16.mxu0 %v18187_v0  ;;  %11170 = vmatprep.subr.bf16.mxu1 %v18190_v2  ;;  %v18253_v0 = vld [vmem:[%s24738_s13 + $0x9a4] ss:$28 sps:$4 sm:$0xff]   ;;  %v7797_v2 = vrot.slane %v22079_v61, %v21748_v51 }
 0x869   :  { %11007 = vmatpush1.bf16.msra.mxu0 %v18185_v6  ;;  %v18256_v6 = vld [vmem:[%s24738_s13 + $0x9ac] ss:$28 sps:$4 sm:$0xff]  }
 0x86a   :  { %11171 = vmatpush1.bf16.msra.mxu1 %v18188_v7  ;;  %11008 = vmatprep.subr.bf16.mxu0 %v18193_v8  ;;  %v8006_v7 = vadd.f32 %v22089_v38, %v7785_v59  ;;  %v18251_v8 = vld [vmem:[%s24738_s13 + $0x9a0] ss:$28 sps:$4 sm:$0xff]  }
 0x86b   :  { %11172 = vmatprep.subr.bf16.mxu1 %v18196_v31  ;;  %v18254_v31 = vld [vmem:[%s24738_s13 + $0x9a8] ss:$28 sps:$4 sm:$0xff]  }
 0x86c   :  { %v18262_v38 = vld [vmem:[%s24738_s13 + $0x9e4] ss:$28 sps:$4 sm:$0xff]   ;;  %18643 = vtanh.f32 %v8006_v7  ;;  %v18314_v7 = vld [vmem:[%s24738_s13 + $0xbd8] ss:$28 sps:$4 sm:$0xff]  }
 0x86d   :  { %11009 = vmatpush1.bf16.msra.mxu0 %v18191_v10  ;;  %v18259_v10 = vld [vmem:[%s24738_s13 + $0x9dc] ss:$28 sps:$4 sm:$0xff]   ;;  %v18310_v59 = vld [vmem:[%s24738_s13 + $0xba4] ss:$28 sps:$4 sm:$0xff]  }
 0x86e   :  { %11173 = vmatpush1.bf16.msra.mxu1 %v18194_v11  ;;  %11010 = vmatprep.subr.bf16.mxu0 %v18199_v12  ;;  %v8049_v11 = vadd.f32 %v22095_v15, %v7797_v2  ;;  %v18257_v12 = vld [vmem:[%s24738_s13 + $0x9d8] ss:$28 sps:$4 sm:$0xff]  }
 0x86f   :  { %11174 = vmatprep.subr.bf16.mxu1 %v18202_v52  ;;  %v18260_v52 = vld [vmem:[%s24738_s13 + $0x9e0] ss:$28 sps:$4 sm:$0xff]   ;;  %v18265_v15 = vld [vmem:[%s24738_s13 + $0xa14] ss:$28 sps:$4 sm:$0xff]  }
 0x870   :  { %18645 = vtanh.f32 %v8049_v11  ;;  %v18316_v2 = vld [vmem:[%s24738_s13 + $0xbdc] ss:$28 sps:$4 sm:$0xff]   ;;  %v18320_v11 = vld [vmem:[%s24738_s13 + $0xc10] ss:$28 sps:$4 sm:$0xff]  }
 0x871   :  { %11011 = vmatpush1.bf16.msra.mxu0 %v18197_v42  ;;  %v18268_v42 = vld [vmem:[%s24738_s13 + $0xa1c] ss:$28 sps:$4 sm:$0xff]  }
 0x872   :  { %11175 = vmatpush1.bf16.msra.mxu1 %v18200_v20  ;;  %11012 = vmatprep.subr.bf16.mxu0 %v18205_v62  ;;  %v18263_v20 = vld [vmem:[%s24738_s13 + $0xa10] ss:$28 sps:$4 sm:$0xff]   ;;  %v18266_v62 = vld [vmem:[%s24738_s13 + $0xa18] ss:$28 sps:$4 sm:$0xff]  }
 0x873   :  { %11176 = vmatprep.subr.bf16.mxu1 %v18208_v21  ;;  %v18271_v21 = vld [vmem:[%s24738_s13 + $0xa4c] ss:$28 sps:$4 sm:$0xff]  }
 0x875   :  { %11013 = vmatpush1.bf16.msra.mxu0 %v18203_v25  ;;  %v18274_v25 = vld [vmem:[%s24738_s13 + $0xa54] ss:$28 sps:$4 sm:$0xff]  }
 0x876   :  { %11177 = vmatpush1.bf16.msra.mxu1 %v18206_v24  ;;  %11014 = vmatprep.subr.bf16.mxu0 %v18211_v27  ;;  %v18269_v24 = vld [vmem:[%s24738_s13 + $0xa48] ss:$28 sps:$4 sm:$0xff]   ;;  %v18272_v27 = vld [vmem:[%s24738_s13 + $0xa50] ss:$28 sps:$4 sm:$0xff]  }
 0x877   :  { %11178 = vmatprep.subr.bf16.mxu1 %v18214_v56  ;;  %v18277_v56 = vld [vmem:[%s24738_s13 + $0xa84] ss:$28 sps:$4 sm:$0xff]  }
 0x879   :  { %11015 = vmatpush1.bf16.msra.mxu0 %v18209_v28  ;;  %v18644_v28 = vpop.eup %18643 }
 0x87a   :  { %11179 = vmatpush1.bf16.msra.mxu1 %v18212_v29  ;;  %11016 = vmatprep.subr.bf16.mxu0 %v18217_v30  ;;  %v18280_v29 = vld [vmem:[%s24738_s13 + $0xa8c] ss:$28 sps:$4 sm:$0xff]   ;;  %v18646_v30 = vpop.eup %18645 }
 0x87b   :  { %11180 = vmatprep.subr.bf16.mxu1 %v18220_v32  ;;  %v18275_v32 = vld [vmem:[%s24738_s13 + $0xa80] ss:$28 sps:$4 sm:$0xff]  }
 0x87d   :  { %11017 = vmatpush1.bf16.msra.mxu0 %v18215_v35  ;;  %v22516_v35 = vpack.c.bf16 %v18644_v28, %v18644_v28  ;;  %v18343_v28 = vld [vmem:[%s24738_s13 + $0xcec] ss:$28 sps:$4 sm:$0xff]  }
 0x87e   :  { %11181 = vmatpush1.bf16.msra.mxu1 %v18218_v37  ;;  %11018 = vmatprep.subr.bf16.mxu0 %v18223_v41  ;;  %v18278_v37 = vld [vmem:[%s24738_s13 + $0xa88] ss:$28 sps:$4 sm:$0xff]   ;;  %v18283_v41 = vld [vmem:[%s24738_s13 + $0xabc] ss:$28 sps:$4 sm:$0xff]  }
 0x87f   :  { %11182 = vmatprep.subr.bf16.mxu1 %v18226_v26  ;;  %v22524_v26 = vpack.c.bf16 %v18646_v30, %v18646_v30  ;;  %v7793_v30 = vrot.slane %v22079_v61, %v20684_v36  ;;  %v18352_v61 = vld [vmem:[%s24738_s13 + $0xd2c] ss:$28 sps:$4 sm:$0xff]  }
 0x881   :  { %11019 = vmatpush1.bf16.msra.mxu0 %v18221_v46  ;;  %v18286_v46 = vld [vmem:[%s24738_s13 + $0xac4] ss:$28 sps:$4 sm:$0xff]  }
 0x882   :  { %11183 = vmatpush1.bf16.msra.mxu1 %v18224_v47  ;;  %11020 = vmatprep.subr.bf16.mxu0 %v18229_v5  ;;  %v18281_v47 = vld [vmem:[%s24738_s13 + $0xab8] ss:$28 sps:$4 sm:$0xff]   ;;  %v18284_v5 = vld [vmem:[%s24738_s13 + $0xac0] ss:$28 sps:$4 sm:$0xff]  }
 0x883   :  { %11184 = vmatprep.subr.bf16.mxu1 %v18232_v53  ;;  %v18289_v53 = vld [vmem:[%s24738_s13 + $0xaf4] ss:$28 sps:$4 sm:$0xff]  }
 0x885   :  { %11021 = vmatpush1.bf16.msra.mxu0 %v18227_v13  ;;  %v18292_v13 = vld [vmem:[%s24738_s13 + $0xafc] ss:$28 sps:$4 sm:$0xff]  }
 0x886   :  { %11185 = vmatpush1.bf16.msra.mxu1 %v18230_v1  ;;  %11022 = vmatprep.subr.bf16.mxu0 %v18235_v48  ;;  %v18287_v1 = vld [vmem:[%s24738_s13 + $0xaf0] ss:$28 sps:$4 sm:$0xff]   ;;  %v18290_v48 = vld [vmem:[%s24738_s13 + $0xaf8] ss:$28 sps:$4 sm:$0xff]  }
 0x887   :  { %11186 = vmatprep.subr.bf16.mxu1 %v18238_v9  ;;  %v18295_v9 = vld [vmem:[%s24738_s13 + $0xb2c] ss:$28 sps:$4 sm:$0xff]  }
 0x889   :  { %11023 = vmatpush1.bf16.msra.mxu0 %v18233_v43  ;;  %v18298_v43 = vld [vmem:[%s24738_s13 + $0xb34] ss:$28 sps:$4 sm:$0xff]  }
 0x88a   :  { %11187 = vmatpush1.bf16.msra.mxu1 %v18236_v45  ;;  %11024 = vmatprep.subr.bf16.mxu0 %v18241_v50  ;;  %v18293_v45 = vld [vmem:[%s24738_s13 + $0xb28] ss:$28 sps:$4 sm:$0xff]   ;;  %v18296_v50 = vld [vmem:[%s24738_s13 + $0xb30] ss:$28 sps:$4 sm:$0xff]  }
 0x88b   :  { %11188 = vmatprep.subr.bf16.mxu1 %v18244_v14  ;;  %v18301_v14 = vld [vmem:[%s24738_s13 + $0xb64] ss:$28 sps:$4 sm:$0xff]  }
 0x88d   :  { %11025 = vmatpush1.bf16.msra.mxu0 %v18239_v57  ;;  %v18304_v57 = vld [vmem:[%s24738_s13 + $0xb6c] ss:$28 sps:$4 sm:$0xff]  }
 0x88e   :  { %11189 = vmatpush1.bf16.msra.mxu1 %v18242_v58  ;;  %11026 = vmatprep.subr.bf16.mxu0 %v18247_v22  ;;  %v18299_v58 = vld [vmem:[%s24738_s13 + $0xb60] ss:$28 sps:$4 sm:$0xff]   ;;  %v18302_v22 = vld [vmem:[%s24738_s13 + $0xb68] ss:$28 sps:$4 sm:$0xff]  }
 0x88f   :  { %11190 = vmatprep.subr.bf16.mxu1 %v18250_v3  ;;  %v18307_v3 = vld [vmem:[%s24738_s13 + $0xb9c] ss:$28 sps:$4 sm:$0xff]  }
 0x891   :  { %11027 = vmatpush1.bf16.msra.mxu0 %v18245_v60  ;;  %v18305_v60 = vld [vmem:[%s24738_s13 + $0xb98] ss:$28 sps:$4 sm:$0xff]  }
 0x892   :  { %11191 = vmatpush1.bf16.msra.mxu1 %v18248_v63  ;;  %11028 = vmatprep.subr.bf16.mxu0 %v18253_v0  ;;  %v18308_v63 = vld [vmem:[%s24738_s13 + $0xba0] ss:$28 sps:$4 sm:$0xff]   ;;  %v18313_v0 = vld [vmem:[%s24738_s13 + $0xbd4] ss:$28 sps:$4 sm:$0xff]  }
 0x893   :  { %11192 = vmatprep.subr.bf16.mxu1 %v18256_v6  ;;  %v18311_v6 = vld [vmem:[%s24738_s13 + $0xbd0] ss:$28 sps:$4 sm:$0xff]  }
 0x895   :  { %11029 = vmatpush1.bf16.msra.mxu0 %v18251_v8  ;;  %v18319_v8 = vld [vmem:[%s24738_s13 + $0xc0c] ss:$28 sps:$4 sm:$0xff]  }
 0x896   :  { %11193 = vmatpush1.bf16.msra.mxu1 %v18254_v31  ;;  %11030 = vmatprep.subr.bf16.mxu0 %v18259_v10  ;;  %v18322_v31 = vld [vmem:[%s24738_s13 + $0xc14] ss:$28 sps:$4 sm:$0xff]   ;;  %v18317_v10 = vld [vmem:[%s24738_s13 + $0xc08] ss:$28 sps:$4 sm:$0xff]  }
 0x897   :  { %11194 = vmatprep.subr.bf16.mxu1 %v18262_v38  ;;  %v18325_v38 = vld [vmem:[%s24738_s13 + $0xc44] ss:$28 sps:$4 sm:$0xff]  }
 0x899   :  { %11031 = vmatpush1.bf16.msra.mxu0 %v18257_v12  ;;  %v18328_v12 = vld [vmem:[%s24738_s13 + $0xc4c] ss:$28 sps:$4 sm:$0xff]  }
 0x89a   :  { %11195 = vmatpush1.bf16.msra.mxu1 %v18260_v52  ;;  %11032 = vmatprep.subr.bf16.mxu0 %v18265_v15  ;;  %v18323_v52 = vld [vmem:[%s24738_s13 + $0xc40] ss:$28 sps:$4 sm:$0xff]   ;;  %v18326_v15 = vld [vmem:[%s24738_s13 + $0xc48] ss:$28 sps:$4 sm:$0xff]  }
 0x89b   :  { %11196 = vmatprep.subr.bf16.mxu1 %v18268_v42  ;;  %v18331_v42 = vld [vmem:[%s24738_s13 + $0xc7c] ss:$28 sps:$4 sm:$0xff]  }
 0x89d   :  { %11033 = vmatpush1.bf16.msra.mxu0 %v18263_v20  ;;  %v18334_v20 = vld [vmem:[%s24738_s13 + $0xc84] ss:$28 sps:$4 sm:$0xff]  }
 0x89e   :  { %11197 = vmatpush1.bf16.msra.mxu1 %v18266_v62  ;;  %11034 = vmatprep.subr.bf16.mxu0 %v18271_v21  ;;  %v18329_v62 = vld [vmem:[%s24738_s13 + $0xc78] ss:$28 sps:$4 sm:$0xff]   ;;  %v18332_v21 = vld [vmem:[%s24738_s13 + $0xc80] ss:$28 sps:$4 sm:$0xff]  }
 0x89f   :  { %11198 = vmatprep.subr.bf16.mxu1 %v18274_v25  ;;  %v18337_v25 = vld [vmem:[%s24738_s13 + $0xcb4] ss:$28 sps:$4 sm:$0xff]  }
 0x8a1   :  { %11035 = vmatpush1.bf16.msra.mxu0 %v18269_v24  ;;  %v18340_v24 = vld [vmem:[%s24738_s13 + $0xcbc] ss:$28 sps:$4 sm:$0xff]  }
 0x8a2   :  { %11199 = vmatpush1.bf16.msra.mxu1 %v18272_v27  ;;  %11045 = vmatprep.subr.bf16.mxu0 %v18277_v56  ;;  %v18335_v27 = vld [vmem:[%s24738_s13 + $0xcb0] ss:$28 sps:$4 sm:$0xff]   ;;  %v18338_v56 = vld [vmem:[%s24738_s13 + $0xcb8] ss:$28 sps:$4 sm:$0xff]  }
 0x8a3   :  { %11209 = vmatprep.subr.bf16.mxu1 %v18280_v29  ;;  %v18346_v29 = vld [vmem:[%s24738_s13 + $0xcf4] ss:$28 sps:$4 sm:$0xff]  }
 0x8a4   :  { %11037 = vmatmul.mubr.bf16.vlgmr.msra.gmra.mrb[28].mxu0 %v22516_v35 }
 0x8a5   :  { %11201 = vmatmul.mubr.bf16.vlgmr.msra.gmra.mrb[60].mxu1 %v22516_v35  ;;  %11046 = vmatpush1.bf16.msra.mxu0 %v18275_v32  ;;  %v18341_v32 = vld [vmem:[%s24738_s13 + $0xce8] ss:$28 sps:$4 sm:$0xff]  }
 0x8a6   :  { %11077 = vmatprep.mubr.bf16.mxu0 %v22524_v26  ;;  %11210 = vmatpush1.bf16.msra.mxu1 %v18278_v37  ;;  %v18344_v37 = vld [vmem:[%s24738_s13 + $0xcf0] ss:$28 sps:$4 sm:$0xff]  }
 0x8a7   :  { %11241 = vmatprep.mubr.bf16.mxu1 %v22524_v26  ;;  %11047 = vmatprep.subr.bf16.mxu0 %v18283_v41  ;;  %v18349_v41 = vld [vmem:[%s24738_s13 + $0xd24] ss:$28 sps:$4 sm:$0xff]  }
 0x8a8   :  { %11211 = vmatprep.subr.bf16.mxu1 %v18286_v46  ;;  %v8047_v46 = vadd.f32 %v22091_v54, %v7793_v30  ;;  %v18358_v54 = vld [vmem:[%s24738_s13 + $0xd64] ss:$28 sps:$4 sm:$0xff]  }
 0x8a9   :  { %11048 = vmatpush1.bf16.msra.mxu0 %v18281_v47  ;;  %v18347_v47 = vld [vmem:[%s24738_s13 + $0xd20] ss:$28 sps:$4 sm:$0xff]  }
 0x8aa   :  { %11212 = vmatpush1.bf16.msra.mxu1 %v18284_v5  ;;  %11049 = vmatprep.subr.bf16.mxu0 %v18289_v53  ;;  %v18350_v5 = vld [vmem:[%s24738_s13 + $0xd28] ss:$28 sps:$4 sm:$0xff]   ;;  %v18355_v53 = vld [vmem:[%s24738_s13 + $0xd5c] ss:$28 sps:$4 sm:$0xff]   ;;  %18647 = vtanh.f32 %v8047_v46 }
 0x8ab   :  { %11213 = vmatprep.subr.bf16.mxu1 %v18292_v13  ;;  %v18353_v13 = vld [vmem:[%s24738_s13 + $0xd58] ss:$28 sps:$4 sm:$0xff]   ;;  %v18401_v30 = vld [vmem:[%s24738_s13 + $0x160] ss:$28 sps:$4 sm:$0xff]  }
 0x8ac   :  { %v18410_v46 = vld [vmem:[%s24738_s13 + $0x1a0] ss:$28 sps:$4 sm:$0xff]  }
 0x8ad   :  { %11050 = vmatpush1.bf16.msra.mxu0 %v18287_v1  ;;  %v18356_v1 = vld [vmem:[%s24738_s13 + $0xd60] ss:$28 sps:$4 sm:$0xff]  }
 0x8ae   :  { %11214 = vmatpush1.bf16.msra.mxu1 %v18290_v48  ;;  %11051 = vmatprep.subr.bf16.mxu0 %v18295_v9  ;;  %v18361_v48 = vld [vmem:[%s24738_s13 + $0xd94] ss:$28 sps:$4 sm:$0xff]   ;;  %v18364_v9 = vld [vmem:[%s24738_s13 + $0xd9c] ss:$28 sps:$4 sm:$0xff]  }
 0x8af   :  { %11215 = vmatprep.subr.bf16.mxu1 %v18298_v43  ;;  %v18359_v43 = vld [vmem:[%s24738_s13 + $0xd90] ss:$28 sps:$4 sm:$0xff]  }
 0x8b1   :  { %11052 = vmatpush1.bf16.msra.mxu0 %v18293_v45  ;;  %v18362_v45 = vld [vmem:[%s24738_s13 + $0xd98] ss:$28 sps:$4 sm:$0xff]  }
 0x8b2   :  { %11216 = vmatpush1.bf16.msra.mxu1 %v18296_v50  ;;  %11053 = vmatprep.subr.bf16.mxu0 %v18301_v14  ;;  %v18367_v50 = vld [vmem:[%s24738_s13 + $0xdcc] ss:$28 sps:$4 sm:$0xff]   ;;  %v18370_v14 = vld [vmem:[%s24738_s13 + $0xdd4] ss:$28 sps:$4 sm:$0xff]  }
 0x8b3   :  { %11217 = vmatprep.subr.bf16.mxu1 %v18304_v57  ;;  %v18365_v57 = vld [vmem:[%s24738_s13 + $0xdc8] ss:$28 sps:$4 sm:$0xff]  }
 0x8b5   :  { %11054 = vmatpush1.bf16.msra.mxu0 %v18299_v58  ;;  %v18368_v58 = vld [vmem:[%s24738_s13 + $0xdd0] ss:$28 sps:$4 sm:$0xff]  }
 0x8b6   :  { %11218 = vmatpush1.bf16.msra.mxu1 %v18302_v22  ;;  %11055 = vmatprep.subr.bf16.mxu0 %v18307_v3  ;;  %v18373_v22 = vld [vmem:[%s24738_s13 + $0x14] ss:$28 sps:$4 sm:$0xff]   ;;  %v18648_v3 = vpop.eup %18647 }
 0x8b7   :  { %11219 = vmatprep.subr.bf16.mxu1 %v18310_v59  ;;  %v18374_v59 = vld [vmem:[%s24738_s13 + $0x1d8] ss:$28 sps:$4 sm:$0xff]  }
 0x8b9   :  { %11056 = vmatpush1.bf16.msra.mxu0 %v18305_v60  ;;  %v18371_v60 = vld [vmem:[%s24738_s13 + $0x10] ss:$28 sps:$4 sm:$0xff]  }
 0x8ba   :  { %11220 = vmatpush1.bf16.msra.mxu1 %v18308_v63  ;;  %11057 = vmatprep.subr.bf16.mxu0 %v18313_v0  ;;  %v22719_v63 = vpack.c.bf16 %v18648_v3, %v18648_v3  ;;  %v18375_v0 = vld [vmem:[%s24738_s13 + $0x18] ss:$28 sps:$4 sm:$0xff]   ;;  %v18430_v3 = vld [vmem:[%s24738_s13 + $0x440] ss:$28 sps:$4 sm:$0xff]  }
 0x8bb   :  { %11221 = vmatprep.subr.bf16.mxu1 %v18316_v2  ;;  %v18378_v2 = vld [vmem:[%s24738_s13 + $0x4c] ss:$28 sps:$4 sm:$0xff]  }
 0x8bd   :  { %11058 = vmatpush1.bf16.msra.mxu0 %v18311_v6  ;;  %v18379_v6 = vld [vmem:[%s24738_s13 + $0x210] ss:$28 sps:$4 sm:$0xff]  }
 0x8be   :  { %11222 = vmatpush1.bf16.msra.mxu1 %v18314_v7  ;;  %11059 = vmatprep.subr.bf16.mxu0 %v18319_v8  ;;  %v18376_v7 = vld [vmem:[%s24738_s13 + $0x48] ss:$28 sps:$4 sm:$0xff]   ;;  %v18380_v8 = vld [vmem:[%s24738_s13 + $0x50] ss:$28 sps:$4 sm:$0xff]  }
 0x8bf   :  { %11223 = vmatprep.subr.bf16.mxu1 %v18322_v31  ;;  %v18383_v31 = vld [vmem:[%s24738_s13 + $0x84] ss:$28 sps:$4 sm:$0xff]  }
 0x8c1   :  { %11060 = vmatpush1.bf16.msra.mxu0 %v18317_v10  ;;  %v18384_v10 = vld [vmem:[%s24738_s13 + $0x248] ss:$28 sps:$4 sm:$0xff]  }
 0x8c2   :  { %11224 = vmatpush1.bf16.msra.mxu1 %v18320_v11  ;;  %11061 = vmatprep.subr.bf16.mxu0 %v18325_v38  ;;  %v18381_v11 = vld [vmem:[%s24738_s13 + $0x80] ss:$28 sps:$4 sm:$0xff]   ;;  %v18385_v38 = vld [vmem:[%s24738_s13 + $0x88] ss:$28 sps:$4 sm:$0xff]  }
 0x8c3   :  { %11225 = vmatprep.subr.bf16.mxu1 %v18328_v12  ;;  %v18389_v12 = vld [vmem:[%s24738_s13 + $0x280] ss:$28 sps:$4 sm:$0xff]  }
 0x8c5   :  { %11062 = vmatpush1.bf16.msra.mxu0 %v18323_v52  ;;  %v18386_v52 = vld [vmem:[%s24738_s13 + $0xb8] ss:$28 sps:$4 sm:$0xff]  }
 0x8c6   :  { %11226 = vmatpush1.bf16.msra.mxu1 %v18326_v15  ;;  %11063 = vmatprep.subr.bf16.mxu0 %v18331_v42  ;;  %v18390_v15 = vld [vmem:[%s24738_s13 + $0xc0] ss:$28 sps:$4 sm:$0xff]   ;;  %v18393_v42 = vld [vmem:[%s24738_s13 + $0xf4] ss:$28 sps:$4 sm:$0xff]  }
 0x8c7   :  { %11227 = vmatprep.subr.bf16.mxu1 %v18334_v20  ;;  %v18394_v20 = vld [vmem:[%s24738_s13 + $0x2b8] ss:$28 sps:$4 sm:$0xff]  }
 0x8c9   :  { %11064 = vmatpush1.bf16.msra.mxu0 %v18329_v62  ;;  %v18391_v62 = vld [vmem:[%s24738_s13 + $0xf0] ss:$28 sps:$4 sm:$0xff]  }
 0x8ca   :  { %11228 = vmatpush1.bf16.msra.mxu1 %v18332_v21  ;;  %11065 = vmatprep.subr.bf16.mxu0 %v18337_v25  ;;  %v18395_v21 = vld [vmem:[%s24738_s13 + $0xf8] ss:$28 sps:$4 sm:$0xff]   ;;  %v18398_v25 = vld [vmem:[%s24738_s13 + $0x12c] ss:$28 sps:$4 sm:$0xff]  }
 0x8cb   :  { %11229 = vmatprep.subr.bf16.mxu1 %v18340_v24  ;;  %v18399_v24 = vld [vmem:[%s24738_s13 + $0x2f0] ss:$28 sps:$4 sm:$0xff]  }
 0x8cd   :  { %11066 = vmatpush1.bf16.msra.mxu0 %v18335_v27  ;;  %v18396_v27 = vld [vmem:[%s24738_s13 + $0x128] ss:$28 sps:$4 sm:$0xff]  }
 0x8ce   :  { %11230 = vmatpush1.bf16.msra.mxu1 %v18338_v56  ;;  %11067 = vmatprep.subr.bf16.mxu0 %v18343_v28  ;;  %v18400_v56 = vld [vmem:[%s24738_s13 + $0x130] ss:$28 sps:$4 sm:$0xff]   ;;  %v18403_v28 = vld [vmem:[%s24738_s13 + $0x164] ss:$28 sps:$4 sm:$0xff]  }
 0x8cf   :  { %11231 = vmatprep.subr.bf16.mxu1 %v18346_v29  ;;  %v18404_v29 = vld [vmem:[%s24738_s13 + $0x328] ss:$28 sps:$4 sm:$0xff]  }
 0x8d1   :  { %11068 = vmatpush1.bf16.msra.mxu0 %v18341_v32  ;;  %v18405_v32 = vld [vmem:[%s24738_s13 + $0x168] ss:$28 sps:$4 sm:$0xff]  }
 0x8d2   :  { %11232 = vmatpush1.bf16.msra.mxu1 %v18344_v37  ;;  %11069 = vmatprep.subr.bf16.mxu0 %v18349_v41  ;;  %v18408_v37 = vld [vmem:[%s24738_s13 + $0x19c] ss:$28 sps:$4 sm:$0xff]  }
 0x8d3   :  { %11233 = vmatprep.subr.bf16.mxu1 %v18352_v61  ;;  %v18409_v41 = vld [vmem:[%s24738_s13 + $0x360] ss:$28 sps:$4 sm:$0xff]   ;;  %v18406_v61 = vld [vmem:[%s24738_s13 + $0x198] ss:$28 sps:$4 sm:$0xff]  }
 0x8d5   :  { %11070 = vmatpush1.bf16.msra.mxu0 %v18347_v47  ;;  %v18413_v47 = vld [vmem:[%s24738_s13 + $0x1d4] ss:$28 sps:$4 sm:$0xff]  }
 0x8d6   :  { %11234 = vmatpush1.bf16.msra.mxu1 %v18350_v5  ;;  %11071 = vmatprep.subr.bf16.mxu0 %v18355_v53  ;;  %v18414_v5 = vld [vmem:[%s24738_s13 + $0x558] ss:$28 sps:$4 sm:$0xff]   ;;  %v18411_v53 = vld [vmem:[%s24738_s13 + $0x1d0] ss:$28 sps:$4 sm:$0xff]  }
 0x8d7   :  { %11235 = vmatprep.subr.bf16.mxu1 %v18358_v54  ;;  %v18415_v54 = vld [vmem:[%s24738_s13 + $0x398] ss:$28 sps:$4 sm:$0xff]  }
 0x8d9   :  { %11072 = vmatpush1.bf16.msra.mxu0 %v18353_v13  ;;  %v18418_v13 = vld [vmem:[%s24738_s13 + $0x20c] ss:$28 sps:$4 sm:$0xff]  }
 0x8da   :  { %11236 = vmatpush1.bf16.msra.mxu1 %v18356_v1  ;;  %11073 = vmatprep.subr.bf16.mxu0 %v18361_v48  ;;  %v18419_v1 = vld [vmem:[%s24738_s13 + $0x590] ss:$28 sps:$4 sm:$0xff]   ;;  %v18416_v48 = vld [vmem:[%s24738_s13 + $0x208] ss:$28 sps:$4 sm:$0xff]  }
 0x8db   :  { %11237 = vmatprep.subr.bf16.mxu1 %v18364_v9  ;;  %v18420_v9 = vld [vmem:[%s24738_s13 + $0x3d0] ss:$28 sps:$4 sm:$0xff]  }
 0x8dd   :  { %11074 = vmatpush1.bf16.msra.mxu0 %v18359_v43  ;;  %v18423_v43 = vld [vmem:[%s24738_s13 + $0x244] ss:$28 sps:$4 sm:$0xff]  }
 0x8de   :  { %11238 = vmatpush1.bf16.msra.mxu1 %v18362_v45  ;;  %11075 = vmatprep.subr.bf16.mxu0 %v18367_v50  ;;  %v18424_v45 = vld [vmem:[%s24738_s13 + $0x5c8] ss:$28 sps:$4 sm:$0xff]   ;;  %v18421_v50 = vld [vmem:[%s24738_s13 + $0x240] ss:$28 sps:$4 sm:$0xff]  }
 0x8df   :  { %11239 = vmatprep.subr.bf16.mxu1 %v18370_v14  ;;  %v18425_v14 = vld [vmem:[%s24738_s13 + $0x408] ss:$28 sps:$4 sm:$0xff]  }
 0x8e1   :  { %11076 = vmatpush1.bf16.msra.mxu0 %v18365_v57  ;;  %v18428_v57 = vld [vmem:[%s24738_s13 + $0x27c] ss:$28 sps:$4 sm:$0xff]  }
 0x8e2   :  { %11240 = vmatpush1.bf16.msra.mxu1 %v18368_v58  ;;  %11250 = vmatprep.subr.bf16.mxu0 %v18373_v22  ;;  %v18429_v58 = vld [vmem:[%s24738_s13 + $0x600] ss:$28 sps:$4 sm:$0xff]   ;;  %v18426_v22 = vld [vmem:[%s24738_s13 + $0x278] ss:$28 sps:$4 sm:$0xff]  }
 0x8e3   :  { %16979 = vmatprep.subr.bf16.mxu1 %v18374_v59  ;;  %v18433_v59 = vld [vmem:[%s24738_s13 + $0x2b4] ss:$28 sps:$4 sm:$0xff]  }
 0x8e4   :  { %11078 = vmatmul.mubr.bf16.vlgmr.msra.gmra.mrb[28].mxu0 %v22719_v63 }
 0x8e5   :  { %11242 = vmatmul.mubr.bf16.vlgmr.msra.gmra.mrb[60].mxu1 %v22719_v63  ;;  %11251 = vmatpush1.bf16.msra.mxu0 %v18371_v60  ;;  %v18434_v60 = vld [vmem:[%s24738_s13 + $0x638] ss:$28 sps:$4 sm:$0xff]  }
 0x8e6   :  { %11282 = vmatprep.mubr.bf16.mxu0 %v22097_v18  ;;  %16980 = vmatpush3.bf16.msra.mxu1 %v18375_v0  ;;  %v18431_v0 = vld [vmem:[%s24738_s13 + $0x2b0] ss:$28 sps:$4 sm:$0xff]  }
 0x8e7   :  { %11446 = vmatprep.mubr.bf16.mxu1 %v22097_v18  ;;  %11252 = vmatprep.subr.bf16.mxu0 %v18378_v2  ;;  %v18388_v18 = vld [vmem:[%s24738_s13 + $0xbc] ss:$28 sps:$4 sm:$0xff]  }
 0x8e8   :  { %16981 = vmatprep.subr.bf16.mxu1 %v18379_v6  ;;  %v18435_v2 = vld [vmem:[%s24738_s13 + $0x478] ss:$28 sps:$4 sm:$0xff]   ;;  %v18438_v6 = vld [vmem:[%s24738_s13 + $0x2ec] ss:$28 sps:$4 sm:$0xff]  }
 0x8e9   :  { %11253 = vmatpush1.bf16.msra.mxu0 %v18376_v7  ;;  %v18439_v7 = vld [vmem:[%s24738_s13 + $0x670] ss:$28 sps:$4 sm:$0xff]  }
 0x8ea   :  { %16982 = vmatpush3.bf16.msra.mxu1 %v18380_v8  ;;  %11254 = vmatprep.subr.bf16.mxu0 %v18383_v31  ;;  %v18436_v8 = vld [vmem:[%s24738_s13 + $0x2e8] ss:$28 sps:$4 sm:$0xff]   ;;  %v18440_v31 = vld [vmem:[%s24738_s13 + $0x4b0] ss:$28 sps:$4 sm:$0xff]  }
 0x8eb   :  { %16983 = vmatprep.subr.bf16.mxu1 %v18384_v10  ;;  %v18443_v10 = vld [vmem:[%s24738_s13 + $0x324] ss:$28 sps:$4 sm:$0xff]  }
 0x8ed   :  { %11255 = vmatpush1.bf16.msra.mxu0 %v18381_v11  ;;  %v18444_v11 = vld [vmem:[%s24738_s13 + $0x6a8] ss:$28 sps:$4 sm:$0xff]  }
 0x8ee   :  { %16984 = vmatpush3.bf16.msra.mxu1 %v18385_v38  ;;  %11256 = vmatprep.subr.bf16.mxu0 %v18388_v18  ;;  %v18441_v38 = vld [vmem:[%s24738_s13 + $0x320] ss:$28 sps:$4 sm:$0xff]   ;;  %v18445_v18 = vld [vmem:[%s24738_s13 + $0x4e8] ss:$28 sps:$4 sm:$0xff]  }
 0x8ef   :  { %16985 = vmatprep.subr.bf16.mxu1 %v18389_v12  ;;  %v18448_v12 = vld [vmem:[%s24738_s13 + $0x35c] ss:$28 sps:$4 sm:$0xff]  }
 0x8f1   :  { %11257 = vmatpush1.bf16.msra.mxu0 %v18386_v52  ;;  %v18449_v52 = vld [vmem:[%s24738_s13 + $0x6e0] ss:$28 sps:$4 sm:$0xff]  }
 0x8f2   :  { %16986 = vmatpush3.bf16.msra.mxu1 %v18390_v15  ;;  %11258 = vmatprep.subr.bf16.mxu0 %v18393_v42  ;;  %v18446_v15 = vld [vmem:[%s24738_s13 + $0x358] ss:$28 sps:$4 sm:$0xff]   ;;  %v18450_v42 = vld [vmem:[%s24738_s13 + $0x520] ss:$28 sps:$4 sm:$0xff]  }
 0x8f3   :  { %16987 = vmatprep.subr.bf16.mxu1 %v18394_v20  ;;  %v18453_v20 = vld [vmem:[%s24738_s13 + $0x394] ss:$28 sps:$4 sm:$0xff]  }
 0x8f5   :  { %11259 = vmatpush1.bf16.msra.mxu0 %v18391_v62  ;;  %v18454_v62 = vld [vmem:[%s24738_s13 + $0x8d8] ss:$28 sps:$4 sm:$0xff]  }
 0x8f6   :  { %16988 = vmatpush3.bf16.msra.mxu1 %v18395_v21  ;;  %11260 = vmatprep.subr.bf16.mxu0 %v18398_v25  ;;  %v18451_v21 = vld [vmem:[%s24738_s13 + $0x390] ss:$28 sps:$4 sm:$0xff]   ;;  %v18455_v25 = vld [vmem:[%s24738_s13 + $0x718] ss:$28 sps:$4 sm:$0xff]  }
 0x8f7   :  { %16989 = vmatprep.subr.bf16.mxu1 %v18399_v24  ;;  %v18458_v24 = vld [vmem:[%s24738_s13 + $0x3cc] ss:$28 sps:$4 sm:$0xff]  }
 0x8f9   :  { %11261 = vmatpush1.bf16.msra.mxu0 %v18396_v27  ;;  %v18459_v27 = vld [vmem:[%s24738_s13 + $0x910] ss:$28 sps:$4 sm:$0xff]  }
 0x8fa   :  { %16990 = vmatpush3.bf16.msra.mxu1 %v18400_v56  ;;  %11262 = vmatprep.subr.bf16.mxu0 %v18403_v28  ;;  %v18456_v56 = vld [vmem:[%s24738_s13 + $0x3c8] ss:$28 sps:$4 sm:$0xff]   ;;  %v18460_v28 = vld [vmem:[%s24738_s13 + $0x750] ss:$28 sps:$4 sm:$0xff]  }
 0x8fb   :  { %16991 = vmatprep.subr.bf16.mxu1 %v18404_v29  ;;  %v18464_v29 = vld [vmem:[%s24738_s13 + $0x948] ss:$28 sps:$4 sm:$0xff]  }
 0x8fd   :  { %11263 = vmatpush1.bf16.msra.mxu0 %v18401_v30  ;;  %v18465_v30 = vld [vmem:[%s24738_s13 + $0x788] ss:$28 sps:$4 sm:$0xff]  }
 0x8fe   :  { %16992 = vmatpush3.bf16.msra.mxu1 %v18405_v32  ;;  %11264 = vmatprep.subr.bf16.mxu0 %v18408_v37  ;;  %v18468_v32 = vld [vmem:[%s24738_s13 + $0x43c] ss:$28 sps:$4 sm:$0xff]  }
 0x8ff   :  { %16993 = vmatprep.subr.bf16.mxu1 %v18409_v41  ;;  %v18469_v37 = vld [vmem:[%s24738_s13 + $0x980] ss:$28 sps:$4 sm:$0xff]   ;;  %v18466_v41 = vld [vmem:[%s24738_s13 + $0x438] ss:$28 sps:$4 sm:$0xff]  }
 0x901   :  { %11265 = vmatpush1.bf16.msra.mxu0 %v18406_v61  ;;  %v18470_v61 = vld [vmem:[%s24738_s13 + $0x7c0] ss:$28 sps:$4 sm:$0xff]  }
 0x902   :  { %16994 = vmatpush3.bf16.msra.mxu1 %v18410_v46  ;;  %11266 = vmatprep.subr.bf16.mxu0 %v18413_v47  ;;  %v18473_v46 = vld [vmem:[%s24738_s13 + $0x474] ss:$28 sps:$4 sm:$0xff]  }
 0x903   :  { %17001 = vmatprep.subr.bf16.mxu1 %v18414_v5  ;;  %v18474_v47 = vld [vmem:[%s24738_s13 + $0x9b8] ss:$28 sps:$4 sm:$0xff]   ;;  %v18471_v5 = vld [vmem:[%s24738_s13 + $0x470] ss:$28 sps:$4 sm:$0xff]  }
 0x905   :  { %11447 = vmatmul.mubr.bf16.vlgmr.msra.gmra.mrb[64].mxu1 %v22105_v55  ;;  %11267 = vmatpush1.bf16.msra.mxu0 %v18411_v53  ;;  %v18475_v53 = vld [vmem:[%s24738_s13 + $0x7f8] ss:$28 sps:$4 sm:$0xff]  }
 0x906   :  { %17002 = vmatpush3.bf16.msra.mxu1 %v18415_v54  ;;  %11486 = vmatprep.mubr.bf16.mxu1 %v22115_v33  ;;  %v18478_v54 = vld [vmem:[%s24738_s13 + $0x4ac] ss:$28 sps:$4 sm:$0xff]  }
 0x907   :  { %11268 = vmatprep.subr.bf16.mxu0 %v18418_v13  ;;  %17003 = vmatprep.subr.bf16.mxu1 %v18419_v1  ;;  %v18479_v13 = vld [vmem:[%s24738_s13 + $0x9f0] ss:$28 sps:$4 sm:$0xff]   ;;  %v18476_v1 = vld [vmem:[%s24738_s13 + $0x4a8] ss:$28 sps:$4 sm:$0xff]  }
 0x909   :  { %11269 = vmatpush1.bf16.msra.mxu0 %v18416_v48  ;;  %v18480_v48 = vld [vmem:[%s24738_s13 + $0x830] ss:$28 sps:$4 sm:$0xff]  }
 0x90a   :  { %17004 = vmatpush3.bf16.msra.mxu1 %v18420_v9  ;;  %11270 = vmatprep.subr.bf16.mxu0 %v18423_v43  ;;  %v18483_v9 = vld [vmem:[%s24738_s13 + $0x4e4] ss:$28 sps:$4 sm:$0xff]  }
 0x90b   :  { %17005 = vmatprep.subr.bf16.mxu1 %v18424_v45  ;;  %v18484_v43 = vld [vmem:[%s24738_s13 + $0xa28] ss:$28 sps:$4 sm:$0xff]   ;;  %v18481_v45 = vld [vmem:[%s24738_s13 + $0x4e0] ss:$28 sps:$4 sm:$0xff]  }
 0x90d   :  { %11271 = vmatpush1.bf16.msra.mxu0 %v18421_v50  ;;  %v18485_v50 = vld [vmem:[%s24738_s13 + $0x868] ss:$28 sps:$4 sm:$0xff]  }
 0x90e   :  { %17006 = vmatpush3.bf16.msra.mxu1 %v18425_v14  ;;  %11272 = vmatprep.subr.bf16.mxu0 %v18428_v57  ;;  %v18488_v14 = vld [vmem:[%s24738_s13 + $0x51c] ss:$28 sps:$4 sm:$0xff]  }
 0x90f   :  { %17007 = vmatprep.subr.bf16.mxu1 %v18429_v58  ;;  %v18489_v57 = vld [vmem:[%s24738_s13 + $0xa60] ss:$28 sps:$4 sm:$0xff]   ;;  %v18486_v58 = vld [vmem:[%s24738_s13 + $0x518] ss:$28 sps:$4 sm:$0xff]  }
 0x911   :  { %11273 = vmatpush1.bf16.msra.mxu0 %v18426_v22  ;;  %v18490_v22 = vld [vmem:[%s24738_s13 + $0x8a0] ss:$28 sps:$4 sm:$0xff]  }
 0x912   :  { %17008 = vmatpush3.bf16.msra.mxu1 %v18430_v3  ;;  %11274 = vmatprep.subr.bf16.mxu0 %v18433_v59  ;;  %v18493_v3 = vld [vmem:[%s24738_s13 + $0x554] ss:$28 sps:$4 sm:$0xff]  }
 0x913   :  { %17009 = vmatprep.subr.bf16.mxu1 %v18434_v60  ;;  %v18494_v59 = vld [vmem:[%s24738_s13 + $0xc58] ss:$28 sps:$4 sm:$0xff]   ;;  %v18491_v60 = vld [vmem:[%s24738_s13 + $0x550] ss:$28 sps:$4 sm:$0xff]  }
 0x915   :  { %11275 = vmatpush1.bf16.msra.mxu0 %v18431_v0  ;;  %v18495_v0 = vld [vmem:[%s24738_s13 + $0xa98] ss:$28 sps:$4 sm:$0xff]  }
 0x916   :  { %17010 = vmatpush3.bf16.msra.mxu1 %v18435_v2  ;;  %11276 = vmatprep.subr.bf16.mxu0 %v18438_v6  ;;  %v18498_v2 = vld [vmem:[%s24738_s13 + $0x58c] ss:$28 sps:$4 sm:$0xff]  }
 0x917   :  { %17011 = vmatprep.subr.bf16.mxu1 %v18439_v7  ;;  %v18499_v6 = vld [vmem:[%s24738_s13 + $0xc90] ss:$28 sps:$4 sm:$0xff]   ;;  %v18496_v7 = vld [vmem:[%s24738_s13 + $0x588] ss:$28 sps:$4 sm:$0xff]  }
 0x919   :  { %11277 = vmatpush1.bf16.msra.mxu0 %v18436_v8  ;;  %v18500_v8 = vld [vmem:[%s24738_s13 + $0xad0] ss:$28 sps:$4 sm:$0xff]  }
 0x91a   :  { %17012 = vmatpush3.bf16.msra.mxu1 %v18440_v31  ;;  %11278 = vmatprep.subr.bf16.mxu0 %v18443_v10  ;;  %v18503_v31 = vld [vmem:[%s24738_s13 + $0x5c4] ss:$28 sps:$4 sm:$0xff]  }
 0x91b   :  { %17013 = vmatprep.subr.bf16.mxu1 %v18444_v11  ;;  %v18504_v10 = vld [vmem:[%s24738_s13 + $0xcc8] ss:$28 sps:$4 sm:$0xff]   ;;  %v18501_v11 = vld [vmem:[%s24738_s13 + $0x5c0] ss:$28 sps:$4 sm:$0xff]  }
 0x91d   :  { %11279 = vmatpush1.bf16.msra.mxu0 %v18441_v38  ;;  %v18505_v38 = vld [vmem:[%s24738_s13 + $0xb08] ss:$28 sps:$4 sm:$0xff]  }
 0x91e   :  { %17014 = vmatpush3.bf16.msra.mxu1 %v18445_v18  ;;  %11280 = vmatprep.subr.bf16.mxu0 %v18448_v12  ;;  %v18508_v18 = vld [vmem:[%s24738_s13 + $0x5fc] ss:$28 sps:$4 sm:$0xff]  }
 0x91f   :  { %17015 = vmatprep.subr.bf16.mxu1 %v18449_v52  ;;  %v18509_v12 = vld [vmem:[%s24738_s13 + $0xd00] ss:$28 sps:$4 sm:$0xff]   ;;  %v18506_v52 = vld [vmem:[%s24738_s13 + $0x5f8] ss:$28 sps:$4 sm:$0xff]  }
 0x921   :  { %11281 = vmatpush1.bf16.msra.mxu0 %v18446_v15  ;;  %v18510_v15 = vld [vmem:[%s24738_s13 + $0xb40] ss:$28 sps:$4 sm:$0xff]  }
 0x922   :  { %17016 = vmatpush3.bf16.msra.mxu1 %v18450_v42  ;;  %11291 = vmatprep.subr.bf16.mxu0 %v18453_v20  ;;  %v18513_v42 = vld [vmem:[%s24738_s13 + $0x634] ss:$28 sps:$4 sm:$0xff]  }
 0x923   :  { %17023 = vmatprep.subr.bf16.mxu1 %v18454_v62  ;;  %v18514_v20 = vld [vmem:[%s24738_s13 + $0xd38] ss:$28 sps:$4 sm:$0xff]   ;;  %v18511_v62 = vld [vmem:[%s24738_s13 + $0x630] ss:$28 sps:$4 sm:$0xff]  }
 0x924   :  { %11283 = vmatmul.mubr.bf16.vlgmr.msra.gmra.mrb[32].mxu0 %v22105_v55  ;;  %v18463_v55 = vld [vmem:[%s24738_s13 + $0x404] ss:$28 sps:$4 sm:$0xff]  }
 0x925   :  { %11487 = vmatmul.mubr.bf16.vlgmr.msra.gmra.mrb[68].mxu1 %v22310_v44  ;;  %11292 = vmatpush1.bf16.msra.mxu0 %v18451_v21  ;;  %v18515_v21 = vld [vmem:[%s24738_s13 + $0xb78] ss:$28 sps:$4 sm:$0xff]  }
 0x926   :  { %11323 = vmatprep.mubr.bf16.mxu0 %v22115_v33  ;;  %17024 = vmatpush3.bf16.msra.mxu1 %v18455_v25  ;;  %v18461_v33 = vld [vmem:[%s24738_s13 + $0x400] ss:$28 sps:$4 sm:$0xff]   ;;  %v18518_v25 = vld [vmem:[%s24738_s13 + $0x66c] ss:$28 sps:$4 sm:$0xff]  }
 0x927   :  { %11526 = vmatprep.mubr.bf16.mxu1 %v22315_v17  ;;  %11293 = vmatprep.subr.bf16.mxu0 %v18458_v24  ;;  %v18519_v24 = vld [vmem:[%s24738_s13 + $0xd70] ss:$28 sps:$4 sm:$0xff]  }
 0x928   :  { %17025 = vmatprep.subr.bf16.mxu1 %v18459_v27  ;;  %v18516_v27 = vld [vmem:[%s24738_s13 + $0x668] ss:$28 sps:$4 sm:$0xff]  }
 0x929   :  { %11294 = vmatpush1.bf16.msra.mxu0 %v18456_v56  ;;  %v18520_v56 = vld [vmem:[%s24738_s13 + $0xbb0] ss:$28 sps:$4 sm:$0xff]  }
 0x92a   :  { %17026 = vmatpush3.bf16.msra.mxu1 %v18460_v28  ;;  %11295 = vmatprep.subr.bf16.mxu0 %v18463_v55  ;;  %v18523_v28 = vld [vmem:[%s24738_s13 + $0x6a4] ss:$28 sps:$4 sm:$0xff]  }
 0x92b   :  { %17027 = vmatprep.subr.bf16.mxu1 %v18464_v29  ;;  %v18524_v55 = vld [vmem:[%s24738_s13 + $0xda8] ss:$28 sps:$4 sm:$0xff]   ;;  %v18521_v29 = vld [vmem:[%s24738_s13 + $0x6a0] ss:$28 sps:$4 sm:$0xff]  }
 0x92d   :  { %11296 = vmatpush1.bf16.msra.mxu0 %v18461_v33  ;;  %v18525_v33 = vld [vmem:[%s24738_s13 + $0xbe8] ss:$28 sps:$4 sm:$0xff]  }
 0x92e   :  { %17028 = vmatpush3.bf16.msra.mxu1 %v18465_v30  ;;  %11297 = vmatprep.subr.bf16.mxu0 %v18468_v32  ;;  %v18528_v30 = vld [vmem:[%s24738_s13 + $0x6dc] ss:$28 sps:$4 sm:$0xff]  }
 0x92f   :  { %17029 = vmatprep.subr.bf16.mxu1 %v18469_v37  ;;  %v18529_v32 = vld [vmem:[%s24738_s13 + $0xde0] ss:$28 sps:$4 sm:$0xff]  }
 0x930   :  { %v11588_v37 = vld [vmem:[%s24741_s15] sm:$0xff] }
 0x931   :  { %11298 = vmatpush1.bf16.msra.mxu0 %v18466_v41  ;;  %v11592_v41 = vld [vmem:[%s24741_s15 + $0x20] sm:$0xff] }
 0x932   :  { %17030 = vmatpush3.bf16.msra.mxu1 %v18470_v61  ;;  %11299 = vmatprep.subr.bf16.mxu0 %v18473_v46  ;;  %v18526_v61 = vld [vmem:[%s24738_s13 + $0x6d8] ss:$28 sps:$4 sm:$0xff]   ;;  %v18530_v46 = vld [vmem:[%s24738_s13 + $0xc20] ss:$28 sps:$4 sm:$0xff]  }
 0x933   :  { %17031 = vmatprep.subr.bf16.mxu1 %v18474_v47  ;;  %v18533_v47 = vld [vmem:[%s24738_s13 + $0x714] ss:$28 sps:$4 sm:$0xff]  }
 0x935   :  { %11300 = vmatpush1.bf16.msra.mxu0 %v18471_v5  ;;  %v16363_v5 = vcombine.high %v11588_v37, %v11592_v41 }
 0x936   :  { %17032 = vmatpush3.bf16.msra.mxu1 %v18475_v53  ;;  %11301 = vmatprep.subr.bf16.mxu0 %v18478_v54  ;;  %v18531_v53 = vld [vmem:[%s24738_s13 + $0x710] ss:$28 sps:$4 sm:$0xff]   ;;  %v11596_v54 = vld [vmem:[%s24741_s15 + $0x40] sm:$0xff] }
 0x937   :  { %17033 = vmatprep.subr.bf16.mxu1 %v18479_v13  ;;  %v11600_v13 = vld [vmem:[%s24741_s15 + $0x60] sm:$0xff] }
 0x939   :  { %11302 = vmatpush1.bf16.msra.mxu0 %v18476_v1  ;;  %v18536_v1 = vld [vmem:[%s24738_s13 + $0x74c] ss:$28 sps:$4 sm:$0xff]  }
 0x93a   :  { %17034 = vmatpush3.bf16.msra.mxu1 %v18480_v48  ;;  %11303 = vmatprep.subr.bf16.mxu0 %v18483_v9  ;;  %v16362_v48 = vcombine.low %v11588_v37, %v11592_v41  ;;  %v16371_v9 = vcombine.high %v11596_v54, %v11600_v13  ;;  %v18557_v37 = vld [vmem:[%s24738_s13 + $0x8d4] ss:$28 sps:$4 sm:$0xff]  }
 0x93b   :  { %17035 = vmatprep.subr.bf16.mxu1 %v18484_v43  ;;  %v18534_v43 = vld [vmem:[%s24738_s13 + $0x748] ss:$28 sps:$4 sm:$0xff]  }
 0x93d   :  { %11304 = vmatpush1.bf16.msra.mxu0 %v18481_v45  ;;  %v11604_v45 = vld [vmem:[%s24741_s15 + $0x80] sm:$0xff] }
 0x93e   :  { %17036 = vmatpush3.bf16.msra.mxu1 %v18485_v50  ;;  %11305 = vmatprep.subr.bf16.mxu0 %v18488_v14  ;;  %v11608_v50 = vld [vmem:[%s24741_s15 + $0xa0] sm:$0xff]  ;;  %v16370_v14 = vcombine.low %v11596_v54, %v11600_v13 }
 0x93f   :  { %17037 = vmatprep.subr.bf16.mxu1 %v18489_v57  ;;  %v16379_v57 = vcombine.high %v11604_v45, %v11608_v50 }
 0x941   :  { %11306 = vmatpush1.bf16.msra.mxu0 %v18486_v58  ;;  %v18537_v58 = vld [vmem:[%s24738_s13 + $0x780] ss:$28 sps:$4 sm:$0xff]  }
 0x942   :  { %17038 = vmatpush3.bf16.msra.mxu1 %v18490_v22  ;;  %11307 = vmatprep.subr.bf16.mxu0 %v18493_v3  ;;  %v11612_v22 = vld [vmem:[%s24741_s15 + $0xc0] sm:$0xff]  ;;  %v18542_v3 = vld [vmem:[%s24738_s13 + $0x7bc] ss:$28 sps:$4 sm:$0xff]  }
 0x943   :  { %17045 = vmatprep.subr.bf16.mxu1 %v18494_v59  ;;  %v16378_v59 = vcombine.low %v11604_v45, %v11608_v50 }
 0x945   :  { %11527 = vmatmul.mubr.bf16.vlgmr.msra.gmra.mrb[72].mxu1 %v22516_v35  ;;  %11308 = vmatpush1.bf16.msra.mxu0 %v18491_v60 }
 0x946   :  { %17046 = vmatpush3.bf16.msra.mxu1 %v18495_v0  ;;  %11566 = vmatprep.mubr.bf16.mxu1 %v22524_v26  ;;  %v18540_v0 = vld [vmem:[%s24738_s13 + $0x7b8] ss:$28 sps:$4 sm:$0xff]  }
 0x947   :  { %11309 = vmatprep.subr.bf16.mxu0 %v18498_v2  ;;  %17047 = vmatprep.subr.bf16.mxu1 %v18499_v6  ;;  %v11620_v2 = vld [vmem:[%s24741_s15 + $0x100] sm:$0xff] }
 0x948   :  { %v11624_v6 = vld [vmem:[%s24741_s15 + $0x120] sm:$0xff] }
 0x949   :  { %11310 = vmatpush1.bf16.msra.mxu0 %v18496_v7  ;;  %v18545_v7 = vld [vmem:[%s24738_s13 + $0x7f4] ss:$28 sps:$4 sm:$0xff]  }
 0x94a   :  { %17048 = vmatpush3.bf16.msra.mxu1 %v18500_v8  ;;  %11311 = vmatprep.subr.bf16.mxu0 %v18503_v31  ;;  %v16395_v31 = vcombine.high %v11620_v2, %v11624_v6 }
 0x94b   :  { %17049 = vmatprep.subr.bf16.mxu1 %v18504_v10  ;;  %v18543_v10 = vld [vmem:[%s24738_s13 + $0x7f0] ss:$28 sps:$4 sm:$0xff]  }
 0x94d   :  { %11312 = vmatpush1.bf16.msra.mxu0 %v18501_v11  ;;  %v11628_v11 = vld [vmem:[%s24741_s15 + $0x140] sm:$0xff] }
 0x94e   :  { %17050 = vmatpush3.bf16.msra.mxu1 %v18505_v38  ;;  %11313 = vmatprep.subr.bf16.mxu0 %v18508_v18  ;;  %v11632_v38 = vld [vmem:[%s24741_s15 + $0x160] sm:$0xff]  ;;  %v18548_v18 = vld [vmem:[%s24738_s13 + $0x82c] ss:$28 sps:$4 sm:$0xff]  }
 0x94f   :  { %17051 = vmatprep.subr.bf16.mxu1 %v18509_v12  ;;  %v16394_v12 = vcombine.low %v11620_v2, %v11624_v6 }
 0x951   :  { %11314 = vmatpush1.bf16.msra.mxu0 %v18506_v52  ;;  %v16403_v52 = vcombine.high %v11628_v11, %v11632_v38 }
 0x952   :  { %17052 = vmatpush3.bf16.msra.mxu1 %v18510_v15  ;;  %11315 = vmatprep.subr.bf16.mxu0 %v18513_v42  ;;  %v18546_v15 = vld [vmem:[%s24738_s13 + $0x828] ss:$28 sps:$4 sm:$0xff]  }
 0x953   :  { %17053 = vmatprep.subr.bf16.mxu1 %v18514_v20  ;;  %v11636_v42 = vld [vmem:[%s24741_s15 + $0x180] sm:$0xff] }
 0x954   :  { %v11640_v20 = vld [vmem:[%s24741_s15 + $0x1a0] sm:$0xff] }
 0x955   :  { %11316 = vmatpush1.bf16.msra.mxu0 %v18511_v62  ;;  %v18551_v62 = vld [vmem:[%s24738_s13 + $0x864] ss:$28 sps:$4 sm:$0xff]  }
 0x956   :  { %17054 = vmatpush3.bf16.msra.mxu1 %v18515_v21  ;;  %11317 = vmatprep.subr.bf16.mxu0 %v18518_v25  ;;  %v16402_v21 = vcombine.low %v11628_v11, %v11632_v38  ;;  %v16411_v25 = vcombine.high %v11636_v42, %v11640_v20 }
 0x957   :  { %17055 = vmatprep.subr.bf16.mxu1 %v18519_v24  ;;  %v18549_v24 = vld [vmem:[%s24738_s13 + $0x860] ss:$28 sps:$4 sm:$0xff]  }
 0x959   :  { %11318 = vmatpush1.bf16.msra.mxu0 %v18516_v27  ;;  %v11644_v27 = vld [vmem:[%s24741_s15 + $0x1c0] sm:$0xff] }
 0x95a   :  { %17056 = vmatpush3.bf16.msra.mxu1 %v18520_v56  ;;  %11319 = vmatprep.subr.bf16.mxu0 %v18523_v28  ;;  %v11648_v56 = vld [vmem:[%s24741_s15 + $0x1e0] sm:$0xff]  ;;  %v18554_v28 = vld [vmem:[%s24738_s13 + $0x89c] ss:$28 sps:$4 sm:$0xff]  }
 0x95b   :  { %17057 = vmatprep.subr.bf16.mxu1 %v18524_v55  ;;  %v16410_v55 = vcombine.low %v11636_v42, %v11640_v20  ;;  %v16418_v41 = vcombine.low %v11644_v27, %v11648_v56 }
 0x95d   :  { %11320 = vmatpush1.bf16.msra.mxu0 %v18521_v29  ;;  %v16419_v29 = vcombine.high %v11644_v27, %v11648_v56 }
 0x95e   :  { %17058 = vmatpush3.bf16.msra.mxu1 %v18525_v33  ;;  %11321 = vmatprep.subr.bf16.mxu0 %v18528_v30  ;;  %v18552_v33 = vld [vmem:[%s24738_s13 + $0x898] ss:$28 sps:$4 sm:$0xff]   ;;  %v11652_v30 = vld [vmem:[%s24741_s15 + $0x200] sm:$0xff] }
 0x95f   :  { %17059 = vmatprep.subr.bf16.mxu1 %v18529_v32  ;;  %v11656_v32 = vld [vmem:[%s24741_s15 + $0x220] sm:$0xff] }
 0x960   :  { %v16426_v54 = vcombine.low %v11652_v30, %v11656_v32 }
 0x961   :  { %11322 = vmatpush1.bf16.msra.mxu0 %v18526_v61  ;;  %v16427_v61 = vcombine.high %v11652_v30, %v11656_v32 }
 0x962   :  { %17060 = vmatpush3.bf16.msra.mxu1 %v18530_v46  ;;  %11332 = vmatprep.subr.bf16.mxu0 %v18533_v47  ;;  %v18555_v46 = vld [vmem:[%s24738_s13 + $0x8d0] ss:$28 sps:$4 sm:$0xff]   ;;  %v11660_v47 = vld [vmem:[%s24741_s15 + $0x240] sm:$0xff] }
 0x963   :  { %14225 = vmatprep.subr.bf16.mxu1 %v16363_v5  ;;  %v11664_v5 = vld [vmem:[%s24741_s15 + $0x260] sm:$0xff] }
 0x964   :  { %11324 = vmatmul.mubr.bf16.vlgmr.msra.gmra.mrb[32].mxu0 %v22310_v44  ;;  %v18539_v44 = vld [vmem:[%s24738_s13 + $0x784] ss:$28 sps:$4 sm:$0xff]   ;;  %v16435_v13 = vcombine.high %v11660_v47, %v11664_v5  ;;  %v16434_v45 = vcombine.low %v11660_v47, %v11664_v5  ;;  %v18593_v5 = vld [vmem:[%s24738_s13 + $0xb74] ss:$28 sps:$4 sm:$0xff]  }
 0x965   :  { %11567 = vmatmul.mubr.bf16.vlgmr.msra.gmra.mrb[76].mxu1 %v22719_v63  ;;  %11333 = vmatpush1.bf16.msra.mxu0 %v18531_v53  ;;  %v18560_v53 = vld [vmem:[%s24738_s13 + $0x90c] ss:$28 sps:$4 sm:$0xff]   ;;  %v18585_v47 = vld [vmem:[%s24738_s13 + $0xb00] ss:$28 sps:$4 sm:$0xff]  }
 0x966   :  { %11364 = vmatprep.mubr.bf16.mxu0 %v22315_v17  ;;  %11334 = vmatprep.subr.bf16.mxu0 %v18536_v1  ;;  %v11616_v17 = vld [vmem:[%s24741_s15 + $0xe0] sm:$0xff] }
 0x967   :  { %14226 = vmatpush1.bf16.msra.mxu1 %v16362_v48  ;;  %v16387_v60 = vcombine.high %v11612_v22, %v11616_v17  ;;  %v16386_v8 = vcombine.low %v11612_v22, %v11616_v17  ;;  %v18558_v1 = vld [vmem:[%s24738_s13 + $0x908] ss:$28 sps:$4 sm:$0xff]  }
 0x968   :  { %14227 = vmatprep.subr.bf16.mxu1 %v16371_v9  ;;  %v11668_v48 = vld [vmem:[%s24741_s15 + $0x280] sm:$0xff] }
 0x969   :  { %11335 = vmatpush1.bf16.msra.mxu0 %v18534_v43  ;;  %v11672_v9 = vld [vmem:[%s24741_s15 + $0x2a0] sm:$0xff] }
 0x96a   :  { %11336 = vmatprep.subr.bf16.mxu0 %v18539_v44  ;;  %v18563_v43 = vld [vmem:[%s24738_s13 + $0x944] ss:$28 sps:$4 sm:$0xff]   ;;  %v16443_v50 = vcombine.high %v11668_v48, %v11672_v9  ;;  %v16442_v22 = vcombine.low %v11668_v48, %v11672_v9 }
 0x96b   :  { %14228 = vmatpush1.bf16.msra.mxu1 %v16370_v14  ;;  %v18561_v44 = vld [vmem:[%s24738_s13 + $0x940] ss:$28 sps:$4 sm:$0xff]   ;;  %v18594_v9 = vld [vmem:[%s24738_s13 + $0xba8] ss:$28 sps:$4 sm:$0xff]  }
 0x96c   :  { %14229 = vmatprep.subr.bf16.mxu1 %v16379_v57  ;;  %v11676_v14 = vld [vmem:[%s24741_s15 + $0x2c0] sm:$0xff] }
 0x96d   :  { %11337 = vmatpush1.bf16.msra.mxu0 %v18537_v58  ;;  %v11680_v57 = vld [vmem:[%s24741_s15 + $0x2e0] sm:$0xff]  ;;  %v18566_v58 = vld [vmem:[%s24738_s13 + $0x97c] ss:$28 sps:$4 sm:$0xff]  }
 0x96e   :  { %11338 = vmatprep.subr.bf16.mxu0 %v18542_v3  ;;  %v16451_v17 = vcombine.high %v11676_v14, %v11680_v57  ;;  %v18564_v3 = vld [vmem:[%s24738_s13 + $0x978] ss:$28 sps:$4 sm:$0xff]   ;;  %v16450_v2 = vcombine.low %v11676_v14, %v11680_v57 }
 0x96f   :  { %14230 = vmatpush1.bf16.msra.mxu1 %v16378_v59  ;;  %v11684_v59 = vld [vmem:[%s24741_s15 + $0x300] sm:$0xff] }
 0x970   :  { %14231 = vmatprep.subr.bf16.mxu1 %v16387_v60  ;;  %v11688_v60 = vld [vmem:[%s24741_s15 + $0x320] sm:$0xff] }
 0x971   :  { %11339 = vmatpush1.bf16.msra.mxu0 %v18540_v0  ;;  %v18569_v0 = vld [vmem:[%s24738_s13 + $0x9b4] ss:$28 sps:$4 sm:$0xff]   ;;  %v16459_v6 = vcombine.high %v11684_v59, %v11688_v60  ;;  %v16458_v11 = vcombine.low %v11684_v59, %v11688_v60 }
 0x972   :  { %11340 = vmatprep.subr.bf16.mxu0 %v18545_v7  ;;  %v18567_v7 = vld [vmem:[%s24738_s13 + $0x9b0] ss:$28 sps:$4 sm:$0xff]  }
 0x973   :  { %14232 = vmatpush1.bf16.msra.mxu1 %v16386_v8  ;;  %v11692_v8 = vld [vmem:[%s24741_s15 + $0x340] sm:$0xff] }
 0x974   :  { %14233 = vmatprep.subr.bf16.mxu1 %v16395_v31  ;;  %v11696_v31 = vld [vmem:[%s24741_s15 + $0x360] sm:$0xff] }
 0x975   :  { %11341 = vmatpush1.bf16.msra.mxu0 %v18543_v10  ;;  %v18572_v10 = vld [vmem:[%s24738_s13 + $0x9ec] ss:$28 sps:$4 sm:$0xff]   ;;  %v16467_v38 = vcombine.high %v11692_v8, %v11696_v31  ;;  %v16466_v42 = vcombine.low %v11692_v8, %v11696_v31  ;;  %v11724_v31 = vld [vmem:[%s24741_s15 + $0x440] sm:$0xff] }
 0x976   :  { %11342 = vmatprep.subr.bf16.mxu0 %v18548_v18  ;;  %v18570_v18 = vld [vmem:[%s24738_s13 + $0x9e8] ss:$28 sps:$4 sm:$0xff]  }
 0x977   :  { %14234 = vmatpush1.bf16.msra.mxu1 %v16394_v12  ;;  %v11700_v12 = vld [vmem:[%s24741_s15 + $0x380] sm:$0xff] }
 0x978   :  { %14235 = vmatprep.subr.bf16.mxu1 %v16403_v52  ;;  %v11704_v52 = vld [vmem:[%s24741_s15 + $0x3a0] sm:$0xff] }
 0x979   :  { %11343 = vmatpush1.bf16.msra.mxu0 %v18546_v15  ;;  %v18575_v15 = vld [vmem:[%s24738_s13 + $0xa24] ss:$28 sps:$4 sm:$0xff]   ;;  %v16475_v20 = vcombine.high %v11700_v12, %v11704_v52  ;;  %v16474_v27 = vcombine.low %v11700_v12, %v11704_v52  ;;  %v18600_v12 = vld [vmem:[%s24738_s13 + $0xc18] ss:$28 sps:$4 sm:$0xff]  }
 0x97a   :  { %11344 = vmatprep.subr.bf16.mxu0 %v18551_v62  ;;  %v18573_v62 = vld [vmem:[%s24738_s13 + $0xa20] ss:$28 sps:$4 sm:$0xff]  }
 0x97b   :  { %14236 = vmatpush1.bf16.msra.mxu1 %v16402_v21  ;;  %v11708_v21 = vld [vmem:[%s24741_s15 + $0x3c0] sm:$0xff] }
 0x97c   :  { %14237 = vmatprep.subr.bf16.mxu1 %v16411_v25  ;;  %v11712_v25 = vld [vmem:[%s24741_s15 + $0x3e0] sm:$0xff] }
 0x97d   :  { %11345 = vmatpush1.bf16.msra.mxu0 %v18549_v24  ;;  %v18578_v24 = vld [vmem:[%s24738_s13 + $0xa5c] ss:$28 sps:$4 sm:$0xff]   ;;  %v16483_v56 = vcombine.high %v11708_v21, %v11712_v25  ;;  %v16482_v30 = vcombine.low %v11708_v21, %v11712_v25 }
 0x97e   :  { %11346 = vmatprep.subr.bf16.mxu0 %v18554_v28  ;;  %v18576_v28 = vld [vmem:[%s24738_s13 + $0xa58] ss:$28 sps:$4 sm:$0xff]  }
 0x97f   :  { %14238 = vmatpush1.bf16.msra.mxu1 %v16410_v55  ;;  %v23306_v55 = vld [vmem:[%s24741_s15 + $0x400] sm:$0xff] }
 0x980   :  { %14239 = vmatprep.subr.bf16.mxu1 %v16419_v29  ;;  %v23311_v29 = vld [vmem:[%s24741_s15 + $0x420] sm:$0xff] }
 0x981   :  { %11347 = vmatpush1.bf16.msra.mxu0 %v18552_v33  ;;  %v18581_v33 = vld [vmem:[%s24738_s13 + $0xa94] ss:$28 sps:$4 sm:$0xff]   ;;  %v16491_v32 = vcombine.high %v23306_v55, %v23311_v29 }
 0x982   :  { %11348 = vmatprep.subr.bf16.mxu0 %v18557_v37  ;;  %v18579_v37 = vld [vmem:[%s24738_s13 + $0xa90] ss:$28 sps:$4 sm:$0xff]  }
 0x983   :  { %14240 = vmatpush1.bf16.msra.mxu1 %v16418_v41  ;;  %v18584_v41 = vld [vmem:[%s24738_s13 + $0xacc] ss:$28 sps:$4 sm:$0xff]  }
 0x984   :  { %14241 = vmatprep.subr.bf16.mxu1 %v16427_v61  ;;  %v18582_v61 = vld [vmem:[%s24738_s13 + $0xac8] ss:$28 sps:$4 sm:$0xff]  }
 0x985   :  { %11349 = vmatpush1.bf16.msra.mxu0 %v18555_v46  ;;  %v18587_v46 = vld [vmem:[%s24738_s13 + $0xb04] ss:$28 sps:$4 sm:$0xff]  }
 0x986   :  { %11350 = vmatprep.subr.bf16.mxu0 %v18560_v53  ;;  %v18591_v53 = vld [vmem:[%s24738_s13 + $0xb70] ss:$28 sps:$4 sm:$0xff]  }
 0x987   :  { %14242 = vmatpush1.bf16.msra.mxu1 %v16426_v54  ;;  %v23350_v54 = vld [vmem:[%s24742_s14] sm:$0x7f] }
 0x988   :  { %14243 = vmatprep.subr.bf16.mxu1 %v16435_v13  ;;  %v18596_v13 = vld [vmem:[%s24738_s13 + $0xbac] ss:$28 sps:$4 sm:$0xff]   ;;  %v8590_v48 = vrot.slane %v23350_v54, %v20040_v39 }
 0x989   :  { %11351 = vmatpush1.bf16.msra.mxu0 %v18558_v1  ;;  %v8586_v1 = vrot.slane %v23350_v54, %v20026_v34 }
 0x98a   :  { %11352 = vmatprep.subr.bf16.mxu0 %v18563_v43  ;;  %v8598_v43 = vrot.slane %v23350_v54, %v20469_v40 }
 0x98b   :  { %14244 = vmatpush1.bf16.msra.mxu1 %v16434_v45  ;;  %v18599_v45 = vld [vmem:[%s24738_s13 + $0xbe4] ss:$28 sps:$4 sm:$0xff]  }
 0x98c   :  { %14245 = vmatprep.subr.bf16.mxu1 %v16443_v50 }
 0x98d   :  { %11353 = vmatpush1.bf16.msra.mxu0 %v18561_v44 }
 0x98e   :  { %11354 = vmatprep.subr.bf16.mxu0 %v18566_v58 }
 0x98f   :  { %14246 = vmatpush1.bf16.msra.mxu1 %v16442_v22 }
 0x990   :  { %14247 = vmatprep.subr.bf16.mxu1 %v16451_v17 }
 0x991   :  { %11355 = vmatpush1.bf16.msra.mxu0 %v18564_v3  ;;  %v18597_v3 = vld [vmem:[%s24738_s13 + $0xbe0] ss:$28 sps:$4 sm:$0xff]  }
 0x992   :  { %11356 = vmatprep.subr.bf16.mxu0 %v18569_v0 }
 0x993   :  { %14248 = vmatpush1.bf16.msra.mxu1 %v16450_v2 }
 0x994   :  { %14249 = vmatprep.subr.bf16.mxu1 %v16459_v6  ;;  %v18602_v6 = vld [vmem:[%s24738_s13 + $0xc1c] ss:$28 sps:$4 sm:$0xff]  }
 0x995   :  { %11357 = vmatpush1.bf16.msra.mxu0 %v18567_v7 }
 0x996   :  { %11358 = vmatprep.subr.bf16.mxu0 %v18572_v10  ;;  %v11728_v10 = vld [vmem:[%s24741_s15 + $0x460] sm:$0xff] }
 0x997   :  { %14250 = vmatpush1.bf16.msra.mxu1 %v16458_v11  ;;  %v16498_v25 = vcombine.low %v11724_v31, %v11728_v10 }
 0x998   :  { %14251 = vmatprep.subr.bf16.mxu1 %v16467_v38 }
 0x999   :  { %11359 = vmatpush1.bf16.msra.mxu0 %v18570_v18  ;;  %v16490_v18 = vcombine.low %v23306_v55, %v23311_v29  ;;  %v11744_v55 = vld [vmem:[%s24741_s15 + $0x4e0] sm:$0xff] }
 0x99a   :  { %11360 = vmatprep.subr.bf16.mxu0 %v18575_v15  ;;  %v16499_v15 = vcombine.high %v11724_v31, %v11728_v10  ;;  %v18621_v31 = vld [vmem:[%s24738_s13 + $0xda0] ss:$28 sps:$4 sm:$0xff]  }
 0x99b   :  { %14252 = vmatpush1.bf16.msra.mxu1 %v16466_v42  ;;  %v18605_v42 = vld [vmem:[%s24738_s13 + $0xc54] ss:$28 sps:$4 sm:$0xff]  }
 0x99c   :  { %14253 = vmatprep.subr.bf16.mxu1 %v16475_v20  ;;  %v11732_v20 = vld [vmem:[%s24741_s15 + $0x480] sm:$0xff] }
 0x99d   :  { %11361 = vmatpush1.bf16.msra.mxu0 %v18573_v62  ;;  %v11736_v62 = vld [vmem:[%s24741_s15 + $0x4a0] sm:$0xff] }
 0x99e   :  { %11362 = vmatprep.subr.bf16.mxu0 %v18578_v24  ;;  %v18603_v24 = vld [vmem:[%s24738_s13 + $0xc50] ss:$28 sps:$4 sm:$0xff]   ;;  %v16506_v29 = vcombine.low %v11732_v20, %v11736_v62 }
 0x99f   :  { %14254 = vmatpush1.bf16.msra.mxu1 %v16474_v27  ;;  %v16507_v27 = vcombine.high %v11732_v20, %v11736_v62  ;;  %v11792_v20 = vld [vmem:[%s24741_s15 + $0x660] sm:$0xff]  ;;  %v11589_v62 = vld [vmem:[%s24741_s15 + $0x8] sm:$0xff] }
 0x9a0   :  { %14255 = vmatprep.subr.bf16.mxu1 %v16483_v56  ;;  %v18608_v56 = vld [vmem:[%s24738_s13 + $0xc8c] ss:$28 sps:$4 sm:$0xff]  }
 0x9a1   :  { %11363 = vmatpush1.bf16.msra.mxu0 %v18576_v28  ;;  %v11740_v28 = vld [vmem:[%s24741_s15 + $0x4c0] sm:$0xff] }
 0x9a2   :  { %11373 = vmatprep.subr.bf16.mxu0 %v18581_v33  ;;  %v18606_v33 = vld [vmem:[%s24738_s13 + $0xc88] ss:$28 sps:$4 sm:$0xff]  }
 0x9a3   :  { %14256 = vmatpush1.bf16.msra.mxu1 %v16482_v30  ;;  %v16515_v30 = vcombine.high %v11740_v28, %v11744_v55 }
 0x9a4   :  { %11365 = vmatmul.mubr.bf16.vlgmr.msra.gmra.mrb[32].mxu0 %v22516_v35  ;;  %14266 = vmatprep.subr.bf16.mxu1 %v16491_v32  ;;  %v18590_v35 = vld [vmem:[%s24738_s13 + $0xb3c] ss:$28 sps:$4 sm:$0xff]   ;;  %v18611_v32 = vld [vmem:[%s24738_s13 + $0xcc4] ss:$28 sps:$4 sm:$0xff]  }
 0x9a5   :  { %11374 = vmatpush1.bf16.msra.mxu0 %v18579_v37  ;;  %11405 = vmatprep.mubr.bf16.mxu0 %v22524_v26  ;;  %v18588_v26 = vld [vmem:[%s24738_s13 + $0xb38] ss:$28 sps:$4 sm:$0xff]   ;;  %v11748_v37 = vld [vmem:[%s24741_s15 + $0x500] sm:$0xff] }
 0x9a6   :  { %11375 = vmatprep.subr.bf16.mxu0 %v18584_v41  ;;  %v11752_v41 = vld [vmem:[%s24741_s15 + $0x520] sm:$0xff] }
 0x9a9   :  { %11376 = vmatpush1.bf16.msra.mxu0 %v18582_v61  ;;  %v16514_v61 = vcombine.low %v11740_v28, %v11744_v55  ;;  %v11796_v55 = vld [vmem:[%s24741_s15 + $0x680] sm:$0xff] }
 0x9aa   :  { %11377 = vmatprep.subr.bf16.mxu0 %v18587_v46  ;;  %v18609_v46 = vld [vmem:[%s24738_s13 + $0xcc0] ss:$28 sps:$4 sm:$0xff]  }
 0x9ad   :  { %11378 = vmatpush1.bf16.msra.mxu0 %v18585_v47  ;;  %v16523_v47 = vcombine.high %v11748_v37, %v11752_v41 }
 0x9ae   :  { %11379 = vmatprep.subr.bf16.mxu0 %v18590_v35  ;;  %v18614_v35 = vld [vmem:[%s24738_s13 + $0xcfc] ss:$28 sps:$4 sm:$0xff]  }
 0x9b1   :  { %11380 = vmatpush1.bf16.msra.mxu0 %v18588_v26  ;;  %v11756_v26 = vld [vmem:[%s24741_s15 + $0x540] sm:$0xff] }
 0x9b2   :  { %11381 = vmatprep.subr.bf16.mxu0 %v18593_v5  ;;  %v11760_v5 = vld [vmem:[%s24741_s15 + $0x560] sm:$0xff] }
 0x9b5   :  { %11382 = vmatpush1.bf16.msra.mxu0 %v18591_v53  ;;  %v16522_v53 = vcombine.low %v11748_v37, %v11752_v41 }
 0x9b6   :  { %11383 = vmatprep.subr.bf16.mxu0 %v18596_v13  ;;  %v18612_v13 = vld [vmem:[%s24738_s13 + $0xcf8] ss:$28 sps:$4 sm:$0xff]  }
 0x9b7   :  { %v11079_v50 = vpop.f32.mrb[28].mxu0 }
 0x9b8   :  { %v17097_v44 = vadd.f32 %v11079_v50, %v8586_v1  ;;  %v23367_v14 = vpop.f32.mrb[60].mxu1  ;;  %v11081_v57 = vpop.f32.mrb[29].mxu0  ;;  %v16531_v1 = vcombine.high %v11756_v26, %v11760_v5  ;;  %v18615_v50 = vld [vmem:[%s24738_s13 + $0xd30] ss:$28 sps:$4 sm:$0xff]  }
 0x9b9   :  { %v17098_v58 = vadd.f32 %v11081_v57, %v8590_v48  ;;  %v11245_v22 = vpop.f32.mrb[61].mxu1  ;;  %v11083_v17 = vpop.f32.mrb[30].mxu0  ;;  %11384 = vmatpush1.bf16.msra.mxu0 %v18594_v9  ;;  %v18617_v48 = vld [vmem:[%s24738_s13 + $0xd34] ss:$28 sps:$4 sm:$0xff]   ;;  %v11764_v9 = vld [vmem:[%s24741_s15 + $0x580] sm:$0xff] }
 0x9ba   :  { %v11574_v59 = vmax.f32 %v17097_v44, 0.0  ;;  %v17100_v60 = vadd.f32 %v11245_v22, %v8598_v43  ;;  %v11247_v0 = vpop.f32.mrb[62].mxu1  ;;  %v11084_v2 = vpop.f32.mrb[31].mxu0  ;;  %11385 = vmatprep.subr.bf16.mxu0 %v18599_v45  ;;  %v11768_v43 = vld [vmem:[%s24741_s15 + $0x5a0] sm:$0xff]  ;;  %v16530_v45 = vcombine.low %v11756_v26, %v11760_v5  ;;  %v18620_v57 = vld [vmem:[%s24738_s13 + $0xd6c] ss:$28 sps:$4 sm:$0xff]  }
 0x9bb   :  { %v11575_v7 = vmax.f32 %v17098_v58, 0.0  ;;  %v11248_v8 = vpop.f32.mrb[63].mxu1  ;;  %v16539_v44 = vcombine.high %v11764_v9, %v11768_v43  ;;  %v11772_v58 = vld [vmem:[%s24741_s15 + $0x5c0] sm:$0xff]  ;;  %v16538_v17 = vcombine.low %v11764_v9, %v11768_v43  ;;  %v11609_v26 = vld [vmem:[%s24741_s15 + $0xa8] sm:$0xff] }
 0x9bc   :  { %v11577_v11 = vmax.f32 %v17100_v60, 0.0  ;;  %v23388_v52 = vpack.c.bf16 %v11574_v59, %v11574_v59  ;;  %v11776_v22 = vld [vmem:[%s24741_s15 + $0x5e0] sm:$0xff]  ;;  %v11617_v43 = vld [vmem:[%s24741_s15 + $0xe8] sm:$0xff] }
 0x9bd   :  { %v23381_v38 = vpack.c.bf16 %v11575_v7, %v11575_v7  ;;  %11386 = vmatpush1.bf16.msra.mxu0 %v18597_v3  ;;  %v18618_v3 = vld [vmem:[%s24738_s13 + $0xd68] ss:$28 sps:$4 sm:$0xff]   ;;  %v16547_v59 = vcombine.high %v11772_v58, %v11776_v22  ;;  %v16546_v8 = vcombine.low %v11772_v58, %v11776_v22 }
 0x9be   :  { %11387 = vmatprep.subr.bf16.mxu0 %v18602_v6  ;;  %v23400_v21 = vpack.c.bf16 %v11577_v11, %v11577_v11  ;;  %v18623_v60 = vld [vmem:[%s24738_s13 + $0xda4] ss:$28 sps:$4 sm:$0xff]  }
 0x9bf   :  { %14257 = vmatprep.mubr.bf16.mxu1 %v23381_v38  ;;  %v11780_v0 = vld [vmem:[%s24741_s15 + $0x600] sm:$0xff] }
 0x9c0   :  { %14258 = vmatmul.mubr.bf16.vlgmr.msra.gmra.mrb[80].mxu1 %v23388_v52  ;;  %v11784_v2 = vld [vmem:[%s24741_s15 + $0x620] sm:$0xff] }
 0x9c1   :  { %14267 = vmatpush1.bf16.msra.mxu1 %v16490_v18  ;;  %11388 = vmatpush1.bf16.msra.mxu0 %v18600_v12  ;;  %v16555_v18 = vcombine.high %v11780_v0, %v11784_v2  ;;  %v18626_v12 = vld [vmem:[%s24738_s13 + $0xddc] ss:$28 sps:$4 sm:$0xff]   ;;  %v11816_v9 = vld [vmem:[%s24741_s15 + $0x720] sm:$0xff] }
 0x9c2   :  { %14298 = vmatprep.mubr.bf16.mxu1 %v23400_v21  ;;  %14268 = vmatprep.subr.bf16.mxu1 %v16499_v15  ;;  %v11788_v15 = vld [vmem:[%s24741_s15 + $0x640] sm:$0xff] }
 0x9c3   :  { %11389 = vmatprep.subr.bf16.mxu0 %v18605_v42  ;;  %v11820_v58 = vld [vmem:[%s24741_s15 + $0x740] sm:$0xff] }
 0x9c4   :  { %v11824_v22 = vld [vmem:[%s24741_s15 + $0x760] sm:$0xff] }
 0x9c5   :  { %14269 = vmatpush1.bf16.msra.mxu1 %v16498_v25  ;;  %11390 = vmatpush1.bf16.msra.mxu0 %v18603_v24  ;;  %v11593_v25 = vld [vmem:[%s24741_s15 + $0x28] sm:$0xff]  ;;  %v16554_v24 = vcombine.low %v11780_v0, %v11784_v2  ;;  %v16595_v0 = vcombine.high %v11820_v58, %v11824_v22 }
 0x9c6   :  { %14270 = vmatprep.subr.bf16.mxu1 %v16507_v27  ;;  %11391 = vmatprep.subr.bf16.mxu0 %v18608_v56  ;;  %v18624_v27 = vld [vmem:[%s24738_s13 + $0xdd8] ss:$28 sps:$4 sm:$0xff]   ;;  %v16563_v56 = vcombine.high %v11788_v15, %v11792_v20  ;;  %v16365_v28 = vcombine.high %v11589_v62, %v11593_v25  ;;  %v16364_v37 = vcombine.low %v11589_v62, %v11593_v25  ;;  %v11840_v62 = vld [vmem:[%s24741_s15 + $0x7e0] sm:$0xff]  ;;  %v11637_v25 = vld [vmem:[%s24741_s15 + $0x188] sm:$0xff] }
 0x9c9   :  { %14271 = vmatpush1.bf16.msra.mxu1 %v16506_v29  ;;  %11392 = vmatpush1.bf16.msra.mxu0 %v18606_v33  ;;  %v11800_v29 = vld [vmem:[%s24741_s15 + $0x6a0] sm:$0xff]  ;;  %v11597_v33 = vld [vmem:[%s24741_s15 + $0x48] sm:$0xff] }
 0x9ca   :  { %14272 = vmatprep.subr.bf16.mxu1 %v16515_v30  ;;  %11393 = vmatprep.subr.bf16.mxu0 %v18611_v32  ;;  %v11601_v30 = vld [vmem:[%s24741_s15 + $0x68] sm:$0xff]  ;;  %v16562_v32 = vcombine.low %v11788_v15, %v11792_v20  ;;  %v16571_v41 = vcombine.high %v11796_v55, %v11800_v29  ;;  %v16570_v5 = vcombine.low %v11796_v55, %v11800_v29  ;;  %v11836_v20 = vld [vmem:[%s24741_s15 + $0x7c0] sm:$0xff] }
 0x9cb   :  { %v16611_v29 = vcombine.high %v11836_v20, %v11840_v62 }
 0x9cd   :  { %14273 = vmatpush1.bf16.msra.mxu1 %v16514_v61  ;;  %11394 = vmatpush1.bf16.msra.mxu0 %v18609_v46  ;;  %v11804_v61 = vld [vmem:[%s24741_s15 + $0x6c0] sm:$0xff]  ;;  %v16373_v46 = vcombine.high %v11597_v33, %v11601_v30 }
 0x9ce   :  { %14274 = vmatprep.subr.bf16.mxu1 %v16523_v47  ;;  %11395 = vmatprep.subr.bf16.mxu0 %v18614_v35  ;;  %v11808_v47 = vld [vmem:[%s24741_s15 + $0x6e0] sm:$0xff]  ;;  %v11605_v35 = vld [vmem:[%s24741_s15 + $0x88] sm:$0xff] }
 0x9d1   :  { %14275 = vmatpush1.bf16.msra.mxu1 %v16522_v53  ;;  %11396 = vmatpush1.bf16.msra.mxu0 %v18612_v13  ;;  %v16372_v53 = vcombine.low %v11597_v33, %v11601_v30  ;;  %v16579_v13 = vcombine.high %v11804_v61, %v11808_v47  ;;  %v11645_v30 = vld [vmem:[%s24741_s15 + $0x1c8] sm:$0xff] }
 0x9d2   :  { %14276 = vmatprep.subr.bf16.mxu1 %v16531_v1  ;;  %11397 = vmatprep.subr.bf16.mxu0 %v18617_v48  ;;  %v16381_v1 = vcombine.high %v11605_v35, %v11609_v26  ;;  %v11812_v48 = vld [vmem:[%s24741_s15 + $0x700] sm:$0xff] }
 0x9d5   :  { %14277 = vmatpush1.bf16.msra.mxu1 %v16530_v45  ;;  %11398 = vmatpush1.bf16.msra.mxu0 %v18615_v50  ;;  %v16578_v45 = vcombine.low %v11804_v61, %v11808_v47  ;;  %v16380_v50 = vcombine.low %v11605_v35, %v11609_v26  ;;  %v16610_v61 = vcombine.low %v11836_v20, %v11840_v62  ;;  %v11681_v62 = vld [vmem:[%s24741_s15 + $0x2e8] sm:$0xff] }
 0x9d6   :  { %14278 = vmatprep.subr.bf16.mxu1 %v16539_v44  ;;  %11399 = vmatprep.subr.bf16.mxu0 %v18620_v57  ;;  %v16587_v44 = vcombine.high %v11812_v48, %v11816_v9 }
 0x9d8   :  { %v16995_v6 = vpop.f32.mrb[64].mxu1 }
 0x9d9   :  { %v16996_v7 = vpop.f32.mrb[65].mxu1  ;;  %14279 = vmatpush1.bf16.msra.mxu1 %v16538_v17  ;;  %11400 = vmatpush1.bf16.msra.mxu0 %v18618_v3  ;;  %v11621_v17 = vld [vmem:[%s24741_s15 + $0x108] sm:$0xff] }
 0x9da   :  { %v23479_v10 = vadd.f32 %v16996_v7, %v16995_v6  ;;  %v16998_v11 = vpop.f32.mrb[66].mxu1  ;;  %14280 = vmatprep.subr.bf16.mxu1 %v16547_v59  ;;  %11401 = vmatprep.subr.bf16.mxu0 %v18623_v60  ;;  %v11625_v3 = vld [vmem:[%s24741_s15 + $0x128] sm:$0xff]  ;;  %v16586_v59 = vcombine.low %v11812_v48, %v11816_v9  ;;  %v11828_v6 = vld [vmem:[%s24741_s15 + $0x780] sm:$0xff] }
 0x9db   :  { %v16999_v42 = vpop.f32.mrb[67].mxu1  ;;  %v16397_v2 = vcombine.high %v11621_v17, %v11625_v3  ;;  %v11832_v7 = vld [vmem:[%s24741_s15 + $0x7a0] sm:$0xff]  ;;  %v16594_v11 = vcombine.low %v11820_v58, %v11824_v22  ;;  %v11657_v9 = vld [vmem:[%s24741_s15 + $0x228] sm:$0xff] }
 0x9dc   :  { %v16603_v15 = vcombine.high %v11828_v6, %v11832_v7  ;;  %v11661_v58 = vld [vmem:[%s24741_s15 + $0x248] sm:$0xff] }
 0x9dd   :  { %14281 = vmatpush1.bf16.msra.mxu1 %v16546_v8  ;;  %11402 = vmatpush1.bf16.msra.mxu0 %v18621_v31  ;;  %v11629_v8 = vld [vmem:[%s24741_s15 + $0x148] sm:$0xff] }
 0x9de   :  { %14282 = vmatprep.subr.bf16.mxu1 %v16555_v18  ;;  %11403 = vmatprep.subr.bf16.mxu0 %v18626_v12  ;;  %v11633_v31 = vld [vmem:[%s24741_s15 + $0x168] sm:$0xff]  ;;  %v16396_v18 = vcombine.low %v11621_v17, %v11625_v3  ;;  %v8594_v12 = vrot.slane %v23350_v54, %v20576_v23  ;;  %v11860_v3 = vld [vmem:[%s24741_s15 + $0x880] sm:$0xff] }
 0x9df   :  { %v16405_v42 = vcombine.high %v11629_v8, %v11633_v31  ;;  %v11665_v17 = vld [vmem:[%s24741_s15 + $0x268] sm:$0xff] }
 0x9e0   :  { %v17099_v55 = vadd.f32 %v23367_v14, %v8594_v12  ;;  %v11848_v14 = vld [vmem:[%s24741_s15 + $0x820] sm:$0xff] }
 0x9e1   :  { %14283 = vmatpush1.bf16.msra.mxu1 %v16554_v24  ;;  %11404 = vmatpush1.bf16.msra.mxu0 %v18624_v27  ;;  %v11641_v24 = vld [vmem:[%s24741_s15 + $0x1a8] sm:$0xff]  ;;  %v8610_v27 = vrot.slane %v23350_v54, %v20684_v36  ;;  %v11844_v54 = vld [vmem:[%s24741_s15 + $0x800] sm:$0xff] }
 0x9e2   :  { %14284 = vmatprep.subr.bf16.mxu1 %v16563_v56  ;;  %14389 = vmatprep.subr.bf16.mxu0 %v16365_v28  ;;  %v16602_v56 = vcombine.low %v11828_v6, %v11832_v7  ;;  %v16404_v28 = vcombine.low %v11629_v8, %v11633_v31  ;;  %v16413_v33 = vcombine.high %v11637_v25, %v11641_v24  ;;  %v11576_v35 = vmax.f32 %v17099_v55, 0.0  ;;  %v11669_v6 = vld [vmem:[%s24741_s15 + $0x288] sm:$0xff]  ;;  %v11868_v31 = vld [vmem:[%s24741_s15 + $0x8c0] sm:$0xff] }
 0x9e3   :  { %v11449_v26 = vadd.f32 %v23479_v10, %v8610_v27  ;;  %v11856_v10 = vld [vmem:[%s24741_s15 + $0x860] sm:$0xff]  ;;  %v11673_v8 = vld [vmem:[%s24741_s15 + $0x2a8] sm:$0xff] }
 0x9e4   :  { %11406 = vmatmul.mubr.bf16.vlgmr.msra.gmra.mrb[32].mxu0 %v22719_v63  ;;  %v11613_v63 = vld [vmem:[%s24741_s15 + $0xc8] sm:$0xff]  ;;  %v16444_v27 = vcombine.low %v11669_v6, %v11673_v8 }
 0x9e5   :  { %14285 = vmatpush1.bf16.msra.mxu1 %v16562_v32  ;;  %14390 = vmatpush1.bf16.msra.mxu0 %v16364_v37  ;;  %v16389_v57 = vcombine.high %v11613_v63, %v11617_v43  ;;  %v16388_v60 = vcombine.low %v11613_v63, %v11617_v43  ;;  %v11649_v32 = vld [vmem:[%s24741_s15 + $0x1e8] sm:$0xff]  ;;  %v11852_v63 = vld [vmem:[%s24741_s15 + $0x840] sm:$0xff] }
 0x9e6   :  { %14421 = vmatprep.mubr.bf16.mxu0 %v23381_v38  ;;  %14286 = vmatprep.subr.bf16.mxu1 %v16571_v41  ;;  %v16421_v47 = vcombine.high %v11645_v30, %v11649_v32  ;;  %v16627_v22 = vcombine.high %v11852_v63, %v11856_v10  ;;  %v11685_v55 = vld [vmem:[%s24741_s15 + $0x308] sm:$0xff] }
 0x9e7   :  { %14391 = vmatprep.subr.bf16.mxu0 %v16373_v46  ;;  %v16412_v46 = vcombine.low %v11637_v25, %v11641_v24  ;;  %v11876_v25 = vld [vmem:[%s24741_s15 + $0x900] sm:$0xff] }
 0x9e8   :  { %v11880_v24 = vld [vmem:[%s24741_s15 + $0x920] sm:$0xff] }
 0x9e9   :  { %14287 = vmatpush1.bf16.msra.mxu1 %v16570_v5  ;;  %14392 = vmatpush1.bf16.msra.mxu0 %v16372_v53 }
 0x9ea   :  { %14288 = vmatprep.subr.bf16.mxu1 %v16579_v13  ;;  %14393 = vmatprep.subr.bf16.mxu0 %v16381_v1  ;;  %v11653_v13 = vld [vmem:[%s24741_s15 + $0x208] sm:$0xff]  ;;  %v16619_v1 = vcombine.high %v11844_v54, %v11848_v14 }
 0x9ed   :  { %14289 = vmatpush1.bf16.msra.mxu1 %v16578_v45  ;;  %14394 = vmatpush1.bf16.msra.mxu0 %v16380_v50  ;;  %v16420_v45 = vcombine.low %v11645_v30, %v11649_v32  ;;  %v16618_v50 = vcombine.low %v11844_v54, %v11848_v14  ;;  %v11884_v30 = vld [vmem:[%s24741_s15 + $0x940] sm:$0xff]  ;;  %v16650_v14 = vcombine.low %v11876_v25, %v11880_v24 }
 0x9ee   :  { %14290 = vmatprep.subr.bf16.mxu1 %v16587_v44  ;;  %14395 = vmatprep.subr.bf16.mxu0 %v16389_v57  ;;  %v23605_v44 = vpack.c.bf16 %v11576_v35, %v11576_v35  ;;  %v16429_v57 = vcombine.high %v11653_v13, %v11657_v9  ;;  %v11888_v32 = vld [vmem:[%s24741_s15 + $0x960] sm:$0xff] }
 0x9ef   :  { %v11896_v35 = vld [vmem:[%s24741_s15 + $0x9a0] sm:$0xff] }
 0x9f1   :  { %14291 = vmatpush1.bf16.msra.mxu1 %v16586_v59  ;;  %14396 = vmatpush1.bf16.msra.mxu0 %v16388_v60  ;;  %v11864_v59 = vld [vmem:[%s24741_s15 + $0x8a0] sm:$0xff]  ;;  %v16428_v60 = vcombine.low %v11653_v13, %v11657_v9  ;;  %v11701_v13 = vld [vmem:[%s24741_s15 + $0x388] sm:$0xff] }
 0x9f2   :  { %14292 = vmatprep.subr.bf16.mxu1 %v16595_v0  ;;  %14397 = vmatprep.subr.bf16.mxu0 %v16397_v2  ;;  %v16626_v0 = vcombine.low %v11852_v63, %v11856_v10  ;;  %v16437_v2 = vcombine.high %v11661_v58, %v11665_v17  ;;  %v16635_v7 = vcombine.high %v11860_v3, %v11864_v59  ;;  %v11900_v9 = vld [vmem:[%s24741_s15 + $0x9c0] sm:$0xff] }
 0x9f3   :  { %v16634_v12 = vcombine.low %v11860_v3, %v11864_v59  ;;  %v11904_v63 = vld [vmem:[%s24741_s15 + $0x9e0] sm:$0xff] }
 0x9f4   :  { %v11912_v3 = vld [vmem:[%s24741_s15 + $0xa20] sm:$0xff] }
 0x9f5   :  { %14293 = vmatpush1.bf16.msra.mxu1 %v16594_v11  ;;  %14398 = vmatpush1.bf16.msra.mxu0 %v16396_v18  ;;  %v11872_v11 = vld [vmem:[%s24741_s15 + $0x8e0] sm:$0xff]  ;;  %v16436_v18 = vcombine.low %v11661_v58, %v11665_v17  ;;  %v16675_v58 = vcombine.high %v11900_v9, %v11904_v63 }
 0x9f6   :  { %14294 = vmatprep.subr.bf16.mxu1 %v16603_v15  ;;  %14399 = vmatprep.subr.bf16.mxu0 %v16405_v42  ;;  %v16445_v15 = vcombine.high %v11669_v6, %v11673_v8  ;;  %v11677_v42 = vld [vmem:[%s24741_s15 + $0x2c8] sm:$0xff]  ;;  %v16643_v20 = vcombine.high %v11868_v31, %v11872_v11  ;;  %v11908_v17 = vld [vmem:[%s24741_s15 + $0xa00] sm:$0xff] }
 0x9f7   :  { %v16452_v54 = vcombine.low %v11677_v42, %v11681_v62 }
 0x9f8   :  { %v17017_v37 = vpop.f32.mrb[68].mxu1 }
 0x9f9   :  { %v17018_v41 = vpop.f32.mrb[69].mxu1  ;;  %14295 = vmatpush1.bf16.msra.mxu1 %v16602_v56  ;;  %14400 = vmatpush1.bf16.msra.mxu0 %v16404_v28  ;;  %v16642_v56 = vcombine.low %v11868_v31, %v11872_v11  ;;  %v16453_v28 = vcombine.high %v11677_v42, %v11681_v62  ;;  %v11717_v31 = vld [vmem:[%s24741_s15 + $0x408] sm:$0xff]  ;;  %v16683_v11 = vcombine.high %v11908_v17, %v11912_v3  ;;  %v11920_v42 = vld [vmem:[%s24741_s15 + $0xa60] sm:$0xff] }
 0x9fa   :  { %v17019_v5 = vadd.f32 %v17018_v41, %v17017_v37  ;;  %v17020_v53 = vpop.f32.mrb[70].mxu1  ;;  %14296 = vmatprep.subr.bf16.mxu1 %v16611_v29  ;;  %14401 = vmatprep.subr.bf16.mxu0 %v16413_v33  ;;  %v16651_v29 = vcombine.high %v11876_v25, %v11880_v24  ;;  %v11689_v33 = vld [vmem:[%s24741_s15 + $0x328] sm:$0xff]  ;;  %v16682_v25 = vcombine.low %v11908_v17, %v11912_v3 }
 0x9fb   :  { %v17021_v48 = vpop.f32.mrb[71].mxu1  ;;  %v16461_v37 = vcombine.high %v11685_v55, %v11689_v33  ;;  %v11693_v41 = vld [vmem:[%s24741_s15 + $0x348] sm:$0xff] }
 0x9fc   :  { %v23603_v43 = vadd.f32 %v17019_v5, %v11449_v26  ;;  %v16460_v26 = vcombine.low %v11685_v55, %v11689_v33  ;;  %v16658_v5 = vcombine.low %v11884_v30, %v11888_v32  ;;  %v11705_v48 = vld [vmem:[%s24741_s15 + $0x3a8] sm:$0xff]  ;;  %v11928_v55 = vld [vmem:[%s24741_s15 + $0xaa0] sm:$0xff] }
 0x9fd   :  { %14297 = vmatpush1.bf16.msra.mxu1 %v16610_v61  ;;  %14402 = vmatpush1.bf16.msra.mxu0 %v16412_v46  ;;  %v16659_v61 = vcombine.high %v11884_v30, %v11888_v32  ;;  %v11697_v46 = vld [vmem:[%s24741_s15 + $0x368] sm:$0xff] }
 0x9fe   :  { %14403 = vmatprep.subr.bf16.mxu0 %v16421_v47  ;;  %14307 = vmatprep.subr.bf16.mxu1 %v16619_v1  ;;  %v11892_v47 = vld [vmem:[%s24741_s15 + $0x980] sm:$0xff]  ;;  %v16469_v53 = vcombine.high %v11693_v41, %v11697_v46  ;;  %v16468_v10 = vcombine.low %v11693_v41, %v11697_v46  ;;  %v11733_v32 = vld [vmem:[%s24741_s15 + $0x488] sm:$0xff] }
 0x9ff   :  { %v16667_v1 = vcombine.high %v11892_v47, %v11896_v35  ;;  %v11936_v41 = vld [vmem:[%s24741_s15 + $0xae0] sm:$0xff]  ;;  %v11757_v3 = vld [vmem:[%s24741_s15 + $0x548] sm:$0xff] }
 0xa00   :  { %14299 = vmatmul.mubr.bf16.vlgmr.msra.gmra.mrb[80].mxu1 %v23605_v44 }
 0xa01   :  { %14404 = vmatpush1.bf16.msra.mxu0 %v16420_v45  ;;  %14308 = vmatpush1.bf16.msra.mxu1 %v16618_v50  ;;  %v16666_v45 = vcombine.low %v11892_v47, %v11896_v35  ;;  %v16477_v50 = vcombine.high %v11701_v13, %v11705_v48  ;;  %v11741_v35 = vld [vmem:[%s24741_s15 + $0x4c8] sm:$0xff] }
 0xa02   :  { %14405 = vmatprep.subr.bf16.mxu0 %v16429_v57  ;;  %14309 = vmatprep.subr.bf16.mxu1 %v16627_v22  ;;  %v11709_v57 = vld [vmem:[%s24741_s15 + $0x3c8] sm:$0xff] }
 0xa03   :  { %v11713_v22 = vld [vmem:[%s24741_s15 + $0x3e8] sm:$0xff] }
 0xa04   :  { %v16485_v8 = vcombine.high %v11709_v57, %v11713_v22  ;;  %v16484_v62 = vcombine.low %v11709_v57, %v11713_v22  ;;  %v11952_v57 = vld [vmem:[%s24741_s15 + $0xb60] sm:$0xff] }
 0xa05   :  { %14406 = vmatpush1.bf16.msra.mxu0 %v16428_v60  ;;  %14310 = vmatpush1.bf16.msra.mxu1 %v16626_v0  ;;  %v16476_v0 = vcombine.low %v11701_v13, %v11705_v48  ;;  %v11944_v13 = vld [vmem:[%s24741_s15 + $0xb20] sm:$0xff] }
 0xa06   :  { %14407 = vmatprep.subr.bf16.mxu0 %v16437_v2  ;;  %14311 = vmatprep.subr.bf16.mxu1 %v16635_v7  ;;  %v16674_v2 = vcombine.low %v11900_v9, %v11904_v63  ;;  %v11749_v63 = vld [vmem:[%s24741_s15 + $0x508] sm:$0xff] }
 0xa09   :  { %14408 = vmatpush1.bf16.msra.mxu0 %v16436_v18  ;;  %14312 = vmatpush1.bf16.msra.mxu1 %v16634_v12  ;;  %v11721_v12 = vld [vmem:[%s24741_s15 + $0x428] sm:$0xff] }
 0xa0a   :  { %14409 = vmatprep.subr.bf16.mxu0 %v16445_v15  ;;  %14313 = vmatprep.subr.bf16.mxu1 %v16643_v20  ;;  %v11916_v15 = vld [vmem:[%s24741_s15 + $0xa40] sm:$0xff]  ;;  %v16493_v24 = vcombine.high %v11717_v31, %v11721_v12 }
 0xa0b   :  { %v16690_v30 = vcombine.low %v11916_v15, %v11920_v42 }
 0xa0d   :  { %14410 = vmatpush1.bf16.msra.mxu0 %v16444_v27  ;;  %14314 = vmatpush1.bf16.msra.mxu1 %v16642_v56  ;;  %v16691_v27 = vcombine.high %v11916_v15, %v11920_v42  ;;  %v11725_v56 = vld [vmem:[%s24741_s15 + $0x448] sm:$0xff] }
 0xa0e   :  { %14411 = vmatprep.subr.bf16.mxu0 %v16453_v28  ;;  %14315 = vmatprep.subr.bf16.mxu1 %v16651_v29  ;;  %v11729_v28 = vld [vmem:[%s24741_s15 + $0x468] sm:$0xff]  ;;  %v16492_v29 = vcombine.low %v11717_v31, %v11721_v12  ;;  %v11960_v12 = vld [vmem:[%s24741_s15 + $0xba0] sm:$0xff] }
 0xa0f   :  { %v16501_v33 = vcombine.high %v11725_v56, %v11729_v28  ;;  %v11773_v15 = vld [vmem:[%s24741_s15 + $0x5c8] sm:$0xff] }
 0xa10   :  { %v11777_v42 = vld [vmem:[%s24741_s15 + $0x5e8] sm:$0xff] }
 0xa11   :  { %14412 = vmatpush1.bf16.msra.mxu0 %v16452_v54  ;;  %14316 = vmatpush1.bf16.msra.mxu1 %v16650_v14  ;;  %v11737_v54 = vld [vmem:[%s24741_s15 + $0x4a8] sm:$0xff] }
 0xa12   :  { %14413 = vmatprep.subr.bf16.mxu0 %v16461_v37  ;;  %14317 = vmatprep.subr.bf16.mxu1 %v16659_v61  ;;  %v11932_v37 = vld [vmem:[%s24741_s15 + $0xac0] sm:$0xff]  ;;  %v16500_v61 = vcombine.low %v11725_v56, %v11729_v28  ;;  %v16509_v46 = vcombine.high %v11733_v32, %v11737_v54 }
 0xa13   :  { %v16706_v9 = vcombine.low %v11932_v37, %v11936_v41 }
 0xa15   :  { %14414 = vmatpush1.bf16.msra.mxu0 %v16460_v26  ;;  %14318 = vmatpush1.bf16.msra.mxu1 %v16658_v5  ;;  %v11745_v26 = vld [vmem:[%s24741_s15 + $0x4e8] sm:$0xff]  ;;  %v16707_v5 = vcombine.high %v11932_v37, %v11936_v41 }
 0xa16   :  { %14415 = vmatprep.subr.bf16.mxu0 %v16469_v53  ;;  %14319 = vmatprep.subr.bf16.mxu1 %v16667_v1  ;;  %v11940_v53 = vld [vmem:[%s24741_s15 + $0xb00] sm:$0xff]  ;;  %v16508_v1 = vcombine.low %v11733_v32, %v11737_v54  ;;  %v16517_v48 = vcombine.high %v11741_v35, %v11745_v26  ;;  %v11781_v32 = vld [vmem:[%s24741_s15 + $0x608] sm:$0xff] }
 0xa17   :  { %v16714_v17 = vcombine.low %v11940_v53, %v11944_v13  ;;  %v11785_v54 = vld [vmem:[%s24741_s15 + $0x628] sm:$0xff] }
 0xa18   :  { %v17039_v59 = vpop.f32.mrb[72].mxu1 }
 0xa19   :  { %v17040_v60 = vpop.f32.mrb[73].mxu1  ;;  %14416 = vmatpush1.bf16.msra.mxu0 %v16468_v10  ;;  %14320 = vmatpush1.bf16.msra.mxu1 %v16666_v45  ;;  %v11753_v10 = vld [vmem:[%s24741_s15 + $0x528] sm:$0xff]  ;;  %v16715_v45 = vcombine.high %v11940_v53, %v11944_v13  ;;  %v16556_v13 = vcombine.low %v11781_v32, %v11785_v54 }
 0xa1a   :  { %v17041_v6 = vadd.f32 %v17040_v60, %v17039_v59  ;;  %v17042_v7 = vpop.f32.mrb[74].mxu1  ;;  %14417 = vmatprep.subr.bf16.mxu0 %v16477_v50  ;;  %14321 = vmatprep.subr.bf16.mxu1 %v16675_v58  ;;  %v11948_v50 = vld [vmem:[%s24741_s15 + $0xb40] sm:$0xff]  ;;  %v16516_v58 = vcombine.low %v11741_v35, %v11745_v26  ;;  %v16525_v22 = vcombine.high %v11749_v63, %v11753_v10  ;;  %v11761_v59 = vld [vmem:[%s24741_s15 + $0x568] sm:$0xff] }
 0xa1b   :  { %v17043_v18 = vpop.f32.mrb[75].mxu1  ;;  %v16723_v60 = vcombine.high %v11948_v50, %v11952_v57  ;;  %v11765_v7 = vld [vmem:[%s24741_s15 + $0x588] sm:$0xff]  ;;  %v16532_v31 = vcombine.low %v11757_v3, %v11761_v59  ;;  %v23804_v35 = vld [vmem:[%s24741_s15 + $0xc20] sm:$0xff] }
 0xa1c   :  { %v23705_v20 = vadd.f32 %v17041_v6, %v23603_v43  ;;  %v11924_v43 = vld [vmem:[%s24741_s15 + $0xa80] sm:$0xff]  ;;  %v16722_v6 = vcombine.low %v11948_v50, %v11952_v57  ;;  %v11793_v26 = vld [vmem:[%s24741_s15 + $0x668] sm:$0xff] }
 0xa1d   :  { %14418 = vmatpush1.bf16.msra.mxu0 %v16476_v0  ;;  %14322 = vmatpush1.bf16.msra.mxu1 %v16674_v2  ;;  %v16699_v14 = vcombine.high %v11924_v43, %v11928_v55  ;;  %v16698_v47 = vcombine.low %v11924_v43, %v11928_v55  ;;  %v16524_v0 = vcombine.low %v11749_v63, %v11753_v10  ;;  %v11956_v18 = vld [vmem:[%s24741_s15 + $0xb80] sm:$0xff]  ;;  %v11809_v50 = vld [vmem:[%s24741_s15 + $0x6e8] sm:$0xff] }
 0xa1e   :  { %14419 = vmatprep.subr.bf16.mxu0 %v16485_v8  ;;  %14323 = vmatprep.subr.bf16.mxu1 %v16683_v11  ;;  %v16533_v2 = vcombine.high %v11757_v3, %v11761_v59  ;;  %v11769_v8 = vld [vmem:[%s24741_s15 + $0x5a8] sm:$0xff]  ;;  %v16549_v55 = vcombine.high %v11773_v15, %v11777_v42 }
 0xa1f   :  { %v16541_v11 = vcombine.high %v11765_v7, %v11769_v8  ;;  %v16540_v56 = vcombine.low %v11765_v7, %v11769_v8  ;;  %v11829_v7 = vld [vmem:[%s24741_s15 + $0x788] sm:$0xff] }
 0xa20   :  { %v11833_v8 = vld [vmem:[%s24741_s15 + $0x7a8] sm:$0xff] }
 0xa21   :  { %14420 = vmatpush1.bf16.msra.mxu0 %v16484_v62  ;;  %14324 = vmatpush1.bf16.msra.mxu1 %v16682_v25  ;;  %v16731_v62 = vcombine.high %v11956_v18, %v11960_v12 }
 0xa22   :  { %14430 = vmatprep.subr.bf16.mxu0 %v16493_v24  ;;  %14325 = vmatprep.subr.bf16.mxu1 %v16691_v27  ;;  %v16730_v24 = vcombine.low %v11956_v18, %v11960_v12  ;;  %v11837_v18 = vld [vmem:[%s24741_s15 + $0x7c8] sm:$0xff] }
 0xa23   :  { %v11841_v12 = vld [vmem:[%s24741_s15 + $0x7e8] sm:$0xff] }
 0xa24   :  { %14422 = vmatmul.mubr.bf16.vlgmr.msra.gmra.mrb[36].mxu0 %v23388_v52 }
 0xa25   :  { %14431 = vmatpush1.bf16.msra.mxu0 %v16492_v29  ;;  %14462 = vmatprep.mubr.bf16.mxu0 %v23400_v21  ;;  %v11964_v29 = vld [vmem:[%s24741_s15 + $0xbc0] sm:$0xff] }
 0xa26   :  { %14432 = vmatprep.subr.bf16.mxu0 %v16501_v33  ;;  %14326 = vmatpush1.bf16.msra.mxu1 %v16690_v30  ;;  %v11968_v33 = vld [vmem:[%s24741_s15 + $0xbe0] sm:$0xff] }
 0xa27   :  { %14327 = vmatprep.subr.bf16.mxu1 %v16699_v14  ;;  %v16739_v14 = vcombine.high %v11964_v29, %v11968_v33  ;;  %v16738_v41 = vcombine.low %v11964_v29, %v11968_v33  ;;  %v11861_v29 = vld [vmem:[%s24741_s15 + $0x888] sm:$0xff] }
 0xa28   :  { %v11865_v33 = vld [vmem:[%s24741_s15 + $0x8a8] sm:$0xff] }
 0xa29   :  { %14433 = vmatpush1.bf16.msra.mxu0 %v16500_v61  ;;  %v16548_v61 = vcombine.low %v11773_v15, %v11777_v42  ;;  %v16604_v15 = vcombine.low %v11829_v7, %v11833_v8  ;;  %v16613_v42 = vcombine.high %v11837_v18, %v11841_v12 }
 0xa2a   :  { %14434 = vmatprep.subr.bf16.mxu0 %v16509_v46  ;;  %14328 = vmatpush1.bf16.msra.mxu1 %v16698_v47  ;;  %v16557_v46 = vcombine.high %v11781_v32, %v11785_v54  ;;  %v23799_v47 = vld [vmem:[%s24741_s15 + $0xc00] sm:$0xff]  ;;  %v16637_v32 = vcombine.high %v11861_v29, %v11865_v33  ;;  %v11869_v54 = vld [vmem:[%s24741_s15 + $0x8c8] sm:$0xff] }
 0xa2b   :  { %14329 = vmatprep.subr.bf16.mxu1 %v16707_v5  ;;  %v16746_v5 = vcombine.low %v23799_v47, %v23804_v35  ;;  %v16747_v53 = vcombine.high %v23799_v47, %v23804_v35  ;;  %v11997_v47 = vld [vmem:[%s24741_s15 + $0xcc8] sm:$0xff] }
 0xa2c   :  { %v12001_v35 = vld [vmem:[%s24741_s15 + $0xce8] sm:$0xff] }
 0xa2d   :  { %14435 = vmatpush1.bf16.msra.mxu0 %v16508_v1 }
 0xa2e   :  { %14436 = vmatprep.subr.bf16.mxu0 %v16517_v48  ;;  %14330 = vmatpush1.bf16.msra.mxu1 %v16706_v9  ;;  %v11797_v48 = vld [vmem:[%s24741_s15 + $0x688] sm:$0xff] }
 0xa2f   :  { %14331 = vmatprep.subr.bf16.mxu1 %v16715_v45  ;;  %v11801_v9 = vld [vmem:[%s24741_s15 + $0x6a8] sm:$0xff] }
 0xa30   :  { %v16573_v10 = vcombine.high %v11797_v48, %v11801_v9  ;;  %v11805_v45 = vld [vmem:[%s24741_s15 + $0x6c8] sm:$0xff]  ;;  %v16572_v57 = vcombine.low %v11797_v48, %v11801_v9 }
 0xa31   :  { %14437 = vmatpush1.bf16.msra.mxu0 %v16516_v58  ;;  %v16581_v58 = vcombine.high %v11805_v45, %v11809_v50  ;;  %v16580_v3 = vcombine.low %v11805_v45, %v11809_v50 }
 0xa32   :  { %14438 = vmatprep.subr.bf16.mxu0 %v16525_v22  ;;  %14332 = vmatpush1.bf16.msra.mxu1 %v16714_v17  ;;  %v11813_v22 = vld [vmem:[%s24741_s15 + $0x708] sm:$0xff] }
 0xa33   :  { %14333 = vmatprep.subr.bf16.mxu1 %v16723_v60  ;;  %v11817_v17 = vld [vmem:[%s24741_s15 + $0x728] sm:$0xff] }
 0xa34   :  { %v16589_v59 = vcombine.high %v11813_v22, %v11817_v17  ;;  %v11821_v60 = vld [vmem:[%s24741_s15 + $0x748] sm:$0xff] }
 0xa35   :  { %14439 = vmatpush1.bf16.msra.mxu0 %v16524_v0  ;;  %v11825_v0 = vld [vmem:[%s24741_s15 + $0x768] sm:$0xff] }
 0xa36   :  { %14440 = vmatprep.subr.bf16.mxu0 %v16533_v2  ;;  %14334 = vmatpush1.bf16.msra.mxu1 %v16722_v6  ;;  %v16588_v2 = vcombine.low %v11813_v22, %v11817_v17  ;;  %v16597_v6 = vcombine.high %v11821_v60, %v11825_v0 }
 0xa37   :  { %14335 = vmatprep.subr.bf16.mxu1 %v16731_v62  ;;  %v11845_v62 = vld [vmem:[%s24741_s15 + $0x808] sm:$0xff] }
 0xa38   :  { %v17061_v25 = vpop.f32.mrb[76].mxu1 }
 0xa39   :  { %v17062_v27 = vpop.f32.mrb[77].mxu1  ;;  %14441 = vmatpush1.bf16.msra.mxu0 %v16532_v31  ;;  %v16596_v31 = vcombine.low %v11821_v60, %v11825_v0 }
 0xa3a   :  { %v17063_v28 = vadd.f32 %v17062_v27, %v17061_v25  ;;  %v17064_v43 = vpop.f32.mrb[78].mxu1  ;;  %14442 = vmatprep.subr.bf16.mxu0 %v16541_v11  ;;  %14336 = vmatpush1.bf16.msra.mxu1 %v16730_v24  ;;  %v16605_v11 = vcombine.high %v11829_v7, %v11833_v8  ;;  %v11849_v25 = vld [vmem:[%s24741_s15 + $0x828] sm:$0xff]  ;;  %v16612_v24 = vcombine.low %v11837_v18, %v11841_v12 }
 0xa3b   :  { %v17065_v30 = vpop.f32.mrb[79].mxu1  ;;  %14337 = vmatprep.subr.bf16.mxu1 %v16739_v14  ;;  %v16621_v27 = vcombine.high %v11845_v62, %v11849_v25  ;;  %v16620_v43 = vcombine.low %v11845_v62, %v11849_v25  ;;  %v11873_v14 = vld [vmem:[%s24741_s15 + $0x8e8] sm:$0xff] }
 0xa3c   :  { %v23794_v37 = vadd.f32 %v17063_v28, %v23705_v20  ;;  %v11789_v20 = vld [vmem:[%s24741_s15 + $0x648] sm:$0xff] }
 0xa3d   :  { %14443 = vmatpush1.bf16.msra.mxu0 %v16540_v56  ;;  %v16565_v1 = vcombine.high %v11789_v20, %v11793_v26  ;;  %v16564_v63 = vcombine.low %v11789_v20, %v11793_v26  ;;  %v11853_v56 = vld [vmem:[%s24741_s15 + $0x848] sm:$0xff]  ;;  %v16644_v26 = vcombine.low %v11869_v54, %v11873_v14 }
 0xa3e   :  { %14444 = vmatprep.subr.bf16.mxu0 %v16549_v55  ;;  %14338 = vmatpush1.bf16.msra.mxu1 %v16738_v41  ;;  %v11857_v28 = vld [vmem:[%s24741_s15 + $0x868] sm:$0xff]  ;;  %v16636_v41 = vcombine.low %v11861_v29, %v11865_v33 }
 0xa3f   :  { %14348 = vmatprep.subr.bf16.mxu1 %v16747_v53  ;;  %v16629_v55 = vcombine.high %v11853_v56, %v11857_v28  ;;  %v16628_v30 = vcombine.low %v11853_v56, %v11857_v28  ;;  %v11881_v20 = vld [vmem:[%s24741_s15 + $0x928] sm:$0xff] }
 0xa41   :  { %14445 = vmatpush1.bf16.msra.mxu0 %v16548_v61  ;;  %v16645_v61 = vcombine.high %v11869_v54, %v11873_v14 }
 0xa42   :  { %14446 = vmatprep.subr.bf16.mxu0 %v16557_v46  ;;  %v11877_v46 = vld [vmem:[%s24741_s15 + $0x908] sm:$0xff] }
 0xa43   :  { %v16653_v53 = vcombine.high %v11877_v46, %v11881_v20  ;;  %v16652_v48 = vcombine.low %v11877_v46, %v11881_v20 }
 0xa45   :  { %14447 = vmatpush1.bf16.msra.mxu0 %v16556_v13  ;;  %v11885_v13 = vld [vmem:[%s24741_s15 + $0x948] sm:$0xff] }
 0xa46   :  { %14448 = vmatprep.subr.bf16.mxu0 %v16565_v1  ;;  %v11889_v1 = vld [vmem:[%s24741_s15 + $0x968] sm:$0xff] }
 0xa47   :  { %v16661_v9 = vcombine.high %v11885_v13, %v11889_v1  ;;  %v16660_v45 = vcombine.low %v11885_v13, %v11889_v1 }
 0xa49   :  { %14449 = vmatpush1.bf16.msra.mxu0 %v16564_v63  ;;  %v11893_v63 = vld [vmem:[%s24741_s15 + $0x988] sm:$0xff] }
 0xa4a   :  { %14450 = vmatprep.subr.bf16.mxu0 %v16573_v10  ;;  %v11897_v10 = vld [vmem:[%s24741_s15 + $0x9a8] sm:$0xff] }
 0xa4b   :  { %v16669_v50 = vcombine.high %v11893_v63, %v11897_v10  ;;  %v16668_v22 = vcombine.low %v11893_v63, %v11897_v10 }
 0xa4d   :  { %14451 = vmatpush1.bf16.msra.mxu0 %v16572_v57  ;;  %v11901_v57 = vld [vmem:[%s24741_s15 + $0x9c8] sm:$0xff] }
 0xa4e   :  { %14452 = vmatprep.subr.bf16.mxu0 %v16581_v58  ;;  %v11905_v58 = vld [vmem:[%s24741_s15 + $0x9e8] sm:$0xff] }
 0xa4f   :  { %v16677_v17 = vcombine.high %v11901_v57, %v11905_v58  ;;  %v16676_v60 = vcombine.low %v11901_v57, %v11905_v58 }
 0xa51   :  { %14453 = vmatpush1.bf16.msra.mxu0 %v16580_v3  ;;  %v11909_v3 = vld [vmem:[%s24741_s15 + $0xa08] sm:$0xff] }
 0xa52   :  { %14454 = vmatprep.subr.bf16.mxu0 %v16589_v59  ;;  %v11913_v59 = vld [vmem:[%s24741_s15 + $0xa28] sm:$0xff] }
 0xa53   :  { %v16685_v0 = vcombine.high %v11909_v3, %v11913_v59  ;;  %v16684_v7 = vcombine.low %v11909_v3, %v11913_v59  ;;  %v11980_v3 = vld [vmem:[%s24741_s15 + $0xc40] sm:$0xff] }
 0xa55   :  { %14455 = vmatpush1.bf16.msra.mxu0 %v16588_v2  ;;  %v11917_v2 = vld [vmem:[%s24741_s15 + $0xa48] sm:$0xff] }
 0xa56   :  { %14456 = vmatprep.subr.bf16.mxu0 %v16597_v6  ;;  %v11921_v6 = vld [vmem:[%s24741_s15 + $0xa68] sm:$0xff] }
 0xa57   :  { %v16693_v8 = vcombine.high %v11917_v2, %v11921_v6  ;;  %v16692_v18 = vcombine.low %v11917_v2, %v11921_v6  ;;  %v11985_v2 = vld [vmem:[%s24741_s15 + $0xc68] sm:$0xff] }
 0xa59   :  { %14457 = vmatpush1.bf16.msra.mxu0 %v16596_v31  ;;  %v11925_v31 = vld [vmem:[%s24741_s15 + $0xa88] sm:$0xff] }
 0xa5a   :  { %14458 = vmatprep.subr.bf16.mxu0 %v16605_v11  ;;  %v11929_v11 = vld [vmem:[%s24741_s15 + $0xaa8] sm:$0xff] }
 0xa5b   :  { %v16701_v12 = vcombine.high %v11925_v31, %v11929_v11  ;;  %v16700_v62 = vcombine.low %v11925_v31, %v11929_v11 }
 0xa5d   :  { %14459 = vmatpush1.bf16.msra.mxu0 %v16604_v15  ;;  %v11933_v15 = vld [vmem:[%s24741_s15 + $0xac8] sm:$0xff] }
 0xa5e   :  { %14460 = vmatprep.subr.bf16.mxu0 %v16613_v42  ;;  %v11937_v42 = vld [vmem:[%s24741_s15 + $0xae8] sm:$0xff] }
 0xa5f   :  { %v16709_v25 = vcombine.high %v11933_v15, %v11937_v42  ;;  %v16708_v56 = vcombine.low %v11933_v15, %v11937_v42  ;;  %v11989_v15 = vld [vmem:[%s24741_s15 + $0xc88] sm:$0xff] }
 0xa60   :  { %v11993_v42 = vld [vmem:[%s24741_s15 + $0xca8] sm:$0xff] }
 0xa61   :  { %14461 = vmatpush1.bf16.msra.mxu0 %v16612_v24  ;;  %v11941_v24 = vld [vmem:[%s24741_s15 + $0xb08] sm:$0xff] }
 0xa62   :  { %14471 = vmatprep.subr.bf16.mxu0 %v16621_v27  ;;  %v11945_v27 = vld [vmem:[%s24741_s15 + $0xb28] sm:$0xff] }
 0xa63   :  { %v16717_v28 = vcombine.high %v11941_v24, %v11945_v27  ;;  %v16716_v29 = vcombine.low %v11941_v24, %v11945_v27  ;;  %v16765_v27 = vcombine.high %v11989_v15, %v11993_v42 }
 0xa64   :  { %14463 = vmatmul.mubr.bf16.vlgmr.msra.gmra.mrb[36].mxu0 %v23605_v44 }
 0xa65   :  { %14472 = vmatpush1.bf16.msra.mxu0 %v16620_v43  ;;  %v11949_v43 = vld [vmem:[%s24741_s15 + $0xb48] sm:$0xff] }
 0xa66   :  { %14473 = vmatprep.subr.bf16.mxu0 %v16629_v55  ;;  %v11953_v55 = vld [vmem:[%s24741_s15 + $0xb68] sm:$0xff] }
 0xa67   :  { %v16725_v33 = vcombine.high %v11949_v43, %v11953_v55  ;;  %v16724_v54 = vcombine.low %v11949_v43, %v11953_v55  ;;  %v16764_v43 = vcombine.low %v11989_v15, %v11993_v42  ;;  %v11606_v15 = vld [vmem:[%s24741_s15 + $0x90] sm:$0xff] }
 0xa68   :  { %v11610_v42 = vld [vmem:[%s24741_s15 + $0xb0] sm:$0xff] }
 0xa69   :  { %14474 = vmatpush1.bf16.msra.mxu0 %v16628_v30  ;;  %v11957_v30 = vld [vmem:[%s24741_s15 + $0xb88] sm:$0xff] }
 0xa6a   :  { %14475 = vmatprep.subr.bf16.mxu0 %v16637_v32  ;;  %v11961_v32 = vld [vmem:[%s24741_s15 + $0xba8] sm:$0xff] }
 0xa6b   :  { %v16733_v14 = vcombine.high %v11957_v30, %v11961_v32  ;;  %v16732_v46 = vcombine.low %v11957_v30, %v11961_v32  ;;  %v12008_v30 = vld [vmem:[%s24741_s15 + $0xd20] sm:$0xff]  ;;  %v12005_v32 = vld [vmem:[%s24741_s15 + $0xd08] sm:$0xff] }
 0xa6d   :  { %14476 = vmatpush1.bf16.msra.mxu0 %v16636_v41  ;;  %v11965_v41 = vld [vmem:[%s24741_s15 + $0xbc8] sm:$0xff] }
 0xa6e   :  { %14477 = vmatprep.subr.bf16.mxu0 %v16645_v61  ;;  %v11969_v61 = vld [vmem:[%s24741_s15 + $0xbe8] sm:$0xff] }
 0xa6f   :  { %v16741_v20 = vcombine.high %v11965_v41, %v11969_v61  ;;  %v16740_v13 = vcombine.low %v11965_v41, %v11969_v61  ;;  %v16772_v41 = vcombine.low %v11997_v47, %v12001_v35 }
 0xa71   :  { %14478 = vmatpush1.bf16.msra.mxu0 %v16644_v26  ;;  %v11973_v26 = vld [vmem:[%s24741_s15 + $0xc08] sm:$0xff] }
 0xa72   :  { %14479 = vmatprep.subr.bf16.mxu0 %v16653_v53  ;;  %v11977_v53 = vld [vmem:[%s24741_s15 + $0xc28] sm:$0xff] }
 0xa73   :  { %v16749_v1 = vcombine.high %v11973_v26, %v11977_v53 }
 0xa75   :  { %14480 = vmatpush1.bf16.msra.mxu0 %v16652_v48  ;;  %v18650_v48 = vld [vmem:[%s24742_s14] sm:$0x7f] }
 0xa76   :  { %14481 = vmatprep.subr.bf16.mxu0 %v16661_v9  ;;  %v8602_v9 = vrot.slane %v18650_v48, %v20830_v16  ;;  %v8606_v63 = vrot.slane %v18650_v48, %v20833_v19 }
 0xa79   :  { %14482 = vmatpush1.bf16.msra.mxu0 %v16660_v45 }
 0xa7a   :  { %14483 = vmatprep.subr.bf16.mxu0 %v16669_v50 }
 0xa7d   :  { %14484 = vmatpush1.bf16.msra.mxu0 %v16668_v22 }
 0xa7e   :  { %14485 = vmatprep.subr.bf16.mxu0 %v16677_v17 }
 0xa81   :  { %14486 = vmatpush1.bf16.msra.mxu0 %v16676_v60  ;;  %v11984_v60 = vld [vmem:[%s24741_s15 + $0xc60] sm:$0xff] }
 0xa82   :  { %14487 = vmatprep.subr.bf16.mxu0 %v16685_v0  ;;  %v11981_v0 = vld [vmem:[%s24741_s15 + $0xc48] sm:$0xff]  ;;  %v16755_v31 = vcombine.high %v11980_v3, %v11984_v60 }
 0xa83   :  { %v16757_v11 = vcombine.high %v11981_v0, %v11985_v2 }
 0xa85   :  { %14488 = vmatpush1.bf16.msra.mxu0 %v16684_v7  ;;  %v16748_v7 = vcombine.low %v11973_v26, %v11977_v53  ;;  %v12016_v26 = vld [vmem:[%s24741_s15 + $0xd60] sm:$0xff]  ;;  %v12013_v53 = vld [vmem:[%s24741_s15 + $0xd48] sm:$0xff] }
 0xa86   :  { %14489 = vmatprep.subr.bf16.mxu0 %v16693_v8 }
 0xa89   :  { %14490 = vmatpush1.bf16.msra.mxu0 %v16692_v18  ;;  %v11988_v18 = vld [vmem:[%s24741_s15 + $0xc80] sm:$0xff] }
 0xa8a   :  { %14491 = vmatprep.subr.bf16.mxu0 %v16701_v12  ;;  %v11992_v12 = vld [vmem:[%s24741_s15 + $0xca0] sm:$0xff] }
 0xa8b   :  { %v16763_v24 = vcombine.high %v11988_v18, %v11992_v12 }
 0xa8d   :  { %14492 = vmatpush1.bf16.msra.mxu0 %v16700_v62  ;;  %v16754_v62 = vcombine.low %v11980_v3, %v11984_v60  ;;  %v11598_v60 = vld [vmem:[%s24741_s15 + $0x50] sm:$0xff] }
 0xa8e   :  { %14493 = vmatprep.subr.bf16.mxu0 %v16709_v25  ;;  %v16756_v25 = vcombine.low %v11981_v0, %v11985_v2  ;;  %v11602_v0 = vld [vmem:[%s24741_s15 + $0x70] sm:$0xff]  ;;  %v11599_v2 = vld [vmem:[%s24741_s15 + $0x58] sm:$0xff] }
 0xa91   :  { %14494 = vmatpush1.bf16.msra.mxu0 %v16708_v56  ;;  %v11996_v56 = vld [vmem:[%s24741_s15 + $0xcc0] sm:$0xff] }
 0xa92   :  { %14495 = vmatprep.subr.bf16.mxu0 %v16717_v28  ;;  %v12000_v28 = vld [vmem:[%s24741_s15 + $0xce0] sm:$0xff] }
 0xa93   :  { %v16771_v55 = vcombine.high %v11996_v56, %v12000_v28 }
 0xa95   :  { %14496 = vmatpush1.bf16.msra.mxu0 %v16716_v29  ;;  %v16773_v29 = vcombine.high %v11997_v47, %v12001_v35  ;;  %v11614_v47 = vld [vmem:[%s24741_s15 + $0xd0] sm:$0xff] }
 0xa96   :  { %14497 = vmatprep.subr.bf16.mxu0 %v16725_v33  ;;  %v12004_v33 = vld [vmem:[%s24741_s15 + $0xd00] sm:$0xff]  ;;  %v11618_v35 = vld [vmem:[%s24741_s15 + $0xf0] sm:$0xff] }
 0xa97   :  { %v16779_v61 = vcombine.high %v12004_v33, %v12008_v30 }
 0xa99   :  { %14498 = vmatpush1.bf16.msra.mxu0 %v16724_v54  ;;  %v12009_v54 = vld [vmem:[%s24741_s15 + $0xd28] sm:$0xff] }
 0xa9a   :  { %14499 = vmatprep.subr.bf16.mxu0 %v16733_v14  ;;  %v16770_v14 = vcombine.low %v11996_v56, %v12000_v28  ;;  %v16780_v48 = vcombine.low %v12005_v32, %v12009_v54  ;;  %v16383_v56 = vcombine.high %v11606_v15, %v11610_v42 }
 0xa9d   :  { %14500 = vmatpush1.bf16.msra.mxu0 %v16732_v46  ;;  %v16781_v46 = vcombine.high %v12005_v32, %v12009_v54  ;;  %v11626_v32 = vld [vmem:[%s24741_s15 + $0x130] sm:$0xff]  ;;  %v11623_v54 = vld [vmem:[%s24741_s15 + $0x118] sm:$0xff] }
 0xa9e   :  { %14501 = vmatprep.subr.bf16.mxu0 %v16741_v20  ;;  %v12012_v20 = vld [vmem:[%s24741_s15 + $0xd40] sm:$0xff] }
 0xaa1   :  { %14502 = vmatpush1.bf16.msra.mxu0 %v16740_v13  ;;  %v12017_v13 = vld [vmem:[%s24741_s15 + $0xd68] sm:$0xff] }
 0xaa2   :  { %14512 = vmatprep.subr.bf16.mxu0 %v16749_v1  ;;  %v16778_v1 = vcombine.low %v12004_v33, %v12008_v30  ;;  %v11622_v30 = vld [vmem:[%s24741_s15 + $0x110] sm:$0xff] }
 0xab7   :  { %v11407_v10 = vpop.f32.mrb[32].mxu0 }
 0xab8   :  { %v17101_v45 = vadd.f32 %v11407_v10, %v8602_v9  ;;  %v11409_v50 = vpop.f32.mrb[33].mxu0  ;;  %v16787_v9 = vcombine.high %v12012_v20, %v12016_v26  ;;  %v11590_v10 = vld [vmem:[%s24741_s15 + $0x10] sm:$0xff] }
 0xab9   :  { %v17102_v57 = vadd.f32 %v11409_v50, %v8606_v63  ;;  %v11411_v58 = vpop.f32.mrb[34].mxu0  ;;  %v16789_v63 = vcombine.high %v12013_v53, %v12017_v13  ;;  %v11591_v50 = vld [vmem:[%s24741_s15 + $0x18] sm:$0xff] }
 0xaba   :  { %v11578_v22 = vmax.f32 %v17101_v45, 0.0  ;;  %v11412_v17 = vpop.f32.mrb[35].mxu0  ;;  %v11594_v45 = vld [vmem:[%s24741_s15 + $0x30] sm:$0xff]  ;;  %v16786_v58 = vcombine.low %v12012_v20, %v12016_v26 }
 0xabb   :  { %v11579_v59 = vmax.f32 %v17102_v57, 0.0  ;;  %v11595_v57 = vld [vmem:[%s24741_s15 + $0x38] sm:$0xff]  ;;  %v11580_v17 = vmax.f32 %v23794_v37, 0.0  ;;  %v16367_v3 = vcombine.high %v11590_v10, %v11594_v45  ;;  %v11630_v26 = vld [vmem:[%s24741_s15 + $0x150] sm:$0xff] }
 0xabc   :  { %v23974_v8 = vpack.c.bf16 %v11578_v22, %v11578_v22  ;;  %v16788_v22 = vcombine.low %v12013_v53, %v12017_v13  ;;  %v11603_v37 = vld [vmem:[%s24741_s15 + $0x78] sm:$0xff]  ;;  %v11634_v53 = vld [vmem:[%s24741_s15 + $0x170] sm:$0xff] }
 0xabd   :  { %v23972_v6 = vpack.c.bf16 %v11579_v59, %v11579_v59  ;;  %v16369_v59 = vcombine.high %v11591_v50, %v11595_v57  ;;  %v11631_v13 = vld [vmem:[%s24741_s15 + $0x158] sm:$0xff] }
 0xabf   :  { %14339 = vmatprep.mubr.bf16.mxu1 %v23972_v6  ;;  %14503 = vmatprep.mubr.bf16.mxu0 %v23972_v6 }
 0xac0   :  { %14340 = vmatmul.mubr.bf16.vlgmr.msra.gmra.mrb[80].mxu1 %v23974_v8  ;;  %14504 = vmatmul.mubr.bf16.vlgmr.msra.gmra.mrb[36].mxu0 %v23974_v8 }
 0xac1   :  { %14349 = vmatpush1.bf16.msra.mxu1 %v16746_v5  ;;  %14513 = vmatpush1.bf16.msra.mxu0 %v16748_v7  ;;  %v16762_v5 = vcombine.low %v11988_v18, %v11992_v12  ;;  %v16366_v7 = vcombine.low %v11590_v10, %v11594_v45  ;;  %v16375_v18 = vcombine.high %v11598_v60, %v11602_v0  ;;  %v11638_v45 = vld [vmem:[%s24741_s15 + $0x190] sm:$0xff] }
 0xac2   :  { %14350 = vmatprep.subr.bf16.mxu1 %v16755_v31  ;;  %14514 = vmatprep.subr.bf16.mxu0 %v16757_v11  ;;  %v24058_v31 = vpack.c.bf16 %v11580_v17, %v11580_v17  ;;  %v16368_v11 = vcombine.low %v11591_v50, %v11595_v57  ;;  %v16377_v12 = vcombine.high %v11599_v2, %v11603_v37  ;;  %v11642_v50 = vld [vmem:[%s24741_s15 + $0x1b0] sm:$0xff]  ;;  %v11639_v57 = vld [vmem:[%s24741_s15 + $0x198] sm:$0xff] }
 0xac3   :  { %14380 = vmatprep.mubr.bf16.mxu1 %v18652_v4  ;;  %14544 = vmatprep.mubr.bf16.mxu0 %v18652_v4 }
 0xac5   :  { %14351 = vmatpush1.bf16.msra.mxu1 %v16754_v62  ;;  %14515 = vmatpush1.bf16.msra.mxu0 %v16756_v25  ;;  %v11607_v62 = vld [vmem:[%s24741_s15 + $0x98] sm:$0xff] }
 0xac6   :  { %14352 = vmatprep.subr.bf16.mxu1 %v16763_v24  ;;  %14516 = vmatprep.subr.bf16.mxu0 %v16765_v27  ;;  %v11611_v25 = vld [vmem:[%s24741_s15 + $0xb8] sm:$0xff]  ;;  %v16374_v24 = vcombine.low %v11598_v60, %v11602_v0  ;;  %v16376_v27 = vcombine.low %v11599_v2, %v11603_v37  ;;  %v11646_v60 = vld [vmem:[%s24741_s15 + $0x1d0] sm:$0xff] }
 0xac7   :  { %v16385_v28 = vcombine.high %v11607_v62, %v11611_v25  ;;  %v11650_v0 = vld [vmem:[%s24741_s15 + $0x1f0] sm:$0xff]  ;;  %v11647_v2 = vld [vmem:[%s24741_s15 + $0x1d8] sm:$0xff] }
 0xac8   :  { %v11651_v37 = vld [vmem:[%s24741_s15 + $0x1f8] sm:$0xff] }
 0xac9   :  { %14353 = vmatpush1.bf16.msra.mxu1 %v16762_v5  ;;  %14517 = vmatpush1.bf16.msra.mxu0 %v16764_v43  ;;  %v11615_v5 = vld [vmem:[%s24741_s15 + $0xd8] sm:$0xff]  ;;  %v16382_v43 = vcombine.low %v11606_v15, %v11610_v42  ;;  %v11654_v15 = vld [vmem:[%s24741_s15 + $0x210] sm:$0xff] }
 0xaca   :  { %14354 = vmatprep.subr.bf16.mxu1 %v16771_v55  ;;  %14518 = vmatprep.subr.bf16.mxu0 %v16773_v29  ;;  %v16384_v55 = vcombine.low %v11607_v62, %v11611_v25  ;;  %v16391_v29 = vcombine.high %v11614_v47, %v11618_v35  ;;  %v11658_v42 = vld [vmem:[%s24741_s15 + $0x230] sm:$0xff]  ;;  %v11655_v62 = vld [vmem:[%s24741_s15 + $0x218] sm:$0xff] }
 0xacb   :  { %v11659_v25 = vld [vmem:[%s24741_s15 + $0x238] sm:$0xff] }
 0xacd   :  { %14355 = vmatpush1.bf16.msra.mxu1 %v16770_v14  ;;  %14519 = vmatpush1.bf16.msra.mxu0 %v16772_v41  ;;  %v11627_v14 = vld [vmem:[%s24741_s15 + $0x138] sm:$0xff]  ;;  %v16390_v41 = vcombine.low %v11614_v47, %v11618_v35  ;;  %v11662_v47 = vld [vmem:[%s24741_s15 + $0x250] sm:$0xff] }
 0xace   :  { %14356 = vmatprep.subr.bf16.mxu1 %v16779_v61  ;;  %14520 = vmatprep.subr.bf16.mxu0 %v16781_v46  ;;  %v16399_v46 = vcombine.high %v11622_v30, %v11626_v32  ;;  %v16401_v20 = vcombine.high %v11623_v54, %v11627_v14  ;;  %v11666_v35 = vld [vmem:[%s24741_s15 + $0x270] sm:$0xff] }
 0xad1   :  { %14357 = vmatpush1.bf16.msra.mxu1 %v16778_v1  ;;  %14521 = vmatpush1.bf16.msra.mxu0 %v16780_v48  ;;  %v11635_v1 = vld [vmem:[%s24741_s15 + $0x178] sm:$0xff]  ;;  %v16398_v48 = vcombine.low %v11622_v30, %v11626_v32  ;;  %v11670_v30 = vld [vmem:[%s24741_s15 + $0x290] sm:$0xff] }
 0xad2   :  { %14358 = vmatprep.subr.bf16.mxu1 %v16787_v9  ;;  %14522 = vmatprep.subr.bf16.mxu0 %v16789_v63  ;;  %v16400_v9 = vcombine.low %v11623_v54, %v11627_v14  ;;  %v16407_v63 = vcombine.high %v11630_v26, %v11634_v53  ;;  %v16409_v10 = vcombine.high %v11631_v13, %v11635_v1  ;;  %v11674_v32 = vld [vmem:[%s24741_s15 + $0x2b0] sm:$0xff]  ;;  %v11671_v54 = vld [vmem:[%s24741_s15 + $0x298] sm:$0xff] }
 0xad3   :  { %v16408_v17 = vcombine.low %v11631_v13, %v11635_v1  ;;  %v11675_v14 = vld [vmem:[%s24741_s15 + $0x2b8] sm:$0xff] }
 0xad4   :  { %v11679_v13 = vld [vmem:[%s24741_s15 + $0x2d8] sm:$0xff] }
 0xad5   :  { %14359 = vmatpush1.bf16.msra.mxu1 %v16786_v58  ;;  %14523 = vmatpush1.bf16.msra.mxu0 %v16788_v22  ;;  %v11643_v58 = vld [vmem:[%s24741_s15 + $0x1b8] sm:$0xff]  ;;  %v16406_v22 = vcombine.low %v11630_v26, %v11634_v53  ;;  %v11678_v26 = vld [vmem:[%s24741_s15 + $0x2d0] sm:$0xff] }
 0xad6   :  { %14553 = vmatprep.subr.bf16.mxu1 %v16367_v3  ;;  %14717 = vmatprep.subr.bf16.mxu0 %v16369_v59  ;;  %v16415_v3 = vcombine.high %v11638_v45, %v11642_v50  ;;  %v16417_v59 = vcombine.high %v11639_v57, %v11643_v58  ;;  %v11682_v53 = vld [vmem:[%s24741_s15 + $0x2f0] sm:$0xff]  ;;  %v11683_v1 = vld [vmem:[%s24741_s15 + $0x2f8] sm:$0xff] }
 0xad8   :  { %16794 = vmatmul.mubr.msk.bf16.vlgmr.msra.gmra.mrb[80].mxu1 %vm6264_vm0, %v24058_v31  ;;  %16795 = vmatmul.mubr.msk.bf16.vlgmr.msra.gmra.mrb[36].mxu0 %vm6264_vm0, %v24058_v31 }
 0xad9   :  { %14554 = vmatpush1.bf16.msra.mxu1 %v16366_v7  ;;  %14585 = vmatprep.mubr.bf16.mxu1 %v23381_v38  ;;  %v16414_v7 = vcombine.low %v11638_v45, %v11642_v50  ;;  %v11686_v45 = vld [vmem:[%s24741_s15 + $0x310] sm:$0xff] }
 0xada   :  { %14718 = vmatpush1.bf16.msra.mxu0 %v16368_v11  ;;  %14749 = vmatprep.mubr.bf16.mxu0 %v23381_v38  ;;  %v11619_v38 = vld [vmem:[%s24741_s15 + $0xf8] sm:$0xff]  ;;  %v16416_v11 = vcombine.low %v11639_v57, %v11643_v58  ;;  %v11690_v50 = vld [vmem:[%s24741_s15 + $0x330] sm:$0xff] }
 0xadb   :  { %14555 = vmatprep.subr.bf16.mxu1 %v16375_v18  ;;  %14719 = vmatprep.subr.bf16.mxu0 %v16377_v12  ;;  %v16393_v33 = vcombine.high %v11615_v5, %v11619_v38  ;;  %v16392_v61 = vcombine.low %v11615_v5, %v11619_v38  ;;  %v16423_v18 = vcombine.high %v11646_v60, %v11650_v0  ;;  %v11663_v5 = vld [vmem:[%s24741_s15 + $0x258] sm:$0xff] }
 0xadc   :  { %v16425_v12 = vcombine.high %v11647_v2, %v11651_v37  ;;  %v11667_v38 = vld [vmem:[%s24741_s15 + $0x278] sm:$0xff] }
 0xadd   :  { %14556 = vmatpush1.bf16.msra.mxu1 %v16374_v24  ;;  %v16422_v24 = vcombine.low %v11646_v60, %v11650_v0  ;;  %v11687_v57 = vld [vmem:[%s24741_s15 + $0x318] sm:$0xff]  ;;  %v11694_v60 = vld [vmem:[%s24741_s15 + $0x350] sm:$0xff] }
 0xade   :  { %14720 = vmatpush1.bf16.msra.mxu0 %v16376_v27  ;;  %14557 = vmatprep.subr.bf16.mxu1 %v16383_v56  ;;  %v16424_v27 = vcombine.low %v11647_v2, %v11651_v37  ;;  %v16431_v56 = vcombine.high %v11654_v15, %v11658_v42  ;;  %v11691_v58 = vld [vmem:[%s24741_s15 + $0x338] sm:$0xff]  ;;  %v11698_v0 = vld [vmem:[%s24741_s15 + $0x370] sm:$0xff] }
 0xadf   :  { %14721 = vmatprep.subr.bf16.mxu0 %v16385_v28  ;;  %v16433_v28 = vcombine.high %v11655_v62, %v11659_v25  ;;  %v11695_v2 = vld [vmem:[%s24741_s15 + $0x358] sm:$0xff] }
 0xae0   :  { %v11699_v37 = vld [vmem:[%s24741_s15 + $0x378] sm:$0xff] }
 0xae1   :  { %14558 = vmatpush1.bf16.msra.mxu1 %v16382_v43  ;;  %v16430_v43 = vcombine.low %v11654_v15, %v11658_v42  ;;  %v11702_v15 = vld [vmem:[%s24741_s15 + $0x390] sm:$0xff] }
 0xae2   :  { %14722 = vmatpush1.bf16.msra.mxu0 %v16384_v55  ;;  %14559 = vmatprep.subr.bf16.mxu1 %v16391_v29  ;;  %v16432_v55 = vcombine.low %v11655_v62, %v11659_v25  ;;  %v16439_v29 = vcombine.high %v11662_v47, %v11666_v35  ;;  %v11706_v42 = vld [vmem:[%s24741_s15 + $0x3b0] sm:$0xff]  ;;  %v11703_v62 = vld [vmem:[%s24741_s15 + $0x398] sm:$0xff] }
 0xae3   :  { %14723 = vmatprep.subr.bf16.mxu0 %v16393_v33  ;;  %v16441_v33 = vcombine.high %v11663_v5, %v11667_v38  ;;  %v11707_v25 = vld [vmem:[%s24741_s15 + $0x3b8] sm:$0xff] }
 0xae5   :  { %14560 = vmatpush1.bf16.msra.mxu1 %v16390_v41  ;;  %v16438_v41 = vcombine.low %v11662_v47, %v11666_v35  ;;  %v11710_v47 = vld [vmem:[%s24741_s15 + $0x3d0] sm:$0xff] }
 0xae6   :  { %14724 = vmatpush1.bf16.msra.mxu0 %v16392_v61  ;;  %14561 = vmatprep.subr.bf16.mxu1 %v16399_v46  ;;  %v16440_v61 = vcombine.low %v11663_v5, %v11667_v38  ;;  %v16447_v46 = vcombine.high %v11670_v30, %v11674_v32  ;;  %v11714_v35 = vld [vmem:[%s24741_s15 + $0x3f0] sm:$0xff]  ;;  %v11711_v5 = vld [vmem:[%s24741_s15 + $0x3d8] sm:$0xff] }
 0xae7   :  { %14725 = vmatprep.subr.bf16.mxu0 %v16401_v20  ;;  %v16449_v20 = vcombine.high %v11671_v54, %v11675_v14  ;;  %v11715_v38 = vld [vmem:[%s24741_s15 + $0x3f8] sm:$0xff] }
 0xae9   :  { %14562 = vmatpush1.bf16.msra.mxu1 %v16398_v48  ;;  %v16446_v48 = vcombine.low %v11670_v30, %v11674_v32  ;;  %v11718_v30 = vld [vmem:[%s24741_s15 + $0x410] sm:$0xff] }
 0xaea   :  { %14726 = vmatpush1.bf16.msra.mxu0 %v16400_v9  ;;  %14563 = vmatprep.subr.bf16.mxu1 %v16407_v63  ;;  %v16448_v9 = vcombine.low %v11671_v54, %v11675_v14  ;;  %v16455_v63 = vcombine.high %v11678_v26, %v11682_v53  ;;  %v11722_v32 = vld [vmem:[%s24741_s15 + $0x430] sm:$0xff]  ;;  %v11719_v54 = vld [vmem:[%s24741_s15 + $0x418] sm:$0xff] }
 0xaeb   :  { %14727 = vmatprep.subr.bf16.mxu0 %v16409_v10  ;;  %v16457_v10 = vcombine.high %v11679_v13, %v11683_v1  ;;  %v11723_v14 = vld [vmem:[%s24741_s15 + $0x438] sm:$0xff] }
 0xaed   :  { %14564 = vmatpush1.bf16.msra.mxu1 %v16406_v22  ;;  %v16454_v22 = vcombine.low %v11678_v26, %v11682_v53  ;;  %v11726_v26 = vld [vmem:[%s24741_s15 + $0x450] sm:$0xff] }
 0xaee   :  { %14728 = vmatpush1.bf16.msra.mxu0 %v16408_v17  ;;  %14565 = vmatprep.subr.bf16.mxu1 %v16415_v3  ;;  %v16456_v17 = vcombine.low %v11679_v13, %v11683_v1  ;;  %v16463_v3 = vcombine.high %v11686_v45, %v11690_v50  ;;  %v11730_v53 = vld [vmem:[%s24741_s15 + $0x470] sm:$0xff]  ;;  %v16494_v13 = vcombine.low %v11718_v30, %v11722_v32  ;;  %v11727_v1 = vld [vmem:[%s24741_s15 + $0x458] sm:$0xff] }
 0xaef   :  { %14729 = vmatprep.subr.bf16.mxu0 %v16417_v59  ;;  %v16465_v59 = vcombine.high %v11687_v57, %v11691_v58 }
 0xaf1   :  { %14566 = vmatpush1.bf16.msra.mxu1 %v16414_v7  ;;  %v16462_v7 = vcombine.low %v11686_v45, %v11690_v50  ;;  %v11738_v45 = vld [vmem:[%s24741_s15 + $0x4b0] sm:$0xff] }
 0xaf2   :  { %14730 = vmatpush1.bf16.msra.mxu0 %v16416_v11  ;;  %14567 = vmatprep.subr.bf16.mxu1 %v16423_v18  ;;  %v16464_v11 = vcombine.low %v11687_v57, %v11691_v58  ;;  %v16471_v18 = vcombine.high %v11694_v60, %v11698_v0  ;;  %v11735_v57 = vld [vmem:[%s24741_s15 + $0x498] sm:$0xff] }
 0xaf3   :  { %14731 = vmatprep.subr.bf16.mxu0 %v16425_v12  ;;  %v16473_v12 = vcombine.high %v11695_v2, %v11699_v37  ;;  %v11739_v58 = vld [vmem:[%s24741_s15 + $0x4b8] sm:$0xff] }
 0xaf5   :  { %14568 = vmatpush1.bf16.msra.mxu1 %v16422_v24  ;;  %v16470_v24 = vcombine.low %v11694_v60, %v11698_v0  ;;  %v11742_v60 = vld [vmem:[%s24741_s15 + $0x4d0] sm:$0xff] }
 0xaf6   :  { %14732 = vmatpush1.bf16.msra.mxu0 %v16424_v27  ;;  %14569 = vmatprep.subr.bf16.mxu1 %v16431_v56  ;;  %v16472_v27 = vcombine.low %v11695_v2, %v11699_v37  ;;  %v16479_v56 = vcombine.high %v11702_v15, %v11706_v42  ;;  %v11746_v0 = vld [vmem:[%s24741_s15 + $0x4f0] sm:$0xff]  ;;  %v11747_v2 = vld [vmem:[%s24741_s15 + $0x4f8] sm:$0xff]  ;;  %v16512_v37 = vcombine.low %v11735_v57, %v11739_v58 }
 0xaf7   :  { %14733 = vmatprep.subr.bf16.mxu0 %v16433_v28  ;;  %v16481_v28 = vcombine.high %v11703_v62, %v11707_v25 }
 0xaf9   :  { %14570 = vmatpush1.bf16.msra.mxu1 %v16430_v43  ;;  %v16478_v43 = vcombine.low %v11702_v15, %v11706_v42  ;;  %v11751_v15 = vld [vmem:[%s24741_s15 + $0x518] sm:$0xff] }
 0xafa   :  { %14734 = vmatpush1.bf16.msra.mxu0 %v16432_v55  ;;  %14571 = vmatprep.subr.bf16.mxu1 %v16439_v29  ;;  %v16480_v55 = vcombine.low %v11703_v62, %v11707_v25  ;;  %v16487_v29 = vcombine.high %v11710_v47, %v11714_v35  ;;  %v11755_v42 = vld [vmem:[%s24741_s15 + $0x538] sm:$0xff]  ;;  %v16518_v62 = vcombine.low %v11742_v60, %v11746_v0 }
 0xafb   :  { %14735 = vmatprep.subr.bf16.mxu0 %v16441_v33  ;;  %v16489_v33 = vcombine.high %v11711_v5, %v11715_v38 }
 0xafd   :  { %14572 = vmatpush1.bf16.msra.mxu1 %v16438_v41  ;;  %v16486_v41 = vcombine.low %v11710_v47, %v11714_v35  ;;  %v11759_v47 = vld [vmem:[%s24741_s15 + $0x558] sm:$0xff] }
 0xafe   :  { %14736 = vmatpush1.bf16.msra.mxu0 %v16440_v61  ;;  %14573 = vmatprep.subr.bf16.mxu1 %v16447_v46  ;;  %v16488_v61 = vcombine.low %v11711_v5, %v11715_v38  ;;  %v16495_v46 = vcombine.high %v11718_v30, %v11722_v32  ;;  %v11763_v35 = vld [vmem:[%s24741_s15 + $0x578] sm:$0xff]  ;;  %v16528_v38 = vcombine.low %v11751_v15, %v11755_v42 }
 0xaff   :  { %14737 = vmatprep.subr.bf16.mxu0 %v16449_v20  ;;  %v16497_v20 = vcombine.high %v11719_v54, %v11723_v14  ;;  %v11767_v30 = vld [vmem:[%s24741_s15 + $0x598] sm:$0xff] }
 0xb00   :  { %v11771_v32 = vld [vmem:[%s24741_s15 + $0x5b8] sm:$0xff] }
 0xb01   :  { %14574 = vmatpush1.bf16.msra.mxu1 %v16446_v48  ;;  %v11731_v48 = vld [vmem:[%s24741_s15 + $0x478] sm:$0xff] }
 0xb02   :  { %14738 = vmatpush1.bf16.msra.mxu0 %v16448_v9  ;;  %14575 = vmatprep.subr.bf16.mxu1 %v16455_v63  ;;  %v16496_v9 = vcombine.low %v11719_v54, %v11723_v14  ;;  %v16503_v63 = vcombine.high %v11726_v26, %v11730_v53  ;;  %v16505_v50 = vcombine.high %v11727_v1, %v11731_v48 }
 0xb03   :  { %14739 = vmatprep.subr.bf16.mxu0 %v16457_v10  ;;  %v11734_v10 = vld [vmem:[%s24741_s15 + $0x490] sm:$0xff]  ;;  %v16536_v14 = vcombine.low %v11759_v47, %v11763_v35 }
 0xb05   :  { %14576 = vmatpush1.bf16.msra.mxu1 %v16454_v22  ;;  %v16502_v22 = vcombine.low %v11726_v26, %v11730_v53  ;;  %v11775_v26 = vld [vmem:[%s24741_s15 + $0x5d8] sm:$0xff] }
 0xb06   :  { %14740 = vmatpush1.bf16.msra.mxu0 %v16456_v17  ;;  %14577 = vmatprep.subr.bf16.mxu1 %v16463_v3  ;;  %v16504_v17 = vcombine.low %v11727_v1, %v11731_v48  ;;  %v16511_v3 = vcombine.high %v11734_v10, %v11738_v45  ;;  %v11779_v53 = vld [vmem:[%s24741_s15 + $0x5f8] sm:$0xff]  ;;  %v16544_v1 = vcombine.low %v11767_v30, %v11771_v32 }
 0xb07   :  { %14741 = vmatprep.subr.bf16.mxu0 %v16465_v59  ;;  %v16513_v59 = vcombine.high %v11735_v57, %v11739_v58  ;;  %v16552_v58 = vcombine.low %v11775_v26, %v11779_v53 }
 0xb09   :  { %14578 = vmatpush1.bf16.msra.mxu1 %v16462_v7  ;;  %v16519_v7 = vcombine.high %v11742_v60, %v11746_v0  ;;  %v11791_v60 = vld [vmem:[%s24741_s15 + $0x658] sm:$0xff] }
 0xb0a   :  { %14742 = vmatpush1.bf16.msra.mxu0 %v16464_v11  ;;  %14579 = vmatprep.subr.bf16.mxu1 %v16471_v18  ;;  %v11750_v18 = vld [vmem:[%s24741_s15 + $0x510] sm:$0xff]  ;;  %v11795_v0 = vld [vmem:[%s24741_s15 + $0x678] sm:$0xff] }
 0xb0b   :  { %14743 = vmatprep.subr.bf16.mxu0 %v16473_v12  ;;  %v11754_v12 = vld [vmem:[%s24741_s15 + $0x530] sm:$0xff] }
 0xb0c   :  { %v16526_v5 = vcombine.low %v11750_v18, %v11754_v12 }
 0xb0d   :  { %14580 = vmatpush1.bf16.msra.mxu1 %v16470_v24  ;;  %v16527_v24 = vcombine.high %v11750_v18, %v11754_v12  ;;  %v11799_v18 = vld [vmem:[%s24741_s15 + $0x698] sm:$0xff] }
 0xb0e   :  { %14744 = vmatpush1.bf16.msra.mxu0 %v16472_v27  ;;  %14581 = vmatprep.subr.bf16.mxu1 %v16479_v56  ;;  %v16529_v27 = vcombine.high %v11751_v15, %v11755_v42  ;;  %v11758_v56 = vld [vmem:[%s24741_s15 + $0x550] sm:$0xff]  ;;  %v11803_v12 = vld [vmem:[%s24741_s15 + $0x6b8] sm:$0xff]  ;;  %v16568_v42 = vcombine.low %v11791_v60, %v11795_v0 }
 0xb0f   :  { %14745 = vmatprep.subr.bf16.mxu0 %v16481_v28  ;;  %v11762_v28 = vld [vmem:[%s24741_s15 + $0x570] sm:$0xff] }
 0xb10   :  { %v16534_v54 = vcombine.low %v11758_v56, %v11762_v28 }
 0xb11   :  { %14582 = vmatpush1.bf16.msra.mxu1 %v16478_v43  ;;  %v16535_v43 = vcombine.high %v11758_v56, %v11762_v28  ;;  %v11807_v56 = vld [vmem:[%s24741_s15 + $0x6d8] sm:$0xff] }
 0xb12   :  { %14746 = vmatpush1.bf16.msra.mxu0 %v16480_v55  ;;  %14583 = vmatprep.subr.bf16.mxu1 %v16487_v29  ;;  %v16537_v55 = vcombine.high %v11759_v47, %v11763_v35  ;;  %v11766_v29 = vld [vmem:[%s24741_s15 + $0x590] sm:$0xff]  ;;  %v11811_v28 = vld [vmem:[%s24741_s15 + $0x6f8] sm:$0xff]  ;;  %v16576_v35 = vcombine.low %v11799_v18, %v11803_v12 }
 0xb13   :  { %14747 = vmatprep.subr.bf16.mxu0 %v16489_v33  ;;  %v11770_v33 = vld [vmem:[%s24741_s15 + $0x5b0] sm:$0xff] }
 0xb15   :  { %14584 = vmatpush1.bf16.msra.mxu1 %v16486_v41  ;;  %v16543_v41 = vcombine.high %v11766_v29, %v11770_v33 }
 0xb16   :  { %14748 = vmatpush1.bf16.msra.mxu0 %v16488_v61  ;;  %14594 = vmatprep.subr.bf16.mxu1 %v16495_v46  ;;  %v16545_v61 = vcombine.high %v11767_v30, %v11771_v32  ;;  %v11774_v46 = vld [vmem:[%s24741_s15 + $0x5d0] sm:$0xff]  ;;  %v16584_v32 = vcombine.low %v11807_v56, %v11811_v28 }
 0xb17   :  { %14758 = vmatprep.subr.bf16.mxu0 %v16497_v20  ;;  %v11778_v20 = vld [vmem:[%s24741_s15 + $0x5f0] sm:$0xff] }
 0xb18   :  { %14586 = vmatmul.mubr.bf16.vlgmr.msra.gmra.mrb[84].mxu1 %v23388_v52  ;;  %v16551_v48 = vcombine.high %v11774_v46, %v11778_v20  ;;  %v16550_v57 = vcombine.low %v11774_v46, %v11778_v20  ;;  %v11823_v46 = vld [vmem:[%s24741_s15 + $0x758] sm:$0xff] }
 0xb19   :  { %14750 = vmatmul.mubr.bf16.vlgmr.msra.gmra.mrb[40].mxu0 %v23388_v52  ;;  %14595 = vmatpush1.bf16.msra.mxu1 %v16494_v13  ;;  %v11743_v52 = vld [vmem:[%s24741_s15 + $0x4d8] sm:$0xff]  ;;  %v16542_v13 = vcombine.low %v11766_v29, %v11770_v33 }
 0xb1a   :  { %14626 = vmatprep.mubr.bf16.mxu1 %v23400_v21  ;;  %14759 = vmatpush1.bf16.msra.mxu0 %v16496_v9  ;;  %v16521_v11 = vcombine.high %v11743_v52, %v11747_v2  ;;  %v16520_v25 = vcombine.low %v11743_v52, %v11747_v2  ;;  %v16553_v9 = vcombine.high %v11775_v26, %v11779_v53  ;;  %v11815_v29 = vld [vmem:[%s24741_s15 + $0x718] sm:$0xff] }
 0xb1b   :  { %14790 = vmatprep.mubr.bf16.mxu0 %v23400_v21  ;;  %14596 = vmatprep.subr.bf16.mxu1 %v16503_v63  ;;  %v16510_v21 = vcombine.low %v11734_v10, %v11738_v45  ;;  %v11782_v63 = vld [vmem:[%s24741_s15 + $0x610] sm:$0xff]  ;;  %v11783_v45 = vld [vmem:[%s24741_s15 + $0x618] sm:$0xff] }
 0xb1c   :  { %14760 = vmatprep.subr.bf16.mxu0 %v16505_v50  ;;  %v11786_v10 = vld [vmem:[%s24741_s15 + $0x630] sm:$0xff]  ;;  %v11787_v50 = vld [vmem:[%s24741_s15 + $0x638] sm:$0xff] }
 0xb1d   :  { %14597 = vmatpush1.bf16.msra.mxu1 %v16502_v22  ;;  %v16559_v22 = vcombine.high %v11782_v63, %v11786_v10  ;;  %v16558_v52 = vcombine.low %v11782_v63, %v11786_v10  ;;  %v16560_v2 = vcombine.low %v11783_v45, %v11787_v50  ;;  %v11819_v33 = vld [vmem:[%s24741_s15 + $0x738] sm:$0xff] }
 0xb1e   :  { %14761 = vmatpush1.bf16.msra.mxu0 %v16504_v17  ;;  %14598 = vmatprep.subr.bf16.mxu1 %v16511_v3  ;;  %v16561_v17 = vcombine.high %v11783_v45, %v11787_v50  ;;  %v11790_v3 = vld [vmem:[%s24741_s15 + $0x650] sm:$0xff]  ;;  %v11827_v20 = vld [vmem:[%s24741_s15 + $0x778] sm:$0xff]  ;;  %v16592_v53 = vcombine.low %v11815_v29, %v11819_v33 }
 0xb1f   :  { %14762 = vmatprep.subr.bf16.mxu0 %v16513_v59  ;;  %v11794_v59 = vld [vmem:[%s24741_s15 + $0x670] sm:$0xff]  ;;  %v11831_v63 = vld [vmem:[%s24741_s15 + $0x798] sm:$0xff]  ;;  %v16600_v50 = vcombine.low %v11823_v46, %v11827_v20 }
 0xb20   :  { %v16566_v15 = vcombine.low %v11790_v3, %v11794_v59  ;;  %v11835_v10 = vld [vmem:[%s24741_s15 + $0x7b8] sm:$0xff] }
 0xb21   :  { %14599 = vmatpush1.bf16.msra.mxu1 %v16510_v21  ;;  %v16567_v21 = vcombine.high %v11790_v3, %v11794_v59  ;;  %v11839_v3 = vld [vmem:[%s24741_s15 + $0x7d8] sm:$0xff] }
 0xb22   :  { %14763 = vmatpush1.bf16.msra.mxu0 %v16512_v37  ;;  %14600 = vmatprep.subr.bf16.mxu1 %v16519_v7  ;;  %v16569_v37 = vcombine.high %v11791_v60, %v11795_v0  ;;  %v11798_v7 = vld [vmem:[%s24741_s15 + $0x690] sm:$0xff]  ;;  %v11843_v59 = vld [vmem:[%s24741_s15 + $0x7f8] sm:$0xff]  ;;  %v16608_v0 = vcombine.low %v11831_v63, %v11835_v10 }
 0xb23   :  { %14764 = vmatprep.subr.bf16.mxu0 %v16521_v11  ;;  %v11802_v11 = vld [vmem:[%s24741_s15 + $0x6b0] sm:$0xff] }
 0xb24   :  { %v16574_v47 = vcombine.low %v11798_v7, %v11802_v11 }
 0xb25   :  { %14601 = vmatpush1.bf16.msra.mxu1 %v16518_v62  ;;  %v16575_v62 = vcombine.high %v11798_v7, %v11802_v11  ;;  %v11847_v7 = vld [vmem:[%s24741_s15 + $0x818] sm:$0xff] }
 0xb26   :  { %14765 = vmatpush1.bf16.msra.mxu0 %v16520_v25  ;;  %14602 = vmatprep.subr.bf16.mxu1 %v16527_v24  ;;  %v16577_v25 = vcombine.high %v11799_v18, %v11803_v12  ;;  %v11806_v24 = vld [vmem:[%s24741_s15 + $0x6d0] sm:$0xff]  ;;  %v11851_v11 = vld [vmem:[%s24741_s15 + $0x838] sm:$0xff]  ;;  %v16616_v12 = vcombine.low %v11839_v3, %v11843_v59 }
 0xb27   :  { %14766 = vmatprep.subr.bf16.mxu0 %v16529_v27  ;;  %v11810_v27 = vld [vmem:[%s24741_s15 + $0x6f0] sm:$0xff] }
 0xb28   :  { %v16582_v30 = vcombine.low %v11806_v24, %v11810_v27 }
 0xb29   :  { %14603 = vmatpush1.bf16.msra.mxu1 %v16526_v5  ;;  %v16583_v5 = vcombine.high %v11806_v24, %v11810_v27  ;;  %v11855_v27 = vld [vmem:[%s24741_s15 + $0x858] sm:$0xff] }
 0xb2a   :  { %14767 = vmatpush1.bf16.msra.mxu0 %v16528_v38  ;;  %14604 = vmatprep.subr.bf16.mxu1 %v16535_v43  ;;  %v16585_v38 = vcombine.high %v11807_v56, %v11811_v28  ;;  %v11814_v43 = vld [vmem:[%s24741_s15 + $0x710] sm:$0xff]  ;;  %v11859_v56 = vld [vmem:[%s24741_s15 + $0x878] sm:$0xff]  ;;  %v16624_v28 = vcombine.low %v11847_v7, %v11851_v11 }
 0xb2b   :  { %14768 = vmatprep.subr.bf16.mxu0 %v16537_v55  ;;  %v11818_v55 = vld [vmem:[%s24741_s15 + $0x730] sm:$0xff] }
 0xb2c   :  { %v16590_v26 = vcombine.low %v11814_v43, %v11818_v55 }
 0xb2d   :  { %14605 = vmatpush1.bf16.msra.mxu1 %v16534_v54  ;;  %v16591_v54 = vcombine.high %v11814_v43, %v11818_v55  ;;  %v11863_v43 = vld [vmem:[%s24741_s15 + $0x898] sm:$0xff] }
 0xb2e   :  { %14769 = vmatpush1.bf16.msra.mxu0 %v16536_v14  ;;  %14606 = vmatprep.subr.bf16.mxu1 %v16543_v41  ;;  %v16593_v14 = vcombine.high %v11815_v29, %v11819_v33  ;;  %v11822_v41 = vld [vmem:[%s24741_s15 + $0x750] sm:$0xff]  ;;  %v11867_v55 = vld [vmem:[%s24741_s15 + $0x8b8] sm:$0xff]  ;;  %v16632_v33 = vcombine.low %v11855_v27, %v11859_v56 }
 0xb2f   :  { %14770 = vmatprep.subr.bf16.mxu0 %v16545_v61  ;;  %v11826_v61 = vld [vmem:[%s24741_s15 + $0x770] sm:$0xff] }
 0xb30   :  { %v16598_v45 = vcombine.low %v11822_v41, %v11826_v61 }
 0xb31   :  { %14607 = vmatpush1.bf16.msra.mxu1 %v16542_v13  ;;  %v16599_v13 = vcombine.high %v11822_v41, %v11826_v61  ;;  %v11875_v41 = vld [vmem:[%s24741_s15 + $0x8f8] sm:$0xff]  ;;  %v16640_v61 = vcombine.low %v11863_v43, %v11867_v55 }
 0xb32   :  { %14771 = vmatpush1.bf16.msra.mxu0 %v16544_v1  ;;  %14608 = vmatprep.subr.bf16.mxu1 %v16551_v48  ;;  %v16601_v1 = vcombine.high %v11823_v46, %v11827_v20  ;;  %v11830_v48 = vld [vmem:[%s24741_s15 + $0x790] sm:$0xff] }
 0xb33   :  { %14772 = vmatprep.subr.bf16.mxu0 %v16553_v9  ;;  %v11834_v9 = vld [vmem:[%s24741_s15 + $0x7b0] sm:$0xff] }
 0xb34   :  { %v16606_v60 = vcombine.low %v11830_v48, %v11834_v9 }
 0xb35   :  { %14609 = vmatpush1.bf16.msra.mxu1 %v16550_v57  ;;  %v16607_v57 = vcombine.high %v11830_v48, %v11834_v9 }
 0xb36   :  { %14773 = vmatpush1.bf16.msra.mxu0 %v16552_v58  ;;  %14610 = vmatprep.subr.bf16.mxu1 %v16559_v22  ;;  %v16609_v58 = vcombine.high %v11831_v63, %v11835_v10  ;;  %v11838_v22 = vld [vmem:[%s24741_s15 + $0x7d0] sm:$0xff] }
 0xb37   :  { %14774 = vmatprep.subr.bf16.mxu0 %v16561_v17  ;;  %v11842_v17 = vld [vmem:[%s24741_s15 + $0x7f0] sm:$0xff] }
 0xb38   :  { %v16614_v18 = vcombine.low %v11838_v22, %v11842_v17 }
 0xb39   :  { %14611 = vmatpush1.bf16.msra.mxu1 %v16558_v52  ;;  %v16615_v52 = vcombine.high %v11838_v22, %v11842_v17 }
 0xb3a   :  { %14775 = vmatpush1.bf16.msra.mxu0 %v16560_v2  ;;  %14612 = vmatprep.subr.bf16.mxu1 %v16567_v21  ;;  %v16617_v2 = vcombine.high %v11839_v3, %v11843_v59  ;;  %v11846_v21 = vld [vmem:[%s24741_s15 + $0x810] sm:$0xff] }
 0xb3b   :  { %14776 = vmatprep.subr.bf16.mxu0 %v16569_v37  ;;  %v11850_v37 = vld [vmem:[%s24741_s15 + $0x830] sm:$0xff] }
 0xb3c   :  { %v16622_v24 = vcombine.low %v11846_v21, %v11850_v37 }
 0xb3d   :  { %14613 = vmatpush1.bf16.msra.mxu1 %v16566_v15  ;;  %v16623_v15 = vcombine.high %v11846_v21, %v11850_v37 }
 0xb3e   :  { %14777 = vmatpush1.bf16.msra.mxu0 %v16568_v42  ;;  %14614 = vmatprep.subr.bf16.mxu1 %v16575_v62  ;;  %v16625_v42 = vcombine.high %v11847_v7, %v11851_v11  ;;  %v11854_v62 = vld [vmem:[%s24741_s15 + $0x850] sm:$0xff] }
 0xb3f   :  { %14778 = vmatprep.subr.bf16.mxu0 %v16577_v25  ;;  %v11858_v25 = vld [vmem:[%s24741_s15 + $0x870] sm:$0xff] }
 0xb40   :  { %v16630_v29 = vcombine.low %v11854_v62, %v11858_v25 }
 0xb41   :  { %14615 = vmatpush1.bf16.msra.mxu1 %v16574_v47  ;;  %v16631_v47 = vcombine.high %v11854_v62, %v11858_v25 }
 0xb42   :  { %14779 = vmatpush1.bf16.msra.mxu0 %v16576_v35  ;;  %14616 = vmatprep.subr.bf16.mxu1 %v16583_v5  ;;  %v11862_v35 = vld [vmem:[%s24741_s15 + $0x890] sm:$0xff] }
 0xb43   :  { %14780 = vmatprep.subr.bf16.mxu0 %v16585_v38  ;;  %v11866_v5 = vld [vmem:[%s24741_s15 + $0x8b0] sm:$0xff]  ;;  %v16633_v38 = vcombine.high %v11855_v27, %v11859_v56 }
 0xb44   :  { %v11910_v56 = vld [vmem:[%s24741_s15 + $0xa10] sm:$0xff] }
 0xb45   :  { %14617 = vmatpush1.bf16.msra.mxu1 %v16582_v30  ;;  %v16639_v30 = vcombine.high %v11862_v35, %v11866_v5 }
 0xb46   :  { %14781 = vmatpush1.bf16.msra.mxu0 %v16584_v32  ;;  %14618 = vmatprep.subr.bf16.mxu1 %v16591_v54  ;;  %v16641_v32 = vcombine.high %v11863_v43, %v11867_v55  ;;  %v11870_v54 = vld [vmem:[%s24741_s15 + $0x8d0] sm:$0xff] }
 0xb47   :  { %14782 = vmatprep.subr.bf16.mxu0 %v16593_v14  ;;  %v11874_v14 = vld [vmem:[%s24741_s15 + $0x8f0] sm:$0xff] }
 0xb48   :  { %v16647_v46 = vcombine.high %v11870_v54, %v11874_v14  ;;  %v16646_v48 = vcombine.low %v11870_v54, %v11874_v14 }
 0xb49   :  { %14619 = vmatpush1.bf16.msra.mxu1 %v16590_v26  ;;  %v11878_v26 = vld [vmem:[%s24741_s15 + $0x910] sm:$0xff] }
 0xb4a   :  { %14783 = vmatpush1.bf16.msra.mxu0 %v16592_v53  ;;  %14620 = vmatprep.subr.bf16.mxu1 %v16599_v13  ;;  %v11882_v53 = vld [vmem:[%s24741_s15 + $0x930] sm:$0xff]  ;;  %v11879_v13 = vld [vmem:[%s24741_s15 + $0x918] sm:$0xff] }
 0xb4b   :  { %14784 = vmatprep.subr.bf16.mxu0 %v16601_v1  ;;  %v11883_v1 = vld [vmem:[%s24741_s15 + $0x938] sm:$0xff]  ;;  %v16655_v63 = vcombine.high %v11878_v26, %v11882_v53  ;;  %v16654_v22 = vcombine.low %v11878_v26, %v11882_v53 }
 0xb4c   :  { %v16657_v10 = vcombine.high %v11879_v13, %v11883_v1  ;;  %v16656_v17 = vcombine.low %v11879_v13, %v11883_v1 }
 0xb4d   :  { %14621 = vmatpush1.bf16.msra.mxu1 %v16598_v45  ;;  %v11886_v45 = vld [vmem:[%s24741_s15 + $0x950] sm:$0xff] }
 0xb4e   :  { %14785 = vmatpush1.bf16.msra.mxu0 %v16600_v50  ;;  %14622 = vmatprep.subr.bf16.mxu1 %v16607_v57  ;;  %v11890_v50 = vld [vmem:[%s24741_s15 + $0x970] sm:$0xff]  ;;  %v11887_v57 = vld [vmem:[%s24741_s15 + $0x958] sm:$0xff] }
 0xb4f   :  { %14786 = vmatprep.subr.bf16.mxu0 %v16609_v58  ;;  %v11891_v58 = vld [vmem:[%s24741_s15 + $0x978] sm:$0xff]  ;;  %v16663_v3 = vcombine.high %v11886_v45, %v11890_v50  ;;  %v16662_v21 = vcombine.low %v11886_v45, %v11890_v50 }
 0xb50   :  { %v16665_v59 = vcombine.high %v11887_v57, %v11891_v58  ;;  %v16664_v37 = vcombine.low %v11887_v57, %v11891_v58 }
 0xb51   :  { %14623 = vmatpush1.bf16.msra.mxu1 %v16606_v60  ;;  %v11894_v60 = vld [vmem:[%s24741_s15 + $0x990] sm:$0xff] }
 0xb52   :  { %14787 = vmatpush1.bf16.msra.mxu0 %v16608_v0  ;;  %14624 = vmatprep.subr.bf16.mxu1 %v16615_v52  ;;  %v11898_v0 = vld [vmem:[%s24741_s15 + $0x9b0] sm:$0xff]  ;;  %v11895_v52 = vld [vmem:[%s24741_s15 + $0x998] sm:$0xff] }
 0xb53   :  { %14788 = vmatprep.subr.bf16.mxu0 %v16617_v2  ;;  %v11899_v2 = vld [vmem:[%s24741_s15 + $0x9b8] sm:$0xff]  ;;  %v16671_v7 = vcombine.high %v11894_v60, %v11898_v0  ;;  %v16670_v62 = vcombine.low %v11894_v60, %v11898_v0 }
 0xb54   :  { %v16673_v11 = vcombine.high %v11895_v52, %v11899_v2  ;;  %v16672_v25 = vcombine.low %v11895_v52, %v11899_v2 }
 0xb55   :  { %14625 = vmatpush1.bf16.msra.mxu1 %v16614_v18  ;;  %v11902_v18 = vld [vmem:[%s24741_s15 + $0x9d0] sm:$0xff] }
 0xb56   :  { %14789 = vmatpush1.bf16.msra.mxu0 %v16616_v12  ;;  %14635 = vmatprep.subr.bf16.mxu1 %v16623_v15  ;;  %v11906_v12 = vld [vmem:[%s24741_s15 + $0x9f0] sm:$0xff]  ;;  %v11903_v15 = vld [vmem:[%s24741_s15 + $0x9d8] sm:$0xff] }
 0xb57   :  { %14799 = vmatprep.subr.bf16.mxu0 %v16625_v42  ;;  %v11907_v42 = vld [vmem:[%s24741_s15 + $0x9f8] sm:$0xff] }
 0xb58   :  { %14627 = vmatmul.mubr.bf16.vlgmr.msra.gmra.mrb[84].mxu1 %v23605_v44  ;;  %v16681_v27 = vcombine.high %v11903_v15, %v11907_v42 }
 0xb59   :  { %14791 = vmatmul.mubr.bf16.vlgmr.msra.gmra.mrb[40].mxu0 %v23605_v44  ;;  %14636 = vmatpush1.bf16.msra.mxu1 %v16622_v24  ;;  %v11871_v44 = vld [vmem:[%s24741_s15 + $0x8d8] sm:$0xff]  ;;  %v16679_v24 = vcombine.high %v11902_v18, %v11906_v12 }
 0xb5a   :  { %14667 = vmatprep.mubr.bf16.mxu1 %v23972_v6  ;;  %14800 = vmatpush1.bf16.msra.mxu0 %v16624_v28  ;;  %v16649_v20 = vcombine.high %v11871_v44, %v11875_v41  ;;  %v16648_v9 = vcombine.low %v11871_v44, %v11875_v41  ;;  %v11914_v28 = vld [vmem:[%s24741_s15 + $0xa30] sm:$0xff] }
 0xb5b   :  { %14831 = vmatprep.mubr.bf16.mxu0 %v23972_v6  ;;  %14637 = vmatprep.subr.bf16.mxu1 %v16631_v47  ;;  %v16638_v6 = vcombine.low %v11862_v35, %v11866_v5  ;;  %v11911_v47 = vld [vmem:[%s24741_s15 + $0xa18] sm:$0xff]  ;;  %v16678_v5 = vcombine.low %v11902_v18, %v11906_v12  ;;  %v16687_v43 = vcombine.high %v11910_v56, %v11914_v28 }
 0xb5c   :  { %14801 = vmatprep.subr.bf16.mxu0 %v16633_v38  ;;  %v11915_v35 = vld [vmem:[%s24741_s15 + $0xa38] sm:$0xff]  ;;  %v16680_v38 = vcombine.low %v11903_v15, %v11907_v42  ;;  %v16686_v54 = vcombine.low %v11910_v56, %v11914_v28 }
 0xb5d   :  { %14638 = vmatpush1.bf16.msra.mxu1 %v16630_v29  ;;  %v16689_v55 = vcombine.high %v11911_v47, %v11915_v35  ;;  %v11918_v29 = vld [vmem:[%s24741_s15 + $0xa50] sm:$0xff]  ;;  %v16688_v14 = vcombine.low %v11911_v47, %v11915_v35 }
 0xb5e   :  { %14802 = vmatpush1.bf16.msra.mxu0 %v16632_v33  ;;  %14639 = vmatprep.subr.bf16.mxu1 %v16639_v30  ;;  %v11922_v33 = vld [vmem:[%s24741_s15 + $0xa70] sm:$0xff]  ;;  %v11919_v30 = vld [vmem:[%s24741_s15 + $0xa58] sm:$0xff] }
 0xb5f   :  { %14803 = vmatprep.subr.bf16.mxu0 %v16641_v32  ;;  %v11923_v32 = vld [vmem:[%s24741_s15 + $0xa78] sm:$0xff]  ;;  %v16695_v44 = vcombine.high %v11918_v29, %v11922_v33  ;;  %v16694_v26 = vcombine.low %v11918_v29, %v11922_v33 }
 0xb60   :  { %v16697_v41 = vcombine.high %v11919_v30, %v11923_v32  ;;  %v16696_v53 = vcombine.low %v11919_v30, %v11923_v32 }
 0xb61   :  { %14640 = vmatpush1.bf16.msra.mxu1 %v16638_v6  ;;  %v11926_v6 = vld [vmem:[%s24741_s15 + $0xa90] sm:$0xff] }
 0xb62   :  { %14804 = vmatpush1.bf16.msra.mxu0 %v16640_v61  ;;  %14641 = vmatprep.subr.bf16.mxu1 %v16647_v46  ;;  %v11930_v61 = vld [vmem:[%s24741_s15 + $0xab0] sm:$0xff]  ;;  %v11927_v46 = vld [vmem:[%s24741_s15 + $0xa98] sm:$0xff] }
 0xb63   :  { %14805 = vmatprep.subr.bf16.mxu0 %v16649_v20  ;;  %v11931_v20 = vld [vmem:[%s24741_s15 + $0xab8] sm:$0xff]  ;;  %v16703_v13 = vcombine.high %v11926_v6, %v11930_v61  ;;  %v16702_v45 = vcombine.low %v11926_v6, %v11930_v61 }
 0xb64   :  { %v16705_v1 = vcombine.high %v11927_v46, %v11931_v20  ;;  %v16704_v50 = vcombine.low %v11927_v46, %v11931_v20 }
 0xb65   :  { %14642 = vmatpush1.bf16.msra.mxu1 %v16646_v48  ;;  %v11934_v48 = vld [vmem:[%s24741_s15 + $0xad0] sm:$0xff] }
 0xb66   :  { %14806 = vmatpush1.bf16.msra.mxu0 %v16648_v9  ;;  %14643 = vmatprep.subr.bf16.mxu1 %v16655_v63  ;;  %v11938_v9 = vld [vmem:[%s24741_s15 + $0xaf0] sm:$0xff]  ;;  %v11935_v63 = vld [vmem:[%s24741_s15 + $0xad8] sm:$0xff] }
 0xb67   :  { %14807 = vmatprep.subr.bf16.mxu0 %v16657_v10  ;;  %v11939_v10 = vld [vmem:[%s24741_s15 + $0xaf8] sm:$0xff]  ;;  %v16711_v57 = vcombine.high %v11934_v48, %v11938_v9  ;;  %v16710_v60 = vcombine.low %v11934_v48, %v11938_v9 }
 0xb68   :  { %v16713_v58 = vcombine.high %v11935_v63, %v11939_v10  ;;  %v16712_v0 = vcombine.low %v11935_v63, %v11939_v10 }
 0xb69   :  { %14644 = vmatpush1.bf16.msra.mxu1 %v16654_v22  ;;  %v11942_v22 = vld [vmem:[%s24741_s15 + $0xb10] sm:$0xff] }
 0xb6a   :  { %14808 = vmatpush1.bf16.msra.mxu0 %v16656_v17  ;;  %14645 = vmatprep.subr.bf16.mxu1 %v16663_v3  ;;  %v11946_v17 = vld [vmem:[%s24741_s15 + $0xb30] sm:$0xff]  ;;  %v11943_v3 = vld [vmem:[%s24741_s15 + $0xb18] sm:$0xff] }
 0xb6b   :  { %14809 = vmatprep.subr.bf16.mxu0 %v16665_v59  ;;  %v11947_v59 = vld [vmem:[%s24741_s15 + $0xb38] sm:$0xff]  ;;  %v16719_v52 = vcombine.high %v11942_v22, %v11946_v17  ;;  %v16718_v18 = vcombine.low %v11942_v22, %v11946_v17 }
 0xb6c   :  { %v16721_v2 = vcombine.high %v11943_v3, %v11947_v59  ;;  %v16720_v12 = vcombine.low %v11943_v3, %v11947_v59 }
 0xb6d   :  { %14646 = vmatpush1.bf16.msra.mxu1 %v16662_v21  ;;  %v11950_v21 = vld [vmem:[%s24741_s15 + $0xb50] sm:$0xff] }
 0xb6e   :  { %14810 = vmatpush1.bf16.msra.mxu0 %v16664_v37  ;;  %14647 = vmatprep.subr.bf16.mxu1 %v16671_v7  ;;  %v11954_v37 = vld [vmem:[%s24741_s15 + $0xb70] sm:$0xff]  ;;  %v11951_v7 = vld [vmem:[%s24741_s15 + $0xb58] sm:$0xff] }
 0xb6f   :  { %14811 = vmatprep.subr.bf16.mxu0 %v16673_v11  ;;  %v11955_v11 = vld [vmem:[%s24741_s15 + $0xb78] sm:$0xff]  ;;  %v16727_v15 = vcombine.high %v11950_v21, %v11954_v37  ;;  %v16726_v56 = vcombine.low %v11950_v21, %v11954_v37 }
 0xb70   :  { %v16729_v42 = vcombine.high %v11951_v7, %v11955_v11  ;;  %v16728_v28 = vcombine.low %v11951_v7, %v11955_v11  ;;  %v12006_v11 = vld [vmem:[%s24741_s15 + $0xd10] sm:$0xff] }
 0xb71   :  { %14648 = vmatpush1.bf16.msra.mxu1 %v16670_v62  ;;  %v11958_v62 = vld [vmem:[%s24741_s15 + $0xb90] sm:$0xff] }
 0xb72   :  { %14812 = vmatpush1.bf16.msra.mxu0 %v16672_v25  ;;  %14649 = vmatprep.subr.bf16.mxu1 %v16679_v24  ;;  %v11962_v25 = vld [vmem:[%s24741_s15 + $0xbb0] sm:$0xff]  ;;  %v11959_v24 = vld [vmem:[%s24741_s15 + $0xb98] sm:$0xff] }
 0xb73   :  { %14813 = vmatprep.subr.bf16.mxu0 %v16681_v27  ;;  %v11963_v27 = vld [vmem:[%s24741_s15 + $0xbb8] sm:$0xff]  ;;  %v16735_v47 = vcombine.high %v11958_v62, %v11962_v25  ;;  %v16734_v29 = vcombine.low %v11958_v62, %v11962_v25 }
 0xb74   :  { %v16737_v35 = vcombine.high %v11959_v24, %v11963_v27  ;;  %v16736_v33 = vcombine.low %v11959_v24, %v11963_v27  ;;  %v12014_v24 = vld [vmem:[%s24741_s15 + $0xd50] sm:$0xff] }
 0xb75   :  { %14650 = vmatpush1.bf16.msra.mxu1 %v16678_v5  ;;  %v11966_v5 = vld [vmem:[%s24741_s15 + $0xbd0] sm:$0xff] }
 0xb76   :  { %14814 = vmatpush1.bf16.msra.mxu0 %v16680_v38  ;;  %14651 = vmatprep.subr.bf16.mxu1 %v16687_v43  ;;  %v11970_v38 = vld [vmem:[%s24741_s15 + $0xbf0] sm:$0xff]  ;;  %v11967_v43 = vld [vmem:[%s24741_s15 + $0xbd8] sm:$0xff] }
 0xb77   :  { %14815 = vmatprep.subr.bf16.mxu0 %v16689_v55  ;;  %v11971_v55 = vld [vmem:[%s24741_s15 + $0xbf8] sm:$0xff]  ;;  %v16743_v30 = vcombine.high %v11966_v5, %v11970_v38  ;;  %v16742_v6 = vcombine.low %v11966_v5, %v11970_v38  ;;  %v12018_v27 = vld [vmem:[%s24741_s15 + $0xd70] sm:$0xff] }
 0xb78   :  { %v16745_v32 = vcombine.high %v11967_v43, %v11971_v55  ;;  %v16744_v61 = vcombine.low %v11967_v43, %v11971_v55  ;;  %v16791_v38 = vcombine.high %v12014_v24, %v12018_v27 }
 0xb79   :  { %14652 = vmatpush1.bf16.msra.mxu1 %v16686_v54  ;;  %v11974_v54 = vld [vmem:[%s24741_s15 + $0xc10] sm:$0xff] }
 0xb7a   :  { %14816 = vmatpush1.bf16.msra.mxu0 %v16688_v14  ;;  %14653 = vmatprep.subr.bf16.mxu1 %v16695_v44  ;;  %v11978_v14 = vld [vmem:[%s24741_s15 + $0xc30] sm:$0xff]  ;;  %v11975_v44 = vld [vmem:[%s24741_s15 + $0xc18] sm:$0xff] }
 0xb7b   :  { %14817 = vmatprep.subr.bf16.mxu0 %v16697_v41  ;;  %v11979_v41 = vld [vmem:[%s24741_s15 + $0xc38] sm:$0xff]  ;;  %v16751_v46 = vcombine.high %v11974_v54, %v11978_v14  ;;  %v16750_v48 = vcombine.low %v11974_v54, %v11978_v14 }
 0xb7c   :  { %v16753_v20 = vcombine.high %v11975_v44, %v11979_v41  ;;  %v16752_v9 = vcombine.low %v11975_v44, %v11979_v41 }
 0xb7d   :  { %14654 = vmatpush1.bf16.msra.mxu1 %v16694_v26  ;;  %v11982_v26 = vld [vmem:[%s24741_s15 + $0xc50] sm:$0xff] }
 0xb7e   :  { %14818 = vmatpush1.bf16.msra.mxu0 %v16696_v53  ;;  %14655 = vmatprep.subr.bf16.mxu1 %v16703_v13  ;;  %v11986_v53 = vld [vmem:[%s24741_s15 + $0xc70] sm:$0xff]  ;;  %v11983_v13 = vld [vmem:[%s24741_s15 + $0xc58] sm:$0xff] }
 0xb7f   :  { %14819 = vmatprep.subr.bf16.mxu0 %v16705_v1  ;;  %v11987_v1 = vld [vmem:[%s24741_s15 + $0xc78] sm:$0xff]  ;;  %v16759_v63 = vcombine.high %v11982_v26, %v11986_v53  ;;  %v16758_v22 = vcombine.low %v11982_v26, %v11986_v53 }
 0xb80   :  { %v16761_v10 = vcombine.high %v11983_v13, %v11987_v1  ;;  %v16760_v17 = vcombine.low %v11983_v13, %v11987_v1 }
 0xb81   :  { %14656 = vmatpush1.bf16.msra.mxu1 %v16702_v45  ;;  %v11990_v45 = vld [vmem:[%s24741_s15 + $0xc90] sm:$0xff] }
 0xb82   :  { %14820 = vmatpush1.bf16.msra.mxu0 %v16704_v50  ;;  %14657 = vmatprep.subr.bf16.mxu1 %v16711_v57  ;;  %v11994_v50 = vld [vmem:[%s24741_s15 + $0xcb0] sm:$0xff]  ;;  %v11991_v57 = vld [vmem:[%s24741_s15 + $0xc98] sm:$0xff] }
 0xb83   :  { %14821 = vmatprep.subr.bf16.mxu0 %v16713_v58  ;;  %v11995_v58 = vld [vmem:[%s24741_s15 + $0xcb8] sm:$0xff]  ;;  %v16767_v3 = vcombine.high %v11990_v45, %v11994_v50 }
 0xb84   :  { %v16769_v59 = vcombine.high %v11991_v57, %v11995_v58  ;;  %v16768_v21 = vcombine.low %v11991_v57, %v11995_v58 }
 0xb85   :  { %14658 = vmatpush1.bf16.msra.mxu1 %v16710_v60  ;;  %v11998_v60 = vld [vmem:[%s24741_s15 + $0xcd0] sm:$0xff] }
 0xb86   :  { %14822 = vmatpush1.bf16.msra.mxu0 %v16712_v0  ;;  %14659 = vmatprep.subr.bf16.mxu1 %v16719_v52  ;;  %v12002_v0 = vld [vmem:[%s24741_s15 + $0xcf0] sm:$0xff]  ;;  %v12003_v52 = vld [vmem:[%s24741_s15 + $0xcf8] sm:$0xff] }
 0xb87   :  { %14823 = vmatprep.subr.bf16.mxu0 %v16721_v2  ;;  %v16766_v2 = vcombine.low %v11990_v45, %v11994_v50  ;;  %v16775_v37 = vcombine.high %v11998_v60, %v12002_v0 }
 0xb89   :  { %14660 = vmatpush1.bf16.msra.mxu1 %v16718_v18  ;;  %v12010_v18 = vld [vmem:[%s24741_s15 + $0xd30] sm:$0xff] }
 0xb8a   :  { %14824 = vmatpush1.bf16.msra.mxu0 %v16720_v12  ;;  %14661 = vmatprep.subr.bf16.mxu1 %v16727_v15  ;;  %v12011_v12 = vld [vmem:[%s24741_s15 + $0xd38] sm:$0xff]  ;;  %v16774_v15 = vcombine.low %v11998_v60, %v12002_v0  ;;  %v16783_v62 = vcombine.high %v12006_v11, %v12010_v18 }
 0xb8b   :  { %14825 = vmatprep.subr.bf16.mxu0 %v16729_v42 }
 0xb8d   :  { %14662 = vmatpush1.bf16.msra.mxu1 %v16726_v56  ;;  %v12015_v56 = vld [vmem:[%s24741_s15 + $0xd58] sm:$0xff] }
 0xb8e   :  { %14826 = vmatpush1.bf16.msra.mxu0 %v16728_v28  ;;  %14663 = vmatprep.subr.bf16.mxu1 %v16735_v47  ;;  %v12019_v28 = vld [vmem:[%s24741_s15 + $0xd78] sm:$0xff]  ;;  %v16782_v47 = vcombine.low %v12006_v11, %v12010_v18 }
 0xb8f   :  { %14827 = vmatprep.subr.bf16.mxu0 %v16737_v35  ;;  %v12020_v35 = vld [vmem:[%s24743_s16] sm:$0xff]  ;;  %v16793_v43 = vcombine.high %v12015_v56, %v12019_v28  ;;  %v16792_v54 = vcombine.low %v12015_v56, %v12019_v28 }
 0xb90   :  { %v12025_v55 = vrot.slane %v12020_v35, %v20026_v34  ;;  %v12041_v57 = vrot.slane %v12020_v35, %v20830_v16  ;;  %v12049_v58 = vrot.slane %v12020_v35, %v20684_v36 }
 0xb91   :  { %14664 = vmatpush1.bf16.msra.mxu1 %v16734_v29  ;;  %v12033_v29 = vrot.slane %v12020_v35, %v20576_v23 }
 0xb92   :  { %14828 = vmatpush1.bf16.msra.mxu0 %v16736_v33  ;;  %14665 = vmatprep.subr.bf16.mxu1 %v16743_v30  ;;  %v12029_v33 = vrot.slane %v12020_v35, %v20040_v39  ;;  %v12037_v30 = vrot.slane %v12020_v35, %v20469_v40 }
 0xb93   :  { %14829 = vmatprep.subr.bf16.mxu0 %v16745_v32  ;;  %v16790_v32 = vcombine.low %v12014_v24, %v12018_v27 }
 0xb95   :  { %14666 = vmatpush1.bf16.msra.mxu1 %v16742_v6 }
 0xb96   :  { %14830 = vmatpush1.bf16.msra.mxu0 %v16744_v61  ;;  %14676 = vmatprep.subr.bf16.mxu1 %v16751_v46 }
 0xb97   :  { %14840 = vmatprep.subr.bf16.mxu0 %v16753_v20 }
 0xb98   :  { %14668 = vmatmul.mubr.bf16.vlgmr.msra.gmra.mrb[84].mxu1 %v23974_v8 }
 0xb99   :  { %14832 = vmatmul.mubr.bf16.vlgmr.msra.gmra.mrb[40].mxu0 %v23974_v8  ;;  %14677 = vmatpush1.bf16.msra.mxu1 %v16750_v48  ;;  %v11999_v8 = vld [vmem:[%s24741_s15 + $0xcd8] sm:$0xff] }
 0xb9a   :  { %14841 = vmatpush1.bf16.msra.mxu0 %v16752_v9  ;;  %14678 = vmatprep.subr.bf16.mxu1 %v16759_v63  ;;  %v16777_v7 = vcombine.high %v11999_v8, %v12003_v52  ;;  %v16776_v42 = vcombine.low %v11999_v8, %v12003_v52 }
 0xb9b   :  { %14842 = vmatprep.subr.bf16.mxu0 %v16761_v10  ;;  %14708 = vmatprep.mubr.bf16.mxu1 %v18652_v4 }
 0xb9c   :  { %14872 = vmatprep.mubr.bf16.mxu0 %v18652_v4  ;;  %v12007_v4 = vld [vmem:[%s24741_s15 + $0xd18] sm:$0xff] }
 0xb9d   :  { %14679 = vmatpush1.bf16.msra.mxu1 %v16758_v22  ;;  %v16785_v25 = vcombine.high %v12007_v4, %v12011_v12  ;;  %v16784_v5 = vcombine.low %v12007_v4, %v12011_v12  ;;  %v12045_v22 = vrot.slane %v12020_v35, %v20833_v19 }
 0xb9e   :  { %14843 = vmatpush1.bf16.msra.mxu0 %v16760_v17  ;;  %14680 = vmatprep.subr.bf16.mxu1 %v16767_v3  ;;  %v12053_v17 = vrot.slane %v12020_v35, %v21748_v51 }
 0xb9f   :  { %14844 = vmatprep.subr.bf16.mxu0 %v16769_v59 }
 0xba1   :  { %14681 = vmatpush1.bf16.msra.mxu1 %v16766_v2 }
 0xba2   :  { %14845 = vmatpush1.bf16.msra.mxu0 %v16768_v21  ;;  %14682 = vmatprep.subr.bf16.mxu1 %v16775_v37 }
 0xba3   :  { %14846 = vmatprep.subr.bf16.mxu0 %v16777_v7 }
 0xba5   :  { %14683 = vmatpush1.bf16.msra.mxu1 %v16774_v15 }
 0xba6   :  { %14847 = vmatpush1.bf16.msra.mxu0 %v16776_v42  ;;  %14684 = vmatprep.subr.bf16.mxu1 %v16783_v62 }
 0xba7   :  { %14848 = vmatprep.subr.bf16.mxu0 %v16785_v25 }
 0xba9   :  { %14685 = vmatpush1.bf16.msra.mxu1 %v16782_v47 }
 0xbaa   :  { %14849 = vmatpush1.bf16.msra.mxu0 %v16784_v5  ;;  %14686 = vmatprep.subr.bf16.mxu1 %v16791_v38 }
 0xbab   :  { %v14382_v14 = vpop.f32.mrb[80].mxu1  ;;  %v14546_v44 = vpop.f32.mrb[36].mxu0  ;;  %14850 = vmatprep.subr.bf16.mxu0 %v16793_v43 }
 0xbac   :  { %v17103_v41 = vadd.f32 %v14382_v14, %v12025_v55  ;;  %v17105_v6 = vadd.f32 %v14546_v44, %v12033_v29  ;;  %v14384_v61 = vpop.f32.mrb[81].mxu1  ;;  %v14548_v46 = vpop.f32.mrb[37].mxu0 }
 0xbad   :  { %v17104_v20 = vadd.f32 %v14384_v61, %v12029_v33  ;;  %v17106_v34 = vadd.f32 %v14548_v46, %v12037_v30  ;;  %v14386_v26 = vpop.f32.mrb[82].mxu1  ;;  %v14550_v23 = vpop.f32.mrb[38].mxu0  ;;  %14687 = vmatpush1.bf16.msra.mxu1 %v16790_v32 }
 0xbae   :  { %v14881_v53 = vmax.f32 %v17103_v41, 0.0  ;;  %v14883_v39 = vmax.f32 %v17105_v6, 0.0  ;;  %14851 = vmatpush1.bf16.msra.mxu0 %v16792_v54  ;;  %v14387_v40 = vpop.f32.mrb[83].mxu1  ;;  %v14551_v13 = vpop.f32.mrb[39].mxu0 }
 0xbaf   :  { %v14882_v1 = vmax.f32 %v17104_v20, 0.0  ;;  %v14884_v48 = vmax.f32 %v17106_v34, 0.0 }
 0xbb0   :  { %16796 = vmatmul.mubr.msk.bf16.vlgmr.msra.gmra.mrb[84].mxu1 %vm6264_vm0, %v24058_v31 }
 0xbb1   :  { %v14897_v9 = vcombine.low %v14881_v53, %v14882_v1  ;;  %v14898_v63 = vcombine.low %v14883_v39, %v14884_v48  ;;  %16797 = vmatmul.mubr.msk.bf16.vlgmr.msra.gmra.mrb[40].mxu0 %vm6264_vm0, %v24058_v31 }
 0xbb3   :  { %v14905_v10 = vrot.slane %v14897_v9, %v18880_v49  ;;  %v14912_v45 = vrot.slane %v14898_v63, %v18880_v49 }
 0xbb5   :  { %v14913_v50 = vcombine.low %v14905_v10, %v14912_v45 }
 0xbb7   :  { %14933 = vst [vmem:[%s24744_s17] sm:$0xff] %v14913_v50 }
 0xc83   :  { %v14710_v3 = vpop.f32.mrb[84].mxu1 }
 0xc84   :  { %v17107_v59 = vadd.f32 %v14710_v3, %v12041_v57  ;;  %v14874_v31 = vpop.f32.mrb[40].mxu0  ;;  %v14712_v60 = vpop.f32.mrb[85].mxu1 }
 0xc85   :  { %v17109_v0 = vadd.f32 %v14874_v31, %v12049_v58  ;;  %v17108_v8 = vadd.f32 %v14712_v60, %v12045_v22  ;;  %v14876_v52 = vpop.f32.mrb[41].mxu0  ;;  %v14714_v2 = vpop.f32.mrb[86].mxu1 }
 0xc86   :  { %v14885_v21 = vmax.f32 %v17107_v59, 0.0  ;;  %v17110_v37 = vadd.f32 %v14876_v52, %v12053_v17  ;;  %v14878_v7 = vpop.f32.mrb[42].mxu0  ;;  %v14715_v11 = vpop.f32.mrb[87].mxu1 }
 0xc87   :  { %v14887_v18 = vmax.f32 %v17109_v0, 0.0  ;;  %v14886_v16 = vmax.f32 %v17108_v8, 0.0  ;;  %v14879_v4 = vpop.f32.mrb[43].mxu0 }
 0xc88   :  { %v14888_v36 = vmax.f32 %v17110_v37, 0.0 }
 0xc89   :  { %v14914_v12 = vcombine.low %v14885_v21, %v14886_v16 }
 0xc8a   :  { %v14915_v19 = vcombine.low %v14887_v18, %v14888_v36 }
 0xc8b   :  { %v14922_v51 = vrot.slane %v14914_v12, %v18880_v49 }
 0xc8c   :  { %v14929_v15 = vrot.slane %v14915_v19, %v18880_v49 }
 0xc8e   :  { %v14930_v42 = vcombine.low %v14922_v51, %v14929_v15 }
 0xc90   :  { %14934 = vst [vmem:[%s24744_s17 + $0x8] sm:$0xff] %v14930_v42 }

</bundles_post_ra>
